<compile_context>
chip_gen: v7x
topology: tpu7x:2x2x1
jax: 0.10.0
libtpu: 0.0.40
codegen_flags: <defaults>
</compile_context>

<pallas_src>
import functools

import jax
import jax.numpy as jnp
from jax.experimental import pallas as pl
from jax.experimental.pallas import tpu as pltpu

COMPUTE_DTYPE = jnp.bfloat16   # MXU operand dtype; accumulation stays float32.
GROUP = 128                    # lane-aligned per-branch score group width in the head.


# ----------------------------- Pallas kernel -------------------------------

def _pool2x2(ref):
    """2x2 non-overlapping max-pool of a (B, H, W, C) VMEM ref -> (B, H/2, W/2, C) value."""
    _, h, w, _ = ref.shape
    h2, w2 = h // 2, w // 2
    a00 = ref[:, pl.ds(0, h2, stride=2), pl.ds(0, w2, stride=2), :]
    a01 = ref[:, pl.ds(0, h2, stride=2), pl.ds(1, w2, stride=2), :]
    a10 = ref[:, pl.ds(1, h2, stride=2), pl.ds(0, w2, stride=2), :]
    a11 = ref[:, pl.ds(1, h2, stride=2), pl.ds(1, w2, stride=2), :]
    return jnp.maximum(jnp.maximum(a00, a01), jnp.maximum(a10, a11))


def _fused_trinet_kernel(x_ref, w1_ref, b1_ref, w2_ref, b2_ref,
                         fc1w_ref, fc1b_ref, fc2w_ref, fc2b_ref,
                         fc3w_ref, fc3b_ref,
                         o_ref,
                         col1_s, y1_s, pad2_s, col2_s, y2_s, flat_s,
                         *, B, H, W):
    """All three branches (block-diagonally fused) + classifier head + 3-way max."""
    CIN = x_ref.shape[-1]          # 9  (3 views x 3 channels)
    C1 = w1_ref.shape[-1]          # 24 (3 x 8)
    C2 = w2_ref.shape[-1]          # 48 (3 x 16)
    H2, W2 = H // 2, W // 2
    H4, W4 = H // 4, W // 4

    # ---- conv1: in-VMEM im2col (9 taps side by side in lanes) + ONE MXU dot ----
    for t in range(9):
        di, dj = t // 3, t % 3
        patch = x_ref[:, di:di + H, dj:dj + W, :]                # (B,H,W,CIN) bf16
        col1_s[:, t * CIN:(t + 1) * CIN] = patch.reshape(B * H * W, CIN)
    y1 = jnp.dot(col1_s[...], w1_ref[...], preferred_element_type=jnp.float32)
    y1 = jnp.maximum(y1 + b1_ref[...], 0.0)                      # (B*H*W, C1) f32
    y1_s[...] = y1.reshape(B, H, W, C1)

    # ---- 2x2 max-pool, then halo-padded conv2 input (halo-only zeroing) ----
    pool1 = _pool2x2(y1_s)                                       # (B,H2,W2,C1) f32
    pad2_s[:, 0:1, :, :] = jnp.zeros((B, 1, W2 + 2, C1), pad2_s.dtype)
    pad2_s[:, H2 + 1:H2 + 2, :, :] = jnp.zeros((B, 1, W2 + 2, C1), pad2_s.dtype)
    pad2_s[:, :, 0:1, :] = jnp.zeros((B, H2 + 2, 1, C1), pad2_s.dtype)
    pad2_s[:, :, W2 + 1:W2 + 2, :] = jnp.zeros((B, H2 + 2, 1, C1), pad2_s.dtype)
    pad2_s[:, 1:1 + H2, 1:1 + W2, :] = pool1

    # ---- conv2: in-VMEM im2col + ONE MXU dot ----
    for t in range(9):
        di, dj = t // 3, t % 3
        patch = pad2_s[:, di:di + H2, dj:dj + W2, :]             # (B,H2,W2,C1) f32
        col2_s[:, t * C1:(t + 1) * C1] = (
            patch.reshape(B * H2 * W2, C1).astype(col2_s.dtype))
    y2 = jnp.dot(col2_s[...], w2_ref[...], preferred_element_type=jnp.float32)
    y2 = jnp.maximum(y2 + b2_ref[...], 0.0)                      # (B*H2*W2, C2) f32
    y2_s[...] = y2.reshape(B, H2, W2, C2)

    # ---- 2x2 max-pool + flatten (h4, w4, c) into lanes ----
    pool2 = _pool2x2(y2_s)                                       # (B,H4,W4,C2) f32
    for s in range(H4 * W4):
        hh, ww = s // W4, s % W4
        flat_s[:, s * C2:(s + 1) * C2] = pool2[:, hh, ww, :].astype(flat_s.dtype)

    # ---- fc1 (single K=pos*C2 dot) + ReLU ----
    f1 = jnp.dot(flat_s[...], fc1w_ref[...], preferred_element_type=jnp.float32)
    f1 = jnp.maximum(f1 + fc1b_ref[...], 0.0)                    # (B, 3*hid)

    # ---- fc2 + ReLU ----
    f2 = jnp.dot(f1.astype(COMPUTE_DTYPE), fc2w_ref[...],
                 preferred_element_type=jnp.float32)
    f2 = jnp.maximum(f2 + fc2b_ref[...], 0.0)                    # (B, 3*hid)

    # ---- fused head: block-diag classifier[6] + 3-way max over lane-aligned groups ----
    scores = jnp.dot(f2.astype(COMPUTE_DTYPE), fc3w_ref[...],
                     preferred_element_type=jnp.float32) + fc3b_ref[...]   # (B, 3*GROUP)
    o_ref[...] = jnp.maximum(
        jnp.maximum(scores[:, 0:GROUP], scores[:, GROUP:2 * GROUP]),
        scores[:, 2 * GROUP:3 * GROUP]).astype(o_ref.dtype)      # (B, GROUP) lane-dense


# ------------------------------ model params -------------------------------

def init_branch_params(key, cin=3, c1=8, c2=16, hidden=128, num_classes=2, hw=16):
    ks = jax.random.split(key, 5)
    pos = (hw // 4) * (hw // 4)   # spatial positions after two 2x2 pools

    def w(k, shape, fan_in):
        return (jax.random.normal(k, shape, jnp.float32)
                / jnp.sqrt(jnp.float32(fan_in))).astype(jnp.bfloat16)

    return dict(
        conv1_w=w(ks[0], (3, 3, cin, c1), 3 * 3 * cin),
        conv1_b=jnp.zeros((1, c1), jnp.float32),
        conv2_w=w(ks[1], (3, 3, c1, c2), 3 * 3 * c1),
        conv2_b=jnp.zeros((1, c2), jnp.float32),
        # fc1 weight laid out as (spatial position, c2, hidden): flatten order (h,w,c).
        fc1_w=w(ks[2], (pos, c2, hidden), pos * c2),
        fc1_b=jnp.zeros((1, hidden), jnp.float32),
        fc2_w=w(ks[3], (hidden, hidden), hidden),
        fc2_b=jnp.zeros((1, hidden), jnp.float32),
        fc3_w=w(ks[4], (hidden, num_classes), hidden),   # classifier[6]
        fc3_b=jnp.zeros((1, num_classes), jnp.float32),
    )


# --------------------------------- forward ----------------------------------

def othernet_trip_scoremax(x_nchw, params1, params2, params3):
    """x_nchw: (B, 9, H, W) float32.
       x1 = f1(x[:,0:3]); x2 = f2(x[:,3:6]); x3 = f3(x[:,6:9]); return max(max(x1,x2),x3)."""
    B, C, H, W = x_nchw.shape
    assert H % 4 == 0 and W % 4 == 0, "two 2x2 max-pools need H, W divisible by 4"
    plist = (params1, params2, params3)

    cin = params1['conv1_w'].shape[2]
    c1 = params1['conv1_w'].shape[3]
    c2 = params1['conv2_w'].shape[3]
    hid = params1['fc2_w'].shape[1]
    nc = params1['fc3_w'].shape[1]
    assert C == 3 * cin, "expects 3 stacked views"
    assert nc <= GROUP
    pos = (H // 4) * (W // 4)
    CIN, C1, C2, HID = 3 * cin, 3 * c1, 3 * c2, 3 * hid
    H2, W2 = H // 2, W // 2

    bf16, f32 = COMPUTE_DTYPE, jnp.float32

    # ---- block-diagonal branch fusion of all weights (done once, in XLA) ----
    w1f = jnp.zeros((3, 3, CIN, C1), bf16)
    w2f = jnp.zeros((3, 3, C1, C2), bf16)
    fc1f = jnp.zeros((pos, C2, HID), bf16)
    fc2f = jnp.zeros((HID, HID), bf16)
    fc3f = jnp.zeros((HID, 3 * GROUP), bf16)
    b3f = jnp.zeros((1, 3 * GROUP), f32)
    for b, pb in enumerate(plist):
        w1f = w1f.at[:, :, cin * b:cin * (b + 1), c1 * b:c1 * (b + 1)].set(
            pb['conv1_w'].astype(bf16))
        w2f = w2f.at[:, :, c1 * b:c1 * (b + 1), c2 * b:c2 * (b + 1)].set(
            pb['conv2_w'].astype(bf16))
        fc1f = fc1f.at[:, c2 * b:c2 * (b + 1), hid * b:hid * (b + 1)].set(
            pb['fc1_w'].astype(bf16))
        fc2f = fc2f.at[hid * b:hid * (b + 1), hid * b:hid * (b + 1)].set(
            pb['fc2_w'].astype(bf16))
        fc3f = fc3f.at[hid * b:hid * (b + 1), GROUP * b:GROUP * b + nc].set(
            pb['fc3_w'].astype(bf16))
        b3f = b3f.at[:, GROUP * b:GROUP * b + nc].set(pb['fc3_b'])
    w1f = w1f.reshape(9 * CIN, C1)            # row order = (tap, fused cin)
    w2f = w2f.reshape(9 * C1, C2)
    fc1f = fc1f.reshape(pos * C2, HID)        # row order = (position, fused c2)
    b1f = jnp.concatenate([pb['conv1_b'] for pb in plist], axis=-1)   # (1, C1)
    b2f = jnp.concatenate([pb['conv2_b'] for pb in plist], axis=-1)   # (1, C2)
    fb1 = jnp.concatenate([pb['fc1_b'] for pb in plist], axis=-1)     # (1, HID)
    fb2 = jnp.concatenate([pb['fc2_b'] for pb in plist], axis=-1)     # (1, HID)

    # ---- input: NCHW -> NHWC (all 9 channels as lanes), bf16, 'same' halo pad ----
    x = jnp.transpose(x_nchw, (0, 2, 3, 1)).astype(bf16)          # (B, H, W, 9)
    xpad = jnp.pad(x, ((0, 0), (1, 1), (1, 1), (0, 0)))           # (B, H+2, W+2, 9)

    kernel = functools.partial(_fused_trinet_kernel, B=B, H=H, W=W)
    vmem_spec = pl.BlockSpec(memory_space=pltpu.MemorySpace.VMEM)

    out_pad = pl.pallas_call(
        kernel,
        out_shape=jax.ShapeDtypeStruct((B, GROUP), jnp.float32),
        in_specs=[vmem_spec] * 11,
        out_specs=vmem_spec,
        scratch_shapes=[
            pltpu.VMEM((B * H * W, 9 * CIN), bf16),          # conv1 im2col columns
            pltpu.VMEM((B, H, W, C1), f32),                  # conv1 output (pool src)
            pltpu.VMEM((B, H2 + 2, W2 + 2, C1), f32),        # halo-padded conv2 input
            pltpu.VMEM((B * H2 * W2, 9 * C1), bf16),         # conv2 im2col columns
            pltpu.VMEM((B, H2, W2, C2), f32),                # conv2 output (pool src)
            pltpu.VMEM((B, pos * C2), bf16),                 # flattened pooled features
        ],
    )(xpad, w1f, b1f, w2f, b2f, fc1f, fb1, fc2f, fb2, fc3f, b3f)

    return out_pad[:, :nc]


# ----------------------------------- main -----------------------------------

if __name__ == "__main__":
    key = jax.random.PRNGKey(0)
    kx, k1, k2, k3 = jax.random.split(key, 4)

    B, C, H, W = 2, 9, 16, 16
    num_classes = 2
    x = jax.random.normal(kx, (B, C, H, W), jnp.float32)

    p1 = init_branch_params(k1, num_classes=num_classes, hw=H)
    p2 = init_branch_params(k2, num_classes=num_classes, hw=H)
    p3 = init_branch_params(k3, num_classes=num_classes, hw=H)

    out = jax.jit(othernet_trip_scoremax)(x, p1, p2, p3)
    out = jax.block_until_ready(out)
    assert out.shape == (B, num_classes), out.shape
    assert out.dtype == jnp.float32
    assert bool(jnp.isfinite(out).all())
    print("KERNEL_OK")
</pallas_src>

<mosaic_0001>
module attributes {stable_mosaic.version = 11 : i64} {
  func.func @_fused_trinet_kernel(%arg0: memref<2x18x18x9xbf16, #tpu.memory_space<vmem>>, %arg1: memref<81x24xbf16, #tpu.memory_space<vmem>>, %arg2: memref<1x24xf32, #tpu.memory_space<vmem>>, %arg3: memref<216x48xbf16, #tpu.memory_space<vmem>>, %arg4: memref<1x48xf32, #tpu.memory_space<vmem>>, %arg5: memref<768x384xbf16, #tpu.memory_space<vmem>>, %arg6: memref<1x384xf32, #tpu.memory_space<vmem>>, %arg7: memref<384x384xbf16, #tpu.memory_space<vmem>>, %arg8: memref<1x384xf32, #tpu.memory_space<vmem>>, %arg9: memref<384x384xbf16, #tpu.memory_space<vmem>>, %arg10: memref<1x384xf32, #tpu.memory_space<vmem>>, %arg11: memref<2x128xf32, #tpu.memory_space<vmem>>, %arg12: memref<512x81xbf16, #tpu.memory_space<vmem>>, %arg13: memref<2x16x16x24xf32, #tpu.memory_space<vmem>>, %arg14: memref<2x10x10x24xf32, #tpu.memory_space<vmem>>, %arg15: memref<128x216xbf16, #tpu.memory_space<vmem>>, %arg16: memref<2x8x8x48xf32, #tpu.memory_space<vmem>>, %arg17: memref<2x768xbf16, #tpu.memory_space<vmem>>) attributes {dimension_semantics = [], scalar_prefetch = 0 : i64, scratch_operands = 6 : i64, tpu.core_type = #tpu.core_type<tc>} {
    %c0 = arith.constant 0 : index
    %c0_0 = arith.constant 0 : index
    %c0_1 = arith.constant 0 : index
    %c0_2 = arith.constant 0 : index
    %0 = vector.load %arg0[%c0, %c0_0, %c0_1, %c0_2] : memref<2x18x18x9xbf16, #tpu.memory_space<vmem>>, vector<2x16x16x9xbf16>
    %1 = vector.shape_cast %0 : vector<2x16x16x9xbf16> to vector<512x9xbf16>
    %c0_3 = arith.constant 0 : index
    %c0_4 = arith.constant 0 : index
    %2 = vector.load %arg12[%c0_3, %c0_4] : memref<512x81xbf16, #tpu.memory_space<vmem>>, vector<512x9xbf16>
    tpu.vector_store %arg12[%c0_3, %c0_4], %1 {strides = array<i32>} : memref<512x81xbf16, #tpu.memory_space<vmem>>, vector<512x9xbf16>,
    %c0_5 = arith.constant 0 : index
    %c0_6 = arith.constant 0 : index
    %c1 = arith.constant 1 : index
    %c0_7 = arith.constant 0 : index
    %3 = vector.load %arg0[%c0_5, %c0_6, %c1, %c0_7] : memref<2x18x18x9xbf16, #tpu.memory_space<vmem>>, vector<2x16x16x9xbf16>
    %4 = vector.shape_cast %3 : vector<2x16x16x9xbf16> to vector<512x9xbf16>
    %c0_8 = arith.constant 0 : index
    %c9 = arith.constant 9 : index
    %5 = vector.load %arg12[%c0_8, %c9] : memref<512x81xbf16, #tpu.memory_space<vmem>>, vector<512x9xbf16>
    tpu.vector_store %arg12[%c0_8, %c9], %4 {strides = array<i32>} : memref<512x81xbf16, #tpu.memory_space<vmem>>, vector<512x9xbf16>,
    %c0_9 = arith.constant 0 : index
    %c0_10 = arith.constant 0 : index
    %c2 = arith.constant 2 : index
    %c0_11 = arith.constant 0 : index
    %6 = vector.load %arg0[%c0_9, %c0_10, %c2, %c0_11] : memref<2x18x18x9xbf16, #tpu.memory_space<vmem>>, vector<2x16x16x9xbf16>
    %7 = vector.shape_cast %6 : vector<2x16x16x9xbf16> to vector<512x9xbf16>
    %c0_12 = arith.constant 0 : index
    %c18 = arith.constant 18 : index
    %8 = vector.load %arg12[%c0_12, %c18] : memref<512x81xbf16, #tpu.memory_space<vmem>>, vector<512x9xbf16>
    tpu.vector_store %arg12[%c0_12, %c18], %7 {strides = array<i32>} : memref<512x81xbf16, #tpu.memory_space<vmem>>, vector<512x9xbf16>,
    %c0_13 = arith.constant 0 : index
    %c1_14 = arith.constant 1 : index
    %c0_15 = arith.constant 0 : index
    %c0_16 = arith.constant 0 : index
    %9 = vector.load %arg0[%c0_13, %c1_14, %c0_15, %c0_16] : memref<2x18x18x9xbf16, #tpu.memory_space<vmem>>, vector<2x16x16x9xbf16>
    %10 = vector.shape_cast %9 : vector<2x16x16x9xbf16> to vector<512x9xbf16>
    %c0_17 = arith.constant 0 : index
    %c27 = arith.constant 27 : index
    %11 = vector.load %arg12[%c0_17, %c27] : memref<512x81xbf16, #tpu.memory_space<vmem>>, vector<512x9xbf16>
    tpu.vector_store %arg12[%c0_17, %c27], %10 {strides = array<i32>} : memref<512x81xbf16, #tpu.memory_space<vmem>>, vector<512x9xbf16>,
    %c0_18 = arith.constant 0 : index
    %c1_19 = arith.constant 1 : index
    %c1_20 = arith.constant 1 : index
    %c0_21 = arith.constant 0 : index
    %12 = vector.load %arg0[%c0_18, %c1_19, %c1_20, %c0_21] : memref<2x18x18x9xbf16, #tpu.memory_space<vmem>>, vector<2x16x16x9xbf16>
    %13 = vector.shape_cast %12 : vector<2x16x16x9xbf16> to vector<512x9xbf16>
    %c0_22 = arith.constant 0 : index
    %c36 = arith.constant 36 : index
    %14 = vector.load %arg12[%c0_22, %c36] : memref<512x81xbf16, #tpu.memory_space<vmem>>, vector<512x9xbf16>
    tpu.vector_store %arg12[%c0_22, %c36], %13 {strides = array<i32>} : memref<512x81xbf16, #tpu.memory_space<vmem>>, vector<512x9xbf16>,
    %c0_23 = arith.constant 0 : index
    %c1_24 = arith.constant 1 : index
    %c2_25 = arith.constant 2 : index
    %c0_26 = arith.constant 0 : index
    %15 = vector.load %arg0[%c0_23, %c1_24, %c2_25, %c0_26] : memref<2x18x18x9xbf16, #tpu.memory_space<vmem>>, vector<2x16x16x9xbf16>
    %16 = vector.shape_cast %15 : vector<2x16x16x9xbf16> to vector<512x9xbf16>
    %c0_27 = arith.constant 0 : index
    %c45 = arith.constant 45 : index
    %17 = vector.load %arg12[%c0_27, %c45] : memref<512x81xbf16, #tpu.memory_space<vmem>>, vector<512x9xbf16>
    tpu.vector_store %arg12[%c0_27, %c45], %16 {strides = array<i32>} : memref<512x81xbf16, #tpu.memory_space<vmem>>, vector<512x9xbf16>,
    %c0_28 = arith.constant 0 : index
    %c2_29 = arith.constant 2 : index
    %c0_30 = arith.constant 0 : index
    %c0_31 = arith.constant 0 : index
    %18 = vector.load %arg0[%c0_28, %c2_29, %c0_30, %c0_31] : memref<2x18x18x9xbf16, #tpu.memory_space<vmem>>, vector<2x16x16x9xbf16>
    %19 = vector.shape_cast %18 : vector<2x16x16x9xbf16> to vector<512x9xbf16>
    %c0_32 = arith.constant 0 : index
    %c54 = arith.constant 54 : index
    %20 = vector.load %arg12[%c0_32, %c54] : memref<512x81xbf16, #tpu.memory_space<vmem>>, vector<512x9xbf16>
    tpu.vector_store %arg12[%c0_32, %c54], %19 {strides = array<i32>} : memref<512x81xbf16, #tpu.memory_space<vmem>>, vector<512x9xbf16>,
    %c0_33 = arith.constant 0 : index
    %c2_34 = arith.constant 2 : index
    %c1_35 = arith.constant 1 : index
    %c0_36 = arith.constant 0 : index
    %21 = vector.load %arg0[%c0_33, %c2_34, %c1_35, %c0_36] : memref<2x18x18x9xbf16, #tpu.memory_space<vmem>>, vector<2x16x16x9xbf16>
    %22 = vector.shape_cast %21 : vector<2x16x16x9xbf16> to vector<512x9xbf16>
    %c0_37 = arith.constant 0 : index
    %c63 = arith.constant 63 : index
    %23 = vector.load %arg12[%c0_37, %c63] : memref<512x81xbf16, #tpu.memory_space<vmem>>, vector<512x9xbf16>
    tpu.vector_store %arg12[%c0_37, %c63], %22 {strides = array<i32>} : memref<512x81xbf16, #tpu.memory_space<vmem>>, vector<512x9xbf16>,
    %c0_38 = arith.constant 0 : index
    %c2_39 = arith.constant 2 : index
    %c2_40 = arith.constant 2 : index
    %c0_41 = arith.constant 0 : index
    %24 = vector.load %arg0[%c0_38, %c2_39, %c2_40, %c0_41] : memref<2x18x18x9xbf16, #tpu.memory_space<vmem>>, vector<2x16x16x9xbf16>
    %25 = vector.shape_cast %24 : vector<2x16x16x9xbf16> to vector<512x9xbf16>
    %c0_42 = arith.constant 0 : index
    %c72 = arith.constant 72 : index
    %26 = vector.load %arg12[%c0_42, %c72] : memref<512x81xbf16, #tpu.memory_space<vmem>>, vector<512x9xbf16>
    tpu.vector_store %arg12[%c0_42, %c72], %25 {strides = array<i32>} : memref<512x81xbf16, #tpu.memory_space<vmem>>, vector<512x9xbf16>,
    %c0_43 = arith.constant 0 : index
    %c0_44 = arith.constant 0 : index
    %27 = vector.load %arg12[%c0_43, %c0_44] : memref<512x81xbf16, #tpu.memory_space<vmem>>, vector<512x81xbf16>
    %c0_45 = arith.constant 0 : index
    %c0_46 = arith.constant 0 : index
    %28 = vector.load %arg1[%c0_45, %c0_46] : memref<81x24xbf16, #tpu.memory_space<vmem>>, vector<81x24xbf16>
    %cst = arith.constant dense<0.000000e+00> : vector<512x24xf32>
    %29 = tpu.matmul %27, %28, %cst {dimension_numbers = #tpu.dot_dimension_numbers<[1], [0], [0], [1], [0, 0, 1, 1], [], []>} : vector<512x81xbf16>, vector<81x24xbf16>, vector<512x24xf32> -> vector<512x24xf32>
    %c0_47 = arith.constant 0 : index
    %c0_48 = arith.constant 0 : index
    %30 = vector.load %arg2[%c0_47, %c0_48] : memref<1x24xf32, #tpu.memory_space<vmem>>, vector<1x24xf32>
    %31 = vector.broadcast %30 : vector<1x24xf32> to vector<512x24xf32>
    %32 = arith.addf %29, %31 : vector<512x24xf32>
    %cst_49 = arith.constant 0.000000e+00 : f32
    %33 = vector.broadcast %cst_49 : f32 to vector<512x24xf32>
    %34 = arith.maximumf %32, %33 : vector<512x24xf32>
    %35 = vector.shape_cast %34 : vector<512x24xf32> to vector<2x16x16x24xf32>
    %c0_50 = arith.constant 0 : index
    %c0_51 = arith.constant 0 : index
    %c0_52 = arith.constant 0 : index
    %c0_53 = arith.constant 0 : index
    %36 = vector.load %arg13[%c0_50, %c0_51, %c0_52, %c0_53] : memref<2x16x16x24xf32, #tpu.memory_space<vmem>>, vector<2x16x16x24xf32>
    tpu.vector_store %arg13[%c0_50, %c0_51, %c0_52, %c0_53], %35 {strides = array<i32>} : memref<2x16x16x24xf32, #tpu.memory_space<vmem>>, vector<2x16x16x24xf32>,
    %c0_54 = arith.constant 0 : index
    %c0_55 = arith.constant 0 : index
    %c0_56 = arith.constant 0 : index
    %c0_57 = arith.constant 0 : index
    %37 = tpu.strided_load %arg13[%c0_54, %c0_55, %c0_56, %c0_57] {strides = array<i32: 1, 2, 2, 1>} : memref<2x16x16x24xf32, #tpu.memory_space<vmem>>, vector<2x8x8x24xf32>
    %c0_58 = arith.constant 0 : index
    %c0_59 = arith.constant 0 : index
    %c1_60 = arith.constant 1 : index
    %c0_61 = arith.constant 0 : index
    %38 = tpu.strided_load %arg13[%c0_58, %c0_59, %c1_60, %c0_61] {strides = array<i32: 1, 2, 2, 1>} : memref<2x16x16x24xf32, #tpu.memory_space<vmem>>, vector<2x8x8x24xf32>
    %c0_62 = arith.constant 0 : index
    %c1_63 = arith.constant 1 : index
    %c0_64 = arith.constant 0 : index
    %c0_65 = arith.constant 0 : index
    %39 = tpu.strided_load %arg13[%c0_62, %c1_63, %c0_64, %c0_65] {strides = array<i32: 1, 2, 2, 1>} : memref<2x16x16x24xf32, #tpu.memory_space<vmem>>, vector<2x8x8x24xf32>
    %c0_66 = arith.constant 0 : index
    %c1_67 = arith.constant 1 : index
    %c1_68 = arith.constant 1 : index
    %c0_69 = arith.constant 0 : index
    %40 = tpu.strided_load %arg13[%c0_66, %c1_67, %c1_68, %c0_69] {strides = array<i32: 1, 2, 2, 1>} : memref<2x16x16x24xf32, #tpu.memory_space<vmem>>, vector<2x8x8x24xf32>
    %41 = arith.maximumf %37, %38 : vector<2x8x8x24xf32>
    %42 = arith.maximumf %39, %40 : vector<2x8x8x24xf32>
    %43 = arith.maximumf %41, %42 : vector<2x8x8x24xf32>
    %cst_70 = arith.constant 0.000000e+00 : f32
    %44 = vector.broadcast %cst_70 : f32 to vector<2x1x10x24xf32>
    %c0_71 = arith.constant 0 : index
    %c0_72 = arith.constant 0 : index
    %c0_73 = arith.constant 0 : index
    %c0_74 = arith.constant 0 : index
    %45 = vector.load %arg14[%c0_71, %c0_72, %c0_73, %c0_74] : memref<2x10x10x24xf32, #tpu.memory_space<vmem>>, vector<2x1x10x24xf32>
    tpu.vector_store %arg14[%c0_71, %c0_72, %c0_73, %c0_74], %44 {strides = array<i32>} : memref<2x10x10x24xf32, #tpu.memory_space<vmem>>, vector<2x1x10x24xf32>,
    %cst_75 = arith.constant 0.000000e+00 : f32
    %46 = vector.broadcast %cst_75 : f32 to vector<2x1x10x24xf32>
    %c0_76 = arith.constant 0 : index
    %c9_77 = arith.constant 9 : index
    %c0_78 = arith.constant 0 : index
    %c0_79 = arith.constant 0 : index
    %47 = vector.load %arg14[%c0_76, %c9_77, %c0_78, %c0_79] : memref<2x10x10x24xf32, #tpu.memory_space<vmem>>, vector<2x1x10x24xf32>
    tpu.vector_store %arg14[%c0_76, %c9_77, %c0_78, %c0_79], %46 {strides = array<i32>} : memref<2x10x10x24xf32, #tpu.memory_space<vmem>>, vector<2x1x10x24xf32>,
    %cst_80 = arith.constant 0.000000e+00 : f32
    %48 = vector.broadcast %cst_80 : f32 to vector<2x10x1x24xf32>
    %c0_81 = arith.constant 0 : index
    %c0_82 = arith.constant 0 : index
    %c0_83 = arith.constant 0 : index
    %c0_84 = arith.constant 0 : index
    %49 = vector.load %arg14[%c0_81, %c0_82, %c0_83, %c0_84] : memref<2x10x10x24xf32, #tpu.memory_space<vmem>>, vector<2x10x1x24xf32>
    tpu.vector_store %arg14[%c0_81, %c0_82, %c0_83, %c0_84], %48 {strides = array<i32>} : memref<2x10x10x24xf32, #tpu.memory_space<vmem>>, vector<2x10x1x24xf32>,
    %cst_85 = arith.constant 0.000000e+00 : f32
    %50 = vector.broadcast %cst_85 : f32 to vector<2x10x1x24xf32>
    %c0_86 = arith.constant 0 : index
    %c0_87 = arith.constant 0 : index
    %c9_88 = arith.constant 9 : index
    %c0_89 = arith.constant 0 : index
    %51 = vector.load %arg14[%c0_86, %c0_87, %c9_88, %c0_89] : memref<2x10x10x24xf32, #tpu.memory_space<vmem>>, vector<2x10x1x24xf32>
    tpu.vector_store %arg14[%c0_86, %c0_87, %c9_88, %c0_89], %50 {strides = array<i32>} : memref<2x10x10x24xf32, #tpu.memory_space<vmem>>, vector<2x10x1x24xf32>,
    %c0_90 = arith.constant 0 : index
    %c1_91 = arith.constant 1 : index
    %c1_92 = arith.constant 1 : index
    %c0_93 = arith.constant 0 : index
    %52 = vector.load %arg14[%c0_90, %c1_91, %c1_92, %c0_93] : memref<2x10x10x24xf32, #tpu.memory_space<vmem>>, vector<2x8x8x24xf32>
    tpu.vector_store %arg14[%c0_90, %c1_91, %c1_92, %c0_93], %43 {strides = array<i32>} : memref<2x10x10x24xf32, #tpu.memory_space<vmem>>, vector<2x8x8x24xf32>,
    %c0_94 = arith.constant 0 : index
    %c0_95 = arith.constant 0 : index
    %c0_96 = arith.constant 0 : index
    %c0_97 = arith.constant 0 : index
    %53 = vector.load %arg14[%c0_94, %c0_95, %c0_96, %c0_97] : memref<2x10x10x24xf32, #tpu.memory_space<vmem>>, vector<2x8x8x24xf32>
    %54 = vector.shape_cast %53 : vector<2x8x8x24xf32> to vector<128x24xf32>
    %55 = arith.truncf %54 : vector<128x24xf32> to vector<128x24xbf16>
    %c0_98 = arith.constant 0 : index
    %c0_99 = arith.constant 0 : index
    %56 = vector.load %arg15[%c0_98, %c0_99] : memref<128x216xbf16, #tpu.memory_space<vmem>>, vector<128x24xbf16>
    tpu.vector_store %arg15[%c0_98, %c0_99], %55 {strides = array<i32>} : memref<128x216xbf16, #tpu.memory_space<vmem>>, vector<128x24xbf16>,
    %c0_100 = arith.constant 0 : index
    %c0_101 = arith.constant 0 : index
    %c1_102 = arith.constant 1 : index
    %c0_103 = arith.constant 0 : index
    %57 = vector.load %arg14[%c0_100, %c0_101, %c1_102, %c0_103] : memref<2x10x10x24xf32, #tpu.memory_space<vmem>>, vector<2x8x8x24xf32>
    %58 = vector.shape_cast %57 : vector<2x8x8x24xf32> to vector<128x24xf32>
    %59 = arith.truncf %58 : vector<128x24xf32> to vector<128x24xbf16>
    %c0_104 = arith.constant 0 : index
    %c24 = arith.constant 24 : index
    %60 = vector.load %arg15[%c0_104, %c24] : memref<128x216xbf16, #tpu.memory_space<vmem>>, vector<128x24xbf16>
    tpu.vector_store %arg15[%c0_104, %c24], %59 {strides = array<i32>} : memref<128x216xbf16, #tpu.memory_space<vmem>>, vector<128x24xbf16>,
    %c0_105 = arith.constant 0 : index
    %c0_106 = arith.constant 0 : index
    %c2_107 = arith.constant 2 : index
    %c0_108 = arith.constant 0 : index
    %61 = vector.load %arg14[%c0_105, %c0_106, %c2_107, %c0_108] : memref<2x10x10x24xf32, #tpu.memory_space<vmem>>, vector<2x8x8x24xf32>
    %62 = vector.shape_cast %61 : vector<2x8x8x24xf32> to vector<128x24xf32>
    %63 = arith.truncf %62 : vector<128x24xf32> to vector<128x24xbf16>
    %c0_109 = arith.constant 0 : index
    %c48 = arith.constant 48 : index
    %64 = vector.load %arg15[%c0_109, %c48] : memref<128x216xbf16, #tpu.memory_space<vmem>>, vector<128x24xbf16>
    tpu.vector_store %arg15[%c0_109, %c48], %63 {strides = array<i32>} : memref<128x216xbf16, #tpu.memory_space<vmem>>, vector<128x24xbf16>,
    %c0_110 = arith.constant 0 : index
    %c1_111 = arith.constant 1 : index
    %c0_112 = arith.constant 0 : index
    %c0_113 = arith.constant 0 : index
    %65 = vector.load %arg14[%c0_110, %c1_111, %c0_112, %c0_113] : memref<2x10x10x24xf32, #tpu.memory_space<vmem>>, vector<2x8x8x24xf32>
    %66 = vector.shape_cast %65 : vector<2x8x8x24xf32> to vector<128x24xf32>
    %67 = arith.truncf %66 : vector<128x24xf32> to vector<128x24xbf16>
    %c0_114 = arith.constant 0 : index
    %c72_115 = arith.constant 72 : index
    %68 = vector.load %arg15[%c0_114, %c72_115] : memref<128x216xbf16, #tpu.memory_space<vmem>>, vector<128x24xbf16>
    tpu.vector_store %arg15[%c0_114, %c72_115], %67 {strides = array<i32>} : memref<128x216xbf16, #tpu.memory_space<vmem>>, vector<128x24xbf16>,
    %c0_116 = arith.constant 0 : index
    %c1_117 = arith.constant 1 : index
    %c1_118 = arith.constant 1 : index
    %c0_119 = arith.constant 0 : index
    %69 = vector.load %arg14[%c0_116, %c1_117, %c1_118, %c0_119] : memref<2x10x10x24xf32, #tpu.memory_space<vmem>>, vector<2x8x8x24xf32>
    %70 = vector.shape_cast %69 : vector<2x8x8x24xf32> to vector<128x24xf32>
    %71 = arith.truncf %70 : vector<128x24xf32> to vector<128x24xbf16>
    %c0_120 = arith.constant 0 : index
    %c96 = arith.constant 96 : index
    %72 = vector.load %arg15[%c0_120, %c96] : memref<128x216xbf16, #tpu.memory_space<vmem>>, vector<128x24xbf16>
    tpu.vector_store %arg15[%c0_120, %c96], %71 {strides = array<i32>} : memref<128x216xbf16, #tpu.memory_space<vmem>>, vector<128x24xbf16>,
    %c0_121 = arith.constant 0 : index
    %c1_122 = arith.constant 1 : index
    %c2_123 = arith.constant 2 : index
    %c0_124 = arith.constant 0 : index
    %73 = vector.load %arg14[%c0_121, %c1_122, %c2_123, %c0_124] : memref<2x10x10x24xf32, #tpu.memory_space<vmem>>, vector<2x8x8x24xf32>
    %74 = vector.shape_cast %73 : vector<2x8x8x24xf32> to vector<128x24xf32>
    %75 = arith.truncf %74 : vector<128x24xf32> to vector<128x24xbf16>
    %c0_125 = arith.constant 0 : index
    %c120 = arith.constant 120 : index
    %76 = vector.load %arg15[%c0_125, %c120] : memref<128x216xbf16, #tpu.memory_space<vmem>>, vector<128x24xbf16>
    tpu.vector_store %arg15[%c0_125, %c120], %75 {strides = array<i32>} : memref<128x216xbf16, #tpu.memory_space<vmem>>, vector<128x24xbf16>,
    %c0_126 = arith.constant 0 : index
    %c2_127 = arith.constant 2 : index
    %c0_128 = arith.constant 0 : index
    %c0_129 = arith.constant 0 : index
    %77 = vector.load %arg14[%c0_126, %c2_127, %c0_128, %c0_129] : memref<2x10x10x24xf32, #tpu.memory_space<vmem>>, vector<2x8x8x24xf32>
    %78 = vector.shape_cast %77 : vector<2x8x8x24xf32> to vector<128x24xf32>
    %79 = arith.truncf %78 : vector<128x24xf32> to vector<128x24xbf16>
    %c0_130 = arith.constant 0 : index
    %c144 = arith.constant 144 : index
    %80 = vector.load %arg15[%c0_130, %c144] : memref<128x216xbf16, #tpu.memory_space<vmem>>, vector<128x24xbf16>
    tpu.vector_store %arg15[%c0_130, %c144], %79 {strides = array<i32>} : memref<128x216xbf16, #tpu.memory_space<vmem>>, vector<128x24xbf16>,
    %c0_131 = arith.constant 0 : index
    %c2_132 = arith.constant 2 : index
    %c1_133 = arith.constant 1 : index
    %c0_134 = arith.constant 0 : index
    %81 = vector.load %arg14[%c0_131, %c2_132, %c1_133, %c0_134] : memref<2x10x10x24xf32, #tpu.memory_space<vmem>>, vector<2x8x8x24xf32>
    %82 = vector.shape_cast %81 : vector<2x8x8x24xf32> to vector<128x24xf32>
    %83 = arith.truncf %82 : vector<128x24xf32> to vector<128x24xbf16>
    %c0_135 = arith.constant 0 : index
    %c168 = arith.constant 168 : index
    %84 = vector.load %arg15[%c0_135, %c168] : memref<128x216xbf16, #tpu.memory_space<vmem>>, vector<128x24xbf16>
    tpu.vector_store %arg15[%c0_135, %c168], %83 {strides = array<i32>} : memref<128x216xbf16, #tpu.memory_space<vmem>>, vector<128x24xbf16>,
    %c0_136 = arith.constant 0 : index
    %c2_137 = arith.constant 2 : index
    %c2_138 = arith.constant 2 : index
    %c0_139 = arith.constant 0 : index
    %85 = vector.load %arg14[%c0_136, %c2_137, %c2_138, %c0_139] : memref<2x10x10x24xf32, #tpu.memory_space<vmem>>, vector<2x8x8x24xf32>
    %86 = vector.shape_cast %85 : vector<2x8x8x24xf32> to vector<128x24xf32>
    %87 = arith.truncf %86 : vector<128x24xf32> to vector<128x24xbf16>
    %c0_140 = arith.constant 0 : index
    %c192 = arith.constant 192 : index
    %88 = vector.load %arg15[%c0_140, %c192] : memref<128x216xbf16, #tpu.memory_space<vmem>>, vector<128x24xbf16>
    tpu.vector_store %arg15[%c0_140, %c192], %87 {strides = array<i32>} : memref<128x216xbf16, #tpu.memory_space<vmem>>, vector<128x24xbf16>,
    %c0_141 = arith.constant 0 : index
    %c0_142 = arith.constant 0 : index
    %89 = vector.load %arg15[%c0_141, %c0_142] : memref<128x216xbf16, #tpu.memory_space<vmem>>, vector<128x216xbf16>
    %c0_143 = arith.constant 0 : index
    %c0_144 = arith.constant 0 : index
    %90 = vector.load %arg3[%c0_143, %c0_144] : memref<216x48xbf16, #tpu.memory_space<vmem>>, vector<216x48xbf16>
    %cst_145 = arith.constant dense<0.000000e+00> : vector<128x48xf32>
    %91 = tpu.matmul %89, %90, %cst_145 {dimension_numbers = #tpu.dot_dimension_numbers<[1], [0], [0], [1], [0, 0, 1, 1], [], []>} : vector<128x216xbf16>, vector<216x48xbf16>, vector<128x48xf32> -> vector<128x48xf32>
    %c0_146 = arith.constant 0 : index
    %c0_147 = arith.constant 0 : index
    %92 = vector.load %arg4[%c0_146, %c0_147] : memref<1x48xf32, #tpu.memory_space<vmem>>, vector<1x48xf32>
    %93 = vector.broadcast %92 : vector<1x48xf32> to vector<128x48xf32>
    %94 = arith.addf %91, %93 : vector<128x48xf32>
    %cst_148 = arith.constant 0.000000e+00 : f32
    %95 = vector.broadcast %cst_148 : f32 to vector<128x48xf32>
    %96 = arith.maximumf %94, %95 : vector<128x48xf32>
    %97 = vector.shape_cast %96 : vector<128x48xf32> to vector<2x8x8x48xf32>
    %c0_149 = arith.constant 0 : index
    %c0_150 = arith.constant 0 : index
    %c0_151 = arith.constant 0 : index
    %c0_152 = arith.constant 0 : index
    %98 = vector.load %arg16[%c0_149, %c0_150, %c0_151, %c0_152] : memref<2x8x8x48xf32, #tpu.memory_space<vmem>>, vector<2x8x8x48xf32>
    tpu.vector_store %arg16[%c0_149, %c0_150, %c0_151, %c0_152], %97 {strides = array<i32>} : memref<2x8x8x48xf32, #tpu.memory_space<vmem>>, vector<2x8x8x48xf32>,
    %c0_153 = arith.constant 0 : index
    %c0_154 = arith.constant 0 : index
    %c0_155 = arith.constant 0 : index
    %c0_156 = arith.constant 0 : index
    %99 = tpu.strided_load %arg16[%c0_153, %c0_154, %c0_155, %c0_156] {strides = array<i32: 1, 2, 2, 1>} : memref<2x8x8x48xf32, #tpu.memory_space<vmem>>, vector<2x4x4x48xf32>
    %c0_157 = arith.constant 0 : index
    %c0_158 = arith.constant 0 : index
    %c1_159 = arith.constant 1 : index
    %c0_160 = arith.constant 0 : index
    %100 = tpu.strided_load %arg16[%c0_157, %c0_158, %c1_159, %c0_160] {strides = array<i32: 1, 2, 2, 1>} : memref<2x8x8x48xf32, #tpu.memory_space<vmem>>, vector<2x4x4x48xf32>
    %c0_161 = arith.constant 0 : index
    %c1_162 = arith.constant 1 : index
    %c0_163 = arith.constant 0 : index
    %c0_164 = arith.constant 0 : index
    %101 = tpu.strided_load %arg16[%c0_161, %c1_162, %c0_163, %c0_164] {strides = array<i32: 1, 2, 2, 1>} : memref<2x8x8x48xf32, #tpu.memory_space<vmem>>, vector<2x4x4x48xf32>
    %c0_165 = arith.constant 0 : index
    %c1_166 = arith.constant 1 : index
    %c1_167 = arith.constant 1 : index
    %c0_168 = arith.constant 0 : index
    %102 = tpu.strided_load %arg16[%c0_165, %c1_166, %c1_167, %c0_168] {strides = array<i32: 1, 2, 2, 1>} : memref<2x8x8x48xf32, #tpu.memory_space<vmem>>, vector<2x4x4x48xf32>
    %103 = arith.maximumf %99, %100 : vector<2x4x4x48xf32>
    %104 = arith.maximumf %101, %102 : vector<2x4x4x48xf32>
    %105 = arith.maximumf %103, %104 : vector<2x4x4x48xf32>
    %106 = vector.extract_strided_slice %105 {offsets = [0, 0, 0, 0], sizes = [2, 1, 1, 48], strides = [1, 1, 1, 1]} : vector<2x4x4x48xf32> to vector<2x1x1x48xf32>
    %107 = vector.shape_cast %106 : vector<2x1x1x48xf32> to vector<2x48xf32>
    %108 = arith.truncf %107 : vector<2x48xf32> to vector<2x48xbf16>
    %c0_169 = arith.constant 0 : index
    %c0_170 = arith.constant 0 : index
    %109 = vector.load %arg17[%c0_169, %c0_170] : memref<2x768xbf16, #tpu.memory_space<vmem>>, vector<2x48xbf16>
    tpu.vector_store %arg17[%c0_169, %c0_170], %108 {strides = array<i32>} : memref<2x768xbf16, #tpu.memory_space<vmem>>, vector<2x48xbf16>,
    %110 = vector.extract_strided_slice %105 {offsets = [0, 0, 1, 0], sizes = [2, 1, 1, 48], strides = [1, 1, 1, 1]} : vector<2x4x4x48xf32> to vector<2x1x1x48xf32>
    %111 = vector.shape_cast %110 : vector<2x1x1x48xf32> to vector<2x48xf32>
    %112 = arith.truncf %111 : vector<2x48xf32> to vector<2x48xbf16>
    %c0_171 = arith.constant 0 : index
    %c48_172 = arith.constant 48 : index
    %113 = vector.load %arg17[%c0_171, %c48_172] : memref<2x768xbf16, #tpu.memory_space<vmem>>, vector<2x48xbf16>
    tpu.vector_store %arg17[%c0_171, %c48_172], %112 {strides = array<i32>} : memref<2x768xbf16, #tpu.memory_space<vmem>>, vector<2x48xbf16>,
    %114 = vector.extract_strided_slice %105 {offsets = [0, 0, 2, 0], sizes = [2, 1, 1, 48], strides = [1, 1, 1, 1]} : vector<2x4x4x48xf32> to vector<2x1x1x48xf32>
    %115 = vector.shape_cast %114 : vector<2x1x1x48xf32> to vector<2x48xf32>
    %116 = arith.truncf %115 : vector<2x48xf32> to vector<2x48xbf16>
    %c0_173 = arith.constant 0 : index
    %c96_174 = arith.constant 96 : index
    %117 = vector.load %arg17[%c0_173, %c96_174] : memref<2x768xbf16, #tpu.memory_space<vmem>>, vector<2x48xbf16>
    tpu.vector_store %arg17[%c0_173, %c96_174], %116 {strides = array<i32>} : memref<2x768xbf16, #tpu.memory_space<vmem>>, vector<2x48xbf16>,
    %118 = vector.extract_strided_slice %105 {offsets = [0, 0, 3, 0], sizes = [2, 1, 1, 48], strides = [1, 1, 1, 1]} : vector<2x4x4x48xf32> to vector<2x1x1x48xf32>
    %119 = vector.shape_cast %118 : vector<2x1x1x48xf32> to vector<2x48xf32>
    %120 = arith.truncf %119 : vector<2x48xf32> to vector<2x48xbf16>
    %c0_175 = arith.constant 0 : index
    %c144_176 = arith.constant 144 : index
    %121 = vector.load %arg17[%c0_175, %c144_176] : memref<2x768xbf16, #tpu.memory_space<vmem>>, vector<2x48xbf16>
    tpu.vector_store %arg17[%c0_175, %c144_176], %120 {strides = array<i32>} : memref<2x768xbf16, #tpu.memory_space<vmem>>, vector<2x48xbf16>,
    %122 = vector.extract_strided_slice %105 {offsets = [0, 1, 0, 0], sizes = [2, 1, 1, 48], strides = [1, 1, 1, 1]} : vector<2x4x4x48xf32> to vector<2x1x1x48xf32>
    %123 = vector.shape_cast %122 : vector<2x1x1x48xf32> to vector<2x48xf32>
    %124 = arith.truncf %123 : vector<2x48xf32> to vector<2x48xbf16>
    %c0_177 = arith.constant 0 : index
    %c192_178 = arith.constant 192 : index
    %125 = vector.load %arg17[%c0_177, %c192_178] : memref<2x768xbf16, #tpu.memory_space<vmem>>, vector<2x48xbf16>
    tpu.vector_store %arg17[%c0_177, %c192_178], %124 {strides = array<i32>} : memref<2x768xbf16, #tpu.memory_space<vmem>>, vector<2x48xbf16>,
    %126 = vector.extract_strided_slice %105 {offsets = [0, 1, 1, 0], sizes = [2, 1, 1, 48], strides = [1, 1, 1, 1]} : vector<2x4x4x48xf32> to vector<2x1x1x48xf32>
    %127 = vector.shape_cast %126 : vector<2x1x1x48xf32> to vector<2x48xf32>
    %128 = arith.truncf %127 : vector<2x48xf32> to vector<2x48xbf16>
    %c0_179 = arith.constant 0 : index
    %c240 = arith.constant 240 : index
    %129 = vector.load %arg17[%c0_179, %c240] : memref<2x768xbf16, #tpu.memory_space<vmem>>, vector<2x48xbf16>
    tpu.vector_store %arg17[%c0_179, %c240], %128 {strides = array<i32>} : memref<2x768xbf16, #tpu.memory_space<vmem>>, vector<2x48xbf16>,
    %130 = vector.extract_strided_slice %105 {offsets = [0, 1, 2, 0], sizes = [2, 1, 1, 48], strides = [1, 1, 1, 1]} : vector<2x4x4x48xf32> to vector<2x1x1x48xf32>
    %131 = vector.shape_cast %130 : vector<2x1x1x48xf32> to vector<2x48xf32>
    %132 = arith.truncf %131 : vector<2x48xf32> to vector<2x48xbf16>
    %c0_180 = arith.constant 0 : index
    %c288 = arith.constant 288 : index
    %133 = vector.load %arg17[%c0_180, %c288] : memref<2x768xbf16, #tpu.memory_space<vmem>>, vector<2x48xbf16>
    tpu.vector_store %arg17[%c0_180, %c288], %132 {strides = array<i32>} : memref<2x768xbf16, #tpu.memory_space<vmem>>, vector<2x48xbf16>,
    %134 = vector.extract_strided_slice %105 {offsets = [0, 1, 3, 0], sizes = [2, 1, 1, 48], strides = [1, 1, 1, 1]} : vector<2x4x4x48xf32> to vector<2x1x1x48xf32>
    %135 = vector.shape_cast %134 : vector<2x1x1x48xf32> to vector<2x48xf32>
    %136 = arith.truncf %135 : vector<2x48xf32> to vector<2x48xbf16>
    %c0_181 = arith.constant 0 : index
    %c336 = arith.constant 336 : index
    %137 = vector.load %arg17[%c0_181, %c336] : memref<2x768xbf16, #tpu.memory_space<vmem>>, vector<2x48xbf16>
    tpu.vector_store %arg17[%c0_181, %c336], %136 {strides = array<i32>} : memref<2x768xbf16, #tpu.memory_space<vmem>>, vector<2x48xbf16>,
    %138 = vector.extract_strided_slice %105 {offsets = [0, 2, 0, 0], sizes = [2, 1, 1, 48], strides = [1, 1, 1, 1]} : vector<2x4x4x48xf32> to vector<2x1x1x48xf32>
    %139 = vector.shape_cast %138 : vector<2x1x1x48xf32> to vector<2x48xf32>
    %140 = arith.truncf %139 : vector<2x48xf32> to vector<2x48xbf16>
    %c0_182 = arith.constant 0 : index
    %c384 = arith.constant 384 : index
    %141 = vector.load %arg17[%c0_182, %c384] : memref<2x768xbf16, #tpu.memory_space<vmem>>, vector<2x48xbf16>
    tpu.vector_store %arg17[%c0_182, %c384], %140 {strides = array<i32>} : memref<2x768xbf16, #tpu.memory_space<vmem>>, vector<2x48xbf16>,
    %142 = vector.extract_strided_slice %105 {offsets = [0, 2, 1, 0], sizes = [2, 1, 1, 48], strides = [1, 1, 1, 1]} : vector<2x4x4x48xf32> to vector<2x1x1x48xf32>
    %143 = vector.shape_cast %142 : vector<2x1x1x48xf32> to vector<2x48xf32>
    %144 = arith.truncf %143 : vector<2x48xf32> to vector<2x48xbf16>
    %c0_183 = arith.constant 0 : index
    %c432 = arith.constant 432 : index
    %145 = vector.load %arg17[%c0_183, %c432] : memref<2x768xbf16, #tpu.memory_space<vmem>>, vector<2x48xbf16>
    tpu.vector_store %arg17[%c0_183, %c432], %144 {strides = array<i32>} : memref<2x768xbf16, #tpu.memory_space<vmem>>, vector<2x48xbf16>,
    %146 = vector.extract_strided_slice %105 {offsets = [0, 2, 2, 0], sizes = [2, 1, 1, 48], strides = [1, 1, 1, 1]} : vector<2x4x4x48xf32> to vector<2x1x1x48xf32>
    %147 = vector.shape_cast %146 : vector<2x1x1x48xf32> to vector<2x48xf32>
    %148 = arith.truncf %147 : vector<2x48xf32> to vector<2x48xbf16>
    %c0_184 = arith.constant 0 : index
    %c480 = arith.constant 480 : index
    %149 = vector.load %arg17[%c0_184, %c480] : memref<2x768xbf16, #tpu.memory_space<vmem>>, vector<2x48xbf16>
    tpu.vector_store %arg17[%c0_184, %c480], %148 {strides = array<i32>} : memref<2x768xbf16, #tpu.memory_space<vmem>>, vector<2x48xbf16>,
    %150 = vector.extract_strided_slice %105 {offsets = [0, 2, 3, 0], sizes = [2, 1, 1, 48], strides = [1, 1, 1, 1]} : vector<2x4x4x48xf32> to vector<2x1x1x48xf32>
    %151 = vector.shape_cast %150 : vector<2x1x1x48xf32> to vector<2x48xf32>
    %152 = arith.truncf %151 : vector<2x48xf32> to vector<2x48xbf16>
    %c0_185 = arith.constant 0 : index
    %c528 = arith.constant 528 : index
    %153 = vector.load %arg17[%c0_185, %c528] : memref<2x768xbf16, #tpu.memory_space<vmem>>, vector<2x48xbf16>
    tpu.vector_store %arg17[%c0_185, %c528], %152 {strides = array<i32>} : memref<2x768xbf16, #tpu.memory_space<vmem>>, vector<2x48xbf16>,
    %154 = vector.extract_strided_slice %105 {offsets = [0, 3, 0, 0], sizes = [2, 1, 1, 48], strides = [1, 1, 1, 1]} : vector<2x4x4x48xf32> to vector<2x1x1x48xf32>
    %155 = vector.shape_cast %154 : vector<2x1x1x48xf32> to vector<2x48xf32>
    %156 = arith.truncf %155 : vector<2x48xf32> to vector<2x48xbf16>
    %c0_186 = arith.constant 0 : index
    %c576 = arith.constant 576 : index
    %157 = vector.load %arg17[%c0_186, %c576] : memref<2x768xbf16, #tpu.memory_space<vmem>>, vector<2x48xbf16>
    tpu.vector_store %arg17[%c0_186, %c576], %156 {strides = array<i32>} : memref<2x768xbf16, #tpu.memory_space<vmem>>, vector<2x48xbf16>,
    %158 = vector.extract_strided_slice %105 {offsets = [0, 3, 1, 0], sizes = [2, 1, 1, 48], strides = [1, 1, 1, 1]} : vector<2x4x4x48xf32> to vector<2x1x1x48xf32>
    %159 = vector.shape_cast %158 : vector<2x1x1x48xf32> to vector<2x48xf32>
    %160 = arith.truncf %159 : vector<2x48xf32> to vector<2x48xbf16>
    %c0_187 = arith.constant 0 : index
    %c624 = arith.constant 624 : index
    %161 = vector.load %arg17[%c0_187, %c624] : memref<2x768xbf16, #tpu.memory_space<vmem>>, vector<2x48xbf16>
    tpu.vector_store %arg17[%c0_187, %c624], %160 {strides = array<i32>} : memref<2x768xbf16, #tpu.memory_space<vmem>>, vector<2x48xbf16>,
    %162 = vector.extract_strided_slice %105 {offsets = [0, 3, 2, 0], sizes = [2, 1, 1, 48], strides = [1, 1, 1, 1]} : vector<2x4x4x48xf32> to vector<2x1x1x48xf32>
    %163 = vector.shape_cast %162 : vector<2x1x1x48xf32> to vector<2x48xf32>
    %164 = arith.truncf %163 : vector<2x48xf32> to vector<2x48xbf16>
    %c0_188 = arith.constant 0 : index
    %c672 = arith.constant 672 : index
    %165 = vector.load %arg17[%c0_188, %c672] : memref<2x768xbf16, #tpu.memory_space<vmem>>, vector<2x48xbf16>
    tpu.vector_store %arg17[%c0_188, %c672], %164 {strides = array<i32>} : memref<2x768xbf16, #tpu.memory_space<vmem>>, vector<2x48xbf16>,
    %166 = vector.extract_strided_slice %105 {offsets = [0, 3, 3, 0], sizes = [2, 1, 1, 48], strides = [1, 1, 1, 1]} : vector<2x4x4x48xf32> to vector<2x1x1x48xf32>
    %167 = vector.shape_cast %166 : vector<2x1x1x48xf32> to vector<2x48xf32>
    %168 = arith.truncf %167 : vector<2x48xf32> to vector<2x48xbf16>
    %c0_189 = arith.constant 0 : index
    %c720 = arith.constant 720 : index
    %169 = vector.load %arg17[%c0_189, %c720] : memref<2x768xbf16, #tpu.memory_space<vmem>>, vector<2x48xbf16>
    tpu.vector_store %arg17[%c0_189, %c720], %168 {strides = array<i32>} : memref<2x768xbf16, #tpu.memory_space<vmem>>, vector<2x48xbf16>,
    %c0_190 = arith.constant 0 : index
    %c0_191 = arith.constant 0 : index
    %170 = vector.load %arg17[%c0_190, %c0_191] : memref<2x768xbf16, #tpu.memory_space<vmem>>, vector<2x768xbf16>
    %c0_192 = arith.constant 0 : index
    %c0_193 = arith.constant 0 : index
    %171 = vector.load %arg5[%c0_192, %c0_193] : memref<768x384xbf16, #tpu.memory_space<vmem>>, vector<768x384xbf16>
    %cst_194 = arith.constant dense<0.000000e+00> : vector<2x384xf32>
    %172 = tpu.matmul %170, %171, %cst_194 {dimension_numbers = #tpu.dot_dimension_numbers<[1], [0], [0], [1], [0, 0, 1, 1], [], []>} : vector<2x768xbf16>, vector<768x384xbf16>, vector<2x384xf32> -> vector<2x384xf32>
    %c0_195 = arith.constant 0 : index
    %c0_196 = arith.constant 0 : index
    %173 = vector.load %arg6[%c0_195, %c0_196] : memref<1x384xf32, #tpu.memory_space<vmem>>, vector<1x384xf32>
    %174 = vector.broadcast %173 : vector<1x384xf32> to vector<2x384xf32>
    %175 = arith.addf %172, %174 : vector<2x384xf32>
    %cst_197 = arith.constant 0.000000e+00 : f32
    %176 = vector.broadcast %cst_197 : f32 to vector<2x384xf32>
    %177 = arith.maximumf %175, %176 : vector<2x384xf32>
    %178 = arith.truncf %177 : vector<2x384xf32> to vector<2x384xbf16>
    %c0_198 = arith.constant 0 : index
    %c0_199 = arith.constant 0 : index
    %179 = vector.load %arg7[%c0_198, %c0_199] : memref<384x384xbf16, #tpu.memory_space<vmem>>, vector<384x384xbf16>
    %cst_200 = arith.constant dense<0.000000e+00> : vector<2x384xf32>
    %180 = tpu.matmul %178, %179, %cst_200 {dimension_numbers = #tpu.dot_dimension_numbers<[1], [0], [0], [1], [0, 0, 1, 1], [], []>} : vector<2x384xbf16>, vector<384x384xbf16>, vector<2x384xf32> -> vector<2x384xf32>
    %c0_201 = arith.constant 0 : index
    %c0_202 = arith.constant 0 : index
    %181 = vector.load %arg8[%c0_201, %c0_202] : memref<1x384xf32, #tpu.memory_space<vmem>>, vector<1x384xf32>
    %182 = vector.broadcast %181 : vector<1x384xf32> to vector<2x384xf32>
    %183 = arith.addf %180, %182 : vector<2x384xf32>
    %cst_203 = arith.constant 0.000000e+00 : f32
    %184 = vector.broadcast %cst_203 : f32 to vector<2x384xf32>
    %185 = arith.maximumf %183, %184 : vector<2x384xf32>
    %186 = arith.truncf %185 : vector<2x384xf32> to vector<2x384xbf16>
    %c0_204 = arith.constant 0 : index
    %c0_205 = arith.constant 0 : index
    %187 = vector.load %arg9[%c0_204, %c0_205] : memref<384x384xbf16, #tpu.memory_space<vmem>>, vector<384x384xbf16>
    %cst_206 = arith.constant dense<0.000000e+00> : vector<2x384xf32>
    %188 = tpu.matmul %186, %187, %cst_206 {dimension_numbers = #tpu.dot_dimension_numbers<[1], [0], [0], [1], [0, 0, 1, 1], [], []>} : vector<2x384xbf16>, vector<384x384xbf16>, vector<2x384xf32> -> vector<2x384xf32>
    %c0_207 = arith.constant 0 : index
    %c0_208 = arith.constant 0 : index
    %189 = vector.load %arg10[%c0_207, %c0_208] : memref<1x384xf32, #tpu.memory_space<vmem>>, vector<1x384xf32>
    %190 = vector.broadcast %189 : vector<1x384xf32> to vector<2x384xf32>
    %191 = arith.addf %188, %190 : vector<2x384xf32>
    %192 = vector.extract_strided_slice %191 {offsets = [0, 0], sizes = [2, 128], strides = [1, 1]} : vector<2x384xf32> to vector<2x128xf32>
    %193 = vector.extract_strided_slice %191 {offsets = [0, 128], sizes = [2, 128], strides = [1, 1]} : vector<2x384xf32> to vector<2x128xf32>
    %194 = arith.maximumf %192, %193 : vector<2x128xf32>
    %195 = vector.extract_strided_slice %191 {offsets = [0, 256], sizes = [2, 128], strides = [1, 1]} : vector<2x384xf32> to vector<2x128xf32>
    %196 = arith.maximumf %194, %195 : vector<2x128xf32>
    %c0_209 = arith.constant 0 : index
    %c0_210 = arith.constant 0 : index
    %197 = vector.load %arg11[%c0_209, %c0_210] : memref<2x128xf32, #tpu.memory_space<vmem>>, vector<2x128xf32>
    tpu.vector_store %arg11[%c0_209, %c0_210], %196 {strides = array<i32>} : memref<2x128xf32, #tpu.memory_space<vmem>>, vector<2x128xf32>,
    return
  }
}

</mosaic_0001>

<bundles_post_ra>
// kernel: othernet_trip_scoremax.1
= control target key start
LH: loop header
LB: loop body
LE: loop exit
PB: predicated region body
PF: predicated region fallthrough
CT: control target
= control target key end

     0   :  { %vm1613_vm0 = vcmask 1042432   ;;  %s13576_s21 = smov 27   ;;  %vm1614_vm1 = vcmask 1046532   ;;  %vm425_vm3 = vsmask.f32 3328  ;;  %s19064_s28 = smov 18   ;;  %s19052_s0 = inlined_call_operand.vmem [shape: bf16[2,18,18,9], index: 0, kind: input, shape index: {}]   ;;  %s19053_s1 = inlined_call_operand.vmem [shape: bf16[81,24], index: 1, kind: input, shape index: {}]   ;;  %s19054_s2 = inlined_call_operand.vmem [shape: f32[1,24], index: 2, kind: input, shape index: {}]   ;;  %s19055_s3 = inlined_call_operand.vmem [shape: bf16[216,48], index: 3, kind: input, shape index: {}]   ;;  %s19056_s4 = inlined_call_operand.vmem [shape: f32[1,48], index: 4, kind: input, shape index: {}]   ;;  %s19057_s5 = inlined_call_operand.vmem [shape: bf16[768,384], index: 5, kind: input, shape index: {}]   ;;  %s19058_s6 = inlined_call_operand.vmem [shape: f32[1,384], index: 6, kind: input, shape index: {}]   ;;  %s19059_s7 = inlined_call_operand.vmem [shape: bf16[384,384], index: 7, kind: input, shape index: {}]   ;;  %s19060_s8 = inlined_call_operand.vmem [shape: f32[1,384], index: 8, kind: input, shape index: {}]   ;;  %s19061_s9 = inlined_call_operand.vmem [shape: bf16[384,384], index: 9, kind: input, shape index: {}]   ;;  %s19062_s10 = inlined_call_operand.vmem [shape: f32[1,384], index: 10, kind: input, shape index: {}]   ;;  %s19063_s11 = inlined_call_operand.hbm [shape: f32[2,128], index: 11, kind: output, shape index: {}]  }
   0x1   :  { %v13048_v0 = vld [vmem:[%s19052_s0 + $0x18] sm:$0xff]   ;;  %v13049_v1 = vld [vmem:[%s19052_s0 + $0xc] sm:$0xff]   ;;  %v1421_v2 = vld [vmem:[%s19052_s0] sm:$0xe]  ;;  %vm426_vm4 = vsmask.f32 7440 }
   0x2   :  { %2292 = vrot.lane.b32.xlu1 %v13048_v0, %s13576_s21  ;;  %v1422_v3 = vld [vmem:[%s19052_s0 + $0x4] sm:$0xf]  ;;  %v1423_v4 = vld [vmem:[%s19052_s0 + $0x8] sm:$0x1]  ;;  %2290 = vrot.lane.b32.xlu0 %v13049_v1, %s13576_s21  ;;  %v11538_v5 = vrot.slane %v1421_v2, 9  ;;  %vm13677_vm2 = vmor %vm1613_vm0, %vm1614_vm1  ;;  %s13578_s27 = smov 9  }
   0x3   :  { %v1618_v6 = vrot.slane %v1422_v3, 5  ;;  %v1621_v7 = vrot.slane %v1423_v4, 5  ;;  %v1424_v9 = vld [vmem:[%s19052_s0 + $0xc] sm:$0xe]  ;;  %v1425_v10 = vld [vmem:[%s19052_s0 + $0x10] sm:$0xf]  ;;  %vm13722_vm5 = vmor %vm425_vm3, %vm426_vm4 }
   0x4   :  { %v1426_v13 = vld [vmem:[%s19052_s0 + $0x14] sm:$0x1]  ;;  %v11539_v14 = vrot.slane %v1424_v9, 9  ;;  %v1625_v15 = vrot.slane %v1425_v10, 5  ;;  %v329_v17 = vld [vmem:[%s19052_s0] sm:$0xf] }
   0x5   :  { %v1619_v11 = vsel %vm13677_vm2, %v11538_v5, %v1618_v6  ;;  %v1620_v12 = vrot.slane %v1618_v6, 4  ;;  %v1628_v16 = vrot.slane %v1426_v13, 5  ;;  %v330_v18 = vld [vmem:[%s19052_s0 + $0x4] sm:$0xf]  ;;  %v331_v22 = vld [vmem:[%s19052_s0 + $0x8] sm:$0x1] }
   0x6   :  { %v1626_v20 = vsel %vm13677_vm2, %v11539_v14, %v1625_v15  ;;  %v1627_v21 = vrot.slane %v1625_v15, 4  ;;  %v429_v24 = vshrl.u32 %v329_v17, 16  ;;  %v432_v25 = vshll.u32 %v329_v17, 16  ;;  %v11701_v27 = vld [vmem:[%s19052_s0 + $0x18] sm:$0xf]  ;;  %s13579_s18 = smov 36  }
   0x7   :  { %v1622_v19 = vsel %vm13677_vm2, %v1620_v12, %v1621_v7  ;;  %v438_v26 = vshll.u32 %v330_v18, 16  ;;  %v442_v29 = vshrl.u32 %v330_v18, 16  ;;  %v448_v30 = vshll.u32 %v331_v22, 16  ;;  %v11702_v31 = vld [vmem:[%s19052_s0 + $0x1c] sm:$0xf]  ;;  %s13580_s24 = smov 45  }
   0x8   :  { %v11570_v23 = vcombine.low %v1619_v11, %v1622_v19  ;;  %v1629_v28 = vsel %vm13677_vm2, %v1627_v21, %v1628_v16  ;;  %v11703_v32 = vld [vmem:[%s19052_s0 + $0x20] sm:$0x1]  ;;  %v431_v34 = vrot.slane %v429_v24, 4  ;;  %v434_v35 = vrot.slane %v432_v25, 5  ;;  %v332_v37 = vld [vmem:[%s19052_s0 + $0xc] sm:$0xf] }
   0x9   :  { %v11571_v33 = vcombine.low %v1626_v20, %v1629_v28  ;;  %v440_v36 = vrot.slane %v438_v26, 5  ;;  %v444_v38 = vrot.slane %v442_v29, 4  ;;  %v450_v39 = vrot.slane %v448_v30, 5  ;;  %v333_v50 = vld [vmem:[%s19052_s0 + $0x10] sm:$0xf]  ;;  %s13581_s16 = smov 54  }
   0xa   :  { %1936 = vrot.lane.b32.xlu1 %v11570_v23, %s19064_s28  ;;  %v2540_v40 = vshrl.u32 %v11701_v27, 16  ;;  %v2543_v41 = vshll.u32 %v11701_v27, 16  ;;  %v435_v42 = vor.u32 %v434_v35, %v431_v34  ;;  %v2549_v43 = vshll.u32 %v11702_v31, 16  ;;  %v334_v56 = vld [vmem:[%s19052_s0 + $0x14] sm:$0x1]  ;;  %s13582_s25 = smov 63  }
   0xb   :  { %v2553_v44 = vshrl.u32 %v11702_v31, 16  ;;  %v2559_v45 = vshll.u32 %v11703_v32, 16  ;;  %v445_v47 = vor.u32 %v444_v38, %v440_v36  ;;  %v453_v51 = vshrl.u32 %v332_v37, 16  ;;  %v11829_v61 = vld [vmem:[%s19052_s0 + $0x18] sm:$0xe]  ;;  %s13583_s13 = smov 72  }
   0xc   :  { %v2542_v48 = vrot.slane %v2540_v40, 4  ;;  %v2545_v49 = vrot.slane %v2543_v41, 5  ;;  %v436_v52 = vrot.slane %v435_v42, 4  ;;  %v2551_v53 = vrot.slane %v2549_v43, 5  ;;  %v11830_v2 = vld [vmem:[%s19052_s0 + $0x1c] sm:$0xf] }
   0xd   :  { %v2555_v54 = vrot.slane %v2553_v44, 4  ;;  %v2561_v55 = vrot.slane %v2559_v45, 5  ;;  %v446_v57 = vrot.slane %v445_v47, 4  ;;  %v455_v59 = vrot.slane %v453_v51, 4  ;;  %v11831_v3 = vld [vmem:[%s19052_s0 + $0x20] sm:$0x1] }
   0xe   :  { %1938 = vrot.lane.b32.xlu1 %v11571_v33, %s19064_s28  ;;  %v2546_v58 = vor.u32 %v2545_v49, %v2542_v48  ;;  %v456_v60 = vshll.u32 %v332_v37, 16  ;;  %v441_v62 = vsel %vm13722_vm5, %v436_v52, %v440_v36  ;;  %v462_v0 = vshll.u32 %v333_v50, 16  ;;  %v11698_v9 = vld [vmem:[%s19052_s0 + $0xc] sm:$0xf]  ;;  %v11699_v18 = vld [vmem:[%s19052_s0 + $0x10] sm:$0xf] }
   0xf   :  { %v2556_v63 = vor.u32 %v2555_v54, %v2551_v53  ;;  %v466_v1 = vshrl.u32 %v333_v50, 16  ;;  %v451_v4 = vsel %vm13722_vm5, %v446_v57, %v450_v39  ;;  %v472_v7 = vshll.u32 %v334_v56, 16  ;;  %v11700_v23 = vld [vmem:[%s19052_s0 + $0x14] sm:$0x1]  ;;  %v11826_v28 = vld [vmem:[%s19052_s0 + $0xc] sm:$0xe] }
  0x10   :  { %v2547_v5 = vrot.slane %v2546_v58, 4  ;;  %v458_v6 = vrot.slane %v456_v60, 5  ;;  %v11506_v10 = vcombine.low %v441_v62, %v451_v4  ;;  %v464_v12 = vrot.slane %v462_v0, 5  ;;  %v11827_v29 = vld [vmem:[%s19052_s0 + $0x10] sm:$0xf]  ;;  %v13050_v56 = vld [vmem:[%s19052_s0 + $0x24] sm:$0xff]  }
  0x11   :  { %v2557_v11 = vrot.slane %v2556_v63, 4  ;;  %v468_v13 = vrot.slane %v466_v1, 4  ;;  %v474_v16 = vrot.slane %v472_v7, 5  ;;  %v11923_v17 = vrot.slane %v11829_v61, 9  ;;  %v11828_v34 = vld [vmem:[%s19052_s0 + $0x14] sm:$0x1] }
  0x12   :  { %v2552_v14 = vsel %vm13722_vm5, %v2547_v5, %v2551_v53  ;;  %v459_v15 = vor.u32 %v458_v6, %v455_v59  ;;  %1292 = vrot.lane.b32.xlu0 %v11506_v10, %s13578_s27  ;;  %v3709_v21 = vrot.slane %v11830_v2, 5  ;;  %v3712_v22 = vrot.slane %v11831_v3, 5  ;;  %v12085_v39 = vld [vmem:[%s19052_s0 + $0x24] sm:$0xf]  ;;  %v12086_v49 = vld [vmem:[%s19052_s0 + $0x28] sm:$0xf] }
  0x13   :  { %v2562_v19 = vsel %vm13722_vm5, %v2557_v11, %v2561_v55  ;;  %v469_v20 = vor.u32 %v468_v13, %v464_v12  ;;  %v2516_v26 = vshrl.u32 %v11698_v9, 16  ;;  %v2519_v27 = vshll.u32 %v11698_v9, 16  ;;  %v12087_v57 = vld [vmem:[%s19052_s0 + $0x2c] sm:$0x1]  ;;  %v335_v0 = vld [vmem:[%s19052_s0 + $0x18] sm:$0xf] }
  0x14   :  { %v11795_v24 = vcombine.low %v2552_v14, %v2562_v19  ;;  %v460_v25 = vrot.slane %v459_v15, 4  ;;  %v3710_v31 = vsel %vm13677_vm2, %v11923_v17, %v3709_v21  ;;  %v3711_v32 = vrot.slane %v3709_v21, 4  ;;  %v336_v10 = vld [vmem:[%s19052_s0 + $0x1c] sm:$0xf]  ;;  %v337_v14 = vld [vmem:[%s19052_s0 + $0x20] sm:$0x1] }
  0x15   :  { %v470_v30 = vrot.slane %v469_v20, 4  ;;  %v2525_v33 = vshll.u32 %v11699_v18, 16  ;;  %v2518_v36 = vrot.slane %v2516_v26, 4  ;;  %v2521_v37 = vrot.slane %v2519_v27, 5  ;;  %s19070_s29 = smov 18   ;;  %s13587_s23 = smov 16  }
  0x16   :  { %3381 = vrot.lane.b32.xlu1 %v11795_v24, %s13579_s18  ;;  %v465_v35 = vsel %vm13722_vm5, %v460_v25, %v464_v12  ;;  %v2529_v38 = vshrl.u32 %v11699_v18, 16  ;;  %v3713_v41 = vsel %vm13677_vm2, %v3711_v32, %v3712_v22  ;;  %v2535_v43 = vshll.u32 %v11700_v23, 16  ;;  %v12083_v25 = vld [vmem:[%s19052_s0 + $0x1c] sm:$0xf]  ;;  %s13590_s17 = smov 48   ;;  %s13592_s19 = smov 96  }
  0x17   :  { %v475_v40 = vsel %vm13722_vm5, %v470_v30, %v474_v16  ;;  %v2527_v42 = vrot.slane %v2525_v33, 5  ;;  %v11955_v45 = vcombine.low %v3710_v31, %v3713_v41  ;;  %v2522_v47 = vor.u32 %v2521_v37, %v2518_v36  ;;  %v12082_v16 = vld [vmem:[%s19052_s0 + $0x18] sm:$0xf] }
  0x18   :  { %v11507_v44 = vcombine.low %v465_v35, %v475_v40  ;;  %v2531_v48 = vrot.slane %v2529_v38, 4  ;;  %v2537_v50 = vrot.slane %v2535_v43, 5  ;;  %v11922_v51 = vrot.slane %v11826_v28, 9  ;;  %v338_v35 = vld [vmem:[%s19052_s0 + $0x24] sm:$0xf]  ;;  %v13051_v37 = vld [vmem:[%s19052_s0 + $0x18] sm:$0xff]  }
  0x19   :  { %v3702_v52 = vrot.slane %v11827_v29, 5  ;;  %v3705_v53 = vrot.slane %v11828_v34, 5  ;;  %v2523_v54 = vrot.slane %v2522_v47, 4  ;;  %v4624_v58 = vshrl.u32 %v12085_v39, 16  ;;  %v12084_v29 = vld [vmem:[%s19052_s0 + $0x20] sm:$0x1] }
  0x1a   :  { %1294 = vrot.lane.b32.xlu0 %v11507_v44, %s13578_s27  ;;  %4022 = vrot.lane.b32.xlu1 %v11955_v45, %s13580_s24  ;;  %v2532_v55 = vor.u32 %v2531_v48, %v2527_v42  ;;  %v4627_v59 = vshll.u32 %v12085_v39, 16  ;;  %v4633_v62 = vshll.u32 %v12086_v49, 16  ;;  %v4637_v63 = vshrl.u32 %v12086_v49, 16  ;;  %v339_v45 = vld [vmem:[%s19052_s0 + $0x28] sm:$0xf] }
  0x1b   :  { %v3703_v60 = vsel %vm13677_vm2, %v11922_v51, %v3702_v52  ;;  %v3704_v61 = vrot.slane %v3702_v52, 4  ;;  %v2528_v1 = vsel %vm13722_vm5, %v2523_v54, %v2527_v42  ;;  %v4626_v3 = vrot.slane %v4624_v58, 4  ;;  %v340_v47 = vld [vmem:[%s19052_s0 + $0x2c] sm:$0x1]  ;;  %v12210_v52 = vld [vmem:[%s19052_s0 + $0x18] sm:$0xe] }
  0x1c   :  { %v2533_v2 = vrot.slane %v2532_v55, 4  ;;  %v4629_v4 = vrot.slane %v4627_v59, 5  ;;  %v4635_v6 = vrot.slane %v4633_v62, 5  ;;  %v4639_v7 = vrot.slane %v4637_v63, 4  ;;  %v13066_v62 = vld [vmem:[%s19053_s1] sm:$0xff]  }
  0x1d   :  { %v3706_v5 = vsel %vm13677_vm2, %v3704_v61, %v3705_v53  ;;  %v4643_v9 = vshll.u32 %v12087_v57, 16  ;;  %v477_v15 = vshrl.u32 %v335_v0, 16  ;;  %v480_v20 = vshll.u32 %v335_v0, 16  ;;  %v12211_v61 = vld [vmem:[%s19052_s0 + $0x1c] sm:$0xf]  ;;  %12886 = vmatprep.subr.bf16.mxu0 %v13066_v62 }
  0x1e   :  { %v2538_v11 = vsel %vm13722_vm5, %v2533_v2, %v2537_v50  ;;  %4376 = vrot.lane.b32.xlu1 %v13050_v56, %s13581_s16  ;;  %v11954_v12 = vcombine.low %v3703_v60, %v3706_v5  ;;  %v4630_v13 = vor.u32 %v4629_v4, %v4626_v3  ;;  %v4640_v18 = vor.u32 %v4639_v7, %v4635_v6  ;;  %v12212_v3 = vld [vmem:[%s19052_s0 + $0x20] sm:$0x1] }
  0x1f   :  { %v11794_v17 = vcombine.low %v2528_v1, %v2538_v11  ;;  %v4645_v19 = vrot.slane %v4643_v9, 5  ;;  %v479_v22 = vrot.slane %v477_v15, 4  ;;  %v486_v23 = vshll.u32 %v336_v10, 16  ;;  %v1430_v9 = vld [vmem:[%s19052_s0 + $0x24] sm:$0xe]  ;;  %12887 = vmatpush3.bf16.msra.mxu0 %v13066_v62 }
  0x20   :  { %v4631_v21 = vrot.slane %v4630_v13, 4  ;;  %v490_v24 = vshrl.u32 %v336_v10, 16  ;;  %v4641_v26 = vrot.slane %v4640_v18, 4  ;;  %v482_v27 = vrot.slane %v480_v20, 5  ;;  %v1431_v10 = vld [vmem:[%s19052_s0 + $0x28] sm:$0xf] }
  0x21   :  { %3379 = vrot.lane.b32.xlu0 %v11794_v17, %s13579_s18  ;;  %v496_v28 = vshll.u32 %v337_v14, 16  ;;  %v4600_v30 = vshrl.u32 %v12082_v16, 16  ;;  %v488_v32 = vrot.slane %v486_v23, 5  ;;  %v4603_v34 = vshll.u32 %v12082_v16, 16  ;;  %v1432_v15 = vld [vmem:[%s19052_s0 + $0x2c] sm:$0x1] }
  0x22   :  { %v4636_v31 = vsel %vm13722_vm5, %v4631_v21, %v4635_v6  ;;  %v492_v33 = vrot.slane %v490_v24, 4  ;;  %v4646_v36 = vsel %vm13722_vm5, %v4641_v26, %v4645_v19  ;;  %v483_v38 = vor.u32 %v482_v27, %v479_v22  ;;  %v12213_v16 = vld [vmem:[%s19052_s0 + $0x24] sm:$0xe]  ;;  %v12214_v21 = vld [vmem:[%s19052_s0 + $0x28] sm:$0xf] }
  0x23   :  { %v498_v39 = vrot.slane %v496_v28, 5  ;;  %v4602_v40 = vrot.slane %v4600_v30, 4  ;;  %v12179_v41 = vcombine.low %v4636_v31, %v4646_v36  ;;  %v4605_v43 = vrot.slane %v4603_v34, 5  ;;  %v12215_v22 = vld [vmem:[%s19052_s0 + $0x2c] sm:$0x1] }
  0x24   :  { %v493_v42 = vor.u32 %v492_v33, %v488_v32  ;;  %v4609_v44 = vshll.u32 %v12083_v25, 16  ;;  %v484_v48 = vrot.slane %v483_v38, 4  ;;  %v4613_v49 = vshrl.u32 %v12083_v25, 16  ;;  %v1427_v31 = vld [vmem:[%s19052_s0 + $0x18] sm:$0xe]  ;;  %v13068_v33 = vld [vmem:[%s19053_s1 + $0x8] sm:$0xff]  }
  0x25   :  { %4020 = vrot.lane.b32.xlu0 %v11954_v12, %s13580_s24  ;;  %v4619_v50 = vshll.u32 %v12084_v29, 16  ;;  %v501_v51 = vshrl.u32 %v338_v35, 16  ;;  %5465 = vrot.lane.b32.xlu1 %v12179_v41, %s13582_s25  ;;  %v4606_v54 = vor.u32 %v4605_v43, %v4602_v40  ;;  %v504_v56 = vshll.u32 %v338_v35, 16  ;;  %v1429_v38 = vld [vmem:[%s19052_s0 + $0x20] sm:$0x1] }
  0x26   :  { %v494_v53 = vrot.slane %v493_v42, 4  ;;  %v4611_v55 = vrot.slane %v4609_v44, 5  ;;  %v489_v57 = vsel %vm13722_vm5, %v484_v48, %v488_v32  ;;  %v4615_v58 = vrot.slane %v4613_v49, 4  ;;  %v1428_v32 = vld [vmem:[%s19052_s0 + $0x1c] sm:$0xf]  ;;  %12888 = vmatprep.subr.bf16.mxu0 %v13068_v33 }
  0x27   :  { %v4621_v59 = vrot.slane %v4619_v50, 5  ;;  %v503_v60 = vrot.slane %v501_v51, 4  ;;  %v4607_v0 = vrot.slane %v4606_v54, 4  ;;  %v506_v1 = vrot.slane %v504_v56, 5  ;;  %v11708_v44 = vld [vmem:[%s19052_s0 + $0x34] sm:$0xf]  ;;  %12889 = vmatpush3.bf16.msra.mxu0 %v13068_v33 }
  0x28   :  { %v499_v63 = vsel %vm13722_vm5, %v494_v53, %v498_v39  ;;  %v510_v2 = vshll.u32 %v339_v45, 16  ;;  %v4616_v5 = vor.u32 %v4615_v58, %v4611_v55  ;;  %v514_v6 = vshrl.u32 %v339_v45, 16  ;;  %v11707_v39 = vld [vmem:[%s19052_s0 + $0x30] sm:$0xf]  ;;  %v11709_v50 = vld [vmem:[%s19052_s0 + $0x38] sm:$0x1] }
  0x29   :  { %4374 = vrot.lane.b32.xlu0 %v13051_v37, %s13581_s16  ;;  %v11508_v4 = vcombine.low %v489_v57, %v499_v63  ;;  %v520_v7 = vshll.u32 %v340_v47, 16  ;;  %v4612_v11 = vsel %vm13722_vm5, %v4607_v0, %v4611_v55  ;;  %v507_v12 = vor.u32 %v506_v1, %v503_v60  ;;  %v13071_v51 = vld [vmem:[%s19053_s1 + $0x10] sm:$0xff]  }
  0x2a   :  { %v512_v13 = vrot.slane %v510_v2, 5  ;;  %v12306_v14 = vrot.slane %v12210_v52, 9  ;;  %v4617_v17 = vrot.slane %v4616_v5, 4  ;;  %v516_v18 = vrot.slane %v514_v6, 4  ;;  %v11835_v60 = vld [vmem:[%s19052_s0 + $0x30] sm:$0xe]  ;;  %12890 = vmatprep.subr.bf16.mxu0 %v13071_v51 }
  0x2b   :  { %1296 = vrot.lane.b32.xlu1 %v11508_v4, %s13578_s27  ;;  %v522_v19 = vrot.slane %v520_v7, 5  ;;  %v5786_v20 = vrot.slane %v12211_v61, 5  ;;  %v508_v23 = vrot.slane %v507_v12, 4  ;;  %v5789_v24 = vrot.slane %v12212_v3, 5  ;;  %v11836_v1 = vld [vmem:[%s19052_s0 + $0x34] sm:$0xf]  ;;  %12891 = vmatpush3.bf16.msra.mxu0 %v13071_v51 }
  0x2c   :  { %v11541_v25 = vrot.slane %v1430_v9, 9  ;;  %v1639_v26 = vrot.slane %v1431_v10, 5  ;;  %v4622_v27 = vsel %vm13722_vm5, %v4617_v17, %v4621_v59  ;;  %v517_v28 = vor.u32 %v516_v18, %v512_v13  ;;  %v13073_v2 = vld [vmem:[%s19053_s1 + $0x18] sm:$0xff]  }
  0x2d   :  { %v5787_v29 = vsel %vm13677_vm2, %v12306_v14, %v5786_v20  ;;  %v5788_v30 = vrot.slane %v5786_v20, 4  ;;  %v12178_v34 = vcombine.low %v4612_v11, %v4622_v27  ;;  %v513_v35 = vsel %vm13722_vm5, %v508_v23, %v512_v13  ;;  %v11837_v7 = vld [vmem:[%s19052_s0 + $0x38] sm:$0x1]  ;;  %v11704_v13 = vld [vmem:[%s19052_s0 + $0x24] sm:$0xf]  ;;  %12892 = vmatprep.subr.bf16.mxu0 %v13073_v2 }
  0x2e   :  { %v1640_v36 = vsel %vm13677_vm2, %v11541_v25, %v1639_v26  ;;  %v1641_v37 = vrot.slane %v1639_v26, 4  ;;  %v518_v40 = vrot.slane %v517_v28, 4  ;;  %v1642_v42 = vrot.slane %v1432_v15, 5  ;;  %v11705_v14 = vld [vmem:[%s19052_s0 + $0x28] sm:$0xf] }
  0x2f   :  { %v5790_v41 = vsel %vm13677_vm2, %v5788_v30, %v5789_v24  ;;  %v12307_v43 = vrot.slane %v12213_v16, 9  ;;  %5463 = vrot.lane.b32.xlu0 %v12178_v34, %s13582_s25  ;;  %v5793_v47 = vrot.slane %v12214_v21, 5  ;;  %v5796_v48 = vrot.slane %v12215_v22, 5  ;;  %v13052_v24 = vld [vmem:[%s19052_s0 + $0x30] sm:$0xff]   ;;  %v11706_v26 = vld [vmem:[%s19052_s0 + $0x2c] sm:$0x1]  ;;  %12893 = vmatpush3.bf16.msra.mxu0 %v13073_v2 }
  0x30   :  { %v12338_v45 = vcombine.low %v5787_v29, %v5790_v41  ;;  %v11540_v49 = vrot.slane %v1427_v31, 9  ;;  %v523_v52 = vsel %vm13722_vm5, %v518_v40, %v522_v19  ;;  %v1643_v53 = vsel %vm13677_vm2, %v1641_v37, %v1642_v42  ;;  %v13075_v19 = vld [vmem:[%s19053_s1 + $0x20] sm:$0xff]   ;;  %v341_v2 = vld [vmem:[%s19052_s0 + $0x30] sm:$0xf] }
  0x31   :  { %v1632_v54 = vrot.slane %v1428_v32, 5  ;;  %v1635_v55 = vrot.slane %v1429_v38, 5  ;;  %v11509_v56 = vcombine.low %v513_v35, %v523_v52  ;;  %v11573_v57 = vcombine.low %v1640_v36, %v1643_v53  ;;  %v11832_v34 = vld [vmem:[%s19052_s0 + $0x24] sm:$0xe]  ;;  %12894 = vmatprep.subr.bf16.mxu0 %v13075_v19  ;;  %v12092_v52 = vld [vmem:[%s19052_s0 + $0x40] sm:$0xf] }
  0x32   :  { %v5794_v58 = vsel %vm13677_vm2, %v12307_v43, %v5793_v47  ;;  %v5795_v59 = vrot.slane %v5793_v47, 4  ;;  %v2588_v63 = vshrl.u32 %v11707_v39, 16  ;;  %v2591_v0 = vshll.u32 %v11707_v39, 16  ;;  %v11833_v39 = vld [vmem:[%s19052_s0 + $0x28] sm:$0xf] }
  0x33   :  { %v1633_v61 = vsel %vm13677_vm2, %v11540_v49, %v1632_v54  ;;  %v1634_v62 = vrot.slane %v1632_v54, 4  ;;  %1298 = vrot.lane.b32.xlu1 %v11509_v56, %s13578_s27  ;;  %6104 = vrot.lane.b32.xlu0 %v12338_v45, %s13583_s13  ;;  %v2597_v4 = vshll.u32 %v11708_v44, 16  ;;  %v2601_v5 = vshrl.u32 %v11708_v44, 16  ;;  %v11834_v44 = vld [vmem:[%s19052_s0 + $0x2c] sm:$0x1] }
  0x34   :  { %v5797_v3 = vsel %vm13677_vm2, %v5795_v59, %v5796_v48  ;;  %v2607_v6 = vshll.u32 %v11709_v50, 16  ;;  %v2590_v11 = vrot.slane %v2588_v63, 4  ;;  %v2593_v12 = vrot.slane %v2591_v0, 5  ;;  %v12091_v45 = vld [vmem:[%s19052_s0 + $0x3c] sm:$0xf]  ;;  %v13053_v48 = vld [vmem:[%s19052_s0 + $0x24] sm:$0xff]   ;;  %12895 = vmatpush3.bf16.msra.mxu0 %v13075_v19 }
  0x35   :  { %v12339_v9 = vcombine.low %v5794_v58, %v5797_v3  ;;  %v1636_v10 = vsel %vm13677_vm2, %v1634_v62, %v1635_v55  ;;  %v2599_v16 = vrot.slane %v2597_v4, 5  ;;  %v2603_v17 = vrot.slane %v2601_v5, 4  ;;  %v12093_v59 = vld [vmem:[%s19052_s0 + $0x44] sm:$0x1]  ;;  %v12088_v19 = vld [vmem:[%s19052_s0 + $0x30] sm:$0xf] }
  0x36   :  { %v11572_v15 = vcombine.low %v1633_v61, %v1636_v10  ;;  %v2609_v18 = vrot.slane %v2607_v6, 5  ;;  %v2594_v20 = vor.u32 %v2593_v12, %v2590_v11  ;;  %v11925_v21 = vrot.slane %v11835_v60, 9 }
  0x37   :  { %v3723_v22 = vrot.slane %v11836_v1, 5  ;;  %v3726_v23 = vrot.slane %v11837_v7, 5  ;;  %1942 = vrot.lane.b32.xlu1 %v11573_v57, %s19064_s28  ;;  %6106 = vrot.lane.b32.xlu0 %v12339_v9, %s13583_s13  ;;  %v2604_v25 = vor.u32 %v2603_v17, %v2599_v16  ;;  %v2564_v27 = vshrl.u32 %v11704_v13, 16  ;;  %v342_v7 = vld [vmem:[%s19052_s0 + $0x34] sm:$0xf] }
  0x38   :  { %v2567_v28 = vshll.u32 %v11704_v13, 16  ;;  %v2573_v29 = vshll.u32 %v11705_v14, 16  ;;  %v2595_v30 = vrot.slane %v2594_v20, 4  ;;  %v2577_v33 = vshrl.u32 %v11705_v14, 16  ;;  %v343_v13 = vld [vmem:[%s19052_s0 + $0x38] sm:$0x1] }
  0x39   :  { %v13956_v31 = vsel %vm13677_vm2, %v11925_v21, %v3723_v22  ;;  %v3725_v32 = vrot.slane %v3723_v22, 4  ;;  %v2605_v35 = vrot.slane %v2604_v25, 4  ;;  %v2566_v36 = vrot.slane %v2564_v27, 4 }
  0x3a   :  { %v2569_v37 = vrot.slane %v2567_v28, 5  ;;  %v2575_v38 = vrot.slane %v2573_v29, 5  ;;  %v2600_v40 = vsel %vm13722_vm5, %v2595_v30, %v2599_v16  ;;  %v2579_v42 = vrot.slane %v2577_v33, 4  ;;  %v12090_v29 = vld [vmem:[%s19052_s0 + $0x38] sm:$0x1] }
  0x3b   :  { %v3727_v41 = vsel %vm13677_vm2, %v3725_v32, %v3726_v23  ;;  %v2583_v43 = vshll.u32 %v11706_v26, 16  ;;  %2296 = vrot.lane.b32.xlu1 %v13052_v24, %s13576_s21  ;;  %1940 = vrot.lane.b32.xlu0 %v11572_v15, %s19064_s28  ;;  %v2610_v47 = vsel %vm13722_vm5, %v2605_v35, %v2609_v18  ;;  %v11924_v51 = vrot.slane %v11832_v34, 9  ;;  %v13054_v15 = vld [vmem:[%s19052_s0 + $0x3c] sm:$0xff]   ;;  %v12089_v24 = vld [vmem:[%s19052_s0 + $0x34] sm:$0xf] }
  0x3c   :  { %v11957_v49 = vcombine.low %v13956_v31, %v3727_v41  ;;  %v2570_v50 = vor.u32 %v2569_v37, %v2566_v36  ;;  %v11797_v53 = vcombine.low %v2600_v40, %v2610_v47  ;;  %v2580_v54 = vor.u32 %v2579_v42, %v2575_v38  ;;  %v344_v42 = vld [vmem:[%s19052_s0 + $0x3c] sm:$0xf] }
  0x3d   :  { %v2585_v55 = vrot.slane %v2583_v43, 5  ;;  %v3716_v56 = vrot.slane %v11833_v39, 5  ;;  %v3719_v58 = vrot.slane %v11834_v44, 5  ;;  %v4672_v60 = vshrl.u32 %v12091_v45, 16  ;;  %v13055_v44 = vld [vmem:[%s19052_s0 + $0x30] sm:$0xff]  }
  0x3e   :  { %v2571_v57 = vrot.slane %v2570_v50, 4  ;;  %v4675_v61 = vshll.u32 %v12091_v45, 16  ;;  %v2581_v62 = vrot.slane %v2580_v54, 4  ;;  %v4681_v1 = vshll.u32 %v12092_v52, 16  ;;  %v346_v54 = vld [vmem:[%s19052_s0 + $0x44] sm:$0x1] }
  0x3f   :  { %v3717_v63 = vsel %vm13677_vm2, %v11924_v51, %v3716_v56  ;;  %v3718_v0 = vrot.slane %v3716_v56, 4  ;;  %3385 = vrot.lane.b32.xlu1 %v11797_v53, %s13579_s18  ;;  %2294 = vrot.lane.b32.xlu0 %v13053_v48, %s13576_s21  ;;  %v4674_v4 = vrot.slane %v4672_v60, 4  ;;  %v4685_v6 = vshrl.u32 %v12092_v52, 16  ;;  %v12217_v60 = vld [vmem:[%s19052_s0 + $0x34] sm:$0xf] }
  0x40   :  { %v2576_v3 = vsel %vm13722_vm5, %v2571_v57, %v2575_v38  ;;  %v4677_v5 = vrot.slane %v4675_v61, 5  ;;  %v2586_v9 = vsel %vm13722_vm5, %v2581_v62, %v2585_v55  ;;  %v4683_v11 = vrot.slane %v4681_v1, 5  ;;  %v12216_v55 = vld [vmem:[%s19052_s0 + $0x30] sm:$0xe]  ;;  %v12218_v1 = vld [vmem:[%s19052_s0 + $0x38] sm:$0x1] }
  0x41   :  { %v3720_v10 = vsel %vm13677_vm2, %v3718_v0, %v3719_v58  ;;  %v4691_v12 = vshll.u32 %v12093_v59, 16  ;;  %v11796_v14 = vcombine.low %v2576_v3, %v2586_v9  ;;  %v4687_v18 = vrot.slane %v4685_v6, 4  ;;  %v1436_v6 = vld [vmem:[%s19052_s0 + $0x3c] sm:$0xe] }
  0x42   :  { %v11956_v16 = vcombine.low %v3717_v63, %v3720_v10  ;;  %v4678_v17 = vor.u32 %v4677_v5, %v4674_v4  ;;  %v525_v21 = vshrl.u32 %v341_v2, 16  ;;  %v528_v22 = vshll.u32 %v341_v2, 16 }
  0x43   :  { %v4693_v20 = vrot.slane %v4691_v12, 5  ;;  %v534_v23 = vshll.u32 %v342_v7, 16  ;;  %4026 = vrot.lane.b32.xlu1 %v11957_v49, %s13580_s24  ;;  %3383 = vrot.lane.b32.xlu0 %v11796_v14, %s13579_s18  ;;  %v4688_v26 = vor.u32 %v4687_v18, %v4683_v11  ;;  %v538_v27 = vshrl.u32 %v342_v7, 16  ;;  %v345_v49 = vld [vmem:[%s19052_s0 + $0x40] sm:$0xf] }
  0x44   :  { %v4679_v25 = vrot.slane %v4678_v17, 4  ;;  %v544_v28 = vshll.u32 %v343_v13, 16  ;;  %v527_v30 = vrot.slane %v525_v21, 4  ;;  %v530_v31 = vrot.slane %v528_v22, 5  ;;  %v1437_v12 = vld [vmem:[%s19052_s0 + $0x40] sm:$0xf] }
  0x45   :  { %v536_v32 = vrot.slane %v534_v23, 5  ;;  %v4648_v33 = vshrl.u32 %v12088_v19, 16  ;;  %v4689_v35 = vrot.slane %v4688_v26, 4  ;;  %v540_v36 = vrot.slane %v538_v27, 4  ;;  %v1438_v17 = vld [vmem:[%s19052_s0 + $0x44] sm:$0x1] }
  0x46   :  { %v4684_v34 = vsel %vm13722_vm5, %v4679_v25, %v4683_v11  ;;  %v546_v37 = vrot.slane %v544_v28, 5  ;;  %v531_v38 = vor.u32 %v530_v31, %v527_v30  ;;  %v4651_v40 = vshll.u32 %v12088_v19, 16  ;;  %v12219_v22 = vld [vmem:[%s19052_s0 + $0x3c] sm:$0xe]  ;;  %v12220_v23 = vld [vmem:[%s19052_s0 + $0x40] sm:$0xf] }
  0x47   :  { %v4650_v39 = vrot.slane %v4648_v33, 4  ;;  %v4657_v41 = vshll.u32 %v12089_v24, 16  ;;  %4380 = vrot.lane.b32.xlu1 %v13054_v15, %s13581_s16  ;;  %4024 = vrot.lane.b32.xlu0 %v11956_v16, %s13580_s24  ;;  %v4694_v43 = vsel %vm13722_vm5, %v4689_v35, %v4693_v20  ;;  %v541_v45 = vor.u32 %v540_v36, %v536_v32  ;;  %v12221_v28 = vld [vmem:[%s19052_s0 + $0x44] sm:$0x1]  ;;  %v1433_v33 = vld [vmem:[%s19052_s0 + $0x30] sm:$0xe] }
  0x48   :  { %v4661_v47 = vshrl.u32 %v12089_v24, 16  ;;  %v4667_v48 = vshll.u32 %v12090_v29, 16  ;;  %v12181_v50 = vcombine.low %v4684_v34, %v4694_v43  ;;  %v532_v51 = vrot.slane %v531_v38, 4  ;;  %v1434_v38 = vld [vmem:[%s19052_s0 + $0x34] sm:$0xf] }
  0x49   :  { %v4653_v52 = vrot.slane %v4651_v40, 5  ;;  %v4659_v53 = vrot.slane %v4657_v41, 5  ;;  %v542_v56 = vrot.slane %v541_v45, 4  ;;  %v549_v59 = vshrl.u32 %v344_v42, 16  ;;  %v1435_v43 = vld [vmem:[%s19052_s0 + $0x38] sm:$0x1] }
  0x4a   :  { %v4663_v57 = vrot.slane %v4661_v47, 4  ;;  %v4669_v58 = vrot.slane %v4667_v48, 5  ;;  %v537_v61 = vsel %vm13722_vm5, %v532_v51, %v536_v32  ;;  %v552_v63 = vshll.u32 %v344_v42, 16  ;;  %v11715_v51 = vld [vmem:[%s19052_s0 + $0x50] sm:$0x1] }
  0x4b   :  { %v4654_v62 = vor.u32 %v4653_v52, %v4650_v39  ;;  %v558_v0 = vshll.u32 %v345_v49, 16  ;;  %5469 = vrot.lane.b32.xlu1 %v12181_v50, %s13582_s25  ;;  %4378 = vrot.lane.b32.xlu0 %v13055_v44, %s13581_s16  ;;  %v547_v2 = vsel %vm13722_vm5, %v542_v56, %v546_v37  ;;  %v551_v4 = vrot.slane %v549_v59, 4  ;;  %v11713_v44 = vld [vmem:[%s19052_s0 + $0x48] sm:$0xf]  ;;  %v11714_v50 = vld [vmem:[%s19052_s0 + $0x4c] sm:$0xf] }
  0x4c   :  { %v4664_v3 = vor.u32 %v4663_v57, %v4659_v53  ;;  %v562_v5 = vshrl.u32 %v345_v49, 16  ;;  %v11510_v7 = vcombine.low %v537_v61, %v547_v2  ;;  %v554_v10 = vrot.slane %v552_v63, 5  ;;  %v11843_v2 = vld [vmem:[%s19052_s0 + $0x50] sm:$0x1] }
  0x4d   :  { %v4655_v9 = vrot.slane %v4654_v62, 4  ;;  %v560_v11 = vrot.slane %v558_v0, 5  ;;  %v568_v15 = vshll.u32 %v346_v54, 16  ;;  %v12308_v16 = vrot.slane %v12216_v55, 9 }
  0x4e   :  { %v4665_v13 = vrot.slane %v4664_v3, 4  ;;  %v564_v14 = vrot.slane %v562_v5, 4  ;;  %v555_v19 = vor.u32 %v554_v10, %v551_v4  ;;  %v5800_v20 = vrot.slane %v12217_v60, 5  ;;  %v11841_v60 = vld [vmem:[%s19052_s0 + $0x48] sm:$0xe] }
  0x4f   :  { %v4660_v18 = vsel %vm13722_vm5, %v4655_v9, %v4659_v53  ;;  %v5803_v21 = vrot.slane %v12218_v1, 5  ;;  %1300 = vrot.lane.b32.xlu1 %v11510_v7, %s13578_s27  ;;  %v570_v26 = vrot.slane %v568_v15, 5  ;;  %v11543_v27 = vrot.slane %v1436_v6, 9  ;;  %v11842_v1 = vld [vmem:[%s19052_s0 + $0x4c] sm:$0xf] }
  0x50   :  { %v4670_v24 = vsel %vm13722_vm5, %v4665_v13, %v4669_v58  ;;  %v565_v25 = vor.u32 %v564_v14, %v560_v11  ;;  %v556_v30 = vrot.slane %v555_v19, 4  ;;  %v5801_v31 = vsel %vm13677_vm2, %v12308_v16, %v5800_v20  ;;  %v13056_v13 = vld [vmem:[%s19052_s0 + $0x48] sm:$0xff]  }
  0x51   :  { %v12180_v29 = vcombine.low %v4660_v18, %v4670_v24  ;;  %v5802_v32 = vrot.slane %v5800_v20, 4  ;;  %v1653_v35 = vrot.slane %v1437_v12, 5  ;;  %v1656_v36 = vrot.slane %v1438_v17, 5  ;;  %v11710_v12 = vld [vmem:[%s19052_s0 + $0x3c] sm:$0xf] }
  0x52   :  { %v566_v34 = vrot.slane %v565_v25, 4  ;;  %v12309_v37 = vrot.slane %v12219_v22, 9  ;;  %v561_v39 = vsel %vm13722_vm5, %v556_v30, %v560_v11  ;;  %v5807_v41 = vrot.slane %v12220_v23, 5  ;;  %v11711_v18 = vld [vmem:[%s19052_s0 + $0x40] sm:$0xf] }
  0x53   :  { %5467 = vrot.lane.b32.xlu0 %v12180_v29, %s13582_s25  ;;  %v5804_v40 = vsel %vm13677_vm2, %v5802_v32, %v5803_v21  ;;  %v5810_v42 = vrot.slane %v12221_v28, 5  ;;  %v1654_v48 = vsel %vm13677_vm2, %v11543_v27, %v1653_v35  ;;  %v1655_v49 = vrot.slane %v1653_v35, 4  ;;  %v11712_v23 = vld [vmem:[%s19052_s0 + $0x44] sm:$0x1]  ;;  %v11838_v24 = vld [vmem:[%s19052_s0 + $0x3c] sm:$0xe] }
  0x54   :  { %v571_v45 = vsel %vm13722_vm5, %v566_v34, %v570_v26  ;;  %v12340_v47 = vcombine.low %v5801_v31, %v5804_v40  ;;  %v5808_v53 = vsel %vm13677_vm2, %v12309_v37, %v5807_v41  ;;  %v5809_v54 = vrot.slane %v5807_v41, 4  ;;  %v11839_v29 = vld [vmem:[%s19052_s0 + $0x40] sm:$0xf]  ;;  %v11840_v34 = vld [vmem:[%s19052_s0 + $0x44] sm:$0x1] }
  0x55   :  { %v11511_v52 = vcombine.low %v561_v39, %v571_v45  ;;  %v11542_v55 = vrot.slane %v1433_v33, 9  ;;  %v1657_v56 = vsel %vm13677_vm2, %v1655_v49, %v1656_v36  ;;  %v1646_v57 = vrot.slane %v1434_v38, 5  ;;  %v12097_v39 = vld [vmem:[%s19052_s0 + $0x54] sm:$0xf] }
  0x56   :  { %v1649_v58 = vrot.slane %v1435_v43, 5  ;;  %v2636_v59 = vshrl.u32 %v11713_v44, 16  ;;  %v11575_v61 = vcombine.low %v1654_v48, %v1657_v56  ;;  %v5811_v62 = vsel %vm13677_vm2, %v5809_v54, %v5810_v42  ;;  %v13057_v42 = vld [vmem:[%s19052_s0 + $0x3c] sm:$0xff]  }
  0x57   :  { %1302 = vrot.lane.b32.xlu1 %v11511_v52, %s13578_s27  ;;  %6108 = vrot.lane.b32.xlu0 %v12340_v47, %s13583_s13  ;;  %v2639_v63 = vshll.u32 %v11713_v44, 16  ;;  %v2645_v0 = vshll.u32 %v11714_v50, 16  ;;  %v12341_v3 = vcombine.low %v5808_v53, %v5811_v62  ;;  %v1647_v4 = vsel %vm13677_vm2, %v11542_v55, %v1646_v57 }
  0x58   :  { %v1648_v5 = vrot.slane %v1646_v57, 4  ;;  %v2638_v6 = vrot.slane %v2636_v59, 4  ;;  %v2649_v10 = vshrl.u32 %v11714_v50, 16  ;;  %v2655_v11 = vshll.u32 %v11715_v51, 16  ;;  %v12098_v50 = vld [vmem:[%s19052_s0 + $0x58] sm:$0xf] }
  0x59   :  { %v2641_v7 = vrot.slane %v2639_v63, 5  ;;  %v2647_v9 = vrot.slane %v2645_v0, 5  ;;  %v11927_v15 = vrot.slane %v11841_v60, 9  ;;  %v3737_v16 = vrot.slane %v11842_v1, 5  ;;  %v347_v60 = vld [vmem:[%s19052_s0 + $0x48] sm:$0xf] }
  0x5a   :  { %v1650_v14 = vsel %vm13677_vm2, %v1648_v5, %v1649_v58  ;;  %v3740_v17 = vrot.slane %v11843_v2, 5  ;;  %v2651_v21 = vrot.slane %v2649_v10, 4  ;;  %v2657_v22 = vrot.slane %v2655_v11, 5  ;;  %v12099_v58 = vld [vmem:[%s19052_s0 + $0x5c] sm:$0x1] }
  0x5b   :  { %1946 = vrot.lane.b32.xlu1 %v11575_v61, %s19064_s28  ;;  %6110 = vrot.lane.b32.xlu0 %v12341_v3, %s13583_s13  ;;  %v11574_v19 = vcombine.low %v1647_v4, %v1650_v14  ;;  %v2642_v20 = vor.u32 %v2641_v7, %v2638_v6  ;;  %v14146_v25 = vsel %vm13677_vm2, %v11927_v15, %v3737_v16  ;;  %v3739_v26 = vrot.slane %v3737_v16, 4  ;;  %v349_v16 = vld [vmem:[%s19052_s0 + $0x50] sm:$0x1] }
  0x5c   :  { %v2612_v27 = vshrl.u32 %v11710_v12, 16  ;;  %v2615_v28 = vshll.u32 %v11710_v12, 16  ;;  %v2652_v31 = vor.u32 %v2651_v21, %v2647_v9  ;;  %v2621_v32 = vshll.u32 %v11711_v18, 16  ;;  %v13058_v12 = vld [vmem:[%s19052_s0 + $0x54] sm:$0xff]  }
  0x5d   :  { %v2643_v30 = vrot.slane %v2642_v20, 4  ;;  %v2625_v33 = vshrl.u32 %v11711_v18, 16  ;;  %v3741_v35 = vsel %vm13677_vm2, %v3739_v26, %v3740_v17  ;;  %v2631_v38 = vshll.u32 %v11712_v23, 16  ;;  %v12094_v17 = vld [vmem:[%s19052_s0 + $0x48] sm:$0xf] }
  0x5e   :  { %v2614_v36 = vrot.slane %v2612_v27, 4  ;;  %v2617_v37 = vrot.slane %v2615_v28, 5  ;;  %v2653_v41 = vrot.slane %v2652_v31, 4  ;;  %v11959_v43 = vcombine.low %v14146_v25, %v3741_v35  ;;  %v12096_v27 = vld [vmem:[%s19052_s0 + $0x50] sm:$0x1] }
  0x5f   :  { %2300 = vrot.lane.b32.xlu1 %v13056_v13, %s13576_s21  ;;  %1944 = vrot.lane.b32.xlu0 %v11574_v19, %s19064_s28  ;;  %v2648_v40 = vsel %vm13722_vm5, %v2643_v30, %v2647_v9  ;;  %v2623_v44 = vrot.slane %v2621_v32, 5  ;;  %v2627_v47 = vrot.slane %v2625_v33, 4  ;;  %v2633_v48 = vrot.slane %v2631_v38, 5  ;;  %v348_v9 = vld [vmem:[%s19052_s0 + $0x4c] sm:$0xf] }
  0x60   :  { %v2618_v45 = vor.u32 %v2617_v37, %v2614_v36  ;;  %v11926_v49 = vrot.slane %v11838_v24, 9  ;;  %v2658_v51 = vsel %vm13722_vm5, %v2653_v41, %v2657_v22  ;;  %v3730_v52 = vrot.slane %v11839_v29, 5  ;;  %v12095_v22 = vld [vmem:[%s19052_s0 + $0x4c] sm:$0xf]  ;;  %v350_v32 = vld [vmem:[%s19052_s0 + $0x54] sm:$0xf] }
  0x61   :  { %v3733_v53 = vrot.slane %v11840_v34, 5  ;;  %v4720_v54 = vshrl.u32 %v12097_v39, 16  ;;  %v11799_v55 = vcombine.low %v2648_v40, %v2658_v51  ;;  %v2628_v57 = vor.u32 %v2627_v47, %v2623_v44  ;;  %v351_v47 = vld [vmem:[%s19052_s0 + $0x58] sm:$0xf] }
  0x62   :  { %v2619_v56 = vrot.slane %v2618_v45, 4  ;;  %v4723_v59 = vshll.u32 %v12097_v39, 16  ;;  %v3731_v61 = vsel %vm13677_vm2, %v11926_v49, %v3730_v52  ;;  %v3732_v62 = vrot.slane %v3730_v52, 4  ;;  %v352_v52 = vld [vmem:[%s19052_s0 + $0x5c] sm:$0x1] }
  0x63   :  { %2298 = vrot.lane.b32.xlu0 %v13057_v42, %s13576_s21  ;;  %v4722_v63 = vrot.slane %v4720_v54, 4  ;;  %v4729_v0 = vshll.u32 %v12098_v50, 16  ;;  %3389 = vrot.lane.b32.xlu1 %v11799_v55, %s13579_s18  ;;  %v2629_v2 = vrot.slane %v2628_v57, 4  ;;  %v4733_v4 = vshrl.u32 %v12098_v50, 16  ;;  %v13059_v42 = vld [vmem:[%s19052_s0 + $0x48] sm:$0xff]  }
  0x64   :  { %v2624_v1 = vsel %vm13722_vm5, %v2619_v56, %v2623_v44  ;;  %v4725_v3 = vrot.slane %v4723_v59, 5  ;;  %v3734_v5 = vsel %vm13677_vm2, %v3732_v62, %v3733_v53  ;;  %v4739_v7 = vshll.u32 %v12099_v58, 16  ;;  %v12222_v53 = vld [vmem:[%s19052_s0 + $0x48] sm:$0xe]  ;;  %v12223_v58 = vld [vmem:[%s19052_s0 + $0x4c] sm:$0xf] }
  0x65   :  { %v4731_v6 = vrot.slane %v4729_v0, 5  ;;  %v573_v10 = vshrl.u32 %v347_v60, 16  ;;  %v2634_v11 = vsel %vm13722_vm5, %v2629_v2, %v2633_v48  ;;  %v11958_v13 = vcombine.low %v3731_v61, %v3734_v5  ;;  %v12224_v59 = vld [vmem:[%s19052_s0 + $0x50] sm:$0x1]  ;;  %v1442_v0 = vld [vmem:[%s19052_s0 + $0x54] sm:$0xe] }
  0x66   :  { %v4726_v14 = vor.u32 %v4725_v3, %v4722_v63  ;;  %v4735_v15 = vrot.slane %v4733_v4, 4  ;;  %v11798_v18 = vcombine.low %v2624_v1, %v2634_v11  ;;  %v4741_v19 = vrot.slane %v4739_v7, 5  ;;  %v1444_v11 = vld [vmem:[%s19052_s0 + $0x5c] sm:$0x1] }
  0x67   :  { %v575_v20 = vrot.slane %v573_v10, 4  ;;  %v576_v21 = vshll.u32 %v347_v60, 16  ;;  %4030 = vrot.lane.b32.xlu1 %v11959_v43, %s13580_s24  ;;  %v582_v25 = vshll.u32 %v348_v9, 16  ;;  %v586_v26 = vshrl.u32 %v348_v9, 16  ;;  %v1443_v10 = vld [vmem:[%s19052_s0 + $0x58] sm:$0xf] }
  0x68   :  { %v4727_v23 = vrot.slane %v4726_v14, 4  ;;  %v4736_v24 = vor.u32 %v4735_v15, %v4731_v6  ;;  %3387 = vrot.lane.b32.xlu0 %v11798_v18, %s13579_s18  ;;  %v592_v29 = vshll.u32 %v349_v16, 16  ;;  %v4696_v30 = vshrl.u32 %v12094_v17, 16  ;;  %v12225_v16 = vld [vmem:[%s19052_s0 + $0x54] sm:$0xe] }
  0x69   :  { %v578_v28 = vrot.slane %v576_v21, 5  ;;  %v4699_v31 = vshll.u32 %v12094_v17, 16  ;;  %v584_v35 = vrot.slane %v582_v25, 5  ;;  %v588_v36 = vrot.slane %v586_v26, 4  ;;  %v12226_v17 = vld [vmem:[%s19052_s0 + $0x58] sm:$0xf] }
  0x6a   :  { %v4732_v33 = vsel %vm13722_vm5, %v4727_v23, %v4731_v6  ;;  %v4737_v34 = vrot.slane %v4736_v24, 4  ;;  %v594_v38 = vrot.slane %v592_v29, 5  ;;  %v4698_v39 = vrot.slane %v4696_v30, 4 }
  0x6b   :  { %v579_v37 = vor.u32 %v578_v28, %v575_v20  ;;  %v4701_v40 = vrot.slane %v4699_v31, 5  ;;  %4384 = vrot.lane.b32.xlu1 %v13058_v12, %s13581_s16  ;;  %v589_v43 = vor.u32 %v588_v36, %v584_v35  ;;  %v4705_v44 = vshll.u32 %v12095_v22, 16 }
  0x6c   :  { %v4742_v41 = vsel %vm13722_vm5, %v4737_v34, %v4741_v19  ;;  %v4709_v45 = vshrl.u32 %v12095_v22, 16  ;;  %4028 = vrot.lane.b32.xlu0 %v11958_v13, %s13580_s24  ;;  %v4715_v51 = vshll.u32 %v12096_v27, 16  ;;  %v597_v57 = vshrl.u32 %v350_v32, 16  ;;  %v12227_v22 = vld [vmem:[%s19052_s0 + $0x5c] sm:$0x1] }
  0x6d   :  { %v12183_v48 = vcombine.low %v4732_v33, %v4742_v41  ;;  %v580_v49 = vrot.slane %v579_v37, 4  ;;  %v4702_v50 = vor.u32 %v4701_v40, %v4698_v39  ;;  %v590_v54 = vrot.slane %v589_v43, 4  ;;  %v1439_v27 = vld [vmem:[%s19052_s0 + $0x48] sm:$0xe]  ;;  %v1441_v33 = vld [vmem:[%s19052_s0 + $0x50] sm:$0x1] }
  0x6e   :  { %v4707_v55 = vrot.slane %v4705_v44, 5  ;;  %v4711_v56 = vrot.slane %v4709_v45, 4  ;;  %v4717_v62 = vrot.slane %v4715_v51, 5  ;;  %v600_v63 = vshll.u32 %v350_v32, 16  ;;  %v1440_v32 = vld [vmem:[%s19052_s0 + $0x4c] sm:$0xf] }
  0x6f   :  { %v585_v60 = vsel %vm13722_vm5, %v580_v49, %v584_v35  ;;  %v4703_v61 = vrot.slane %v4702_v50, 4  ;;  %5473 = vrot.lane.b32.xlu1 %v12183_v48, %s13582_s25  ;;  %v595_v1 = vsel %vm13722_vm5, %v590_v54, %v594_v38  ;;  %v599_v3 = vrot.slane %v597_v57, 4  ;;  %v11719_v38 = vld [vmem:[%s19052_s0 + $0x60] sm:$0xf]  ;;  %v11720_v49 = vld [vmem:[%s19052_s0 + $0x64] sm:$0xf] }
  0x70   :  { %v4712_v2 = vor.u32 %v4711_v56, %v4707_v55  ;;  %v606_v4 = vshll.u32 %v351_v47, 16  ;;  %4382 = vrot.lane.b32.xlu0 %v13059_v42, %s13581_s16  ;;  %v11512_v5 = vcombine.low %v585_v60, %v595_v1  ;;  %v602_v7 = vrot.slane %v600_v63, 5  ;;  %v11721_v54 = vld [vmem:[%s19052_s0 + $0x68] sm:$0x1]  ;;  %v11848_v60 = vld [vmem:[%s19052_s0 + $0x64] sm:$0xf] }
  0x71   :  { %v4708_v6 = vsel %vm13722_vm5, %v4703_v61, %v4707_v55  ;;  %v610_v9 = vshrl.u32 %v351_v47, 16  ;;  %v616_v14 = vshll.u32 %v352_v52, 16  ;;  %v12310_v15 = vrot.slane %v12222_v53, 9  ;;  %v11847_v55 = vld [vmem:[%s19052_s0 + $0x60] sm:$0xe] }
  0x72   :  { %v4713_v12 = vrot.slane %v4712_v2, 4  ;;  %v608_v13 = vrot.slane %v606_v4, 5  ;;  %v603_v18 = vor.u32 %v602_v7, %v599_v3  ;;  %v5814_v20 = vrot.slane %v12223_v58, 5  ;;  %v11849_v61 = vld [vmem:[%s19052_s0 + $0x68] sm:$0x1] }
  0x73   :  { %v612_v19 = vrot.slane %v610_v9, 4  ;;  %v5817_v21 = vrot.slane %v12224_v59, 5  ;;  %1304 = vrot.lane.b32.xlu1 %v11512_v5, %s13578_s27  ;;  %v618_v24 = vrot.slane %v616_v14, 5  ;;  %v11545_v25 = vrot.slane %v1442_v0, 9  ;;  %v11716_v2 = vld [vmem:[%s19052_s0 + $0x54] sm:$0xf] }
  0x74   :  { %v4718_v23 = vsel %vm13722_vm5, %v4713_v12, %v4717_v62  ;;  %v1667_v26 = vrot.slane %v1443_v10, 5  ;;  %v604_v29 = vrot.slane %v603_v18, 4  ;;  %v5815_v31 = vsel %vm13677_vm2, %v12310_v15, %v5814_v20  ;;  %v14280_v39 = vpop.permute.xlu1 %2292  ;;  %v13060_v18 = vld [vmem:[%s19052_s0 + $0x60] sm:$0xff]  }
  0x75   :  { %v12182_v28 = vcombine.low %v4708_v6, %v4718_v23  ;;  %v613_v30 = vor.u32 %v612_v19, %v608_v13  ;;  %v5816_v34 = vrot.slane %v5814_v20, 4  ;;  %v1670_v37 = vrot.slane %v1444_v11, 5 }
  0x76   :  { %v1668_v35 = vsel %vm13677_vm2, %v11545_v25, %v1667_v26  ;;  %v1669_v36 = vrot.slane %v1667_v26, 4  ;;  %v609_v40 = vsel %vm13722_vm5, %v604_v29, %v608_v13  ;;  %v12311_v42 = vrot.slane %v12225_v16, 9  ;;  %v11717_v13 = vld [vmem:[%s19052_s0 + $0x58] sm:$0xf] }
  0x77   :  { %5471 = vrot.lane.b32.xlu0 %v12182_v28, %s13582_s25  ;;  %v614_v41 = vrot.slane %v613_v30, 4  ;;  %v5821_v43 = vrot.slane %v12226_v17, 5  ;;  %v5818_v44 = vsel %vm13677_vm2, %v5816_v34, %v5817_v21  ;;  %v5824_v47 = vrot.slane %v12227_v22, 5  ;;  %v14332_v28 = vpop.permute.xlu0 %2290  ;;  %v13061_v30 = vld [vmem:[%s19052_s0 + $0x54] sm:$0xff]  }
  0x78   :  { %v1671_v45 = vsel %vm13677_vm2, %v1669_v36, %v1670_v37  ;;  %v11544_v48 = vrot.slane %v1439_v27, 9  ;;  %v12342_v51 = vcombine.low %v5815_v31, %v5818_v44  ;;  %v1660_v58 = vrot.slane %v1440_v32, 5  ;;  %v11844_v34 = vld [vmem:[%s19052_s0 + $0x54] sm:$0xe] }
  0x79   :  { %v619_v50 = vsel %vm13722_vm5, %v614_v41, %v618_v24  ;;  %v11577_v52 = vcombine.low %v1668_v35, %v1671_v45  ;;  %v5822_v53 = vsel %vm13677_vm2, %v12311_v42, %v5821_v43  ;;  %v5823_v57 = vrot.slane %v5821_v43, 4  ;;  %v11718_v24 = vld [vmem:[%s19052_s0 + $0x5c] sm:$0x1] }
  0x7a   :  { %v11513_v56 = vcombine.low %v609_v40, %v619_v50  ;;  %v1663_v59 = vrot.slane %v1441_v33, 5  ;;  %v2684_v62 = vshrl.u32 %v11719_v38, 16  ;;  %v2687_v63 = vshll.u32 %v11719_v38, 16  ;;  %v11845_v40 = vld [vmem:[%s19052_s0 + $0x58] sm:$0xf] }
  0x7b   :  { %6112 = vrot.lane.b32.xlu0 %v12342_v51, %s13583_s13  ;;  %v2693_v0 = vshll.u32 %v11720_v49, 16  ;;  %v2697_v1 = vshrl.u32 %v11720_v49, 16  ;;  %v5825_v3 = vsel %vm13677_vm2, %v5823_v57, %v5824_v47  ;;  %v1661_v4 = vsel %vm13677_vm2, %v11544_v48, %v1660_v58  ;;  %v11846_v47 = vld [vmem:[%s19052_s0 + $0x5c] sm:$0x1]  ;;  %v12103_v48 = vld [vmem:[%s19052_s0 + $0x6c] sm:$0xf] }
  0x7c   :  { %1306 = vrot.lane.b32.xlu1 %v11513_v56, %s13578_s27  ;;  %v1662_v5 = vrot.slane %v1660_v58, 4  ;;  %v2703_v6 = vshll.u32 %v11721_v54, 16  ;;  %v14317_v7 = vpop.permute.xlu1 %1936  ;;  %v12343_v9 = vcombine.low %v5822_v53, %v5825_v3  ;;  %v2686_v10 = vrot.slane %v2684_v62, 4  ;;  %v12104_v53 = vld [vmem:[%s19052_s0 + $0x70] sm:$0xf]  ;;  %v13072_v3 = vld [vmem:[%s19052_s0 + $0x24] sm:$0xff]  }
  0x7d   :  { %v2689_v11 = vrot.slane %v2687_v63, 5  ;;  %v2695_v12 = vrot.slane %v2693_v0, 5  ;;  %v2699_v15 = vrot.slane %v2697_v1, 4  ;;  %v11929_v17 = vrot.slane %v11847_v55, 9  ;;  %v12105_v58 = vld [vmem:[%s19052_s0 + $0x74] sm:$0x1] }
  0x7e   :  { %v1664_v14 = vsel %vm13677_vm2, %v1662_v5, %v1663_v59  ;;  %v2705_v16 = vrot.slane %v2703_v6, 5  ;;  %v3751_v21 = vrot.slane %v11848_v60, 5  ;;  %v3754_v22 = vrot.slane %v11849_v61, 5  ;;  %v13064_v0 = vld [vmem:[%s19052_s0] sm:$0xff]   ;;  %v13065_v1 = vld [vmem:[%s19052_s0 + $0xc] sm:$0xff]  }
  0x7f   :  { %6114 = vrot.lane.b32.xlu0 %v12343_v9, %s13583_s13  ;;  %v11576_v19 = vcombine.low %v1661_v4, %v1664_v14  ;;  %v2690_v20 = vor.u32 %v2689_v11, %v2686_v10  ;;  %v2700_v23 = vor.u32 %v2699_v15, %v2695_v12  ;;  %v2660_v25 = vshrl.u32 %v11716_v2, 16  ;;  %v13080_v4 = vld [vmem:[%s19052_s0 + $0x30] sm:$0xff]   ;;  %v13081_v5 = vld [vmem:[%s19052_s0 + $0x3c] sm:$0xff]   ;;  %v13086_v6 = vld [vmem:[%s19052_s0 + $0x48] sm:$0xff]  }
  0x80   :  { %1950 = vrot.lane.b32.xlu1 %v11577_v52, %s19064_s28  ;;  %v2663_v26 = vshll.u32 %v11716_v2, 16  ;;  %v2669_v27 = vshll.u32 %v11717_v13, 16  ;;  %v14339_v31 = vsel %vm13677_vm2, %v11929_v17, %v3751_v21  ;;  %v3753_v32 = vrot.slane %v3751_v21, 4  ;;  %v14347_v41 = vpop.permute.xlu1 %1938  ;;  %v13070_v2 = vld [vmem:[%s19052_s0 + $0x18] sm:$0xff]   ;;  %v353_v14 = vld [vmem:[%s19052_s0 + $0x60] sm:$0xf] }
  0x81   :  { %v2691_v29 = vrot.slane %v2690_v20, 4  ;;  %v2673_v33 = vshrl.u32 %v11717_v13, 16  ;;  %v2701_v35 = vrot.slane %v2700_v23, 4  ;;  %v2662_v36 = vrot.slane %v2660_v25, 4  ;;  %v13087_v9 = vld [vmem:[%s19052_s0 + $0x54] sm:$0xff]  }
  0x82   :  { %v2665_v37 = vrot.slane %v2663_v26, 5  ;;  %v2671_v38 = vrot.slane %v2669_v27, 5  ;;  %v3755_v43 = vsel %vm13677_vm2, %v3753_v32, %v3754_v22  ;;  %v2679_v45 = vshll.u32 %v11718_v24, 16  ;;  %v354_v24 = vld [vmem:[%s19052_s0 + $0x64] sm:$0xf]  ;;  %v13062_v27 = vld [vmem:[%s19052_s0 + $0x6c] sm:$0xff]  }
  0x83   :  { %1948 = vrot.lane.b32.xlu0 %v11576_v19, %s19064_s28  ;;  %v2696_v42 = vsel %vm13722_vm5, %v2691_v29, %v2695_v12  ;;  %v2675_v44 = vrot.slane %v2673_v33, 4  ;;  %v2706_v49 = vsel %vm13722_vm5, %v2701_v35, %v2705_v16  ;;  %v11961_v50 = vcombine.low %v14339_v31, %v3755_v43  ;;  %v355_v25 = vld [vmem:[%s19052_s0 + $0x68] sm:$0x1]  ;;  %v12100_v32 = vld [vmem:[%s19052_s0 + $0x60] sm:$0xf] }
  0x84   :  { %2304 = vrot.lane.b32.xlu1 %v13060_v18, %s13576_s21  ;;  %v2666_v51 = vor.u32 %v2665_v37, %v2662_v36  ;;  %v11928_v52 = vrot.slane %v11844_v34, 9  ;;  %v11801_v54 = vcombine.low %v2696_v42, %v2706_v49  ;;  %v2681_v56 = vrot.slane %v2679_v45, 5  ;;  %v1293_v63 = vpop.permute.xlu0 %1292 }
  0x85   :  { %v2676_v55 = vor.u32 %v2675_v44, %v2671_v38  ;;  %v3744_v57 = vrot.slane %v11845_v40, 5  ;;  %v3747_v60 = vrot.slane %v11846_v47, 5  ;;  %v4768_v61 = vshrl.u32 %v12103_v48, 16  ;;  %v12102_v47 = vld [vmem:[%s19052_s0 + $0x68] sm:$0x1] }
  0x86   :  { %v2667_v59 = vrot.slane %v2666_v51, 4  ;;  %v4771_v62 = vshll.u32 %v12103_v48, 16  ;;  %v4777_v13 = vshll.u32 %v12104_v53, 16  ;;  %v4781_v18 = vshrl.u32 %v12104_v53, 16  ;;  %v13063_v51 = vld [vmem:[%s19052_s0 + $0x60] sm:$0xff]  }
  0x87   :  { %2302 = vrot.lane.b32.xlu0 %v13061_v30, %s13576_s21  ;;  %v2677_v10 = vrot.slane %v2676_v55, 4  ;;  %v14397_v11 = vsel %vm13677_vm2, %v11928_v52, %v3744_v57  ;;  %v3746_v12 = vrot.slane %v3744_v57, 4  ;;  %v4770_v16 = vrot.slane %v4768_v61, 4 }
  0x88   :  { %3393 = vrot.lane.b32.xlu1 %v11801_v54, %s13579_s18  ;;  %v2672_v15 = vsel %vm13722_vm5, %v2667_v59, %v2671_v38  ;;  %v4773_v17 = vrot.slane %v4771_v62, 5  ;;  %v14405_v19 = vpop.permute.xlu1 %3381  ;;  %v4779_v22 = vrot.slane %v4777_v13, 5  ;;  %v4787_v23 = vshll.u32 %v12105_v58, 16  ;;  %v12101_v38 = vld [vmem:[%s19052_s0 + $0x64] sm:$0xf] }
  0x89   :  { %v2682_v20 = vsel %vm13722_vm5, %v2677_v10, %v2681_v56  ;;  %v3748_v21 = vsel %vm13677_vm2, %v3746_v12, %v3747_v60  ;;  %v4783_v31 = vrot.slane %v4781_v18, 4  ;;  %vm1388_vm6 = vcmask 146504   ;;  %v356_v54 = vld [vmem:[%s19052_s0 + $0x6c] sm:$0xf]  ;;  %v357_v59 = vld [vmem:[%s19052_s0 + $0x70] sm:$0xf] }
  0x8a   :  { %v11800_v26 = vcombine.low %v2672_v15, %v2682_v20  ;;  %v11960_v29 = vcombine.low %v14397_v11, %v3748_v21  ;;  %v4774_v30 = vor.u32 %v4773_v17, %v4770_v16  ;;  %v4789_v33 = vrot.slane %v4787_v23, 5  ;;  %v358_v12 = vld [vmem:[%s19052_s0 + $0x74] sm:$0x1]  ;;  %v12228_v20 = vld [vmem:[%s19052_s0 + $0x60] sm:$0xe] }
  0x8b   :  { %vm2032_vm7 = vcmask 220304   ;;  %vm296_vm8 = vcmask 72704   ;;  %v4784_v35 = vor.u32 %v4783_v31, %v4779_v22  ;;  %v621_v36 = vshrl.u32 %v353_v14, 16 }
  0x8c   :  { %4034 = vrot.lane.b32.xlu1 %v11961_v50, %s13580_s24  ;;  %3391 = vrot.lane.b32.xlu0 %v11800_v26, %s13579_s18  ;;  %v4775_v34 = vrot.slane %v4774_v30, 4  ;;  %297 = vst.msk [vmem:[#allocation2] sm:$0xff] %vm296_vm8, %v13064_v0  ;;  %v624_v37 = vshll.u32 %v353_v14, 16  ;;  %v1295_v40 = vpop.permute.xlu0 %1294  ;;  %298 = vst.msk [vmem:[#allocation2 + $0x8] sm:$0xff] %vm296_vm8, %v13065_v1  ;;  %v14431_v42 = vpop.permute.xlu1 %4022  ;;  %v630_v43 = vshll.u32 %v354_v24, 16  ;;  %v634_v44 = vshrl.u32 %v354_v24, 16 }
  0x8d   :  { %299 = vst.msk [vmem:[#allocation2 + $0x10] sm:$0xff] %vm296_vm8, %v13070_v2  ;;  %300 = vst.msk [vmem:[#allocation2 + $0x18] sm:$0xff] %vm296_vm8, %v13072_v3  ;;  %v640_v45 = vshll.u32 %v355_v25, 16  ;;  %v4744_v48 = vshrl.u32 %v12100_v32, 16  ;;  %v4785_v50 = vrot.slane %v4784_v35, 4  ;;  %v623_v52 = vrot.slane %v621_v36, 4 }
  0x8e   :  { %301 = vst.msk [vmem:[#allocation2 + $0x20] sm:$0xff] %vm296_vm8, %v13080_v4  ;;  %302 = vst.msk [vmem:[#allocation2 + $0x28] sm:$0xff] %vm296_vm8, %v13081_v5  ;;  %v4780_v49 = vsel %vm13722_vm5, %v4775_v34, %v4779_v22  ;;  %v626_v53 = vrot.slane %v624_v37, 5  ;;  %v632_v55 = vrot.slane %v630_v43, 5  ;;  %v636_v56 = vrot.slane %v634_v44, 4 }
  0x8f   :  { %303 = vst.msk [vmem:[#allocation2 + $0x30] sm:$0xff] %vm296_vm8, %v13086_v6  ;;  %304 = vst.msk [vmem:[#allocation2 + $0x38] sm:$0xff] %vm296_vm8, %v13087_v9  ;;  %v642_v57 = vrot.slane %v640_v45, 5  ;;  %v4746_v58 = vrot.slane %v4744_v48, 4  ;;  %v4747_v60 = vshll.u32 %v12100_v32, 16  ;;  %v4753_v61 = vshll.u32 %v12101_v38, 16 }
  0x90   :  { %1389 = vst.msk [vmem:[#allocation2] sm:$0xff] %vm1388_vm6, %v1293_v63  ;;  %1390 = vst.msk [vmem:[#allocation2 + $0x8] sm:$0xff] %vm1388_vm6, %v1295_v40  ;;  %4388 = vrot.lane.b32.xlu1 %v13062_v27, %s13581_s16  ;;  %4032 = vrot.lane.b32.xlu0 %v11960_v29, %s13580_s24  ;;  %v637_v63 = vor.u32 %v636_v56, %v632_v55  ;;  %v4757_v0 = vshrl.u32 %v12101_v38, 16  ;;  %v4763_v1 = vshll.u32 %v12102_v47, 16  ;;  %v645_v5 = vshrl.u32 %v356_v54, 16  ;;  %v14463_v6 = vpop.permute.xlu1 %4376 }
  0x91   :  { %2033 = vst.msk [vmem:[#allocation2] sm:$0xff] %vm2032_vm7, %v14317_v7  ;;  %2034 = vst.msk [vmem:[#allocation2 + $0x8] sm:$0xff] %vm2032_vm7, %v14347_v41  ;;  %v4790_v7 = vsel %vm13722_vm5, %v4785_v50, %v4789_v33  ;;  %v627_v41 = vor.u32 %v626_v53, %v623_v52  ;;  %v4749_v3 = vrot.slane %v4747_v60, 5  ;;  %v4755_v4 = vrot.slane %v4753_v61, 5  ;;  %v12229_v25 = vld [vmem:[%s19052_s0 + $0x64] sm:$0xf] }
  0x92   :  { %v12185_v62 = vcombine.low %v4780_v49, %v4790_v7  ;;  %v638_v9 = vrot.slane %v637_v63, 4  ;;  %v4759_v10 = vrot.slane %v4757_v0, 4  ;;  %v4765_v11 = vrot.slane %v4763_v1, 5  ;;  %v12230_v26 = vld [vmem:[%s19052_s0 + $0x68] sm:$0x1]  ;;  %v13092_v1 = vld [vmem:[%s19052_s0 + $0x60] sm:$0xff]  }
  0x93   :  { %v628_v2 = vrot.slane %v627_v41, 4  ;;  %v648_v13 = vshll.u32 %v356_v54, 16  ;;  %v3380_v14 = vpop.permute.xlu0 %3379  ;;  %v4750_v16 = vor.u32 %v4749_v3, %v4746_v58  ;;  %v647_v17 = vrot.slane %v645_v5, 4  ;;  %v1448_v32 = vld [vmem:[%s19052_s0 + $0x6c] sm:$0xe]  ;;  %305 = vst.msk [vmem:[#allocation2 + $0x40] sm:$0xff] %vm296_vm8, %v13092_v1 }
  0x94   :  { %5477 = vrot.lane.b32.xlu1 %v12185_v62, %s13582_s25  ;;  %4386 = vrot.lane.b32.xlu0 %v13063_v51, %s13581_s16  ;;  %v654_v18 = vshll.u32 %v357_v59, 16  ;;  %v643_v21 = vsel %vm13722_vm5, %v638_v9, %v642_v57  ;;  %v4760_v22 = vor.u32 %v4759_v10, %v4755_v4  ;;  %v658_v24 = vshrl.u32 %v357_v59, 16  ;;  %v1449_v37 = vld [vmem:[%s19052_s0 + $0x70] sm:$0xf]  ;;  %v14492_v38 = vld [vmem:[%s19052_s0 + $0x74] sm:$0x1] }
  0x95   :  { %v633_v15 = vsel %vm13722_vm5, %v628_v2, %v632_v55  ;;  %v650_v23 = vrot.slane %v648_v13, 5  ;;  %v4751_v29 = vrot.slane %v4750_v16, 4  ;;  %v664_v31 = vshll.u32 %v358_v12, 16  ;;  %v12231_v40 = vld [vmem:[%s19052_s0 + $0x6c] sm:$0xe] }
  0x96   :  { %v11514_v27 = vcombine.low %v633_v15, %v643_v21  ;;  %v656_v30 = vrot.slane %v654_v18, 5  ;;  %v4761_v33 = vrot.slane %v4760_v22, 4  ;;  %v660_v35 = vrot.slane %v658_v24, 4  ;;  %v12232_v49 = vld [vmem:[%s19052_s0 + $0x70] sm:$0xf] }
  0x97   :  { %v651_v34 = vor.u32 %v650_v23, %v647_v17  ;;  %v12312_v36 = vrot.slane %v12228_v20, 9  ;;  %v4021_v43 = vpop.permute.xlu0 %4020  ;;  %v4756_v44 = vsel %vm13722_vm5, %v4751_v29, %v4755_v4  ;;  %v666_v45 = vrot.slane %v664_v31, 5  ;;  %v14506_v50 = vld [vmem:[%s19052_s0 + $0x74] sm:$0x1]  ;;  %v14508_v51 = vpop.permute.xlu1 %5465  ;;  %v1445_v58 = vld [vmem:[%s19052_s0 + $0x60] sm:$0xe] }
  0x98   :  { %1308 = vrot.lane.b32.xlu1 %v11514_v27, %s13578_s27  ;;  %v5828_v47 = vrot.slane %v12229_v25, 5  ;;  %v5831_v48 = vrot.slane %v12230_v26, 5  ;;  %v4766_v52 = vsel %vm13722_vm5, %v4761_v33, %v4765_v11  ;;  %v661_v54 = vor.u32 %v660_v35, %v656_v30  ;;  %v1446_v59 = vld [vmem:[%s19052_s0 + $0x64] sm:$0xf]  ;;  %v11725_v0 = vld [vmem:[%s19052_s0 + $0x78] sm:$0xf] }
  0x99   :  { %v652_v53 = vrot.slane %v651_v34, 4  ;;  %vm2386_vm9 = vcmask 294104   ;;  %v12184_v55 = vcombine.low %v4756_v44, %v4766_v52  ;;  %vm3475_vm10 = vcmask 367904   ;;  %v11726_v5 = vld [vmem:[%s19052_s0 + $0x7c] sm:$0xf]  ;;  %v13093_v25 = vld [vmem:[%s19052_s0 + $0x6c] sm:$0xff]  }
  0x9a   :  { %v5829_v56 = vsel %vm13677_vm2, %v12312_v36, %v5828_v47  ;;  %v5830_v57 = vrot.slane %v5828_v47, 4  ;;  %2388 = vst.msk [vmem:[#allocation2 + $0x8] sm:$0xff] %vm2386_vm9, %v14280_v39  ;;  %2387 = vst.msk [vmem:[#allocation2] sm:$0xff] %vm2386_vm9, %v14332_v28  ;;  %v662_v41 = vrot.slane %v661_v54, 4  ;;  %vm4116_vm11 = vcmask 441704   ;;  %v13067_v36 = vld [vmem:[%s19052_s0 + $0x78] sm:$0xff]  }
  0x9b   :  { %v657_v7 = vsel %vm13722_vm5, %v652_v53, %v656_v30  ;;  %3477 = vst.msk [vmem:[#allocation2 + $0x8] sm:$0xff] %vm3475_vm10, %v14405_v19  ;;  %3476 = vst.msk [vmem:[#allocation2] sm:$0xff] %vm3475_vm10, %v3380_v14  ;;  %v11547_v39 = vrot.slane %v1448_v32, 9  ;;  %v1447_v28 = vld [vmem:[%s19052_s0 + $0x68] sm:$0x1]  ;;  %5475 = vrot.lane.b32.xlu0 %v12184_v55, %s13582_s25  ;;  %v1681_v61 = vrot.slane %v1449_v37, 5  ;;  %v4375_v19 = vpop.permute.xlu0 %4374 }
  0x9c   :  { %v5832_v60 = vsel %vm13677_vm2, %v5830_v57, %v5831_v48  ;;  %4118 = vst.msk [vmem:[#allocation2 + $0x8] sm:$0xff] %vm4116_vm11, %v14431_v42  ;;  %v1684_v62 = vrot.slane %v14492_v38, 5  ;;  %v12313_v63 = vrot.slane %v12231_v40, 9  ;;  %4117 = vst.msk [vmem:[#allocation2] sm:$0xff] %vm4116_vm11, %v4021_v43  ;;  %v667_v2 = vsel %vm13722_vm5, %v662_v41, %v666_v45  ;;  %v11727_v13 = vld [vmem:[%s19052_s0 + $0x80] sm:$0x1] }
  0x9d   :  { %v12344_v3 = vcombine.low %v5829_v56, %v5832_v60  ;;  %v5835_v42 = vrot.slane %v12232_v49, 5  ;;  %v5838_v4 = vrot.slane %v14506_v50, 5  ;;  %v1297_v9 = vpop.permute.xlu1 %1296  ;;  %v11515_v10 = vcombine.low %v657_v7, %v667_v2  ;;  %v11853_v14 = vld [vmem:[%s19052_s0 + $0x78] sm:$0xe]  ;;  %v11854_v20 = vld [vmem:[%s19052_s0 + $0x7c] sm:$0xf] }
  0x9e   :  { %v1682_v11 = vsel %vm13677_vm2, %v11547_v39, %v1681_v61  ;;  %v1683_v12 = vrot.slane %v1681_v61, 4  ;;  %vm4470_vm12 = vcmask 515504   ;;  %1391 = vst.msk [vmem:[#allocation2 + $0x10] sm:$0xff] %vm1388_vm6, %v1297_v9  ;;  %v11546_v17 = vrot.slane %v1445_v58, 9  ;;  %v11722_v24 = vld [vmem:[%s19052_s0 + $0x6c] sm:$0xf] }
  0x9f   :  { %v5836_v15 = vsel %vm13677_vm2, %v12313_v63, %v5835_v42  ;;  %v5837_v16 = vrot.slane %v5835_v42, 4  ;;  %4472 = vst.msk [vmem:[#allocation2 + $0x8] sm:$0xff] %vm4470_vm12, %v14463_v6  ;;  %v1674_v18 = vrot.slane %v1446_v59, 5  ;;  %4471 = vst.msk [vmem:[#allocation2] sm:$0xff] %vm4470_vm12, %v4375_v19  ;;  %1310 = vrot.lane.b32.xlu1 %v11515_v10, %s13578_s27  ;;  %6116 = vrot.lane.b32.xlu0 %v12344_v3, %s13583_s13  ;;  %v1677_v22 = vrot.slane %v1447_v28, 5  ;;  %v13069_v28 = vld [vmem:[%s19052_s0 + $0x6c] sm:$0xff]  }
  0xa0   :  { %v1685_v21 = vsel %vm13677_vm2, %v1683_v12, %v1684_v62  ;;  %vm5559_vm13 = vcmask 589304   ;;  %v2732_v23 = vshrl.u32 %v11725_v0, 16  ;;  %v11855_v6 = vld [vmem:[%s19052_s0 + $0x80] sm:$0x1]  ;;  %v2735_v33 = vshll.u32 %v11725_v0, 16  ;;  %306 = vst.msk [vmem:[#allocation2 + $0x48] sm:$0xff] %vm296_vm8, %v13093_v25 }
  0xa1   :  { %v11579_v26 = vcombine.low %v1682_v11, %v1685_v21  ;;  %v5839_v27 = vsel %vm13677_vm2, %v5837_v16, %v5838_v4  ;;  %v1675_v29 = vsel %vm13677_vm2, %v11546_v17, %v1674_v18  ;;  %v1676_v30 = vrot.slane %v1674_v18, 4  ;;  %5561 = vst.msk [vmem:[#allocation2 + $0x8] sm:$0xff] %vm5559_vm13, %v14508_v51  ;;  %v5464_v35 = vpop.permute.xlu0 %5463  ;;  %v11723_v49 = vld [vmem:[%s19052_s0 + $0x70] sm:$0xf]  ;;  %v11724_v53 = vld [vmem:[%s19052_s0 + $0x74] sm:$0x1] }
  0xa2   :  { %v12345_v31 = vcombine.low %v5836_v15, %v5839_v27  ;;  %v2734_v32 = vrot.slane %v2732_v23, 4  ;;  %v2741_v34 = vshll.u32 %v11726_v5, 16  ;;  %v2745_v38 = vshrl.u32 %v11726_v5, 16  ;;  %5560 = vst.msk [vmem:[#allocation2] sm:$0xff] %vm5559_vm13, %v5464_v35  ;;  %v11850_v41 = vld [vmem:[%s19052_s0 + $0x6c] sm:$0xe] }
  0xa3   :  { %v1678_v37 = vsel %vm13677_vm2, %v1676_v30, %v1677_v22  ;;  %v2751_v40 = vshll.u32 %v11727_v13, 16  ;;  %v11931_v43 = vrot.slane %v11853_v14, 9  ;;  %1954 = vrot.lane.b32.xlu1 %v11579_v26, %s19070_s29  ;;  %v2737_v45 = vrot.slane %v2735_v33, 5  ;;  %v11851_v63 = vld [vmem:[%s19052_s0 + $0x70] sm:$0xf] }
  0xa4   :  { %6118 = vrot.lane.b32.xlu0 %v12345_v31, %s13583_s13  ;;  %v11578_v44 = vcombine.low %v1675_v29, %v1678_v37  ;;  %v2743_v47 = vrot.slane %v2741_v34, 5  ;;  %v3765_v48 = vrot.slane %v11854_v20, 5  ;;  %v2747_v50 = vrot.slane %v2745_v38, 4  ;;  %v11852_v3 = vld [vmem:[%s19052_s0 + $0x74] sm:$0x1] }
  0xa5   :  { %v2753_v51 = vrot.slane %v2751_v40, 5  ;;  %v3768_v52 = vrot.slane %v11855_v6, 5  ;;  %v2708_v54 = vshrl.u32 %v11722_v24, 16  ;;  %v2738_v55 = vor.u32 %v2737_v45, %v2734_v32  ;;  %v1299_v59 = vpop.permute.xlu1 %1298  ;;  %v6105_v7 = vpop.permute.xlu0 %6104  ;;  %v12109_v10 = vld [vmem:[%s19052_s0 + $0x84] sm:$0xf] }
  0xa6   :  { %v14605_v56 = vsel %vm13677_vm2, %v11931_v43, %v3765_v48  ;;  %v3767_v57 = vrot.slane %v3765_v48, 4  ;;  %v2711_v58 = vshll.u32 %v11722_v24, 16  ;;  %v2748_v39 = vor.u32 %v2747_v50, %v2743_v47  ;;  %1392 = vst.msk [vmem:[#allocation2 + $0x18] sm:$0xff] %vm1388_vm6, %v1299_v59  ;;  %v12110_v21 = vld [vmem:[%s19052_s0 + $0x88] sm:$0xf] }
  0xa7   :  { %v2710_v60 = vrot.slane %v2708_v54, 4  ;;  %v2717_v61 = vshll.u32 %v11723_v49, 16  ;;  %v2721_v62 = vshrl.u32 %v11723_v49, 16  ;;  %2308 = vrot.lane.b32.xlu1 %v13067_v36, %s13576_s21  ;;  %v2739_v19 = vrot.slane %v2738_v55, 4  ;;  %v12111_v24 = vld [vmem:[%s19052_s0 + $0x8c] sm:$0x1] }
  0xa8   :  { %1952 = vrot.lane.b32.xlu0 %v11578_v44, %s19070_s29  ;;  %v3769_v0 = vsel %vm13677_vm2, %v3767_v57, %v3768_v52  ;;  %v2713_v1 = vrot.slane %v2711_v58, 5  ;;  %v2727_v2 = vshll.u32 %v11724_v53, 16  ;;  %v2749_v42 = vrot.slane %v2748_v39, 4  ;;  %v13077_v31 = vld [vmem:[%s19053_s1 + $0x28] ss:$0 sps:$4 sm:$0x11]  }
  0xa9   :  { %v11963_v4 = vcombine.low %v14605_v56, %v3769_v0  ;;  %v2719_v5 = vrot.slane %v2717_v61, 5  ;;  %v2723_v9 = vrot.slane %v2721_v62, 4  ;;  %v2744_v11 = vsel %vm13722_vm5, %v2739_v19, %v2743_v47  ;;  %v1943_v14 = vpop.permute.xlu1 %1942  ;;  %v6107_v15 = vpop.permute.xlu0 %6106  ;;  %v359_v45 = vld [vmem:[%s19052_s0 + $0x78] sm:$0xf]  ;;  %v360_v47 = vld [vmem:[%s19052_s0 + $0x7c] sm:$0xf] }
  0xaa   :  { %v2714_v12 = vor.u32 %v2713_v1, %v2710_v60  ;;  %v2729_v13 = vrot.slane %v2727_v2, 5  ;;  %vm6200_vm14 = vcmask 663104   ;;  %v2754_v16 = vsel %vm13722_vm5, %v2749_v42, %v2753_v51  ;;  %2036 = vst.msk [vmem:[#allocation2 + $0x18] sm:$0xff] %vm2032_vm7, %v1943_v14  ;;  %v361_v52 = vld [vmem:[%s19052_s0 + $0x80] sm:$0x1]  ;;  %v13074_v56 = vld [vmem:[%s19052_s0 + $0x84] sm:$0xff]  }
  0xab   :  { %v2724_v17 = vor.u32 %v2723_v9, %v2719_v5  ;;  %6201 = vst.msk [vmem:[#allocation2] sm:$0xff] %vm6200_vm14, %v6105_v7  ;;  %v11930_v18 = vrot.slane %v11850_v41, 9  ;;  %v3758_v20 = vrot.slane %v11851_v63, 5  ;;  %6202 = vst.msk [vmem:[#allocation2 + $0x8] sm:$0xff] %vm6200_vm14, %v6107_v15  ;;  %v11803_v22 = vcombine.low %v2744_v11, %v2754_v16  ;;  %v12106_v53 = vld [vmem:[%s19052_s0 + $0x78] sm:$0xf] }
  0xac   :  { %2306 = vrot.lane.b32.xlu0 %v13069_v28, %s13576_s21  ;;  %v2715_v23 = vrot.slane %v2714_v12, 4  ;;  %v3761_v6 = vrot.slane %v11852_v3, 5  ;;  %v4816_v25 = vshrl.u32 %v12109_v10, 16  ;;  %v4819_v30 = vshll.u32 %v12109_v10, 16  ;;  %v13076_v0 = vld [vmem:[%s19052_s0 + $0x78] sm:$0xff]  }
  0xad   :  { %v2725_v26 = vrot.slane %v2724_v17, 4  ;;  %v3759_v27 = vsel %vm13677_vm2, %v11930_v18, %v3758_v20  ;;  %v3760_v29 = vrot.slane %v3758_v20, 4  ;;  %3397 = vrot.lane.b32.xlu1 %v11803_v22, %s13579_s18  ;;  %v4825_v34 = vshll.u32 %v12110_v21, 16  ;;  %v2297_v36 = vpop.permute.xlu1 %2296  ;;  %v1941_v37 = vpop.permute.xlu0 %1940  ;;  %v12107_v42 = vld [vmem:[%s19052_s0 + $0x7c] sm:$0xf] }
  0xae   :  { %v2720_v32 = vsel %vm13722_vm5, %v2715_v23, %v2719_v5  ;;  %v4818_v33 = vrot.slane %v4816_v25, 4  ;;  %v4829_v35 = vshrl.u32 %v12110_v21, 16  ;;  %v4821_v43 = vrot.slane %v4819_v30, 5  ;;  %2390 = vst.msk [vmem:[#allocation2 + $0x18] sm:$0xff] %vm2386_vm9, %v2297_v36  ;;  %v12108_v10 = vld [vmem:[%s19052_s0 + $0x80] sm:$0x1] }
  0xaf   :  { %v2730_v38 = vsel %vm13722_vm5, %v2725_v26, %v2729_v13  ;;  %v3762_v40 = vsel %vm13677_vm2, %v3760_v29, %v3761_v6  ;;  %v4835_v44 = vshll.u32 %v12111_v24, 16  ;;  %2035 = vst.msk [vmem:[#allocation2 + $0x10] sm:$0xff] %vm2032_vm7, %v1941_v37  ;;  %v4827_v50 = vrot.slane %v4825_v34, 5  ;;  %v362_v16 = vld [vmem:[%s19052_s0 + $0x84] sm:$0xf] }
  0xb0   :  { %v11802_v48 = vcombine.low %v2720_v32, %v2730_v38  ;;  %v11962_v49 = vcombine.low %v3759_v27, %v3762_v40  ;;  %v4831_v51 = vrot.slane %v4829_v35, 4  ;;  %v4822_v54 = vor.u32 %v4821_v43, %v4818_v33  ;;  %v363_v6 = vld [vmem:[%s19052_s0 + $0x88] sm:$0xf]  ;;  %v364_v30 = vld [vmem:[%s19052_s0 + $0x8c] sm:$0x1] }
  0xb1   :  { %v4837_v55 = vrot.slane %v4835_v44, 5  ;;  %vm6413_vm15 = vcmask 1040384   ;;  %4038 = vrot.lane.b32.xlu1 %v11963_v4, %s13580_s24  ;;  %v13584_v58 = vmov 0   ;;  %vm6316_vm0 = vcmask 662528   ;;  %v3386_v39 = vpop.permute.xlu1 %3385  ;;  %v2295_v28 = vpop.permute.xlu0 %2294  ;;  %v12234_v35 = vld [vmem:[%s19052_s0 + $0x78] sm:$0xe] }
  0xb2   :  { %3395 = vrot.lane.b32.xlu0 %v11802_v48, %s13579_s18  ;;  %v4832_v57 = vor.u32 %v4831_v51, %v4827_v50  ;;  %v6415_v59 = vsel %vm6413_vm15, 65535, %v13584_v58  ;;  %v6233_v7 = vld [vmem:[#allocation2] sm:$0xff]  ;;  %v669_v41 = vshrl.u32 %v359_v45, 16  ;;  %v4823_v60 = vrot.slane %v4822_v54, 4  ;;  %3479 = vst.msk [vmem:[#allocation2 + $0x18] sm:$0xff] %vm3475_vm10, %v3386_v39  ;;  %7802 = vmatprep.subr.bf16.mxu1 %v13584_v58  ;;  %v6234_v29 = vld [vmem:[#allocation2 + $0x8] sm:$0xff] }
  0xb3   :  { %v6417_v61 = vand.u32 %v13077_v31, %v6415_v59  ;;  %12898 = vmatprep.mubr.msk.bf16.mxu0 %vm6316_vm0, %v6233_v7  ;;  %v672_v62 = vshll.u32 %v359_v45, 16  ;;  %v678_v63 = vshll.u32 %v360_v47, 16  ;;  %2389 = vst.msk [vmem:[#allocation2 + $0x10] sm:$0xff] %vm2386_vm9, %v2295_v28  ;;  %v682_v2 = vshrl.u32 %v360_v47, 16  ;;  %v12235_v43 = vld [vmem:[%s19052_s0 + $0x7c] sm:$0xf] }
  0xb4   :  { %v4833_v19 = vrot.slane %v4832_v57, 4  ;;  %v671_v1 = vrot.slane %v669_v41, 4  ;;  %v688_v3 = vshll.u32 %v361_v52, 16  ;;  %v4828_v4 = vsel %vm13722_vm5, %v4823_v60, %v4827_v50  ;;  %v12236_v44 = vld [vmem:[%s19052_s0 + $0x80] sm:$0x1] }
  0xb5   :  { %12896 = vmatprep.subr.bf16.mxu0 %v6417_v61  ;;  %v674_v5 = vrot.slane %v672_v62, 5  ;;  %v680_v9 = vrot.slane %v678_v63, 5  ;;  %v4792_v11 = vshrl.u32 %v12106_v53, 16  ;;  %4392 = vrot.lane.b32.xlu1 %v13074_v56, %s13581_s16  ;;  %v684_v13 = vrot.slane %v682_v2, 4  ;;  %v4027_v17 = vpop.permute.xlu1 %4026  ;;  %v3384_v18 = vpop.permute.xlu0 %3383  ;;  %v1454_v56 = vld [vmem:[%s19052_s0 + $0x84] sm:$0xe] }
  0xb6   :  { %4036 = vrot.lane.b32.xlu0 %v11962_v49, %s13580_s24  ;;  %v4838_v12 = vsel %vm13722_vm5, %v4833_v19, %v4837_v55  ;;  %v690_v14 = vrot.slane %v688_v3, 5  ;;  %v4795_v15 = vshll.u32 %v12106_v53, 16  ;;  %12897 = vmatpush3.bf16.msra.mxu0 %v6417_v61  ;;  %v4801_v23 = vshll.u32 %v12107_v42, 16  ;;  %4120 = vst.msk [vmem:[#allocation2 + $0x18] sm:$0xff] %vm4116_vm11, %v4027_v17  ;;  %v1455_v39 = vld [vmem:[%s19052_s0 + $0x88] sm:$0xf] }
  0xb7   :  { %v12187_v20 = vcombine.low %v4828_v4, %v4838_v12  ;;  %v675_v21 = vor.u32 %v674_v5, %v671_v1  ;;  %v4794_v22 = vrot.slane %v4792_v11, 4  ;;  %3478 = vst.msk [vmem:[#allocation2 + $0x10] sm:$0xff] %vm3475_vm10, %v3384_v18  ;;  %v685_v24 = vor.u32 %v684_v13, %v680_v9  ;;  %v1456_v28 = vld [vmem:[%s19052_s0 + $0x8c] sm:$0x1]  ;;  %v12237_v19 = vld [vmem:[%s19052_s0 + $0x84] sm:$0xe] }
  0xb8   :  { %v4797_v25 = vrot.slane %v4795_v15, 5  ;;  %v4805_v26 = vshrl.u32 %v12107_v42, 16  ;;  %v4811_v27 = vshll.u32 %v12108_v10, 16  ;;  %v4803_v32 = vrot.slane %v4801_v23, 5 }
  0xb9   :  { %v676_v31 = vrot.slane %v675_v21, 4  ;;  %v693_v33 = vshrl.u32 %v362_v16, 16  ;;  %v696_v34 = vshll.u32 %v362_v16, 16  ;;  %5481 = vrot.lane.b32.xlu1 %v12187_v20, %s13582_s25  ;;  %v686_v36 = vrot.slane %v685_v24, 4  ;;  %v4381_v45 = vpop.permute.xlu1 %4380  ;;  %v4025_v47 = vpop.permute.xlu0 %4024  ;;  %12899 = vmatmul.mubr.msk.bf16.vlgmr.msra.gmra.mrb[0].mxu0 %vm6316_vm0, %v6234_v29  ;;  %v1452_v20 = vld [vmem:[%s19052_s0 + $0x7c] sm:$0xf] }
  0xba   :  { %4390 = vrot.lane.b32.xlu0 %v13076_v0, %s13581_s16  ;;  %v4798_v37 = vor.u32 %v4797_v25, %v4794_v22  ;;  %v4807_v38 = vrot.slane %v4805_v26, 4  ;;  %v4813_v40 = vrot.slane %v4811_v27, 5  ;;  %v702_v51 = vshll.u32 %v363_v6, 16  ;;  %4474 = vst.msk [vmem:[#allocation2 + $0x18] sm:$0xff] %vm4470_vm12, %v4381_v45  ;;  %v12238_v0 = vld [vmem:[%s19052_s0 + $0x88] sm:$0xf] }
  0xbb   :  { %v681_v48 = vsel %vm13722_vm5, %v676_v31, %v680_v9  ;;  %v695_v49 = vrot.slane %v693_v33, 4  ;;  %v698_v50 = vrot.slane %v696_v34, 5  ;;  %4119 = vst.msk [vmem:[#allocation2 + $0x10] sm:$0xff] %vm4116_vm11, %v4025_v47  ;;  %v691_v52 = vsel %vm13722_vm5, %v686_v36, %v690_v14  ;;  %v12239_v9 = vld [vmem:[%s19052_s0 + $0x8c] sm:$0x1]  ;;  %v13098_v22 = vld [vmem:[%s19052_s0 + $0x78] sm:$0xff]  }
  0xbc   :  { %v4799_v53 = vrot.slane %v4798_v37, 4  ;;  %v4808_v54 = vor.u32 %v4807_v38, %v4803_v32  ;;  %v706_v55 = vshrl.u32 %v363_v6, 16  ;;  %v11516_v57 = vcombine.low %v681_v48, %v691_v52  ;;  %v1451_v14 = vld [vmem:[%s19052_s0 + $0x78] sm:$0xe]  ;;  %v1453_v21 = vld [vmem:[%s19052_s0 + $0x80] sm:$0x1] }
  0xbd   :  { %v699_v59 = vor.u32 %v698_v50, %v695_v49  ;;  %v704_v7 = vrot.slane %v702_v51, 5  ;;  %v712_v41 = vshll.u32 %v364_v30, 16  ;;  %v12314_v63 = vrot.slane %v12234_v35, 9  ;;  %v5470_v1 = vpop.permute.xlu1 %5469  ;;  %v4379_v2 = vpop.permute.xlu0 %4378  ;;  %307 = vst.msk [vmem:[#allocation2 + $0x50] sm:$0xff] %vm296_vm8, %v13098_v22  ;;  %v11732_v37 = vld [vmem:[%s19052_s0 + $0x94] sm:$0xf] }
  0xbe   :  { %v4804_v60 = vsel %vm13722_vm5, %v4799_v53, %v4803_v32  ;;  %v4809_v61 = vrot.slane %v4808_v54, 4  ;;  %v708_v62 = vrot.slane %v706_v55, 4  ;;  %1312 = vrot.lane.b32.xlu1 %v11516_v57, %s13578_s27  ;;  %v5842_v4 = vrot.slane %v12235_v43, 5  ;;  %5563 = vst.msk [vmem:[#allocation2 + $0x18] sm:$0xff] %vm5559_vm13, %v5470_v1  ;;  %v11731_v32 = vld [vmem:[%s19052_s0 + $0x90] sm:$0xf] }
  0xbf   :  { %v700_v3 = vrot.slane %v699_v59, 4  ;;  %v714_v42 = vrot.slane %v712_v41, 5  ;;  %v5845_v5 = vrot.slane %v12236_v44, 5  ;;  %4473 = vst.msk [vmem:[#allocation2 + $0x10] sm:$0xff] %vm4470_vm12, %v4379_v2  ;;  %v11549_v12 = vrot.slane %v1454_v56, 9 }
  0xc0   :  { %v4814_v10 = vsel %vm13722_vm5, %v4809_v61, %v4813_v40  ;;  %v709_v11 = vor.u32 %v708_v62, %v704_v7  ;;  %v1695_v13 = vrot.slane %v1455_v39, 5  ;;  %v5843_v17 = vsel %vm13677_vm2, %v12314_v63, %v5842_v4  ;;  %v11733_v38 = vld [vmem:[%s19052_s0 + $0x98] sm:$0x1]  ;;  %v13099_v40 = vld [vmem:[%s19052_s0 + $0x84] sm:$0xff]   ;;  %v11859_v49 = vld [vmem:[%s19052_s0 + $0x90] sm:$0xe] }
  0xc1   :  { %v12186_v15 = vcombine.low %v4804_v60, %v4814_v10  ;;  %v705_v16 = vsel %vm13722_vm5, %v700_v3, %v704_v7  ;;  %v5844_v18 = vrot.slane %v5842_v4, 4  ;;  %v1698_v25 = vrot.slane %v1456_v28, 5  ;;  %v1301_v26 = vpop.permute.xlu1 %1300  ;;  %v11860_v50 = vld [vmem:[%s19052_s0 + $0x94] sm:$0xf]  ;;  %v11861_v55 = vld [vmem:[%s19052_s0 + $0x98] sm:$0x1] }
  0xc2   :  { %v710_v23 = vrot.slane %v709_v11, 4  ;;  %v1696_v6 = vsel %vm13677_vm2, %v11549_v12, %v1695_v13  ;;  %v1697_v24 = vrot.slane %v1695_v13, 4  ;;  %v12315_v29 = vrot.slane %v12237_v19, 9  ;;  %1393 = vst.msk [vmem:[#allocation2 + $0x20] sm:$0xff] %vm1388_vm6, %v1301_v26  ;;  %v11728_v61 = vld [vmem:[%s19052_s0 + $0x84] sm:$0xf] }
  0xc3   :  { %5479 = vrot.lane.b32.xlu0 %v12186_v15, %s13582_s25  ;;  %v5846_v27 = vsel %vm13677_vm2, %v5844_v18, %v5845_v5  ;;  %v5849_v30 = vrot.slane %v12238_v0, 5  ;;  %v5852_v31 = vrot.slane %v12239_v9, 5  ;;  %v11548_v36 = vrot.slane %v1451_v14, 9  ;;  %308 = vst.msk [vmem:[#allocation2 + $0x58] sm:$0xff] %vm296_vm8, %v13099_v40  ;;  %v11729_v1 = vld [vmem:[%s19052_s0 + $0x88] sm:$0xf] }
  0xc4   :  { %v715_v33 = vsel %vm13722_vm5, %v710_v23, %v714_v42  ;;  %v12346_v34 = vcombine.low %v5843_v17, %v5846_v27  ;;  %v1699_v35 = vsel %vm13677_vm2, %v1697_v24, %v1698_v25  ;;  %v1688_v51 = vrot.slane %v1452_v20, 5  ;;  %v13078_v42 = vld [vmem:[%s19052_s0 + $0x90] sm:$0xff]   ;;  %v11730_v14 = vld [vmem:[%s19052_s0 + $0x8c] sm:$0x1]  ;;  %v11857_v22 = vld [vmem:[%s19052_s0 + $0x88] sm:$0xf] }
  0xc5   :  { %v11517_v43 = vcombine.low %v705_v16, %v715_v33  ;;  %v11581_v44 = vcombine.low %v1696_v6, %v1699_v35  ;;  %v5850_v45 = vsel %vm13677_vm2, %v12315_v29, %v5849_v30  ;;  %v5851_v47 = vrot.slane %v5849_v30, 4  ;;  %v5468_v48 = vpop.permute.xlu0 %5467  ;;  %v11856_v16 = vld [vmem:[%s19052_s0 + $0x84] sm:$0xe]  ;;  %v11858_v26 = vld [vmem:[%s19052_s0 + $0x8c] sm:$0x1] }
  0xc6   :  { %v1691_v52 = vrot.slane %v1453_v21, 5  ;;  %v2780_v53 = vshrl.u32 %v11731_v32, 16  ;;  %v2783_v54 = vshll.u32 %v11731_v32, 16  ;;  %5562 = vst.msk [vmem:[#allocation2 + $0x10] sm:$0xff] %vm5559_vm13, %v5468_v48  ;;  %v2789_v57 = vshll.u32 %v11732_v37, 16 }
  0xc7   :  { %1314 = vrot.lane.b32.xlu1 %v11517_v43, %s13578_s27  ;;  %6120 = vrot.lane.b32.xlu0 %v12346_v34, %s13583_s13  ;;  %v5853_v56 = vsel %vm13677_vm2, %v5851_v47, %v5852_v31  ;;  %v2793_v59 = vshrl.u32 %v11732_v37, 16  ;;  %v2799_v7 = vshll.u32 %v11733_v38, 16  ;;  %v1689_v39 = vsel %vm13677_vm2, %v11548_v36, %v1688_v51  ;;  %v12115_v34 = vld [vmem:[%s19052_s0 + $0x9c] sm:$0xf]  ;;  %v13079_v37 = vld [vmem:[%s19052_s0 + $0x84] sm:$0xff]  }
  0xc8   :  { %v12347_v41 = vcombine.low %v5850_v45, %v5853_v56  ;;  %v1690_v28 = vrot.slane %v1688_v51, 4  ;;  %v2782_v60 = vrot.slane %v2780_v53, 4  ;;  %v2785_v62 = vrot.slane %v2783_v54, 5  ;;  %v12116_v43 = vld [vmem:[%s19052_s0 + $0xa0] sm:$0xf] }
  0xc9   :  { %v2791_v63 = vrot.slane %v2789_v57, 5  ;;  %v2795_v19 = vrot.slane %v2793_v59, 4  ;;  %v2801_v0 = vrot.slane %v2799_v7, 5  ;;  %v1303_v2 = vpop.permute.xlu1 %1302  ;;  %v6109_v3 = vpop.permute.xlu0 %6108  ;;  %v11933_v5 = vrot.slane %v11859_v49, 9 }
  0xca   :  { %v1692_v4 = vsel %vm13677_vm2, %v1690_v28, %v1691_v52  ;;  %v3779_v9 = vrot.slane %v11860_v50, 5  ;;  %v3782_v10 = vrot.slane %v11861_v55, 5  ;;  %1394 = vst.msk [vmem:[#allocation2 + $0x28] sm:$0xff] %vm1388_vm6, %v1303_v2  ;;  %v2786_v12 = vor.u32 %v2785_v62, %v2782_v60  ;;  %v12117_v52 = vld [vmem:[%s19052_s0 + $0xa4] sm:$0x1] }
  0xcb   :  { %6203 = vst.msk [vmem:[#allocation2 + $0x10] sm:$0xff] %vm6200_vm14, %v6109_v3  ;;  %1958 = vrot.lane.b32.xlu1 %v11581_v44, %s19070_s29  ;;  %6122 = vrot.lane.b32.xlu0 %v12347_v41, %s13583_s13  ;;  %v11580_v11 = vcombine.low %v1689_v39, %v1692_v4  ;;  %v2796_v13 = vor.u32 %v2795_v19, %v2791_v63  ;;  %v2756_v15 = vshrl.u32 %v11728_v61, 16  ;;  %v2759_v20 = vshll.u32 %v11728_v61, 16  ;;  %v365_v39 = vld [vmem:[%s19052_s0 + $0x90] sm:$0xf] }
  0xcc   :  { %v14828_v17 = vsel %vm13677_vm2, %v11933_v5, %v3779_v9  ;;  %v3781_v18 = vrot.slane %v3779_v9, 4  ;;  %v2765_v21 = vshll.u32 %v11729_v1, 16  ;;  %v2787_v23 = vrot.slane %v2786_v12, 4  ;;  %v366_v2 = vld [vmem:[%s19052_s0 + $0x94] sm:$0xf] }
  0xcd   :  { %v2797_v6 = vrot.slane %v2796_v13, 4  ;;  %v2758_v24 = vrot.slane %v2756_v15, 4  ;;  %v2769_v25 = vshrl.u32 %v11729_v1, 16  ;;  %v1947_v27 = vpop.permute.xlu1 %1946  ;;  %v6111_v29 = vpop.permute.xlu0 %6110  ;;  %v2761_v31 = vrot.slane %v2759_v20, 5  ;;  %v367_v5 = vld [vmem:[%s19052_s0 + $0x98] sm:$0x1] }
  0xce   :  { %v3783_v30 = vsel %vm13677_vm2, %v3781_v18, %v3782_v10  ;;  %v2767_v32 = vrot.slane %v2765_v21, 5  ;;  %v2775_v33 = vshll.u32 %v11730_v14, 16  ;;  %2038 = vst.msk [vmem:[#allocation2 + $0x28] sm:$0xff] %vm2032_vm7, %v1947_v27  ;;  %v2792_v35 = vsel %vm13722_vm5, %v2787_v23, %v2791_v63  ;;  %v13082_v18 = vld [vmem:[%s19052_s0 + $0x9c] sm:$0xff]   ;;  %v12113_v27 = vld [vmem:[%s19052_s0 + $0x94] sm:$0xf] }
  0xcf   :  { %6204 = vst.msk [vmem:[#allocation2 + $0x18] sm:$0xff] %vm6200_vm14, %v6111_v29  ;;  %2312 = vrot.lane.b32.xlu1 %v13078_v42, %s13576_s21  ;;  %1956 = vrot.lane.b32.xlu0 %v11580_v11, %s19070_s29  ;;  %v2802_v36 = vsel %vm13722_vm5, %v2797_v6, %v2801_v0  ;;  %v11965_v38 = vcombine.low %v14828_v17, %v3783_v30  ;;  %v2771_v40 = vrot.slane %v2769_v25, 4  ;;  %v11932_v48 = vrot.slane %v11856_v16, 9  ;;  %v12112_v16 = vld [vmem:[%s19052_s0 + $0x90] sm:$0xf] }
  0xd0   :  { %v11805_v44 = vcombine.low %v2792_v35, %v2802_v36  ;;  %v2762_v45 = vor.u32 %v2761_v31, %v2758_v24  ;;  %v2777_v47 = vrot.slane %v2775_v33, 5  ;;  %v3772_v50 = vrot.slane %v11857_v22, 5  ;;  %v12114_v31 = vld [vmem:[%s19052_s0 + $0x98] sm:$0x1] }
  0xd1   :  { %v2772_v49 = vor.u32 %v2771_v40, %v2767_v32  ;;  %v3775_v51 = vrot.slane %v11858_v26, 5  ;;  %v4864_v53 = vshrl.u32 %v12115_v34, 16  ;;  %v2301_v54 = vpop.permute.xlu1 %2300  ;;  %v1945_v55 = vpop.permute.xlu0 %1944  ;;  %v4867_v59 = vshll.u32 %v12115_v34, 16 }
  0xd2   :  { %v6235_v56 = vld [vmem:[#allocation2 + $0x10] sm:$0xff]  ;;  %v2763_v57 = vrot.slane %v2762_v45, 4  ;;  %v4873_v7 = vshll.u32 %v12116_v43, 16  ;;  %v4877_v41 = vshrl.u32 %v12116_v43, 16  ;;  %2392 = vst.msk [vmem:[#allocation2 + $0x28] sm:$0xff] %vm2386_vm9, %v2301_v54  ;;  %v3773_v60 = vsel %vm13677_vm2, %v11932_v48, %v3772_v50 }
  0xd3   :  { %2037 = vst.msk [vmem:[#allocation2 + $0x20] sm:$0xff] %vm2032_vm7, %v1945_v55  ;;  %12902 = vmatprep.mubr.msk.bf16.mxu0 %vm6316_vm0, %v6235_v56  ;;  %3401 = vrot.lane.b32.xlu1 %v11805_v44, %s13579_s18  ;;  %v2773_v28 = vrot.slane %v2772_v49, 4  ;;  %v3774_v61 = vrot.slane %v3772_v50, 4  ;;  %v4866_v62 = vrot.slane %v4864_v53, 4  ;;  %v4869_v19 = vrot.slane %v4867_v59, 5  ;;  %v13083_v50 = vld [vmem:[%s19052_s0 + $0x90] sm:$0xff]  }
  0xd4   :  { %2310 = vrot.lane.b32.xlu0 %v13079_v37, %s13576_s21  ;;  %v2768_v63 = vsel %vm13722_vm5, %v2763_v57, %v2767_v32  ;;  %v4875_v0 = vrot.slane %v4873_v7, 5  ;;  %v4879_v1 = vrot.slane %v4877_v41, 4  ;;  %v4883_v4 = vshll.u32 %v12117_v52, 16  ;;  %v369_v48 = vld [vmem:[%s19052_s0 + $0xa0] sm:$0xf] }
  0xd5   :  { %v2778_v3 = vsel %vm13722_vm5, %v2773_v28, %v2777_v47  ;;  %v3776_v42 = vsel %vm13677_vm2, %v3774_v61, %v3775_v51  ;;  %v717_v9 = vshrl.u32 %v365_v39, 16  ;;  %v2299_v10 = vpop.permute.xlu0 %2298  ;;  %v4870_v14 = vor.u32 %v4869_v19, %v4866_v62  ;;  %v3390_v17 = vpop.permute.xlu1 %3389  ;;  %v370_v55 = vld [vmem:[%s19052_s0 + $0xa4] sm:$0x1]  ;;  %v12240_v41 = vld [vmem:[%s19052_s0 + $0x90] sm:$0xe] }
  0xd6   :  { %v6236_v11 = vld [vmem:[#allocation2 + $0x18] sm:$0xff]  ;;  %v11804_v12 = vcombine.low %v2768_v63, %v2778_v3  ;;  %v11964_v13 = vcombine.low %v3773_v60, %v3776_v42  ;;  %v4880_v15 = vor.u32 %v4879_v1, %v4875_v0  ;;  %2391 = vst.msk [vmem:[#allocation2 + $0x20] sm:$0xff] %vm2386_vm9, %v2299_v10  ;;  %v4885_v20 = vrot.slane %v4883_v4, 5 }
  0xd7   :  { %12903 = vmatmul.mubr.msk.bf16.gmra.mrb[4].mxu0 %vm6316_vm0, %v6236_v11  ;;  %4042 = vrot.lane.b32.xlu1 %v11965_v38, %s13580_s24  ;;  %v719_v21 = vrot.slane %v717_v9, 4  ;;  %v720_v22 = vshll.u32 %v365_v39, 16  ;;  %v726_v23 = vshll.u32 %v366_v2, 16  ;;  %3481 = vst.msk [vmem:[#allocation2 + $0x28] sm:$0xff] %vm3475_vm10, %v3390_v17  ;;  %v4871_v6 = vrot.slane %v4870_v14, 4 }
  0xd8   :  { %3399 = vrot.lane.b32.xlu0 %v11804_v12, %s13579_s18  ;;  %v4881_v24 = vrot.slane %v4880_v15, 4  ;;  %v730_v25 = vshrl.u32 %v366_v2, 16  ;;  %v736_v26 = vshll.u32 %v367_v5, 16  ;;  %v4840_v32 = vshrl.u32 %v12112_v16, 16  ;;  %v368_v38 = vld [vmem:[%s19052_s0 + $0x9c] sm:$0xf] }
  0xd9   :  { %v722_v29 = vrot.slane %v720_v22, 5  ;;  %v728_v30 = vrot.slane %v726_v23, 5  ;;  %v4843_v33 = vshll.u32 %v12112_v16, 16  ;;  %v4876_v34 = vsel %vm13722_vm5, %v4871_v6, %v4875_v0  ;;  %v4031_v40 = vpop.permute.xlu1 %4030  ;;  %v12241_v2 = vld [vmem:[%s19052_s0 + $0x94] sm:$0xf] }
  0xda   :  { %v4886_v35 = vsel %vm13722_vm5, %v4881_v24, %v4885_v20  ;;  %v732_v36 = vrot.slane %v730_v25, 4  ;;  %v738_v37 = vrot.slane %v736_v26, 5  ;;  %v4842_v45 = vrot.slane %v4840_v32, 4  ;;  %4122 = vst.msk [vmem:[#allocation2 + $0x28] sm:$0xff] %vm4116_vm11, %v4031_v40  ;;  %v3388_v49 = vpop.permute.xlu0 %3387  ;;  %v12242_v10 = vld [vmem:[%s19052_s0 + $0x98] sm:$0x1] }
  0xdb   :  { %4396 = vrot.lane.b32.xlu1 %v13082_v18, %s13581_s16  ;;  %v12189_v43 = vcombine.low %v4876_v34, %v4886_v35  ;;  %v723_v44 = vor.u32 %v722_v29, %v719_v21  ;;  %v4845_v47 = vrot.slane %v4843_v33, 5  ;;  %v4849_v52 = vshll.u32 %v12113_v27, 16  ;;  %3480 = vst.msk [vmem:[#allocation2 + $0x20] sm:$0xff] %vm3475_vm10, %v3388_v49  ;;  %v1460_v11 = vld [vmem:[%s19052_s0 + $0x9c] sm:$0xe] }
  0xdc   :  { %4040 = vrot.lane.b32.xlu0 %v11964_v13, %s13580_s24  ;;  %v733_v51 = vor.u32 %v732_v36, %v728_v30  ;;  %v4853_v53 = vshrl.u32 %v12113_v27, 16  ;;  %v4859_v54 = vshll.u32 %v12114_v31, 16  ;;  %v741_v59 = vshrl.u32 %v368_v38, 16  ;;  %v1461_v16 = vld [vmem:[%s19052_s0 + $0xa0] sm:$0xf] }
  0xdd   :  { %v724_v56 = vrot.slane %v723_v44, 4  ;;  %v4846_v57 = vor.u32 %v4845_v47, %v4842_v45  ;;  %v744_v7 = vshll.u32 %v368_v38, 16  ;;  %v4851_v28 = vrot.slane %v4849_v52, 5  ;;  %v4385_v62 = vpop.permute.xlu1 %4384  ;;  %v1462_v17 = vld [vmem:[%s19052_s0 + $0xa4] sm:$0x1]  ;;  %v13104_v45 = vld [vmem:[%s19052_s0 + $0x90] sm:$0xff]  }
  0xde   :  { %v734_v39 = vrot.slane %v733_v51, 4  ;;  %v4855_v60 = vrot.slane %v4853_v53, 4  ;;  %v4861_v61 = vrot.slane %v4859_v54, 5  ;;  %v743_v0 = vrot.slane %v741_v59, 4  ;;  %4476 = vst.msk [vmem:[#allocation2 + $0x28] sm:$0xff] %vm4470_vm12, %v4385_v62  ;;  %v4029_v3 = vpop.permute.xlu0 %4028 }
  0xdf   :  { %5485 = vrot.lane.b32.xlu1 %v12189_v43, %s13582_s25  ;;  %v729_v63 = vsel %vm13722_vm5, %v724_v56, %v728_v30  ;;  %v4847_v19 = vrot.slane %v4846_v57, 4  ;;  %v746_v1 = vrot.slane %v744_v7, 5  ;;  %v750_v5 = vshll.u32 %v369_v48, 16  ;;  %4121 = vst.msk [vmem:[#allocation2 + $0x20] sm:$0xff] %vm4116_vm11, %v4029_v3  ;;  %v12243_v23 = vld [vmem:[%s19052_s0 + $0x9c] sm:$0xe] }
  0xe0   :  { %4394 = vrot.lane.b32.xlu0 %v13083_v50, %s13581_s16  ;;  %v739_v42 = vsel %vm13722_vm5, %v734_v39, %v738_v37  ;;  %v4856_v4 = vor.u32 %v4855_v60, %v4851_v28  ;;  %v754_v9 = vshrl.u32 %v369_v48, 16  ;;  %v760_v15 = vshll.u32 %v370_v55, 16  ;;  %v12244_v6 = vld [vmem:[%s19052_s0 + $0xa0] sm:$0xf]  ;;  %v12245_v24 = vld [vmem:[%s19052_s0 + $0xa4] sm:$0x1] }
  0xe1   :  { %v11518_v12 = vcombine.low %v729_v63, %v739_v42  ;;  %v4852_v13 = vsel %vm13722_vm5, %v4847_v19, %v4851_v28  ;;  %v747_v14 = vor.u32 %v746_v1, %v743_v0  ;;  %v752_v20 = vrot.slane %v750_v5, 5  ;;  %v5474_v25 = vpop.permute.xlu1 %5473  ;;  %v1457_v31 = vld [vmem:[%s19052_s0 + $0x90] sm:$0xe]  ;;  %v1458_v44 = vld [vmem:[%s19052_s0 + $0x94] sm:$0xf]  ;;  %309 = vst.msk [vmem:[#allocation2 + $0x60] sm:$0xff] %vm296_vm8, %v13104_v45 }
  0xe2   :  { %v4857_v18 = vrot.slane %v4856_v4, 4  ;;  %v756_v21 = vrot.slane %v754_v9, 4  ;;  %v12316_v22 = vrot.slane %v12240_v41, 9  ;;  %v762_v27 = vrot.slane %v760_v15, 5  ;;  %5565 = vst.msk [vmem:[#allocation2 + $0x28] sm:$0xff] %vm5559_vm13, %v5474_v25  ;;  %v4383_v32 = vpop.permute.xlu0 %4382 }
  0xe3   :  { %1316 = vrot.lane.b32.xlu1 %v11518_v12, %s13578_s27  ;;  %v748_v26 = vrot.slane %v747_v14, 4  ;;  %v5856_v29 = vrot.slane %v12241_v2, 5  ;;  %v5859_v30 = vrot.slane %v12242_v10, 5  ;;  %v11551_v35 = vrot.slane %v1460_v11, 9  ;;  %4475 = vst.msk [vmem:[#allocation2 + $0x20] sm:$0xff] %vm4470_vm12, %v4383_v32 }
  0xe4   :  { %v4862_v33 = vsel %vm13722_vm5, %v4857_v18, %v4861_v61  ;;  %v757_v34 = vor.u32 %v756_v21, %v752_v20  ;;  %v1709_v36 = vrot.slane %v1461_v16, 5  ;;  %v1712_v50 = vrot.slane %v1462_v17, 5  ;;  %v1459_v51 = vld [vmem:[%s19052_s0 + $0x98] sm:$0x1]  ;;  %v11737_v57 = vld [vmem:[%s19052_s0 + $0xa8] sm:$0xf] }
  0xe5   :  { %v12188_v37 = vcombine.low %v4852_v13, %v4862_v33  ;;  %v753_v38 = vsel %vm13722_vm5, %v748_v26, %v752_v20  ;;  %v5857_v40 = vsel %vm13677_vm2, %v12316_v22, %v5856_v29  ;;  %v5858_v43 = vrot.slane %v5856_v29, 4  ;;  %v1305_v52 = vpop.permute.xlu1 %1304  ;;  %v11738_v28 = vld [vmem:[%s19052_s0 + $0xac] sm:$0xf]  ;;  %v11739_v60 = vld [vmem:[%s19052_s0 + $0xb0] sm:$0x1]  ;;  %v13105_v61 = vld [vmem:[%s19052_s0 + $0x9c] sm:$0xff]  }
  0xe6   :  { %v758_v47 = vrot.slane %v757_v34, 4  ;;  %v1710_v48 = vsel %vm13677_vm2, %v11551_v35, %v1709_v36  ;;  %v1711_v49 = vrot.slane %v1709_v36, 4  ;;  %v12317_v54 = vrot.slane %v12243_v23, 9  ;;  %1395 = vst.msk [vmem:[#allocation2 + $0x30] sm:$0xff] %vm1388_vm6, %v1305_v52  ;;  %v11865_v2 = vld [vmem:[%s19052_s0 + $0xa8] sm:$0xe] }
  0xe7   :  { %5483 = vrot.lane.b32.xlu0 %v12188_v37, %s13582_s25  ;;  %v5860_v53 = vsel %vm13677_vm2, %v5858_v43, %v5859_v30  ;;  %v5863_v55 = vrot.slane %v12244_v6, 5  ;;  %v5866_v56 = vrot.slane %v12245_v24, 5  ;;  %v11550_v39 = vrot.slane %v1457_v31, 9  ;;  %v11866_v3 = vld [vmem:[%s19052_s0 + $0xac] sm:$0xf]  ;;  %310 = vst.msk [vmem:[#allocation2 + $0x68] sm:$0xff] %vm296_vm8, %v13105_v61 }
  0xe8   :  { %v763_v59 = vsel %vm13722_vm5, %v758_v47, %v762_v27  ;;  %v12348_v7 = vcombine.low %v5857_v40, %v5860_v53  ;;  %v1713_v41 = vsel %vm13677_vm2, %v1711_v49, %v1712_v50  ;;  %v1702_v42 = vrot.slane %v1458_v44, 5  ;;  %v11867_v14 = vld [vmem:[%s19052_s0 + $0xb0] sm:$0x1]  ;;  %v11734_v20 = vld [vmem:[%s19052_s0 + $0x9c] sm:$0xf]  ;;  %v13084_v26 = vld [vmem:[%s19052_s0 + $0xa8] sm:$0xff]  }
  0xe9   :  { %v11519_v62 = vcombine.low %v753_v38, %v763_v59  ;;  %v11583_v63 = vcombine.low %v1710_v48, %v1713_v41  ;;  %v5864_v19 = vsel %vm13677_vm2, %v12317_v54, %v5863_v55  ;;  %v5865_v0 = vrot.slane %v5863_v55, 4  ;;  %v5472_v1 = vpop.permute.xlu0 %5471  ;;  %v11735_v24 = vld [vmem:[%s19052_s0 + $0xa0] sm:$0xf]  ;;  %v11736_v36 = vld [vmem:[%s19052_s0 + $0xa4] sm:$0x1] }
  0xea   :  { %v1705_v4 = vrot.slane %v1459_v51, 5  ;;  %v2828_v5 = vshrl.u32 %v11737_v57, 16  ;;  %v2831_v9 = vshll.u32 %v11737_v57, 16  ;;  %5564 = vst.msk [vmem:[#allocation2 + $0x20] sm:$0xff] %vm5559_vm13, %v5472_v1  ;;  %v2837_v11 = vshll.u32 %v11738_v28, 16 }
  0xeb   :  { %1318 = vrot.lane.b32.xlu1 %v11519_v62, %s13578_s27  ;;  %6124 = vrot.lane.b32.xlu0 %v12348_v7, %s13583_s13  ;;  %v5867_v10 = vsel %vm13677_vm2, %v5865_v0, %v5866_v56  ;;  %v2841_v12 = vshrl.u32 %v11738_v28, 16  ;;  %v2847_v13 = vshll.u32 %v11739_v60, 16  ;;  %v1703_v16 = vsel %vm13677_vm2, %v11550_v39, %v1702_v42  ;;  %v11862_v38 = vld [vmem:[%s19052_s0 + $0x9c] sm:$0xe]  ;;  %v11863_v47 = vld [vmem:[%s19052_s0 + $0xa0] sm:$0xf] }
  0xec   :  { %v12349_v15 = vcombine.low %v5864_v19, %v5867_v10  ;;  %v1704_v17 = vrot.slane %v1702_v42, 4  ;;  %v2830_v18 = vrot.slane %v2828_v5, 4  ;;  %v2833_v21 = vrot.slane %v2831_v9, 5  ;;  %v11864_v52 = vld [vmem:[%s19052_s0 + $0xa4] sm:$0x1]  ;;  %v13085_v28 = vld [vmem:[%s19052_s0 + $0x9c] sm:$0xff]  }
  0xed   :  { %v2839_v22 = vrot.slane %v2837_v11, 5  ;;  %v2843_v23 = vrot.slane %v2841_v12, 4  ;;  %v2849_v6 = vrot.slane %v2847_v13, 5  ;;  %v6113_v25 = vpop.permute.xlu0 %6112  ;;  %v11935_v29 = vrot.slane %v11865_v2, 9  ;;  %v12121_v7 = vld [vmem:[%s19052_s0 + $0xb4] sm:$0xf] }
  0xee   :  { %v1706_v27 = vsel %vm13677_vm2, %v1704_v17, %v1705_v4  ;;  %v3793_v30 = vrot.slane %v11866_v3, 5  ;;  %v3796_v31 = vrot.slane %v11867_v14, 5  ;;  %v1307_v32 = vpop.permute.xlu1 %1306  ;;  %6205 = vst.msk [vmem:[#allocation2 + $0x20] sm:$0xff] %vm6200_vm14, %v6113_v25  ;;  %v2834_v34 = vor.u32 %v2833_v21, %v2830_v18  ;;  %v12122_v62 = vld [vmem:[%s19052_s0 + $0xb8] sm:$0xf] }
  0xef   :  { %1962 = vrot.lane.b32.xlu1 %v11583_v63, %s19070_s29  ;;  %6126 = vrot.lane.b32.xlu0 %v12349_v15, %s13583_s13  ;;  %v11582_v33 = vcombine.low %v1703_v16, %v1706_v27  ;;  %v2844_v35 = vor.u32 %v2843_v23, %v2839_v22  ;;  %v2804_v37 = vshrl.u32 %v11734_v20, 16  ;;  %1396 = vst.msk [vmem:[#allocation2 + $0x38] sm:$0xff] %vm1388_vm6, %v1307_v32  ;;  %v2807_v44 = vshll.u32 %v11734_v20, 16  ;;  %v12123_v4 = vld [vmem:[%s19052_s0 + $0xbc] sm:$0x1] }
  0xf0   :  { %v15041_v40 = vsel %vm13677_vm2, %v11935_v29, %v3793_v30  ;;  %v3795_v43 = vrot.slane %v3793_v30, 4  ;;  %v2813_v45 = vshll.u32 %v11735_v24, 16  ;;  %v2835_v48 = vrot.slane %v2834_v34, 4  ;;  %v371_v16 = vld [vmem:[%s19052_s0 + $0xa8] sm:$0xf] }
  0xf1   :  { %v2845_v49 = vrot.slane %v2844_v35, 4  ;;  %v2806_v50 = vrot.slane %v2804_v37, 4  ;;  %v2817_v51 = vshrl.u32 %v11735_v24, 16  ;;  %v6115_v53 = vpop.permute.xlu0 %6114  ;;  %v2809_v55 = vrot.slane %v2807_v44, 5 }
  0xf2   :  { %v3797_v54 = vsel %vm13677_vm2, %v3795_v43, %v3796_v31  ;;  %v2815_v56 = vrot.slane %v2813_v45, 5  ;;  %v2823_v57 = vshll.u32 %v11736_v36, 16  ;;  %v1951_v59 = vpop.permute.xlu1 %1950  ;;  %6206 = vst.msk [vmem:[#allocation2 + $0x28] sm:$0xff] %vm6200_vm14, %v6115_v53  ;;  %v2840_v41 = vsel %vm13722_vm5, %v2835_v48, %v2839_v22  ;;  %v372_v22 = vld [vmem:[%s19052_s0 + $0xac] sm:$0xf]  ;;  %v13088_v43 = vld [vmem:[%s19052_s0 + $0xb4] sm:$0xff]  }
  0xf3   :  { %2316 = vrot.lane.b32.xlu1 %v13084_v26, %s13576_s21  ;;  %1960 = vrot.lane.b32.xlu0 %v11582_v33, %s19070_s29  ;;  %v2850_v39 = vsel %vm13722_vm5, %v2845_v49, %v2849_v6  ;;  %v11967_v60 = vcombine.low %v15041_v40, %v3797_v54  ;;  %v2819_v61 = vrot.slane %v2817_v51, 4  ;;  %2040 = vst.msk [vmem:[#allocation2 + $0x38] sm:$0xff] %vm2032_vm7, %v1951_v59  ;;  %v11934_v1 = vrot.slane %v11862_v38, 9  ;;  %v373_v26 = vld [vmem:[%s19052_s0 + $0xb0] sm:$0x1] }
  0xf4   :  { %v11807_v63 = vcombine.low %v2840_v41, %v2850_v39  ;;  %v2810_v19 = vor.u32 %v2809_v55, %v2806_v50  ;;  %v2825_v0 = vrot.slane %v2823_v57, 5  ;;  %v3786_v3 = vrot.slane %v11863_v47, 5  ;;  %v12118_v38 = vld [vmem:[%s19052_s0 + $0xa8] sm:$0xf]  ;;  %v12119_v53 = vld [vmem:[%s19052_s0 + $0xac] sm:$0xf] }
  0xf5   :  { %v2820_v2 = vor.u32 %v2819_v61, %v2815_v56  ;;  %v3789_v42 = vrot.slane %v11864_v52, 5  ;;  %v4912_v5 = vshrl.u32 %v12121_v7, 16  ;;  %v1949_v9 = vpop.permute.xlu0 %1948  ;;  %v6237_v10 = vld [vmem:[#allocation2 + $0x20] sm:$0xff]  ;;  %v4915_v12 = vshll.u32 %v12121_v7, 16 }
  0xf6   :  { %v2811_v11 = vrot.slane %v2810_v19, 4  ;;  %v4921_v13 = vshll.u32 %v12122_v62, 16  ;;  %v4925_v14 = vshrl.u32 %v12122_v62, 16  ;;  %v2305_v15 = vpop.permute.xlu1 %2304  ;;  %2039 = vst.msk [vmem:[#allocation2 + $0x30] sm:$0xff] %vm2032_vm7, %v1949_v9  ;;  %12906 = vmatprep.mubr.msk.bf16.mxu0 %vm6316_vm0, %v6237_v10  ;;  %v3787_v18 = vsel %vm13677_vm2, %v11934_v1, %v3786_v3  ;;  %v376_v10 = vld [vmem:[%s19052_s0 + $0xbc] sm:$0x1] }
  0xf7   :  { %3405 = vrot.lane.b32.xlu1 %v11807_v63, %s13579_s18  ;;  %2314 = vrot.lane.b32.xlu0 %v13085_v28, %s13576_s21  ;;  %v2821_v17 = vrot.slane %v2820_v2, 4  ;;  %v3788_v20 = vrot.slane %v3786_v3, 4  ;;  %v4914_v21 = vrot.slane %v4912_v5, 4  ;;  %2394 = vst.msk [vmem:[#allocation2 + $0x38] sm:$0xff] %vm2386_vm9, %v2305_v15  ;;  %v4917_v6 = vrot.slane %v4915_v12, 5  ;;  %v13089_v3 = vld [vmem:[%s19052_s0 + $0xa8] sm:$0xff]  }
  0xf8   :  { %v2816_v23 = vsel %vm13722_vm5, %v2811_v11, %v2815_v56  ;;  %v4923_v24 = vrot.slane %v4921_v13, 5  ;;  %v4927_v25 = vrot.slane %v4925_v14, 4  ;;  %v4931_v30 = vshll.u32 %v12123_v4, 16  ;;  %v12120_v56 = vld [vmem:[%s19052_s0 + $0xb0] sm:$0x1] }
  0xf9   :  { %v2826_v27 = vsel %vm13722_vm5, %v2821_v17, %v2825_v0  ;;  %v3790_v29 = vsel %vm13677_vm2, %v3788_v20, %v3789_v42  ;;  %v765_v31 = vshrl.u32 %v371_v16, 16  ;;  %v2303_v32 = vpop.permute.xlu0 %2302  ;;  %v6238_v33 = vld [vmem:[#allocation2 + $0x28] sm:$0xff]  ;;  %v4918_v36 = vor.u32 %v4917_v6, %v4914_v21  ;;  %v375_v2 = vld [vmem:[%s19052_s0 + $0xb8] sm:$0xf] }
  0xfa   :  { %v11806_v34 = vcombine.low %v2816_v23, %v2826_v27  ;;  %v11966_v35 = vcombine.low %v3787_v18, %v3790_v29  ;;  %v4928_v37 = vor.u32 %v4927_v25, %v4923_v24  ;;  %v3394_v40 = vpop.permute.xlu1 %3393  ;;  %2393 = vst.msk [vmem:[#allocation2 + $0x30] sm:$0xff] %vm2386_vm9, %v2303_v32  ;;  %12907 = vmatmul.mubr.msk.bf16.gmra.mrb[8].mxu0 %vm6316_vm0, %v6238_v33  ;;  %v4933_v44 = vrot.slane %v4931_v30, 5  ;;  %v12246_v15 = vld [vmem:[%s19052_s0 + $0xa8] sm:$0xe]  ;;  %v12247_v21 = vld [vmem:[%s19052_s0 + $0xac] sm:$0xf] }
  0xfb   :  { %4046 = vrot.lane.b32.xlu1 %v11967_v60, %s13580_s24  ;;  %v767_v45 = vrot.slane %v765_v31, 4  ;;  %v768_v47 = vshll.u32 %v371_v16, 16  ;;  %v774_v48 = vshll.u32 %v372_v22, 16  ;;  %3483 = vst.msk [vmem:[#allocation2 + $0x38] sm:$0xff] %vm3475_vm10, %v3394_v40  ;;  %v4919_v49 = vrot.slane %v4918_v36, 4 }
  0xfc   :  { %3403 = vrot.lane.b32.xlu0 %v11806_v34, %s13579_s18  ;;  %v4929_v50 = vrot.slane %v4928_v37, 4  ;;  %v778_v51 = vshrl.u32 %v372_v22, 16  ;;  %v784_v52 = vshll.u32 %v373_v26, 16  ;;  %v4888_v57 = vshrl.u32 %v12118_v38, 16  ;;  %v374_v60 = vld [vmem:[%s19052_s0 + $0xb4] sm:$0xf] }
  0xfd   :  { %v770_v54 = vrot.slane %v768_v47, 5  ;;  %v776_v55 = vrot.slane %v774_v48, 5  ;;  %v4891_v59 = vshll.u32 %v12118_v38, 16  ;;  %v4924_v7 = vsel %vm13722_vm5, %v4919_v49, %v4923_v24  ;;  %v12248_v27 = vld [vmem:[%s19052_s0 + $0xb0] sm:$0x1] }
  0xfe   :  { %v4934_v41 = vsel %vm13722_vm5, %v4929_v50, %v4933_v44  ;;  %v780_v39 = vrot.slane %v778_v51, 4  ;;  %v786_v28 = vrot.slane %v784_v52, 5  ;;  %v4035_v61 = vpop.permute.xlu1 %4034  ;;  %v3392_v62 = vpop.permute.xlu0 %3391  ;;  %v4890_v0 = vrot.slane %v4888_v57, 4  ;;  %v1466_v33 = vld [vmem:[%s19052_s0 + $0xb4] sm:$0xe] }
  0xff   :  { %4400 = vrot.lane.b32.xlu1 %v13088_v43, %s13581_s16  ;;  %v12191_v63 = vcombine.low %v4924_v7, %v4934_v41  ;;  %v771_v19 = vor.u32 %v770_v54, %v767_v45  ;;  %v4893_v1 = vrot.slane %v4891_v59, 5  ;;  %4124 = vst.msk [vmem:[#allocation2 + $0x38] sm:$0xff] %vm4116_vm11, %v4035_v61  ;;  %v4897_v4 = vshll.u32 %v12119_v53, 16  ;;  %v1467_v34 = vld [vmem:[%s19052_s0 + $0xb8] sm:$0xf] }
 0x100   :  { %3482 = vst.msk [vmem:[#allocation2 + $0x30] sm:$0xff] %vm3475_vm10, %v3392_v62  ;;  %4044 = vrot.lane.b32.xlu0 %v11966_v35, %s13580_s24  ;;  %v781_v42 = vor.u32 %v780_v39, %v776_v55  ;;  %v4901_v5 = vshrl.u32 %v12119_v53, 16  ;;  %v4907_v9 = vshll.u32 %v12120_v56, 16  ;;  %v789_v13 = vshrl.u32 %v374_v60, 16  ;;  %v1468_v40 = vld [vmem:[%s19052_s0 + $0xbc] sm:$0x1] }
 0x101   :  { %v772_v11 = vrot.slane %v771_v19, 4  ;;  %v4894_v12 = vor.u32 %v4893_v1, %v4890_v0  ;;  %v792_v14 = vshll.u32 %v374_v60, 16  ;;  %v4899_v17 = vrot.slane %v4897_v4, 5  ;;  %v12249_v48 = vld [vmem:[%s19052_s0 + $0xb4] sm:$0xe]  ;;  %v13110_v0 = vld [vmem:[%s19052_s0 + $0xa8] sm:$0xff]  }
 0x102   :  { %v782_v16 = vrot.slane %v781_v42, 4  ;;  %v4903_v18 = vrot.slane %v4901_v5, 4  ;;  %v4909_v20 = vrot.slane %v4907_v9, 5  ;;  %v4389_v22 = vpop.permute.xlu1 %4388  ;;  %v4033_v23 = vpop.permute.xlu0 %4032  ;;  %v791_v25 = vrot.slane %v789_v13, 4  ;;  %v12250_v49 = vld [vmem:[%s19052_s0 + $0xb8] sm:$0xf] }
 0x103   :  { %5489 = vrot.lane.b32.xlu1 %v12191_v63, %s13582_s25  ;;  %v777_v6 = vsel %vm13722_vm5, %v772_v11, %v776_v55  ;;  %v4895_v24 = vrot.slane %v4894_v12, 4  ;;  %v794_v26 = vrot.slane %v792_v14, 5  ;;  %4478 = vst.msk [vmem:[#allocation2 + $0x38] sm:$0xff] %vm4470_vm12, %v4389_v22  ;;  %v798_v31 = vshll.u32 %v375_v2, 16  ;;  %v12251_v50 = vld [vmem:[%s19052_s0 + $0xbc] sm:$0x1] }
 0x104   :  { %4123 = vst.msk [vmem:[#allocation2 + $0x30] sm:$0xff] %vm4116_vm11, %v4033_v23  ;;  %4398 = vrot.lane.b32.xlu0 %v13089_v3, %s13581_s16  ;;  %v787_v29 = vsel %vm13722_vm5, %v782_v16, %v786_v28  ;;  %v4904_v30 = vor.u32 %v4903_v18, %v4899_v17  ;;  %v802_v32 = vshrl.u32 %v375_v2, 16  ;;  %v808_v38 = vshll.u32 %v376_v10, 16  ;;  %v1463_v39 = vld [vmem:[%s19052_s0 + $0xa8] sm:$0xe] }
 0x105   :  { %v11520_v35 = vcombine.low %v777_v6, %v787_v29  ;;  %v4900_v36 = vsel %vm13722_vm5, %v4895_v24, %v4899_v17  ;;  %v795_v37 = vor.u32 %v794_v26, %v791_v25  ;;  %v800_v44 = vrot.slane %v798_v31, 5  ;;  %v1464_v63 = vld [vmem:[%s19052_s0 + $0xac] sm:$0xf]  ;;  %v1465_v19 = vld [vmem:[%s19052_s0 + $0xb0] sm:$0x1]  ;;  %311 = vst.msk [vmem:[#allocation2 + $0x70] sm:$0xff] %vm296_vm8, %v13110_v0 }
 0x106   :  { %v4905_v43 = vrot.slane %v4904_v30, 4  ;;  %v804_v45 = vrot.slane %v802_v32, 4  ;;  %v12318_v47 = vrot.slane %v12246_v15, 9  ;;  %v5478_v51 = vpop.permute.xlu1 %5477  ;;  %v4387_v52 = vpop.permute.xlu0 %4386  ;;  %v810_v54 = vrot.slane %v808_v38, 5  ;;  %v11743_v4 = vld [vmem:[%s19052_s0 + $0xc0] sm:$0xf] }
 0x107   :  { %1320 = vrot.lane.b32.xlu1 %v11520_v35, %s13578_s27  ;;  %v796_v53 = vrot.slane %v795_v37, 4  ;;  %v5870_v55 = vrot.slane %v12247_v21, 5  ;;  %v5873_v56 = vrot.slane %v12248_v27, 5  ;;  %5567 = vst.msk [vmem:[#allocation2 + $0x38] sm:$0xff] %vm5559_vm13, %v5478_v51  ;;  %v11553_v7 = vrot.slane %v1466_v33, 9  ;;  %v13090_v51 = vld [vmem:[%s19052_s0 + $0xc0] sm:$0xff]  }
 0x108   :  { %4477 = vst.msk [vmem:[#allocation2 + $0x30] sm:$0xff] %vm4470_vm12, %v4387_v52  ;;  %v4910_v57 = vsel %vm13722_vm5, %v4905_v43, %v4909_v20  ;;  %v805_v59 = vor.u32 %v804_v45, %v800_v44  ;;  %v1723_v41 = vrot.slane %v1467_v34, 5  ;;  %v1726_v42 = vrot.slane %v1468_v40, 5  ;;  %v11744_v13 = vld [vmem:[%s19052_s0 + $0xc4] sm:$0xf]  ;;  %v13111_v20 = vld [vmem:[%s19052_s0 + $0xb4] sm:$0xff]  }
 0x109   :  { %v12190_v28 = vcombine.low %v4900_v36, %v4910_v57  ;;  %v801_v60 = vsel %vm13722_vm5, %v796_v53, %v800_v44  ;;  %v5871_v61 = vsel %vm13677_vm2, %v12318_v47, %v5870_v55  ;;  %v5872_v62 = vrot.slane %v5870_v55, 4  ;;  %v11745_v18 = vld [vmem:[%s19052_s0 + $0xc8] sm:$0x1]  ;;  %v11871_v24 = vld [vmem:[%s19052_s0 + $0xc0] sm:$0xe]  ;;  %312 = vst.msk [vmem:[#allocation2 + $0x78] sm:$0xff] %vm296_vm8, %v13111_v20 }
 0x10a   :  { %v806_v1 = vrot.slane %v805_v59, 4  ;;  %v1724_v2 = vsel %vm13677_vm2, %v11553_v7, %v1723_v41  ;;  %v1725_v3 = vrot.slane %v1723_v41, 4  ;;  %v1309_v5 = vpop.permute.xlu1 %1308  ;;  %v12319_v10 = vrot.slane %v12249_v48, 9  ;;  %v11872_v31 = vld [vmem:[%s19052_s0 + $0xc4] sm:$0xf] }
 0x10b   :  { %5487 = vrot.lane.b32.xlu0 %v12190_v28, %s13582_s25  ;;  %v5874_v9 = vsel %vm13677_vm2, %v5872_v62, %v5873_v56  ;;  %v5877_v11 = vrot.slane %v12250_v49, 5  ;;  %v5880_v12 = vrot.slane %v12251_v50, 5  ;;  %1397 = vst.msk [vmem:[#allocation2 + $0x40] sm:$0xff] %vm1388_vm6, %v1309_v5  ;;  %v11552_v17 = vrot.slane %v1463_v39, 9  ;;  %v11873_v36 = vld [vmem:[%s19052_s0 + $0xc8] sm:$0x1] }
 0x10c   :  { %v811_v14 = vsel %vm13722_vm5, %v806_v1, %v810_v54  ;;  %v12350_v15 = vcombine.low %v5871_v61, %v5874_v9  ;;  %v1727_v16 = vsel %vm13677_vm2, %v1725_v3, %v1726_v42  ;;  %v1716_v25 = vrot.slane %v1464_v63, 5  ;;  %v11740_v44 = vld [vmem:[%s19052_s0 + $0xb4] sm:$0xf]  ;;  %v11741_v50 = vld [vmem:[%s19052_s0 + $0xb8] sm:$0xf] }
 0x10d   :  { %v11521_v21 = vcombine.low %v801_v60, %v811_v14  ;;  %v11585_v22 = vcombine.low %v1724_v2, %v1727_v16  ;;  %v5878_v23 = vsel %vm13677_vm2, %v12319_v10, %v5877_v11  ;;  %v5879_v6 = vrot.slane %v5877_v11, 4  ;;  %v5476_v30 = vpop.permute.xlu0 %5475  ;;  %v11742_v39 = vld [vmem:[%s19052_s0 + $0xbc] sm:$0x1]  ;;  %v11868_v60 = vld [vmem:[%s19052_s0 + $0xb4] sm:$0xe] }
 0x10e   :  { %v1719_v26 = vrot.slane %v1465_v19, 5  ;;  %v2876_v27 = vshrl.u32 %v11743_v4, 16  ;;  %v2879_v29 = vshll.u32 %v11743_v4, 16  ;;  %v2885_v33 = vshll.u32 %v11744_v13, 16  ;;  %5566 = vst.msk [vmem:[#allocation2 + $0x30] sm:$0xff] %vm5559_vm13, %v5476_v30 }
 0x10f   :  { %1322 = vrot.lane.b32.xlu1 %v11521_v21, %s13578_s27  ;;  %6128 = vrot.lane.b32.xlu0 %v12350_v15, %s13583_s13  ;;  %v5881_v32 = vsel %vm13677_vm2, %v5879_v6, %v5880_v12  ;;  %v2889_v34 = vshrl.u32 %v11744_v13, 16  ;;  %v2895_v35 = vshll.u32 %v11745_v18, 16  ;;  %v1717_v38 = vsel %vm13677_vm2, %v11552_v17, %v1716_v25  ;;  %v11869_v0 = vld [vmem:[%s19052_s0 + $0xb8] sm:$0xf]  ;;  %v11870_v4 = vld [vmem:[%s19052_s0 + $0xbc] sm:$0x1] }
 0x110   :  { %v12351_v37 = vcombine.low %v5878_v23, %v5881_v32  ;;  %v1718_v40 = vrot.slane %v1716_v25, 4  ;;  %v2878_v43 = vrot.slane %v2876_v27, 4  ;;  %v2881_v45 = vrot.slane %v2879_v29, 5  ;;  %v12127_v14 = vld [vmem:[%s19052_s0 + $0xcc] sm:$0xf]  ;;  %v13091_v17 = vld [vmem:[%s19052_s0 + $0xb4] sm:$0xff]  }
 0x111   :  { %v2887_v47 = vrot.slane %v2885_v33, 5  ;;  %v2891_v48 = vrot.slane %v2889_v34, 4  ;;  %v2897_v49 = vrot.slane %v2895_v35, 5  ;;  %v11937_v53 = vrot.slane %v11871_v24, 9  ;;  %v1311_v56 = vpop.permute.xlu1 %1310  ;;  %v6117_v57 = vpop.permute.xlu0 %6116  ;;  %v12128_v21 = vld [vmem:[%s19052_s0 + $0xd0] sm:$0xf] }
 0x112   :  { %v1720_v52 = vsel %vm13677_vm2, %v1718_v40, %v1719_v26  ;;  %v3807_v54 = vrot.slane %v11872_v31, 5  ;;  %v3810_v55 = vrot.slane %v11873_v36, 5  ;;  %v2882_v7 = vor.u32 %v2881_v45, %v2878_v43  ;;  %1398 = vst.msk [vmem:[#allocation2 + $0x48] sm:$0xff] %vm1388_vm6, %v1311_v56  ;;  %v12129_v25 = vld [vmem:[%s19052_s0 + $0xd4] sm:$0x1] }
 0x113   :  { %1966 = vrot.lane.b32.xlu1 %v11585_v22, %s19070_s29  ;;  %6130 = vrot.lane.b32.xlu0 %v12351_v37, %s13583_s13  ;;  %v11584_v59 = vcombine.low %v1717_v38, %v1720_v52  ;;  %v2892_v41 = vor.u32 %v2891_v48, %v2887_v47  ;;  %v2852_v28 = vshrl.u32 %v11740_v44, 16  ;;  %6207 = vst.msk [vmem:[#allocation2 + $0x30] sm:$0xff] %vm6200_vm14, %v6117_v57  ;;  %v2855_v63 = vshll.u32 %v11740_v44, 16  ;;  %v377_v31 = vld [vmem:[%s19052_s0 + $0xd8] sm:$0xf] }
 0x114   :  { %v15254_v61 = vsel %vm13677_vm2, %v11937_v53, %v3807_v54  ;;  %v3809_v62 = vrot.slane %v3807_v54, 4  ;;  %v2861_v19 = vshll.u32 %v11741_v50, 16  ;;  %v2883_v1 = vrot.slane %v2882_v7, 4 }
 0x115   :  { %v2893_v2 = vrot.slane %v2892_v41, 4  ;;  %v2854_v3 = vrot.slane %v2852_v28, 4  ;;  %v2865_v42 = vshrl.u32 %v11741_v50, 16  ;;  %v2857_v9 = vrot.slane %v2855_v63, 5  ;;  %v1955_v12 = vpop.permute.xlu1 %1954  ;;  %v12124_v28 = vld [vmem:[%s19052_s0 + $0xc0] sm:$0xf] }
 0x116   :  { %v3811_v5 = vsel %vm13677_vm2, %v3809_v62, %v3810_v55  ;;  %v2863_v10 = vrot.slane %v2861_v19, 5  ;;  %v2871_v11 = vshll.u32 %v11742_v39, 16  ;;  %v6119_v13 = vpop.permute.xlu0 %6118  ;;  %v2888_v15 = vsel %vm13722_vm5, %v2883_v1, %v2887_v47  ;;  %2042 = vst.msk [vmem:[#allocation2 + $0x48] sm:$0xff] %vm2032_vm7, %v1955_v12  ;;  %v378_v47 = vld [vmem:[%s19052_s0 + $0xdc] sm:$0xf] }
 0x117   :  { %2320 = vrot.lane.b32.xlu1 %v13090_v51, %s13576_s21  ;;  %1964 = vrot.lane.b32.xlu0 %v11584_v59, %s19070_s29  ;;  %v2898_v16 = vsel %vm13722_vm5, %v2893_v2, %v2897_v49  ;;  %v11969_v18 = vcombine.low %v15254_v61, %v3811_v5  ;;  %v2867_v20 = vrot.slane %v2865_v42, 4  ;;  %6208 = vst.msk [vmem:[#allocation2 + $0x38] sm:$0xff] %vm6200_vm14, %v6119_v13  ;;  %v11936_v24 = vrot.slane %v11868_v60, 9  ;;  %v379_v55 = vld [vmem:[%s19052_s0 + $0xe0] sm:$0x1]  ;;  %v13094_v59 = vld [vmem:[%s19052_s0 + $0xcc] sm:$0xff]  }
 0x118   :  { %v11809_v22 = vcombine.low %v2888_v15, %v2898_v16  ;;  %v2858_v23 = vor.u32 %v2857_v9, %v2854_v3  ;;  %v2873_v6 = vrot.slane %v2871_v11, 5  ;;  %v3800_v27 = vrot.slane %v11869_v0, 5  ;;  %v12125_v1 = vld [vmem:[%s19052_s0 + $0xc4] sm:$0xf]  ;;  %v12126_v5 = vld [vmem:[%s19052_s0 + $0xc8] sm:$0x1] }
 0x119   :  { %v2868_v26 = vor.u32 %v2867_v20, %v2863_v10  ;;  %v3803_v29 = vrot.slane %v11870_v4, 5  ;;  %v4960_v30 = vshrl.u32 %v12127_v14, 16  ;;  %v4963_v33 = vshll.u32 %v12127_v14, 16  ;;  %v2309_v36 = vpop.permute.xlu1 %2308  ;;  %v380_v14 = vld [vmem:[%s19052_s0 + $0xe4] sm:$0xf] }
 0x11a   :  { %v2859_v32 = vrot.slane %v2858_v23, 4  ;;  %v4969_v34 = vshll.u32 %v12128_v21, 16  ;;  %v4973_v35 = vshrl.u32 %v12128_v21, 16  ;;  %v1953_v37 = vpop.permute.xlu0 %1952  ;;  %v6239_v38 = vld [vmem:[#allocation2 + $0x30] sm:$0xff]  ;;  %v3801_v43 = vsel %vm13677_vm2, %v11936_v24, %v3800_v27  ;;  %2396 = vst.msk [vmem:[#allocation2 + $0x48] sm:$0xff] %vm2386_vm9, %v2309_v36  ;;  %v13095_v24 = vld [vmem:[%s19052_s0 + $0xc0] sm:$0xff]  }
 0x11b   :  { %3409 = vrot.lane.b32.xlu1 %v11809_v22, %s13579_s18  ;;  %2318 = vrot.lane.b32.xlu0 %v13091_v17, %s13576_s21  ;;  %v2869_v40 = vrot.slane %v2868_v26, 4  ;;  %v3802_v44 = vrot.slane %v3800_v27, 4  ;;  %v4962_v45 = vrot.slane %v4960_v30, 4  ;;  %2041 = vst.msk [vmem:[#allocation2 + $0x40] sm:$0xff] %vm2032_vm7, %v1953_v37  ;;  %v4965_v49 = vrot.slane %v4963_v33, 5 }
 0x11c   :  { %v2864_v48 = vsel %vm13722_vm5, %v2859_v32, %v2863_v10  ;;  %v4971_v50 = vrot.slane %v4969_v34, 5  ;;  %v4975_v51 = vrot.slane %v4973_v35, 4  ;;  %12910 = vmatprep.mubr.msk.bf16.mxu0 %vm6316_vm0, %v6239_v38  ;;  %v4979_v54 = vshll.u32 %v12129_v25, 16  ;;  %v382_v30 = vld [vmem:[%s19052_s0 + $0xec] sm:$0x1] }
 0x11d   :  { %v2874_v52 = vsel %vm13722_vm5, %v2869_v40, %v2873_v6  ;;  %v3804_v53 = vsel %vm13677_vm2, %v3802_v44, %v3803_v29  ;;  %v813_v56 = vshrl.u32 %v377_v31, 16  ;;  %v4966_v41 = vor.u32 %v4965_v49, %v4962_v45  ;;  %v381_v6 = vld [vmem:[%s19052_s0 + $0xe8] sm:$0xf]  ;;  %v12252_v37 = vld [vmem:[%s19052_s0 + $0xc0] sm:$0xe] }
 0x11e   :  { %v11808_v57 = vcombine.low %v2864_v48, %v2874_v52  ;;  %v11968_v7 = vcombine.low %v3801_v43, %v3804_v53  ;;  %v4976_v39 = vor.u32 %v4975_v51, %v4971_v50  ;;  %v2307_v60 = vpop.permute.xlu0 %2306  ;;  %v6240_v61 = vld [vmem:[#allocation2 + $0x38] sm:$0xff]  ;;  %v4981_v62 = vrot.slane %v4979_v54, 5  ;;  %v12253_v45 = vld [vmem:[%s19052_s0 + $0xc4] sm:$0xf]  ;;  %v12254_v51 = vld [vmem:[%s19052_s0 + $0xc8] sm:$0x1] }
 0x11f   :  { %4050 = vrot.lane.b32.xlu1 %v11969_v18, %s13580_s24  ;;  %v815_v63 = vrot.slane %v813_v56, 4  ;;  %v816_v19 = vshll.u32 %v377_v31, 16  ;;  %v822_v0 = vshll.u32 %v378_v47, 16  ;;  %2395 = vst.msk [vmem:[#allocation2 + $0x40] sm:$0xff] %vm2386_vm9, %v2307_v60  ;;  %12911 = vmatmul.mubr.msk.bf16.gmra.mrb[12].mxu0 %vm6316_vm0, %v6240_v61  ;;  %v4967_v2 = vrot.slane %v4966_v41, 4  ;;  %v3398_v9 = vpop.permute.xlu1 %3397 }
 0x120   :  { %3407 = vrot.lane.b32.xlu0 %v11808_v57, %s13579_s18  ;;  %v4977_v3 = vrot.slane %v4976_v39, 4  ;;  %v826_v42 = vshrl.u32 %v378_v47, 16  ;;  %v832_v4 = vshll.u32 %v379_v55, 16  ;;  %v4936_v12 = vshrl.u32 %v12124_v28, 16  ;;  %3485 = vst.msk [vmem:[#allocation2 + $0x48] sm:$0xff] %vm3475_vm10, %v3398_v9 }
 0x121   :  { %v818_v10 = vrot.slane %v816_v19, 5  ;;  %v824_v11 = vrot.slane %v822_v0, 5  ;;  %v4939_v13 = vshll.u32 %v12124_v28, 16  ;;  %v4972_v15 = vsel %vm13722_vm5, %v4967_v2, %v4971_v50  ;;  %v1472_v56 = vld [vmem:[%s19052_s0 + $0xe4] sm:$0xe] }
 0x122   :  { %v4982_v16 = vsel %vm13722_vm5, %v4977_v3, %v4981_v62  ;;  %v828_v17 = vrot.slane %v826_v42, 4  ;;  %v834_v18 = vrot.slane %v832_v4, 5  ;;  %v4938_v22 = vrot.slane %v4936_v12, 4  ;;  %v1473_v57 = vld [vmem:[%s19052_s0 + $0xe8] sm:$0xf] }
 0x123   :  { %4404 = vrot.lane.b32.xlu1 %v13094_v59, %s13581_s16  ;;  %v12193_v20 = vcombine.low %v4972_v15, %v4982_v16  ;;  %v819_v21 = vor.u32 %v818_v10, %v815_v63  ;;  %v4941_v23 = vrot.slane %v4939_v13, 5  ;;  %v4945_v26 = vshll.u32 %v12125_v1, 16  ;;  %v4039_v31 = vpop.permute.xlu1 %4038  ;;  %v1474_v61 = vld [vmem:[%s19052_s0 + $0xec] sm:$0x1]  ;;  %v12256_v2 = vld [vmem:[%s19052_s0 + $0xd0] sm:$0xf] }
 0x124   :  { %4048 = vrot.lane.b32.xlu0 %v11968_v7, %s13580_s24  ;;  %v829_v25 = vor.u32 %v828_v17, %v824_v11  ;;  %v4949_v27 = vshrl.u32 %v12125_v1, 16  ;;  %v4955_v29 = vshll.u32 %v12126_v5, 16  ;;  %v3396_v32 = vpop.permute.xlu0 %3395  ;;  %v837_v35 = vshrl.u32 %v380_v14, 16  ;;  %4126 = vst.msk [vmem:[#allocation2 + $0x48] sm:$0xff] %vm4116_vm11, %v4039_v31  ;;  %v12255_v1 = vld [vmem:[%s19052_s0 + $0xcc] sm:$0xe] }
 0x125   :  { %v820_v33 = vrot.slane %v819_v21, 4  ;;  %v4942_v34 = vor.u32 %v4941_v23, %v4938_v22  ;;  %v840_v36 = vshll.u32 %v380_v14, 16  ;;  %3484 = vst.msk [vmem:[#allocation2 + $0x40] sm:$0xff] %vm3475_vm10, %v3396_v32  ;;  %v4947_v40 = vrot.slane %v4945_v26, 5  ;;  %v12257_v13 = vld [vmem:[%s19052_s0 + $0xd4] sm:$0x1] }
 0x126   :  { %v830_v38 = vrot.slane %v829_v25, 4  ;;  %v4951_v43 = vrot.slane %v4949_v27, 4  ;;  %v4957_v44 = vrot.slane %v4955_v29, 5  ;;  %v839_v49 = vrot.slane %v837_v35, 4  ;;  %v1469_v14 = vld [vmem:[%s19052_s0 + $0xd8] sm:$0xe] }
 0x127   :  { %5493 = vrot.lane.b32.xlu1 %v12193_v20, %s13582_s25  ;;  %v825_v47 = vsel %vm13722_vm5, %v820_v33, %v824_v11  ;;  %v4943_v48 = vrot.slane %v4942_v34, 4  ;;  %v842_v50 = vrot.slane %v840_v36, 5  ;;  %v846_v54 = vshll.u32 %v381_v6, 16  ;;  %v4393_v59 = vpop.permute.xlu1 %4392  ;;  %v1470_v22 = vld [vmem:[%s19052_s0 + $0xdc] sm:$0xf] }
 0x128   :  { %4402 = vrot.lane.b32.xlu0 %v13095_v24, %s13581_s16  ;;  %v835_v52 = vsel %vm13722_vm5, %v830_v38, %v834_v18  ;;  %v4952_v53 = vor.u32 %v4951_v43, %v4947_v40  ;;  %v850_v55 = vshrl.u32 %v381_v6, 16  ;;  %v4037_v7 = vpop.permute.xlu0 %4036  ;;  %v856_v60 = vshll.u32 %v382_v30, 16  ;;  %4480 = vst.msk [vmem:[#allocation2 + $0x48] sm:$0xff] %vm4470_vm12, %v4393_v59  ;;  %v1471_v23 = vld [vmem:[%s19052_s0 + $0xe0] sm:$0x1]  ;;  %v13116_v24 = vld [vmem:[%s19052_s0 + $0xd8] sm:$0xff]  }
 0x129   :  { %v11522_v41 = vcombine.low %v825_v47, %v835_v52  ;;  %v4948_v39 = vsel %vm13722_vm5, %v4943_v48, %v4947_v40  ;;  %v843_v28 = vor.u32 %v842_v50, %v839_v49  ;;  %4125 = vst.msk [vmem:[#allocation2 + $0x40] sm:$0xff] %vm4116_vm11, %v4037_v7  ;;  %v848_v63 = vrot.slane %v846_v54, 5  ;;  %v11749_v6 = vld [vmem:[%s19052_s0 + $0xf0] sm:$0xf]  ;;  %v11750_v30 = vld [vmem:[%s19052_s0 + $0xf4] sm:$0xf] }
 0x12a   :  { %v4953_v62 = vrot.slane %v4952_v53, 4  ;;  %v852_v19 = vrot.slane %v850_v55, 4  ;;  %v12320_v0 = vrot.slane %v12252_v37, 9  ;;  %v858_v42 = vrot.slane %v856_v60, 5  ;;  %v11751_v35 = vld [vmem:[%s19052_s0 + $0xf8] sm:$0x1] }
 0x12b   :  { %1324 = vrot.lane.b32.xlu1 %v11522_v41, %s13578_s27  ;;  %v844_v3 = vrot.slane %v843_v28, 4  ;;  %v5884_v4 = vrot.slane %v12253_v45, 5  ;;  %v5887_v5 = vrot.slane %v12254_v51, 5  ;;  %v11555_v11 = vrot.slane %v1472_v56, 9  ;;  %v5482_v15 = vpop.permute.xlu1 %5481  ;;  %313 = vst.msk [vmem:[#allocation2 + $0x80] sm:$0xff] %vm296_vm8, %v13116_v24  ;;  %v13117_v43 = vld [vmem:[%s19052_s0 + $0xe4] sm:$0xff]  }
 0x12c   :  { %v4958_v9 = vsel %vm13722_vm5, %v4953_v62, %v4957_v44  ;;  %v853_v10 = vor.u32 %v852_v19, %v848_v63  ;;  %v1737_v12 = vrot.slane %v1473_v57, 5  ;;  %v4391_v16 = vpop.permute.xlu0 %4390  ;;  %5569 = vst.msk [vmem:[#allocation2 + $0x48] sm:$0xff] %vm5559_vm13, %v5482_v15  ;;  %v1740_v29 = vrot.slane %v1474_v61, 5  ;;  %v11877_v50 = vld [vmem:[%s19052_s0 + $0xf0] sm:$0xe] }
 0x12d   :  { %v12192_v17 = vcombine.low %v4948_v39, %v4958_v9  ;;  %v849_v18 = vsel %vm13722_vm5, %v844_v3, %v848_v63  ;;  %v5885_v20 = vsel %vm13677_vm2, %v12320_v0, %v5884_v4  ;;  %v5886_v21 = vrot.slane %v5884_v4, 4  ;;  %4479 = vst.msk [vmem:[#allocation2 + $0x40] sm:$0xff] %vm4470_vm12, %v4391_v16  ;;  %v11878_v55 = vld [vmem:[%s19052_s0 + $0xf4] sm:$0xf]  ;;  %v11879_v41 = vld [vmem:[%s19052_s0 + $0xf8] sm:$0x1] }
 0x12e   :  { %v854_v25 = vrot.slane %v853_v10, 4  ;;  %v1738_v26 = vsel %vm13677_vm2, %v11555_v11, %v1737_v12  ;;  %v1739_v27 = vrot.slane %v1737_v12, 4  ;;  %v12321_v32 = vrot.slane %v12255_v1, 9  ;;  %314 = vst.msk [vmem:[#allocation2 + $0x88] sm:$0xff] %vm296_vm8, %v13117_v43  ;;  %v11746_v62 = vld [vmem:[%s19052_s0 + $0xe4] sm:$0xf] }
 0x12f   :  { %5491 = vrot.lane.b32.xlu0 %v12192_v17, %s13582_s25  ;;  %v5888_v31 = vsel %vm13677_vm2, %v5886_v21, %v5887_v5  ;;  %v5891_v33 = vrot.slane %v12256_v2, 5  ;;  %v5894_v34 = vrot.slane %v12257_v13, 5  ;;  %v11554_v40 = vrot.slane %v1469_v14, 9  ;;  %v11747_v3 = vld [vmem:[%s19052_s0 + $0xe8] sm:$0xf] }
 0x130   :  { %v859_v36 = vsel %vm13722_vm5, %v854_v25, %v858_v42  ;;  %v12352_v37 = vcombine.low %v5885_v20, %v5888_v31  ;;  %v1741_v38 = vsel %vm13677_vm2, %v1739_v27, %v1740_v29  ;;  %v1313_v49 = vpop.permute.xlu1 %1312  ;;  %v1730_v51 = vrot.slane %v1470_v22, 5  ;;  %v13096_v42 = vld [vmem:[%s19052_s0 + $0xf0] sm:$0xff]   ;;  %v11748_v14 = vld [vmem:[%s19052_s0 + $0xec] sm:$0x1]  ;;  %v11874_v16 = vld [vmem:[%s19052_s0 + $0xe4] sm:$0xe] }
 0x131   :  { %v11523_v44 = vcombine.low %v849_v18, %v859_v36  ;;  %v11587_v45 = vcombine.low %v1738_v26, %v1741_v38  ;;  %v5892_v47 = vsel %vm13677_vm2, %v12321_v32, %v5891_v33  ;;  %v5893_v48 = vrot.slane %v5891_v33, 4  ;;  %1399 = vst.msk [vmem:[#allocation2 + $0x50] sm:$0xff] %vm1388_vm6, %v1313_v49  ;;  %v11875_v22 = vld [vmem:[%s19052_s0 + $0xe8] sm:$0xf]  ;;  %v11876_v29 = vld [vmem:[%s19052_s0 + $0xec] sm:$0x1] }
 0x132   :  { %v1733_v52 = vrot.slane %v1471_v23, 5  ;;  %v2924_v53 = vshrl.u32 %v11749_v6, 16  ;;  %v2927_v54 = vshll.u32 %v11749_v6, 16  ;;  %v2933_v57 = vshll.u32 %v11750_v30, 16  ;;  %v12134_v43 = vld [vmem:[%s19052_s0 + $0x100] sm:$0xf] }
 0x133   :  { %1326 = vrot.lane.b32.xlu1 %v11523_v44, %s13578_s27  ;;  %6132 = vrot.lane.b32.xlu0 %v12352_v37, %s13583_s13  ;;  %v5895_v56 = vsel %vm13677_vm2, %v5893_v48, %v5894_v34  ;;  %v2937_v59 = vshrl.u32 %v11750_v30, 16  ;;  %v2943_v7 = vshll.u32 %v11751_v35, 16  ;;  %v1731_v28 = vsel %vm13677_vm2, %v11554_v40, %v1730_v51  ;;  %v12133_v34 = vld [vmem:[%s19052_s0 + $0xfc] sm:$0xf]  ;;  %v13097_v37 = vld [vmem:[%s19052_s0 + $0xe4] sm:$0xff]  }
 0x134   :  { %v12353_v39 = vcombine.low %v5892_v47, %v5895_v56  ;;  %v1732_v60 = vrot.slane %v1730_v51, 4  ;;  %v2926_v61 = vrot.slane %v2924_v53, 4  ;;  %v2929_v63 = vrot.slane %v2927_v54, 5  ;;  %v12135_v49 = vld [vmem:[%s19052_s0 + $0x104] sm:$0x1] }
 0x135   :  { %v2935_v19 = vrot.slane %v2933_v57, 5  ;;  %v2939_v0 = vrot.slane %v2937_v59, 4  ;;  %v2945_v1 = vrot.slane %v2943_v7, 5  ;;  %v5480_v2 = vpop.permute.xlu0 %5479  ;;  %v11939_v5 = vrot.slane %v11877_v50, 9  ;;  %v383_v56 = vld [vmem:[%s19052_s0 + $0xf0] sm:$0xf] }
 0x136   :  { %v1734_v4 = vsel %vm13677_vm2, %v1732_v60, %v1733_v52  ;;  %5568 = vst.msk [vmem:[#allocation2 + $0x40] sm:$0xff] %vm5559_vm13, %v5480_v2  ;;  %v3821_v9 = vrot.slane %v11878_v55, 5  ;;  %v3824_v10 = vrot.slane %v11879_v41, 5  ;;  %v2930_v12 = vor.u32 %v2929_v63, %v2926_v61 }
 0x137   :  { %1970 = vrot.lane.b32.xlu1 %v11587_v45, %s19070_s29  ;;  %6134 = vrot.lane.b32.xlu0 %v12353_v39, %s13583_s13  ;;  %v11586_v11 = vcombine.low %v1731_v28, %v1734_v4  ;;  %v2940_v13 = vor.u32 %v2939_v0, %v2935_v19  ;;  %v2900_v15 = vshrl.u32 %v11746_v62, 16  ;;  %v2903_v20 = vshll.u32 %v11746_v62, 16 }
 0x138   :  { %v15465_v17 = vsel %vm13677_vm2, %v11939_v5, %v3821_v9  ;;  %v3823_v18 = vrot.slane %v3821_v9, 4  ;;  %v2909_v21 = vshll.u32 %v11747_v3, 16  ;;  %v2931_v23 = vrot.slane %v2930_v12, 4 }
 0x139   :  { %v2941_v6 = vrot.slane %v2940_v13, 4  ;;  %v2902_v24 = vrot.slane %v2900_v15, 4  ;;  %v2913_v25 = vshrl.u32 %v11747_v3, 16  ;;  %v1315_v26 = vpop.permute.xlu1 %1314  ;;  %v6121_v27 = vpop.permute.xlu0 %6120  ;;  %v2905_v31 = vrot.slane %v2903_v20, 5  ;;  %v13100_v13 = vld [vmem:[%s19052_s0 + $0xfc] sm:$0xff]  }
 0x13a   :  { %v3825_v30 = vsel %vm13677_vm2, %v3823_v18, %v3824_v10  ;;  %v2911_v32 = vrot.slane %v2909_v21, 5  ;;  %v2919_v33 = vshll.u32 %v11748_v14, 16  ;;  %1400 = vst.msk [vmem:[#allocation2 + $0x58] sm:$0xff] %vm1388_vm6, %v1315_v26  ;;  %v2936_v35 = vsel %vm13722_vm5, %v2931_v23, %v2935_v19  ;;  %v385_v10 = vld [vmem:[%s19052_s0 + $0xf8] sm:$0x1] }
 0x13b   :  { %6209 = vst.msk [vmem:[#allocation2 + $0x40] sm:$0xff] %vm6200_vm14, %v6121_v27  ;;  %2324 = vrot.lane.b32.xlu1 %v13096_v42, %s13576_s21  ;;  %1968 = vrot.lane.b32.xlu0 %v11586_v11, %s19070_s29  ;;  %v2946_v36 = vsel %vm13722_vm5, %v2941_v6, %v2945_v1  ;;  %v11971_v38 = vcombine.low %v15465_v17, %v3825_v30  ;;  %v2915_v40 = vrot.slane %v2913_v25, 4  ;;  %v11938_v48 = vrot.slane %v11874_v16, 9  ;;  %v384_v1 = vld [vmem:[%s19052_s0 + $0xf4] sm:$0xf] }
 0x13c   :  { %v11811_v44 = vcombine.low %v2936_v35, %v2946_v36  ;;  %v2906_v45 = vor.u32 %v2905_v31, %v2902_v24  ;;  %v2921_v47 = vrot.slane %v2919_v33, 5  ;;  %v3814_v51 = vrot.slane %v11875_v22, 5  ;;  %v12130_v17 = vld [vmem:[%s19052_s0 + $0xf0] sm:$0xf]  ;;  %v12131_v23 = vld [vmem:[%s19052_s0 + $0xf4] sm:$0xf] }
 0x13d   :  { %v2916_v50 = vor.u32 %v2915_v40, %v2911_v32  ;;  %v3817_v52 = vrot.slane %v11876_v29, 5  ;;  %v1959_v53 = vpop.permute.xlu1 %1958  ;;  %v6123_v54 = vpop.permute.xlu0 %6122  ;;  %v5008_v55 = vshrl.u32 %v12133_v34, 16  ;;  %v5011_v59 = vshll.u32 %v12133_v34, 16  ;;  %v12132_v6 = vld [vmem:[%s19052_s0 + $0xf8] sm:$0x1]  ;;  %v13101_v40 = vld [vmem:[%s19052_s0 + $0xf0] sm:$0xff]  }
 0x13e   :  { %v2907_v57 = vrot.slane %v2906_v45, 4  ;;  %2044 = vst.msk [vmem:[#allocation2 + $0x58] sm:$0xff] %vm2032_vm7, %v1959_v53  ;;  %v5017_v7 = vshll.u32 %v12134_v43, 16  ;;  %v5021_v41 = vshrl.u32 %v12134_v43, 16  ;;  %v3815_v28 = vsel %vm13677_vm2, %v11938_v48, %v3814_v51  ;;  %v386_v29 = vld [vmem:[%s19052_s0 + $0xfc] sm:$0xf] }
 0x13f   :  { %6210 = vst.msk [vmem:[#allocation2 + $0x48] sm:$0xff] %vm6200_vm14, %v6123_v54  ;;  %3413 = vrot.lane.b32.xlu1 %v11811_v44, %s13579_s18  ;;  %2322 = vrot.lane.b32.xlu0 %v13097_v37, %s13576_s21  ;;  %v2917_v39 = vrot.slane %v2916_v50, 4  ;;  %v3816_v60 = vrot.slane %v3814_v51, 4  ;;  %v5010_v61 = vrot.slane %v5008_v55, 4  ;;  %v5013_v63 = vrot.slane %v5011_v59, 5 }
 0x140   :  { %v2912_v62 = vsel %vm13722_vm5, %v2907_v57, %v2911_v32  ;;  %v5019_v19 = vrot.slane %v5017_v7, 5  ;;  %v5023_v0 = vrot.slane %v5021_v41, 4  ;;  %v5027_v42 = vshll.u32 %v12135_v49, 16  ;;  %v387_v50 = vld [vmem:[%s19052_s0 + $0x100] sm:$0xf] }
 0x141   :  { %v2922_v2 = vsel %vm13722_vm5, %v2917_v39, %v2921_v47  ;;  %v3818_v3 = vsel %vm13677_vm2, %v3816_v60, %v3817_v52  ;;  %v2313_v4 = vpop.permute.xlu1 %2312  ;;  %v1957_v5 = vpop.permute.xlu0 %1956  ;;  %v861_v11 = vshrl.u32 %v383_v56, 16  ;;  %v5014_v15 = vor.u32 %v5013_v63, %v5010_v61  ;;  %v388_v55 = vld [vmem:[%s19052_s0 + $0x104] sm:$0x1]  ;;  %v12258_v41 = vld [vmem:[%s19052_s0 + $0xf0] sm:$0xe] }
 0x142   :  { %v6241_v9 = vld [vmem:[#allocation2 + $0x40] sm:$0xff]  ;;  %v11810_v12 = vcombine.low %v2912_v62, %v2922_v2  ;;  %v11970_v14 = vcombine.low %v3815_v28, %v3818_v3  ;;  %v5024_v16 = vor.u32 %v5023_v0, %v5019_v19  ;;  %2398 = vst.msk [vmem:[#allocation2 + $0x58] sm:$0xff] %vm2386_vm9, %v2313_v4  ;;  %v5029_v18 = vrot.slane %v5027_v42, 5  ;;  %v12259_v63 = vld [vmem:[%s19052_s0 + $0xf4] sm:$0xf] }
 0x143   :  { %2043 = vst.msk [vmem:[#allocation2 + $0x50] sm:$0xff] %vm2032_vm7, %v1957_v5  ;;  %12914 = vmatprep.mubr.msk.bf16.mxu0 %vm6316_vm0, %v6241_v9  ;;  %4054 = vrot.lane.b32.xlu1 %v11971_v38, %s13580_s24  ;;  %v863_v20 = vrot.slane %v861_v11, 4  ;;  %v864_v21 = vshll.u32 %v383_v56, 16  ;;  %v870_v22 = vshll.u32 %v384_v1, 16  ;;  %v5015_v24 = vrot.slane %v5014_v15, 4 }
 0x144   :  { %3411 = vrot.lane.b32.xlu0 %v11810_v12, %s13579_s18  ;;  %v5025_v25 = vrot.slane %v5024_v16, 4  ;;  %v874_v26 = vshrl.u32 %v384_v1, 16  ;;  %v880_v27 = vshll.u32 %v385_v10, 16  ;;  %v4984_v32 = vshrl.u32 %v12130_v17, 16  ;;  %v1478_v4 = vld [vmem:[%s19052_s0 + $0xfc] sm:$0xe] }
 0x145   :  { %v866_v30 = vrot.slane %v864_v21, 5  ;;  %v872_v31 = vrot.slane %v870_v22, 5  ;;  %v4987_v33 = vshll.u32 %v12130_v17, 16  ;;  %v3402_v34 = vpop.permute.xlu1 %3401  ;;  %v5020_v37 = vsel %vm13722_vm5, %v5015_v24, %v5019_v19  ;;  %v12260_v19 = vld [vmem:[%s19052_s0 + $0xf8] sm:$0x1] }
 0x146   :  { %v2311_v35 = vpop.permute.xlu0 %2310  ;;  %v6242_v36 = vld [vmem:[#allocation2 + $0x48] sm:$0xff]  ;;  %v5030_v38 = vsel %vm13722_vm5, %v5025_v25, %v5029_v18  ;;  %v876_v43 = vrot.slane %v874_v26, 4  ;;  %v882_v44 = vrot.slane %v880_v27, 5  ;;  %3487 = vst.msk [vmem:[#allocation2 + $0x58] sm:$0xff] %vm3475_vm10, %v3402_v34  ;;  %v4986_v48 = vrot.slane %v4984_v32, 4 }
 0x147   :  { %2397 = vst.msk [vmem:[#allocation2 + $0x50] sm:$0xff] %vm2386_vm9, %v2311_v35  ;;  %12915 = vmatmul.mubr.msk.bf16.gmra.mrb[16].mxu0 %vm6316_vm0, %v6242_v36  ;;  %4408 = vrot.lane.b32.xlu1 %v13100_v13, %s13581_s16  ;;  %v12195_v45 = vcombine.low %v5020_v37, %v5030_v38  ;;  %v867_v47 = vor.u32 %v866_v30, %v863_v20  ;;  %v4989_v49 = vrot.slane %v4987_v33, 5  ;;  %v4993_v52 = vshll.u32 %v12131_v23, 16  ;;  %v1479_v12 = vld [vmem:[%s19052_s0 + $0x100] sm:$0xf] }
 0x148   :  { %4052 = vrot.lane.b32.xlu0 %v11970_v14, %s13580_s24  ;;  %v877_v51 = vor.u32 %v876_v43, %v872_v31  ;;  %v4997_v53 = vshrl.u32 %v12131_v23, 16  ;;  %v5003_v54 = vshll.u32 %v12132_v6, 16  ;;  %v885_v59 = vshrl.u32 %v386_v29, 16  ;;  %v1480_v17 = vld [vmem:[%s19052_s0 + $0x104] sm:$0x1] }
 0x149   :  { %v868_v56 = vrot.slane %v867_v47, 4  ;;  %v4990_v57 = vor.u32 %v4989_v49, %v4986_v48  ;;  %v888_v7 = vshll.u32 %v386_v29, 16  ;;  %v4043_v39 = vpop.permute.xlu1 %4042  ;;  %v4995_v60 = vrot.slane %v4993_v52, 5  ;;  %v12261_v6 = vld [vmem:[%s19052_s0 + $0xfc] sm:$0xe] }
 0x14a   :  { %v878_v28 = vrot.slane %v877_v51, 4  ;;  %v4999_v61 = vrot.slane %v4997_v53, 4  ;;  %v5005_v62 = vrot.slane %v5003_v54, 5  ;;  %4128 = vst.msk [vmem:[#allocation2 + $0x58] sm:$0xff] %vm4116_vm11, %v4043_v39  ;;  %v3400_v0 = vpop.permute.xlu0 %3399  ;;  %v887_v3 = vrot.slane %v885_v59, 4 }
 0x14b   :  { %5497 = vrot.lane.b32.xlu1 %v12195_v45, %s13582_s25  ;;  %v873_v1 = vsel %vm13722_vm5, %v868_v56, %v872_v31  ;;  %v4991_v2 = vrot.slane %v4990_v57, 4  ;;  %v890_v42 = vrot.slane %v888_v7, 5  ;;  %3486 = vst.msk [vmem:[#allocation2 + $0x50] sm:$0xff] %vm3475_vm10, %v3400_v0  ;;  %v894_v10 = vshll.u32 %v387_v50, 16  ;;  %v12262_v30 = vld [vmem:[%s19052_s0 + $0x100] sm:$0xf] }
 0x14c   :  { %4406 = vrot.lane.b32.xlu0 %v13101_v40, %s13581_s16  ;;  %v883_v5 = vsel %vm13722_vm5, %v878_v28, %v882_v44  ;;  %v5000_v9 = vor.u32 %v4999_v61, %v4995_v60  ;;  %v898_v11 = vshrl.u32 %v387_v50, 16  ;;  %v904_v16 = vshll.u32 %v388_v55, 16  ;;  %v12263_v35 = vld [vmem:[%s19052_s0 + $0x104] sm:$0x1]  ;;  %v1475_v36 = vld [vmem:[%s19052_s0 + $0xf0] sm:$0xe] }
 0x14d   :  { %v11524_v13 = vcombine.low %v873_v1, %v883_v5  ;;  %v4996_v14 = vsel %vm13722_vm5, %v4991_v2, %v4995_v60  ;;  %v891_v15 = vor.u32 %v890_v42, %v887_v3  ;;  %v4397_v18 = vpop.permute.xlu1 %4396  ;;  %v896_v21 = vrot.slane %v894_v10, 5  ;;  %v1476_v44 = vld [vmem:[%s19052_s0 + $0xf4] sm:$0xf]  ;;  %v1477_v45 = vld [vmem:[%s19052_s0 + $0xf8] sm:$0x1] }
 0x14e   :  { %v5001_v20 = vrot.slane %v5000_v9, 4  ;;  %v900_v22 = vrot.slane %v898_v11, 4  ;;  %v12322_v23 = vrot.slane %v12258_v41, 9  ;;  %4482 = vst.msk [vmem:[#allocation2 + $0x58] sm:$0xff] %vm4470_vm12, %v4397_v18  ;;  %v4041_v24 = vpop.permute.xlu0 %4040  ;;  %v906_v26 = vrot.slane %v904_v16, 5  ;;  %v13122_v61 = vld [vmem:[%s19052_s0 + $0xf0] sm:$0xff]  }
 0x14f   :  { %1328 = vrot.lane.b32.xlu1 %v11524_v13, %s13578_s27  ;;  %v892_v25 = vrot.slane %v891_v15, 4  ;;  %v5898_v27 = vrot.slane %v12259_v63, 5  ;;  %v5901_v29 = vrot.slane %v12260_v19, 5  ;;  %4127 = vst.msk [vmem:[#allocation2 + $0x50] sm:$0xff] %vm4116_vm11, %v4041_v24  ;;  %v11557_v33 = vrot.slane %v1478_v4, 9 }
 0x150   :  { %v5006_v31 = vsel %vm13722_vm5, %v5001_v20, %v5005_v62  ;;  %v901_v32 = vor.u32 %v900_v22, %v896_v21  ;;  %v1751_v34 = vrot.slane %v1479_v12, 5  ;;  %v11755_v48 = vld [vmem:[%s19052_s0 + $0x108] sm:$0xf]  ;;  %v1754_v52 = vrot.slane %v1480_v17, 5  ;;  %v11756_v54 = vld [vmem:[%s19052_s0 + $0x10c] sm:$0xf] }
 0x151   :  { %v12194_v37 = vcombine.low %v4996_v14, %v5006_v31  ;;  %v897_v38 = vsel %vm13722_vm5, %v892_v25, %v896_v21  ;;  %v5899_v40 = vsel %vm13677_vm2, %v12322_v23, %v5898_v27  ;;  %v5900_v43 = vrot.slane %v5898_v27, 4  ;;  %v5486_v47 = vpop.permute.xlu1 %5485  ;;  %v11757_v60 = vld [vmem:[%s19052_s0 + $0x110] sm:$0x1]  ;;  %v11883_v2 = vld [vmem:[%s19052_s0 + $0x108] sm:$0xe]  ;;  %315 = vst.msk [vmem:[#allocation2 + $0x90] sm:$0xff] %vm296_vm8, %v13122_v61 }
 0x152   :  { %v902_v49 = vrot.slane %v901_v32, 4  ;;  %v1752_v50 = vsel %vm13677_vm2, %v11557_v33, %v1751_v34  ;;  %v1753_v51 = vrot.slane %v1751_v34, 4  ;;  %5571 = vst.msk [vmem:[#allocation2 + $0x58] sm:$0xff] %vm5559_vm13, %v5486_v47  ;;  %v4395_v53 = vpop.permute.xlu0 %4394  ;;  %v12323_v56 = vrot.slane %v12261_v6, 9  ;;  %v11884_v9 = vld [vmem:[%s19052_s0 + $0x10c] sm:$0xf] }
 0x153   :  { %5495 = vrot.lane.b32.xlu0 %v12194_v37, %s13582_s25  ;;  %v5902_v55 = vsel %vm13677_vm2, %v5900_v43, %v5901_v29  ;;  %v5905_v57 = vrot.slane %v12262_v30, 5  ;;  %v5908_v59 = vrot.slane %v12263_v35, 5  ;;  %4481 = vst.msk [vmem:[#allocation2 + $0x50] sm:$0xff] %vm4470_vm12, %v4395_v53  ;;  %v11556_v28 = vrot.slane %v1475_v36, 9  ;;  %v11885_v14 = vld [vmem:[%s19052_s0 + $0x110] sm:$0x1] }
 0x154   :  { %v907_v7 = vsel %vm13722_vm5, %v902_v49, %v906_v26  ;;  %v12354_v41 = vcombine.low %v5899_v40, %v5902_v55  ;;  %v1755_v39 = vsel %vm13677_vm2, %v1753_v51, %v1754_v52  ;;  %v1744_v3 = vrot.slane %v1476_v44, 5  ;;  %v11752_v20 = vld [vmem:[%s19052_s0 + $0xfc] sm:$0xf]  ;;  %v11753_v25 = vld [vmem:[%s19052_s0 + $0x100] sm:$0xf]  ;;  %v13102_v26 = vld [vmem:[%s19052_s0 + $0x108] sm:$0xff]  }
 0x155   :  { %v11525_v62 = vcombine.low %v897_v38, %v907_v7  ;;  %v11589_v63 = vcombine.low %v1752_v50, %v1755_v39  ;;  %v5906_v19 = vsel %vm13677_vm2, %v12323_v56, %v5905_v57  ;;  %v5907_v0 = vrot.slane %v5905_v57, 4  ;;  %v1317_v1 = vpop.permute.xlu1 %1316  ;;  %v13123_v32 = vld [vmem:[%s19052_s0 + $0xfc] sm:$0xff]   ;;  %v11754_v36 = vld [vmem:[%s19052_s0 + $0x104] sm:$0x1]  ;;  %v12139_v7 = vld [vmem:[%s19052_s0 + $0x114] sm:$0xf] }
 0x156   :  { %v1747_v42 = vrot.slane %v1477_v45, 5  ;;  %v2972_v4 = vshrl.u32 %v11755_v48, 16  ;;  %v2975_v5 = vshll.u32 %v11755_v48, 16  ;;  %1401 = vst.msk [vmem:[#allocation2 + $0x60] sm:$0xff] %vm1388_vm6, %v1317_v1  ;;  %v2981_v11 = vshll.u32 %v11756_v54, 16 }
 0x157   :  { %1330 = vrot.lane.b32.xlu1 %v11525_v62, %s13578_s27  ;;  %6136 = vrot.lane.b32.xlu0 %v12354_v41, %s13583_s13  ;;  %v5909_v10 = vsel %vm13677_vm2, %v5907_v0, %v5908_v59  ;;  %v2985_v12 = vshrl.u32 %v11756_v54, 16  ;;  %v2991_v13 = vshll.u32 %v11757_v60, 16  ;;  %v1745_v16 = vsel %vm13677_vm2, %v11556_v28, %v1744_v3  ;;  %v11880_v38 = vld [vmem:[%s19052_s0 + $0xfc] sm:$0xe]  ;;  %v11881_v47 = vld [vmem:[%s19052_s0 + $0x100] sm:$0xf] }
 0x158   :  { %v12355_v15 = vcombine.low %v5906_v19, %v5909_v10  ;;  %v1746_v17 = vrot.slane %v1744_v3, 4  ;;  %v2974_v18 = vrot.slane %v2972_v4, 4  ;;  %v2977_v21 = vrot.slane %v2975_v5, 5  ;;  %316 = vst.msk [vmem:[#allocation2 + $0x98] sm:$0xff] %vm296_vm8, %v13123_v32  ;;  %v11882_v54 = vld [vmem:[%s19052_s0 + $0x104] sm:$0x1] }
 0x159   :  { %v2983_v22 = vrot.slane %v2981_v11, 5  ;;  %v2987_v23 = vrot.slane %v2985_v12, 4  ;;  %v2993_v6 = vrot.slane %v2991_v13, 5  ;;  %v5484_v24 = vpop.permute.xlu0 %5483  ;;  %v11941_v29 = vrot.slane %v11883_v2, 9  ;;  %v13103_v28 = vld [vmem:[%s19052_s0 + $0xfc] sm:$0xff]  }
 0x15a   :  { %v1748_v27 = vsel %vm13677_vm2, %v1746_v17, %v1747_v42  ;;  %5570 = vst.msk [vmem:[#allocation2 + $0x50] sm:$0xff] %vm5559_vm13, %v5484_v24  ;;  %v3835_v30 = vrot.slane %v11884_v9, 5  ;;  %v3838_v31 = vrot.slane %v11885_v14, 5  ;;  %v2978_v34 = vor.u32 %v2977_v21, %v2974_v18  ;;  %v12140_v62 = vld [vmem:[%s19052_s0 + $0x118] sm:$0xf] }
 0x15b   :  { %1974 = vrot.lane.b32.xlu1 %v11589_v63, %s19070_s29  ;;  %6138 = vrot.lane.b32.xlu0 %v12355_v15, %s13583_s13  ;;  %v11588_v33 = vcombine.low %v1745_v16, %v1748_v27  ;;  %v2988_v35 = vor.u32 %v2987_v23, %v2983_v22  ;;  %v2948_v37 = vshrl.u32 %v11752_v20, 16  ;;  %v2951_v44 = vshll.u32 %v11752_v20, 16  ;;  %v12141_v2 = vld [vmem:[%s19052_s0 + $0x11c] sm:$0x1]  ;;  %v389_v3 = vld [vmem:[%s19052_s0 + $0x108] sm:$0xf] }
 0x15c   :  { %v15677_v40 = vsel %vm13677_vm2, %v11941_v29, %v3835_v30  ;;  %v3837_v43 = vrot.slane %v3835_v30, 4  ;;  %v2957_v45 = vshll.u32 %v11753_v25, 16  ;;  %v2979_v48 = vrot.slane %v2978_v34, 4  ;;  %v390_v24 = vld [vmem:[%s19052_s0 + $0x10c] sm:$0xf] }
 0x15d   :  { %v2989_v49 = vrot.slane %v2988_v35, 4  ;;  %v2950_v50 = vrot.slane %v2948_v37, 4  ;;  %v2961_v51 = vshrl.u32 %v11753_v25, 16  ;;  %v1319_v52 = vpop.permute.xlu1 %1318  ;;  %v6125_v53 = vpop.permute.xlu0 %6124  ;;  %v2953_v56 = vrot.slane %v2951_v44, 5  ;;  %v391_v32 = vld [vmem:[%s19052_s0 + $0x110] sm:$0x1] }
 0x15e   :  { %v3839_v55 = vsel %vm13677_vm2, %v3837_v43, %v3838_v31  ;;  %v2959_v57 = vrot.slane %v2957_v45, 5  ;;  %v2967_v59 = vshll.u32 %v11754_v36, 16  ;;  %1402 = vst.msk [vmem:[#allocation2 + $0x68] sm:$0xff] %vm1388_vm6, %v1319_v52  ;;  %v2984_v41 = vsel %vm13722_vm5, %v2979_v48, %v2983_v22  ;;  %v13106_v35 = vld [vmem:[%s19052_s0 + $0x114] sm:$0xff]   ;;  %v12137_v48 = vld [vmem:[%s19052_s0 + $0x10c] sm:$0xf] }
 0x15f   :  { %6211 = vst.msk [vmem:[#allocation2 + $0x50] sm:$0xff] %vm6200_vm14, %v6125_v53  ;;  %2328 = vrot.lane.b32.xlu1 %v13102_v26, %s13576_s21  ;;  %1972 = vrot.lane.b32.xlu0 %v11588_v33, %s19070_s29  ;;  %v2994_v39 = vsel %vm13722_vm5, %v2989_v49, %v2993_v6  ;;  %v11973_v60 = vcombine.low %v15677_v40, %v3839_v55  ;;  %v2963_v61 = vrot.slane %v2961_v51, 4  ;;  %v11940_v1 = vrot.slane %v11880_v38, 9  ;;  %v12136_v40 = vld [vmem:[%s19052_s0 + $0x108] sm:$0xf] }
 0x160   :  { %v11813_v63 = vcombine.low %v2984_v41, %v2994_v39  ;;  %v2954_v19 = vor.u32 %v2953_v56, %v2950_v50  ;;  %v2969_v0 = vrot.slane %v2967_v59, 5  ;;  %v3828_v4 = vrot.slane %v11881_v47, 5  ;;  %v12138_v49 = vld [vmem:[%s19052_s0 + $0x110] sm:$0x1] }
 0x161   :  { %v2964_v42 = vor.u32 %v2963_v61, %v2959_v57  ;;  %v3831_v5 = vrot.slane %v11882_v54, 5  ;;  %v1963_v9 = vpop.permute.xlu1 %1962  ;;  %v6127_v10 = vpop.permute.xlu0 %6126  ;;  %v5056_v11 = vshrl.u32 %v12139_v7, 16  ;;  %v5059_v13 = vshll.u32 %v12139_v7, 16  ;;  %v392_v54 = vld [vmem:[%s19052_s0 + $0x114] sm:$0xf] }
 0x162   :  { %v2955_v12 = vrot.slane %v2954_v19, 4  ;;  %2046 = vst.msk [vmem:[#allocation2 + $0x68] sm:$0xff] %vm2032_vm7, %v1963_v9  ;;  %v5065_v14 = vshll.u32 %v12140_v62, 16  ;;  %v5069_v15 = vshrl.u32 %v12140_v62, 16  ;;  %v3829_v17 = vsel %vm13677_vm2, %v11940_v1, %v3828_v4  ;;  %v13107_v19 = vld [vmem:[%s19052_s0 + $0x108] sm:$0xff]  }
 0x163   :  { %6212 = vst.msk [vmem:[#allocation2 + $0x58] sm:$0xff] %vm6200_vm14, %v6127_v10  ;;  %3417 = vrot.lane.b32.xlu1 %v11813_v63, %s13579_s18  ;;  %2326 = vrot.lane.b32.xlu0 %v13103_v28, %s13576_s21  ;;  %v2965_v16 = vrot.slane %v2964_v42, 4  ;;  %v3830_v18 = vrot.slane %v3828_v4, 4  ;;  %v5058_v20 = vrot.slane %v5056_v11, 4  ;;  %v5061_v22 = vrot.slane %v5059_v13, 5 }
 0x164   :  { %v2960_v21 = vsel %vm13722_vm5, %v2955_v12, %v2959_v57  ;;  %v5067_v23 = vrot.slane %v5065_v14, 5  ;;  %v5071_v6 = vrot.slane %v5069_v15, 4  ;;  %v5075_v27 = vshll.u32 %v12141_v2, 16  ;;  %v394_v10 = vld [vmem:[%s19052_s0 + $0x11c] sm:$0x1] }
 0x165   :  { %v2970_v25 = vsel %vm13722_vm5, %v2965_v16, %v2969_v0  ;;  %v3832_v26 = vsel %vm13677_vm2, %v3830_v18, %v3831_v5  ;;  %v2317_v29 = vpop.permute.xlu1 %2316  ;;  %v1961_v30 = vpop.permute.xlu0 %1960  ;;  %v909_v33 = vshrl.u32 %v389_v3, 16  ;;  %v5062_v37 = vor.u32 %v5061_v22, %v5058_v20  ;;  %v12264_v15 = vld [vmem:[%s19052_s0 + $0x108] sm:$0xe]  ;;  %v12265_v22 = vld [vmem:[%s19052_s0 + $0x10c] sm:$0xf] }
 0x166   :  { %v6243_v31 = vld [vmem:[#allocation2 + $0x50] sm:$0xff]  ;;  %v11812_v34 = vcombine.low %v2960_v21, %v2970_v25  ;;  %v11972_v36 = vcombine.low %v3829_v17, %v3832_v26  ;;  %v5072_v38 = vor.u32 %v5071_v6, %v5067_v23  ;;  %2400 = vst.msk [vmem:[#allocation2 + $0x68] sm:$0xff] %vm2386_vm9, %v2317_v29  ;;  %v5077_v43 = vrot.slane %v5075_v27, 5 }
 0x167   :  { %2045 = vst.msk [vmem:[#allocation2 + $0x60] sm:$0xff] %vm2032_vm7, %v1961_v30  ;;  %12918 = vmatprep.mubr.msk.bf16.mxu0 %vm6316_vm0, %v6243_v31  ;;  %4058 = vrot.lane.b32.xlu1 %v11973_v60, %s13580_s24  ;;  %v911_v44 = vrot.slane %v909_v33, 4  ;;  %v912_v45 = vshll.u32 %v389_v3, 16  ;;  %v918_v47 = vshll.u32 %v390_v24, 16  ;;  %v5063_v50 = vrot.slane %v5062_v37, 4 }
 0x168   :  { %3415 = vrot.lane.b32.xlu0 %v11812_v34, %s13579_s18  ;;  %v5073_v51 = vrot.slane %v5072_v38, 4  ;;  %v922_v52 = vshrl.u32 %v390_v24, 16  ;;  %v928_v53 = vshll.u32 %v391_v32, 16  ;;  %v5032_v57 = vshrl.u32 %v12136_v40, 16  ;;  %v393_v3 = vld [vmem:[%s19052_s0 + $0x118] sm:$0xf] }
 0x169   :  { %v914_v55 = vrot.slane %v912_v45, 5  ;;  %v920_v56 = vrot.slane %v918_v47, 5  ;;  %v5035_v59 = vshll.u32 %v12136_v40, 16  ;;  %v3406_v7 = vpop.permute.xlu1 %3405  ;;  %v2315_v41 = vpop.permute.xlu0 %2314  ;;  %v5068_v28 = vsel %vm13722_vm5, %v5063_v50, %v5067_v23  ;;  %v12266_v23 = vld [vmem:[%s19052_s0 + $0x110] sm:$0x1] }
 0x16a   :  { %v6244_v39 = vld [vmem:[#allocation2 + $0x58] sm:$0xff]  ;;  %v5078_v60 = vsel %vm13722_vm5, %v5073_v51, %v5077_v43  ;;  %v924_v61 = vrot.slane %v922_v52, 4  ;;  %v930_v62 = vrot.slane %v928_v53, 5  ;;  %3489 = vst.msk [vmem:[#allocation2 + $0x68] sm:$0xff] %vm3475_vm10, %v3406_v7  ;;  %v5034_v1 = vrot.slane %v5032_v57, 4 }
 0x16b   :  { %2399 = vst.msk [vmem:[#allocation2 + $0x60] sm:$0xff] %vm2386_vm9, %v2315_v41  ;;  %12919 = vmatmul.mubr.msk.bf16.gmra.mrb[20].mxu0 %vm6316_vm0, %v6244_v39  ;;  %4412 = vrot.lane.b32.xlu1 %v13106_v35, %s13581_s16  ;;  %v12197_v63 = vcombine.low %v5068_v28, %v5078_v60  ;;  %v915_v0 = vor.u32 %v914_v55, %v911_v44  ;;  %v5037_v2 = vrot.slane %v5035_v59, 5  ;;  %v5041_v4 = vshll.u32 %v12137_v48, 16  ;;  %v1484_v29 = vld [vmem:[%s19052_s0 + $0x114] sm:$0xe] }
 0x16c   :  { %4056 = vrot.lane.b32.xlu0 %v11972_v36, %s13580_s24  ;;  %v925_v42 = vor.u32 %v924_v61, %v920_v56  ;;  %v5045_v5 = vshrl.u32 %v12137_v48, 16  ;;  %v5051_v9 = vshll.u32 %v12138_v49, 16  ;;  %v933_v13 = vshrl.u32 %v392_v54, 16  ;;  %v1485_v30 = vld [vmem:[%s19052_s0 + $0x118] sm:$0xf] }
 0x16d   :  { %v916_v11 = vrot.slane %v915_v0, 4  ;;  %v5038_v12 = vor.u32 %v5037_v2, %v5034_v1  ;;  %v936_v14 = vshll.u32 %v392_v54, 16  ;;  %v4047_v16 = vpop.permute.xlu1 %4046  ;;  %v5043_v18 = vrot.slane %v5041_v4, 5  ;;  %v1486_v40 = vld [vmem:[%s19052_s0 + $0x11c] sm:$0x1] }
 0x16e   :  { %v926_v17 = vrot.slane %v925_v42, 4  ;;  %v5047_v20 = vrot.slane %v5045_v5, 4  ;;  %v5053_v21 = vrot.slane %v5051_v9, 5  ;;  %4130 = vst.msk [vmem:[#allocation2 + $0x68] sm:$0xff] %vm4116_vm11, %v4047_v16  ;;  %v3404_v6 = vpop.permute.xlu0 %3403  ;;  %v935_v26 = vrot.slane %v933_v13, 4 }
 0x16f   :  { %5501 = vrot.lane.b32.xlu1 %v12197_v63, %s13582_s25  ;;  %v921_v24 = vsel %vm13722_vm5, %v916_v11, %v920_v56  ;;  %v5039_v25 = vrot.slane %v5038_v12, 4  ;;  %v938_v27 = vrot.slane %v936_v14, 5  ;;  %3488 = vst.msk [vmem:[#allocation2 + $0x60] sm:$0xff] %vm3475_vm10, %v3404_v6  ;;  %v942_v33 = vshll.u32 %v393_v3, 16  ;;  %v12267_v49 = vld [vmem:[%s19052_s0 + $0x114] sm:$0xe] }
 0x170   :  { %4410 = vrot.lane.b32.xlu0 %v13107_v19, %s13581_s16  ;;  %v931_v31 = vsel %vm13722_vm5, %v926_v17, %v930_v62  ;;  %v5048_v32 = vor.u32 %v5047_v20, %v5043_v18  ;;  %v946_v34 = vshrl.u32 %v393_v3, 16  ;;  %v952_v38 = vshll.u32 %v394_v10, 16  ;;  %v12268_v55 = vld [vmem:[%s19052_s0 + $0x118] sm:$0xf]  ;;  %v12269_v41 = vld [vmem:[%s19052_s0 + $0x11c] sm:$0x1] }
 0x171   :  { %v11526_v35 = vcombine.low %v921_v24, %v931_v31  ;;  %v5044_v36 = vsel %vm13722_vm5, %v5039_v25, %v5043_v18  ;;  %v939_v37 = vor.u32 %v938_v27, %v935_v26  ;;  %v4401_v43 = vpop.permute.xlu1 %4400  ;;  %v944_v45 = vrot.slane %v942_v33, 5  ;;  %v1481_v39 = vld [vmem:[%s19052_s0 + $0x108] sm:$0xe]  ;;  %v1482_v63 = vld [vmem:[%s19052_s0 + $0x10c] sm:$0xf] }
 0x172   :  { %v5049_v44 = vrot.slane %v5048_v32, 4  ;;  %v948_v47 = vrot.slane %v946_v34, 4  ;;  %v12324_v48 = vrot.slane %v12264_v15, 9  ;;  %4484 = vst.msk [vmem:[#allocation2 + $0x68] sm:$0xff] %vm4470_vm12, %v4401_v43  ;;  %v4045_v50 = vpop.permute.xlu0 %4044  ;;  %v954_v52 = vrot.slane %v952_v38, 5 }
 0x173   :  { %1332 = vrot.lane.b32.xlu1 %v11526_v35, %s13578_s27  ;;  %v940_v51 = vrot.slane %v939_v37, 4  ;;  %v5912_v53 = vrot.slane %v12265_v22, 5  ;;  %v5915_v54 = vrot.slane %v12266_v23, 5  ;;  %4129 = vst.msk [vmem:[#allocation2 + $0x60] sm:$0xff] %vm4116_vm11, %v4045_v50  ;;  %v11559_v59 = vrot.slane %v1484_v29, 9 }
 0x174   :  { %v5054_v56 = vsel %vm13722_vm5, %v5049_v44, %v5053_v21  ;;  %v949_v57 = vor.u32 %v948_v47, %v944_v45  ;;  %v1765_v7 = vrot.slane %v1485_v30, 5  ;;  %v1483_v19 = vld [vmem:[%s19052_s0 + $0x110] sm:$0x1]  ;;  %v11761_v1 = vld [vmem:[%s19052_s0 + $0x120] sm:$0xf]  ;;  %v1768_v4 = vrot.slane %v1486_v40, 5 }
 0x175   :  { %v12196_v28 = vcombine.low %v5044_v36, %v5054_v56  ;;  %v945_v60 = vsel %vm13722_vm5, %v940_v51, %v944_v45  ;;  %v5913_v61 = vsel %vm13677_vm2, %v12324_v48, %v5912_v53  ;;  %v5914_v62 = vrot.slane %v5912_v53, 4  ;;  %v5490_v0 = vpop.permute.xlu1 %5489  ;;  %v11762_v17 = vld [vmem:[%s19052_s0 + $0x124] sm:$0xf]  ;;  %v11763_v18 = vld [vmem:[%s19052_s0 + $0x128] sm:$0x1] }
 0x176   :  { %v950_v2 = vrot.slane %v949_v57, 4  ;;  %v1766_v3 = vsel %vm13677_vm2, %v11559_v59, %v1765_v7  ;;  %v1767_v42 = vrot.slane %v1765_v7, 4  ;;  %5573 = vst.msk [vmem:[#allocation2 + $0x68] sm:$0xff] %vm5559_vm13, %v5490_v0  ;;  %v4399_v5 = vpop.permute.xlu0 %4398  ;;  %v12325_v10 = vrot.slane %v12267_v49, 9  ;;  %v11889_v24 = vld [vmem:[%s19052_s0 + $0x120] sm:$0xe] }
 0x177   :  { %5499 = vrot.lane.b32.xlu0 %v12196_v28, %s13582_s25  ;;  %v5916_v9 = vsel %vm13677_vm2, %v5914_v62, %v5915_v54  ;;  %v5919_v11 = vrot.slane %v12268_v55, 5  ;;  %v5922_v12 = vrot.slane %v12269_v41, 5  ;;  %4483 = vst.msk [vmem:[#allocation2 + $0x60] sm:$0xff] %vm4470_vm12, %v4399_v5  ;;  %v11558_v16 = vrot.slane %v1481_v39, 9  ;;  %v11890_v30 = vld [vmem:[%s19052_s0 + $0x124] sm:$0xf] }
 0x178   :  { %v955_v13 = vsel %vm13722_vm5, %v950_v2, %v954_v52  ;;  %v12356_v14 = vcombine.low %v5913_v61, %v5916_v9  ;;  %v1769_v15 = vsel %vm13677_vm2, %v1767_v42, %v1768_v4  ;;  %v1758_v25 = vrot.slane %v1482_v63, 5  ;;  %v11891_v35 = vld [vmem:[%s19052_s0 + $0x128] sm:$0x1]  ;;  %v11758_v44 = vld [vmem:[%s19052_s0 + $0x114] sm:$0xf]  ;;  %v13108_v52 = vld [vmem:[%s19052_s0 + $0x120] sm:$0xff]  }
 0x179   :  { %v11527_v20 = vcombine.low %v945_v60, %v955_v13  ;;  %v11591_v21 = vcombine.low %v1766_v3, %v1769_v15  ;;  %v5920_v22 = vsel %vm13677_vm2, %v12325_v10, %v5919_v11  ;;  %v5921_v23 = vrot.slane %v5919_v11, 4  ;;  %v1321_v6 = vpop.permute.xlu1 %1320  ;;  %v13128_v36 = vld [vmem:[%s19052_s0 + $0x108] sm:$0xff]   ;;  %v11759_v51 = vld [vmem:[%s19052_s0 + $0x118] sm:$0xf]  ;;  %v11760_v39 = vld [vmem:[%s19052_s0 + $0x11c] sm:$0x1] }
 0x17a   :  { %v1761_v26 = vrot.slane %v1483_v19, 5  ;;  %v3020_v27 = vshrl.u32 %v11761_v1, 16  ;;  %v3023_v29 = vshll.u32 %v11761_v1, 16  ;;  %1403 = vst.msk [vmem:[#allocation2 + $0x70] sm:$0xff] %vm1388_vm6, %v1321_v6  ;;  %v3029_v32 = vshll.u32 %v11762_v17, 16  ;;  %v13129_v57 = vld [vmem:[%s19052_s0 + $0x114] sm:$0xff]  }
 0x17b   :  { %1334 = vrot.lane.b32.xlu1 %v11527_v20, %s13578_s27  ;;  %6140 = vrot.lane.b32.xlu0 %v12356_v14, %s13583_s13  ;;  %v5923_v31 = vsel %vm13677_vm2, %v5921_v23, %v5922_v12  ;;  %v3033_v33 = vshrl.u32 %v11762_v17, 16  ;;  %v3039_v34 = vshll.u32 %v11763_v18, 16  ;;  %v1759_v38 = vsel %vm13677_vm2, %v11558_v16, %v1758_v25  ;;  %317 = vst.msk [vmem:[#allocation2 + $0xa0] sm:$0xff] %vm296_vm8, %v13128_v36  ;;  %v11886_v60 = vld [vmem:[%s19052_s0 + $0x114] sm:$0xe] }
 0x17c   :  { %v12357_v37 = vcombine.low %v5920_v22, %v5923_v31  ;;  %v1760_v40 = vrot.slane %v1758_v25, 4  ;;  %v3022_v43 = vrot.slane %v3020_v27, 4  ;;  %v3025_v45 = vrot.slane %v3023_v29, 5  ;;  %v11887_v0 = vld [vmem:[%s19052_s0 + $0x118] sm:$0xf]  ;;  %318 = vst.msk [vmem:[#allocation2 + $0xa8] sm:$0xff] %vm296_vm8, %v13129_v57 }
 0x17d   :  { %v3031_v47 = vrot.slane %v3029_v32, 5  ;;  %v3035_v48 = vrot.slane %v3033_v33, 4  ;;  %v3041_v49 = vrot.slane %v3039_v34, 5  ;;  %v5488_v50 = vpop.permute.xlu0 %5487  ;;  %v11943_v54 = vrot.slane %v11889_v24, 9  ;;  %v11888_v9 = vld [vmem:[%s19052_s0 + $0x11c] sm:$0x1] }
 0x17e   :  { %v1762_v53 = vsel %vm13677_vm2, %v1760_v40, %v1761_v26  ;;  %5572 = vst.msk [vmem:[#allocation2 + $0x60] sm:$0xff] %vm5559_vm13, %v5488_v50  ;;  %v3849_v55 = vrot.slane %v11890_v30, 5  ;;  %v3852_v56 = vrot.slane %v11891_v35, 5  ;;  %v3026_v7 = vor.u32 %v3025_v45, %v3022_v43  ;;  %v12145_v14 = vld [vmem:[%s19052_s0 + $0x12c] sm:$0xf]  ;;  %v13109_v17 = vld [vmem:[%s19052_s0 + $0x114] sm:$0xff]  }
 0x17f   :  { %1978 = vrot.lane.b32.xlu1 %v11591_v21, %s19070_s29  ;;  %6142 = vrot.lane.b32.xlu0 %v12357_v37, %s13583_s13  ;;  %v11590_v59 = vcombine.low %v1759_v38, %v1762_v53  ;;  %v3036_v41 = vor.u32 %v3035_v48, %v3031_v47  ;;  %v2996_v28 = vshrl.u32 %v11758_v44, 16  ;;  %v2999_v63 = vshll.u32 %v11758_v44, 16  ;;  %v12146_v21 = vld [vmem:[%s19052_s0 + $0x130] sm:$0xf]  ;;  %v12147_v25 = vld [vmem:[%s19052_s0 + $0x134] sm:$0x1] }
 0x180   :  { %v15890_v61 = vsel %vm13677_vm2, %v11943_v54, %v3849_v55  ;;  %v3851_v62 = vrot.slane %v3849_v55, 4  ;;  %v3005_v19 = vshll.u32 %v11759_v51, 16  ;;  %v3027_v1 = vrot.slane %v3026_v7, 4  ;;  %v395_v37 = vld [vmem:[%s19052_s0 + $0x120] sm:$0xf] }
 0x181   :  { %v3037_v2 = vrot.slane %v3036_v41, 4  ;;  %v2998_v3 = vrot.slane %v2996_v28, 4  ;;  %v3009_v42 = vshrl.u32 %v11759_v51, 16  ;;  %v1323_v4 = vpop.permute.xlu1 %1322  ;;  %v6129_v5 = vpop.permute.xlu0 %6128  ;;  %v3001_v11 = vrot.slane %v2999_v63, 5  ;;  %v396_v50 = vld [vmem:[%s19052_s0 + $0x124] sm:$0xf] }
 0x182   :  { %v3853_v10 = vsel %vm13677_vm2, %v3851_v62, %v3852_v56  ;;  %v3007_v12 = vrot.slane %v3005_v19, 5  ;;  %v3015_v13 = vshll.u32 %v11760_v39, 16  ;;  %1404 = vst.msk [vmem:[#allocation2 + $0x78] sm:$0xff] %vm1388_vm6, %v1323_v4  ;;  %v3032_v15 = vsel %vm13722_vm5, %v3027_v1, %v3031_v47  ;;  %v397_v57 = vld [vmem:[%s19052_s0 + $0x128] sm:$0x1]  ;;  %v13112_v41 = vld [vmem:[%s19052_s0 + $0x12c] sm:$0xff]  }
 0x183   :  { %6213 = vst.msk [vmem:[#allocation2 + $0x60] sm:$0xff] %vm6200_vm14, %v6129_v5  ;;  %2332 = vrot.lane.b32.xlu1 %v13108_v52, %s13576_s21  ;;  %1976 = vrot.lane.b32.xlu0 %v11590_v59, %s19070_s29  ;;  %v3042_v16 = vsel %vm13722_vm5, %v3037_v2, %v3041_v49  ;;  %v11975_v18 = vcombine.low %v15890_v61, %v3853_v10  ;;  %v3011_v20 = vrot.slane %v3009_v42, 4  ;;  %v11942_v24 = vrot.slane %v11886_v60, 9  ;;  %v12142_v61 = vld [vmem:[%s19052_s0 + $0x120] sm:$0xf] }
 0x184   :  { %v11815_v22 = vcombine.low %v3032_v15, %v3042_v16  ;;  %v3002_v23 = vor.u32 %v3001_v11, %v2998_v3  ;;  %v3017_v6 = vrot.slane %v3015_v13, 5  ;;  %v3842_v27 = vrot.slane %v11887_v0, 5  ;;  %v12143_v1 = vld [vmem:[%s19052_s0 + $0x124] sm:$0xf]  ;;  %v12144_v2 = vld [vmem:[%s19052_s0 + $0x128] sm:$0x1] }
 0x185   :  { %v3012_v26 = vor.u32 %v3011_v20, %v3007_v12  ;;  %v3845_v29 = vrot.slane %v11888_v9, 5  ;;  %v1967_v30 = vpop.permute.xlu1 %1966  ;;  %v6131_v31 = vpop.permute.xlu0 %6130  ;;  %v5104_v32 = vshrl.u32 %v12145_v14, 16  ;;  %v5107_v34 = vshll.u32 %v12145_v14, 16 }
 0x186   :  { %v3003_v33 = vrot.slane %v3002_v23, 4  ;;  %2048 = vst.msk [vmem:[#allocation2 + $0x78] sm:$0xff] %vm2032_vm7, %v1967_v30  ;;  %v5113_v35 = vshll.u32 %v12146_v21, 16  ;;  %v5117_v36 = vshrl.u32 %v12146_v21, 16  ;;  %v3843_v40 = vsel %vm13677_vm2, %v11942_v24, %v3842_v27  ;;  %v398_v21 = vld [vmem:[%s19052_s0 + $0x12c] sm:$0xf] }
 0x187   :  { %6214 = vst.msk [vmem:[#allocation2 + $0x68] sm:$0xff] %vm6200_vm14, %v6131_v31  ;;  %3421 = vrot.lane.b32.xlu1 %v11815_v22, %s13579_s18  ;;  %2330 = vrot.lane.b32.xlu0 %v13109_v17, %s13576_s21  ;;  %v3013_v38 = vrot.slane %v3012_v26, 4  ;;  %v3844_v43 = vrot.slane %v3842_v27, 4  ;;  %v5106_v44 = vrot.slane %v5104_v32, 4  ;;  %v5109_v47 = vrot.slane %v5107_v34, 5  ;;  %v13113_v23 = vld [vmem:[%s19052_s0 + $0x120] sm:$0xff]  }
 0x188   :  { %v3008_v45 = vsel %vm13722_vm5, %v3003_v33, %v3007_v12  ;;  %v5115_v48 = vrot.slane %v5113_v35, 5  ;;  %v5119_v49 = vrot.slane %v5117_v36, 4  ;;  %v5123_v53 = vshll.u32 %v12147_v25, 16  ;;  %v399_v26 = vld [vmem:[%s19052_s0 + $0x130] sm:$0xf] }
 0x189   :  { %v3018_v51 = vsel %vm13722_vm5, %v3013_v38, %v3017_v6  ;;  %v3846_v52 = vsel %vm13677_vm2, %v3844_v43, %v3845_v29  ;;  %v2321_v54 = vpop.permute.xlu1 %2320  ;;  %v1965_v55 = vpop.permute.xlu0 %1964  ;;  %v957_v59 = vshrl.u32 %v395_v37, 16  ;;  %v5110_v28 = vor.u32 %v5109_v47, %v5106_v44  ;;  %v400_v32 = vld [vmem:[%s19052_s0 + $0x134] sm:$0x1]  ;;  %v12270_v38 = vld [vmem:[%s19052_s0 + $0x120] sm:$0xe] }
 0x18a   :  { %v6245_v56 = vld [vmem:[#allocation2 + $0x60] sm:$0xff]  ;;  %v11814_v7 = vcombine.low %v3008_v45, %v3018_v51  ;;  %v11974_v39 = vcombine.low %v3843_v40, %v3846_v52  ;;  %v5120_v60 = vor.u32 %v5119_v49, %v5115_v48  ;;  %2402 = vst.msk [vmem:[#allocation2 + $0x78] sm:$0xff] %vm2386_vm9, %v2321_v54  ;;  %v5125_v62 = vrot.slane %v5123_v53, 5 }
 0x18b   :  { %2047 = vst.msk [vmem:[#allocation2 + $0x70] sm:$0xff] %vm2032_vm7, %v1965_v55  ;;  %12922 = vmatprep.mubr.msk.bf16.mxu0 %vm6316_vm0, %v6245_v56  ;;  %4062 = vrot.lane.b32.xlu1 %v11975_v18, %s13580_s24  ;;  %v959_v63 = vrot.slane %v957_v59, 4  ;;  %v960_v19 = vshll.u32 %v395_v37, 16  ;;  %v966_v0 = vshll.u32 %v396_v50, 16  ;;  %v5111_v3 = vrot.slane %v5110_v28, 4 }
 0x18c   :  { %3419 = vrot.lane.b32.xlu0 %v11814_v7, %s13579_s18  ;;  %v5121_v42 = vrot.slane %v5120_v60, 4  ;;  %v970_v4 = vshrl.u32 %v396_v50, 16  ;;  %v976_v5 = vshll.u32 %v397_v57, 16  ;;  %v5080_v11 = vshrl.u32 %v12142_v61, 16  ;;  %v15981_v33 = vpop.f32.mrb[0].mxu0 }
 0x18d   :  { %v962_v9 = vrot.slane %v960_v19, 5  ;;  %v968_v10 = vrot.slane %v966_v0, 5  ;;  %v5083_v12 = vshll.u32 %v12142_v61, 16  ;;  %v3410_v13 = vpop.permute.xlu1 %3409  ;;  %v2319_v14 = vpop.permute.xlu0 %2318  ;;  %v5116_v16 = vsel %vm13722_vm5, %v5111_v3, %v5115_v48  ;;  %v12271_v49 = vld [vmem:[%s19052_s0 + $0x124] sm:$0xf] }
 0x18e   :  { %v6246_v15 = vld [vmem:[#allocation2 + $0x68] sm:$0xff]  ;;  %v5126_v17 = vsel %vm13722_vm5, %v5121_v42, %v5125_v62  ;;  %v972_v18 = vrot.slane %v970_v4, 4  ;;  %v978_v20 = vrot.slane %v976_v5, 5  ;;  %3491 = vst.msk [vmem:[#allocation2 + $0x78] sm:$0xff] %vm3475_vm10, %v3410_v13  ;;  %v5082_v24 = vrot.slane %v5080_v11, 4  ;;  %v15986_v43 = vpop.f32.mrb[1].mxu0 }
 0x18f   :  { %2401 = vst.msk [vmem:[#allocation2 + $0x70] sm:$0xff] %vm2386_vm9, %v2319_v14  ;;  %12923 = vmatmul.mubr.msk.bf16.gmra.mrb[24].mxu0 %vm6316_vm0, %v6246_v15  ;;  %4416 = vrot.lane.b32.xlu1 %v13112_v41, %s13581_s16  ;;  %v12199_v22 = vcombine.low %v5116_v16, %v5126_v17  ;;  %v963_v6 = vor.u32 %v962_v9, %v959_v63  ;;  %v5085_v25 = vrot.slane %v5083_v12, 5  ;;  %v5089_v29 = vshll.u32 %v12143_v1, 16  ;;  %v12272_v50 = vld [vmem:[%s19052_s0 + $0x128] sm:$0x1]  ;;  %v16002_v57 = vpop.f32.mrb[2].mxu0 }
 0x190   :  { %4060 = vrot.lane.b32.xlu0 %v11974_v39, %s13580_s24  ;;  %v973_v27 = vor.u32 %v972_v18, %v968_v10  ;;  %v5093_v30 = vshrl.u32 %v12143_v1, 16  ;;  %v5099_v31 = vshll.u32 %v12144_v2, 16  ;;  %v981_v36 = vshrl.u32 %v398_v21, 16  ;;  %v1490_v56 = vld [vmem:[%s19052_s0 + $0x12c] sm:$0xe]  ;;  %v16015_v1 = vpop.f32.mrb[3].mxu0 }
 0x191   :  { %v964_v34 = vrot.slane %v963_v6, 4  ;;  %v5086_v35 = vor.u32 %v5085_v25, %v5082_v24  ;;  %v984_v37 = vshll.u32 %v398_v21, 16  ;;  %v4051_v40 = vpop.permute.xlu1 %4050  ;;  %v5091_v45 = vrot.slane %v5089_v29, 5  ;;  %v1491_v28 = vld [vmem:[%s19052_s0 + $0x130] sm:$0xf] }
 0x192   :  { %v974_v44 = vrot.slane %v973_v27, 4  ;;  %v5095_v47 = vrot.slane %v5093_v30, 4  ;;  %v5101_v48 = vrot.slane %v5099_v31, 5  ;;  %4132 = vst.msk [vmem:[#allocation2 + $0x78] sm:$0xff] %vm4116_vm11, %v4051_v40  ;;  %v3408_v51 = vpop.permute.xlu0 %3407  ;;  %v983_v54 = vrot.slane %v981_v36, 4 }
 0x193   :  { %5505 = vrot.lane.b32.xlu1 %v12199_v22, %s13582_s25  ;;  %v969_v52 = vsel %vm13722_vm5, %v964_v34, %v968_v10  ;;  %v5087_v53 = vrot.slane %v5086_v35, 4  ;;  %v986_v55 = vrot.slane %v984_v37, 5  ;;  %3490 = vst.msk [vmem:[#allocation2 + $0x70] sm:$0xff] %vm3475_vm10, %v3408_v51  ;;  %v990_v41 = vshll.u32 %v399_v26, 16  ;;  %v1492_v19 = vld [vmem:[%s19052_s0 + $0x134] sm:$0x1] }
 0x194   :  { %4414 = vrot.lane.b32.xlu0 %v13113_v23, %s13581_s16  ;;  %v979_v59 = vsel %vm13722_vm5, %v974_v44, %v978_v20  ;;  %v5096_v7 = vor.u32 %v5095_v47, %v5091_v45  ;;  %v994_v39 = vshrl.u32 %v399_v26, 16  ;;  %v1000_v63 = vshll.u32 %v400_v32, 16  ;;  %v12273_v5 = vld [vmem:[%s19052_s0 + $0x12c] sm:$0xe]  ;;  %v12274_v14 = vld [vmem:[%s19052_s0 + $0x130] sm:$0xf] }
 0x195   :  { %v11528_v60 = vcombine.low %v969_v52, %v979_v59  ;;  %v5092_v61 = vsel %vm13722_vm5, %v5087_v53, %v5091_v45  ;;  %v987_v62 = vor.u32 %v986_v55, %v983_v54  ;;  %v4405_v0 = vpop.permute.xlu1 %4404  ;;  %v992_v3 = vrot.slane %v990_v41, 5  ;;  %v12275_v20 = vld [vmem:[%s19052_s0 + $0x134] sm:$0x1]  ;;  %v1487_v21 = vld [vmem:[%s19052_s0 + $0x120] sm:$0xe] }
 0x196   :  { %v5097_v2 = vrot.slane %v5096_v7, 4  ;;  %v996_v42 = vrot.slane %v994_v39, 4  ;;  %v12326_v4 = vrot.slane %v12270_v38, 9  ;;  %4486 = vst.msk [vmem:[#allocation2 + $0x78] sm:$0xff] %vm4470_vm12, %v4405_v0  ;;  %v4049_v9 = vpop.permute.xlu0 %4048  ;;  %v1002_v11 = vrot.slane %v1000_v63, 5 }
 0x197   :  { %1336 = vrot.lane.b32.xlu1 %v11528_v60, %s13578_s27  ;;  %v988_v10 = vrot.slane %v987_v62, 4  ;;  %v5926_v12 = vrot.slane %v12271_v49, 5  ;;  %v5929_v13 = vrot.slane %v12272_v50, 5  ;;  %4131 = vst.msk [vmem:[#allocation2 + $0x70] sm:$0xff] %vm4116_vm11, %v4049_v9  ;;  %v11561_v17 = vrot.slane %v1490_v56, 9 }
 0x198   :  { %v5102_v15 = vsel %vm13722_vm5, %v5097_v2, %v5101_v48  ;;  %v997_v16 = vor.u32 %v996_v42, %v992_v3  ;;  %v1779_v18 = vrot.slane %v1491_v28, 5  ;;  %v1488_v25 = vld [vmem:[%s19052_s0 + $0x124] sm:$0xf]  ;;  %v1489_v26 = vld [vmem:[%s19052_s0 + $0x128] sm:$0x1]  ;;  %v1782_v34 = vrot.slane %v1492_v19, 5 }
 0x199   :  { %v12198_v22 = vcombine.low %v5092_v61, %v5102_v15  ;;  %v993_v23 = vsel %vm13722_vm5, %v988_v10, %v992_v3  ;;  %v5927_v6 = vsel %vm13677_vm2, %v12326_v4, %v5926_v12  ;;  %v5928_v24 = vrot.slane %v5926_v12, 4  ;;  %v5494_v27 = vpop.permute.xlu1 %5493  ;;  %v11767_v29 = vld [vmem:[%s19052_s0 + $0x138] sm:$0xf]  ;;  %v11768_v49 = vld [vmem:[%s19052_s0 + $0x13c] sm:$0xf] }
 0x19a   :  { %v998_v30 = vrot.slane %v997_v16, 4  ;;  %v1780_v31 = vsel %vm13677_vm2, %v11561_v17, %v1779_v18  ;;  %v1781_v32 = vrot.slane %v1779_v18, 4  ;;  %5575 = vst.msk [vmem:[#allocation2 + $0x78] sm:$0xff] %vm5559_vm13, %v5494_v27  ;;  %v4403_v35 = vpop.permute.xlu0 %4402  ;;  %v12327_v37 = vrot.slane %v12273_v5, 9  ;;  %v11769_v50 = vld [vmem:[%s19052_s0 + $0x140] sm:$0x1] }
 0x19b   :  { %5503 = vrot.lane.b32.xlu0 %v12198_v22, %s13582_s25  ;;  %v5930_v36 = vsel %vm13677_vm2, %v5928_v24, %v5929_v13  ;;  %v5933_v38 = vrot.slane %v12274_v14, 5  ;;  %v5936_v40 = vrot.slane %v12275_v20, 5  ;;  %4485 = vst.msk [vmem:[#allocation2 + $0x70] sm:$0xff] %vm4470_vm12, %v4403_v35  ;;  %v11560_v48 = vrot.slane %v1487_v21, 9  ;;  %v11895_v56 = vld [vmem:[%s19052_s0 + $0x138] sm:$0xe] }
 0x19c   :  { %v1003_v44 = vsel %vm13722_vm5, %v998_v30, %v1002_v11  ;;  %v12358_v45 = vcombine.low %v5927_v6, %v5930_v36  ;;  %v1783_v47 = vsel %vm13677_vm2, %v1781_v32, %v1782_v34  ;;  %v1772_v59 = vrot.slane %v1488_v25, 5  ;;  %v11896_v28 = vld [vmem:[%s19052_s0 + $0x13c] sm:$0xf]  ;;  %v11897_v19 = vld [vmem:[%s19052_s0 + $0x140] sm:$0x1]  ;;  %v13115_v32 = vld [vmem:[%s19052_s0 + $0x12c] sm:$0xff]  }
 0x19d   :  { %v11529_v51 = vcombine.low %v993_v23, %v1003_v44  ;;  %v11593_v52 = vcombine.low %v1780_v31, %v1783_v47  ;;  %v5934_v53 = vsel %vm13677_vm2, %v12327_v37, %v5933_v38  ;;  %v5935_v54 = vrot.slane %v5933_v38, 4  ;;  %v1325_v55 = vpop.permute.xlu1 %1324  ;;  %v11764_v4 = vld [vmem:[%s19052_s0 + $0x12c] sm:$0xf]  ;;  %v11765_v13 = vld [vmem:[%s19052_s0 + $0x130] sm:$0xf]  ;;  %v13114_v18 = vld [vmem:[%s19052_s0 + $0x138] sm:$0xff]  }
 0x19e   :  { %v1775_v7 = vrot.slane %v1489_v26, 5  ;;  %v3068_v41 = vshrl.u32 %v11767_v29, 16  ;;  %v3071_v39 = vshll.u32 %v11767_v29, 16  ;;  %1405 = vst.msk [vmem:[#allocation2 + $0x80] sm:$0xff] %vm1388_vm6, %v1325_v55  ;;  %v3077_v61 = vshll.u32 %v11768_v49, 16  ;;  %v13134_v29 = vld [vmem:[%s19052_s0 + $0x120] sm:$0xff]  }
 0x19f   :  { %1338 = vrot.lane.b32.xlu1 %v11529_v51, %s13578_s27  ;;  %6144 = vrot.lane.b32.xlu0 %v12358_v45, %s13583_s13  ;;  %v5937_v60 = vsel %vm13677_vm2, %v5935_v54, %v5936_v40  ;;  %v3081_v62 = vshrl.u32 %v11768_v49, 16  ;;  %v3087_v63 = vshll.u32 %v11769_v50, 16  ;;  %v1773_v2 = vsel %vm13677_vm2, %v11560_v48, %v1772_v59  ;;  %v11766_v23 = vld [vmem:[%s19052_s0 + $0x134] sm:$0x1]  ;;  %v16112_v38 = vld [vmem:[%s19054_s2] ss:$0 sm:$0xff] }
 0x1a0   :  { %v12359_v0 = vcombine.low %v5934_v53, %v5937_v60  ;;  %v1774_v3 = vrot.slane %v1772_v59, 4  ;;  %v3070_v42 = vrot.slane %v3068_v41, 4  ;;  %v3073_v5 = vrot.slane %v3071_v39, 5  ;;  %v11892_v48 = vld [vmem:[%s19052_s0 + $0x12c] sm:$0xe]  ;;  %319 = vst.msk [vmem:[#allocation2 + $0xb0] sm:$0xff] %vm296_vm8, %v13134_v29 }
 0x1a1   :  { %v3079_v9 = vrot.slane %v3077_v61, 5  ;;  %v3083_v10 = vrot.slane %v3081_v62, 4  ;;  %v3089_v11 = vrot.slane %v3087_v63, 5  ;;  %v5492_v12 = vpop.permute.xlu0 %5491  ;;  %v11945_v15 = vrot.slane %v11895_v56, 9  ;;  %v13135_v49 = vld [vmem:[%s19052_s0 + $0x12c] sm:$0xff]  }
 0x1a2   :  { %v1776_v14 = vsel %vm13677_vm2, %v1774_v3, %v1775_v7  ;;  %5574 = vst.msk [vmem:[#allocation2 + $0x70] sm:$0xff] %vm5559_vm13, %v5492_v12  ;;  %v3863_v16 = vrot.slane %v11896_v28, 5  ;;  %v3866_v17 = vrot.slane %v11897_v19, 5  ;;  %v3074_v21 = vor.u32 %v3073_v5, %v3070_v42  ;;  %v11893_v54 = vld [vmem:[%s19052_s0 + $0x130] sm:$0xf] }
 0x1a3   :  { %1982 = vrot.lane.b32.xlu1 %v11593_v52, %s19070_s29  ;;  %6146 = vrot.lane.b32.xlu0 %v12359_v0, %s13583_s13  ;;  %v11592_v20 = vcombine.low %v1773_v2, %v1776_v14  ;;  %v3084_v22 = vor.u32 %v3083_v10, %v3079_v9  ;;  %v3044_v6 = vshrl.u32 %v11764_v4, 16  ;;  %v3047_v26 = vshll.u32 %v11764_v4, 16  ;;  %v11894_v55 = vld [vmem:[%s19052_s0 + $0x134] sm:$0x1]  ;;  %320 = vst.msk [vmem:[#allocation2 + $0xb8] sm:$0xff] %vm296_vm8, %v13135_v49 }
 0x1a4   :  { %v16101_v24 = vsel %vm13677_vm2, %v11945_v15, %v3863_v16  ;;  %v3865_v25 = vrot.slane %v3863_v16, 4  ;;  %v3053_v27 = vshll.u32 %v11765_v13, 16  ;;  %v3075_v30 = vrot.slane %v3074_v21, 4  ;;  %v12151_v63 = vld [vmem:[%s19052_s0 + $0x144] sm:$0xf] }
 0x1a5   :  { %v3085_v31 = vrot.slane %v3084_v22, 4  ;;  %v3046_v34 = vrot.slane %v3044_v6, 4  ;;  %v3057_v35 = vshrl.u32 %v11765_v13, 16  ;;  %v1327_v36 = vpop.permute.xlu1 %1326  ;;  %v6133_v37 = vpop.permute.xlu0 %6132  ;;  %v3049_v44 = vrot.slane %v3047_v26, 5  ;;  %v12152_v5 = vld [vmem:[%s19052_s0 + $0x148] sm:$0xf] }
 0x1a6   :  { %v16116_v40 = vsel %vm13677_vm2, %v3865_v25, %v3866_v17  ;;  %v3055_v45 = vrot.slane %v3053_v27, 5  ;;  %v3063_v47 = vshll.u32 %v11766_v23, 16  ;;  %1406 = vst.msk [vmem:[#allocation2 + $0x88] sm:$0xff] %vm1388_vm6, %v1327_v36  ;;  %v3080_v50 = vsel %vm13722_vm5, %v3075_v30, %v3079_v9  ;;  %v12153_v9 = vld [vmem:[%s19052_s0 + $0x14c] sm:$0x1]  ;;  %v13118_v15 = vld [vmem:[%s19052_s0 + $0x144] sm:$0xff]  }
 0x1a7   :  { %6215 = vst.msk [vmem:[#allocation2 + $0x70] sm:$0xff] %vm6200_vm14, %v6133_v37  ;;  %2336 = vrot.lane.b32.xlu1 %v13114_v18, %s13576_s21  ;;  %1980 = vrot.lane.b32.xlu0 %v11592_v20, %s19070_s29  ;;  %v3090_v51 = vsel %vm13722_vm5, %v3085_v31, %v3089_v11  ;;  %v11977_v52 = vcombine.low %v16101_v24, %v16116_v40  ;;  %v3059_v53 = vrot.slane %v3057_v35, 4  ;;  %vm6772_vm1 = vcmask 195584   ;;  %v402_v13 = vld [vmem:[%s19052_s0 + $0x13c] sm:$0xf] }
 0x1a8   :  { %v11817_v56 = vcombine.low %v3080_v50, %v3090_v51  ;;  %v3050_v59 = vor.u32 %v3049_v44, %v3046_v34  ;;  %v3065_v7 = vrot.slane %v3063_v47, 5  ;;  %v6462_v41 = vadd.f32 %v15981_v33, %v16112_v38  ;;  %v403_v23 = vld [vmem:[%s19052_s0 + $0x140] sm:$0x1]  ;;  %v12148_v40 = vld [vmem:[%s19052_s0 + $0x138] sm:$0xf] }
 0x1a9   :  { %v3060_v39 = vor.u32 %v3059_v53, %v3055_v45  ;;  %v6454_v28 = vadd.f32 %v16112_v38, %v15986_v43  ;;  %v11944_v60 = vrot.slane %v11892_v48, 9  ;;  %v1971_v61 = vpop.permute.xlu1 %1970  ;;  %v6135_v62 = vpop.permute.xlu0 %6134  ;;  %v3856_v2 = vrot.slane %v11893_v54, 5  ;;  %v16198_v49 = vld [vmem:[%s19052_s0 + $0x13c] sm:$0xf] }
 0x1aa   :  { %v3051_v19 = vrot.slane %v3050_v59, 4  ;;  %v6710_v0 = vmax.f32 %v6462_v41, 0.0  ;;  %v3859_v3 = vrot.slane %v11894_v55, 5  ;;  %2050 = vst.msk [vmem:[#allocation2 + $0x88] sm:$0xff] %vm2032_vm7, %v1971_v61  ;;  %v6465_v42 = vadd.f32 %v16002_v57, %v16112_v38  ;;  %v13119_v41 = vld [vmem:[%s19052_s0 + $0x138] sm:$0xff]  }
 0x1ab   :  { %6216 = vst.msk [vmem:[#allocation2 + $0x78] sm:$0xff] %vm6200_vm14, %v6135_v62  ;;  %3425 = vrot.lane.b32.xlu1 %v11817_v56, %s13579_s18  ;;  %2334 = vrot.lane.b32.xlu0 %v13115_v32, %s13576_s21  ;;  %v3061_v33 = vrot.slane %v3060_v39, 4  ;;  %v6708_v43 = vmax.f32 %v6454_v28, 0.0  ;;  %v6457_v4 = vadd.f32 %v16112_v38, %v16015_v1  ;;  %v3857_v11 = vsel %vm13677_vm2, %v11944_v60, %v3856_v2  ;;  %v401_v1 = vld [vmem:[%s19052_s0 + $0x138] sm:$0xf]  ;;  %v12904_v32 = vpop.f32.mrb[4].mxu0 }
 0x1ac   :  { %v3056_v10 = vsel %vm13722_vm5, %v3051_v19, %v3055_v45  ;;  %6775 = vst.msk [vmem:[#allocation3 + $0x10] sm:$0xff] %vm6772_vm1, %v6710_v0  ;;  %v3858_v57 = vrot.slane %v3856_v2, 4  ;;  %v5152_v12 = vshrl.u32 %v12151_v63, 16  ;;  %v6711_v16 = vmax.f32 %v6465_v42, 0.0  ;;  %v6469_v60 = vpop.f32.mrb[5].mxu0 }
 0x1ad   :  { %v3066_v14 = vsel %vm13722_vm5, %v3061_v33, %v3065_v7  ;;  %6773 = vst.msk [vmem:[#allocation3] sm:$0xff] %vm6772_vm1, %v6708_v43  ;;  %v6709_v17 = vmax.f32 %v6457_v4, 0.0  ;;  %v5155_v18 = vshll.u32 %v12151_v63, 16  ;;  %v2325_v20 = vpop.permute.xlu1 %2324  ;;  %v1969_v21 = vpop.permute.xlu0 %1968  ;;  %v5161_v26 = vshll.u32 %v12152_v5, 16  ;;  %v12150_v63 = vld [vmem:[%s19052_s0 + $0x140] sm:$0x1] }
 0x1ae   :  { %v6247_v22 = vld [vmem:[#allocation2 + $0x70] sm:$0xff]  ;;  %v11816_v6 = vcombine.low %v3056_v10, %v3066_v14  ;;  %v3860_v24 = vsel %vm13677_vm2, %v3858_v57, %v3859_v3  ;;  %v5154_v25 = vrot.slane %v5152_v12, 4  ;;  %2404 = vst.msk [vmem:[#allocation2 + $0x88] sm:$0xff] %vm2386_vm9, %v2325_v20  ;;  %v5165_v30 = vshrl.u32 %v12152_v5, 16  ;;  %v12905_v2 = vpop.f32.mrb[6].mxu0 }
 0x1af   :  { %2049 = vst.msk [vmem:[#allocation2 + $0x80] sm:$0xff] %vm2032_vm7, %v1969_v21  ;;  %12926 = vmatprep.mubr.msk.bf16.mxu0 %vm6316_vm0, %v6247_v22  ;;  %4066 = vrot.lane.b32.xlu1 %v11977_v52, %s13580_s24  ;;  %v11976_v27 = vcombine.low %v3857_v11, %v3860_v24  ;;  %v5157_v29 = vrot.slane %v5155_v18, 5  ;;  %v5171_v31 = vshll.u32 %v12153_v9, 16  ;;  %v5163_v34 = vrot.slane %v5161_v26, 5  ;;  %v404_v4 = vld [vmem:[%s19052_s0 + $0x144] sm:$0xf] }
 0x1b0   :  { %6776 = vst.msk [vmem:[#allocation3 + $0x18] sm:$0xff] %vm6772_vm1, %v6711_v16  ;;  %6774 = vst.msk [vmem:[#allocation3 + $0x8] sm:$0xff] %vm6772_vm1, %v6709_v17  ;;  %3423 = vrot.lane.b32.xlu0 %v11816_v6, %s13579_s18  ;;  %v1005_v35 = vshrl.u32 %v401_v1, 16  ;;  %v1008_v36 = vshll.u32 %v401_v1, 16  ;;  %v1014_v37 = vshll.u32 %v402_v13, 16  ;;  %v5167_v45 = vrot.slane %v5165_v30, 4 }
 0x1b1   :  { %v5158_v44 = vor.u32 %v5157_v29, %v5154_v25  ;;  %v5173_v47 = vrot.slane %v5171_v31, 5  ;;  %v1018_v48 = vshrl.u32 %v402_v13, 16  ;;  %v3414_v50 = vpop.permute.xlu1 %3413  ;;  %v2323_v51 = vpop.permute.xlu0 %2322  ;;  %v1024_v56 = vshll.u32 %v403_v23, 16  ;;  %v405_v57 = vld [vmem:[%s19052_s0 + $0x148] sm:$0xf] }
 0x1b2   :  { %v6248_v52 = vld [vmem:[#allocation2 + $0x78] sm:$0xff]  ;;  %v1007_v53 = vrot.slane %v1005_v35, 4  ;;  %v1010_v54 = vrot.slane %v1008_v36, 5  ;;  %v1016_v55 = vrot.slane %v1014_v37, 5  ;;  %3493 = vst.msk [vmem:[#allocation2 + $0x88] sm:$0xff] %vm3475_vm10, %v3414_v50  ;;  %v5168_v7 = vor.u32 %v5167_v45, %v5163_v34 }
 0x1b3   :  { %2403 = vst.msk [vmem:[#allocation2 + $0x80] sm:$0xff] %vm2386_vm9, %v2323_v51  ;;  %12927 = vmatmul.mubr.msk.bf16.gmra.mrb[28].mxu0 %vm6316_vm0, %v6248_v52  ;;  %4420 = vrot.lane.b32.xlu1 %v13118_v15, %s13581_s16  ;;  %v5159_v59 = vrot.slane %v5158_v44, 4  ;;  %v1020_v39 = vrot.slane %v1018_v48, 4  ;;  %v5128_v28 = vshrl.u32 %v12148_v40, 16  ;;  %v1026_v62 = vrot.slane %v1024_v56, 5 }
 0x1b4   :  { %4064 = vrot.lane.b32.xlu0 %v11976_v27, %s13580_s24  ;;  %v1011_v61 = vor.u32 %v1010_v54, %v1007_v53  ;;  %v5131_v19 = vshll.u32 %v12148_v40, 16  ;;  %v5137_v0 = vshll.u32 %v16198_v49, 16  ;;  %v5169_v33 = vrot.slane %v5168_v7, 4  ;;  %v406_v21 = vld [vmem:[%s19052_s0 + $0x14c] sm:$0x1] }
 0x1b5   :  { %v5164_v3 = vsel %vm13722_vm5, %v5159_v59, %v5163_v34  ;;  %v1021_v43 = vor.u32 %v1020_v39, %v1016_v55  ;;  %v5130_v42 = vrot.slane %v5128_v28, 4  ;;  %v4055_v5 = vpop.permute.xlu1 %4054  ;;  %v16222_v1 = vadd.f32 %v12904_v32, %v16112_v38  ;;  %v12276_v30 = vld [vmem:[%s19052_s0 + $0x138] sm:$0xe]  ;;  %v12277_v31 = vld [vmem:[%s19052_s0 + $0x13c] sm:$0xf] }
 0x1b6   :  { %4134 = vst.msk [vmem:[#allocation2 + $0x88] sm:$0xff] %vm4116_vm11, %v4055_v5  ;;  %v3412_v12 = vpop.permute.xlu0 %3411  ;;  %v16225_v13 = vadd.f32 %v16112_v38, %v6469_v60  ;;  %v16228_v14 = vadd.f32 %v12905_v2, %v16112_v38  ;;  %v5174_v17 = vsel %vm13722_vm5, %v5169_v33, %v5173_v47  ;;  %v1012_v18 = vrot.slane %v1011_v61, 4  ;;  %v12278_v40 = vld [vmem:[%s19052_s0 + $0x140] sm:$0x1]  ;;  %v1496_v44 = vld [vmem:[%s19052_s0 + $0x144] sm:$0xe] }
 0x1b7   :  { %v6901_v9 = vld [vmem:[#allocation3 + $0x10] ss:$2 sm:$0xff]  ;;  %v6933_v10 = vld [vmem:[#allocation3 + $0x11] ss:$2 sm:$0xff]  ;;  %v6837_v11 = vld [vmem:[#allocation3] ss:$2 sm:$0xff]  ;;  %v12201_v23 = vcombine.low %v5164_v3, %v5174_v17 }
 0x1b8   :  { %v6980_v15 = vmax.f32 %v6901_v9, %v6933_v10  ;;  %v6869_v16 = vld [vmem:[#allocation3 + $0x1] ss:$2 sm:$0xff]  ;;  %v1022_v20 = vrot.slane %v1021_v43, 4  ;;  %3492 = vst.msk [vmem:[#allocation2 + $0x80] sm:$0xff] %vm3475_vm10, %v3412_v12  ;;  %4418 = vrot.lane.b32.xlu0 %v13119_v41, %s13581_s16  ;;  %v5133_v6 = vrot.slane %v5131_v19, 5  ;;  %v5139_v24 = vrot.slane %v5137_v0, 5 }
 0x1b9   :  { %v6964_v22 = vmax.f32 %v6837_v11, %v6869_v16  ;;  %v1017_v25 = vsel %vm13722_vm5, %v1012_v18, %v1016_v55  ;;  %v5141_v27 = vshrl.u32 %v16198_v49, 16  ;;  %v5147_v29 = vshll.u32 %v12150_v63, 16  ;;  %v4409_v32 = vpop.permute.xlu1 %4408  ;;  %5509 = vrot.lane.b32.xlu1 %v12201_v23, %s13582_s25  ;;  %v16256_v47 = vpop.f32.mrb[7].mxu0  ;;  %v1497_v52 = vld [vmem:[%s19052_s0 + $0x148] sm:$0xf] }
 0x1ba   :  { %v1027_v26 = vsel %vm13722_vm5, %v1022_v20, %v1026_v62  ;;  %v5134_v36 = vor.u32 %v5133_v6, %v5130_v42  ;;  %v1029_v37 = vshrl.u32 %v404_v4, 16  ;;  %4488 = vst.msk [vmem:[#allocation2 + $0x88] sm:$0xff] %vm4470_vm12, %v4409_v32  ;;  %v4053_v45 = vpop.permute.xlu0 %4052  ;;  %v1032_v50 = vshll.u32 %v404_v4, 16  ;;  %v1498_v59 = vld [vmem:[%s19052_s0 + $0x14c] sm:$0x1] }
 0x1bb   :  { %v6996_v34 = vmax.f32 %v6964_v22, %v6980_v15  ;;  %v11530_v35 = vcombine.low %v1017_v25, %v1027_v26  ;;  %v5143_v48 = vrot.slane %v5141_v27, 4  ;;  %v5149_v49 = vrot.slane %v5147_v29, 5  ;;  %4133 = vst.msk [vmem:[#allocation2 + $0x80] sm:$0xff] %vm4116_vm11, %v4053_v45  ;;  %v12279_v7 = vld [vmem:[%s19052_s0 + $0x144] sm:$0xe] }
 0x1bc   :  { %v1038_v51 = vshll.u32 %v405_v57, 16  ;;  %v5135_v53 = vrot.slane %v5134_v36, 4  ;;  %v1031_v54 = vrot.slane %v1029_v37, 4  ;;  %v1042_v55 = vshrl.u32 %v405_v57, 16  ;;  %v12280_v4 = vld [vmem:[%s19052_s0 + $0x148] sm:$0xf] }
 0x1bd   :  { %7064 = vst.msk [vmem:[#allocation4 + $0x11] sm:$0xff] %vm6772_vm1, %v6996_v34  ;;  %v1048_v56 = vshll.u32 %v406_v21, 16  ;;  %v5144_v41 = vor.u32 %v5143_v48, %v5139_v24  ;;  %v1034_v39 = vrot.slane %v1032_v50, 5  ;;  %v12328_v60 = vrot.slane %v12276_v30, 9  ;;  %v5498_v61 = vpop.permute.xlu1 %5497  ;;  %1340 = vrot.lane.b32.xlu1 %v11530_v35, %s13578_s27  ;;  %v12281_v57 = vld [vmem:[%s19052_s0 + $0x14c] sm:$0x1] }
 0x1be   :  { %v1040_v28 = vrot.slane %v1038_v51, 5  ;;  %v5140_v62 = vsel %vm13722_vm5, %v5135_v53, %v5139_v24  ;;  %v1044_v63 = vrot.slane %v1042_v55, 4  ;;  %v5940_v0 = vrot.slane %v12277_v31, 5  ;;  %5577 = vst.msk [vmem:[#allocation2 + $0x88] sm:$0xff] %vm5559_vm13, %v5498_v61  ;;  %v4407_v2 = vpop.permute.xlu0 %4406  ;;  %v1493_v12 = vld [vmem:[%s19052_s0 + $0x138] sm:$0xe] }
 0x1bf   :  { %v1050_v19 = vrot.slane %v1048_v56, 5  ;;  %v5145_v3 = vrot.slane %v5144_v41, 4  ;;  %v1035_v33 = vor.u32 %v1034_v39, %v1031_v54  ;;  %v5943_v43 = vrot.slane %v12278_v40, 5  ;;  %4487 = vst.msk [vmem:[#allocation2 + $0x80] sm:$0xff] %vm4470_vm12, %v4407_v2  ;;  %v1494_v20 = vld [vmem:[%s19052_s0 + $0x13c] sm:$0xf] }
 0x1c0   :  { %v11563_v42 = vrot.slane %v1496_v44, 9  ;;  %v1045_v5 = vor.u32 %v1044_v63, %v1040_v28  ;;  %v5941_v9 = vsel %vm13677_vm2, %v12328_v60, %v5940_v0  ;;  %v5942_v10 = vrot.slane %v5940_v0, 4  ;;  %v1495_v30 = vld [vmem:[%s19052_s0 + $0x140] sm:$0x1]  ;;  %v11773_v31 = vld [vmem:[%s19052_s0 + $0x150] sm:$0xf] }
 0x1c1   :  { %v1793_v11 = vrot.slane %v1497_v52, 5  ;;  %v5150_v15 = vsel %vm13722_vm5, %v5145_v3, %v5149_v49  ;;  %v1036_v16 = vrot.slane %v1035_v33, 4  ;;  %v1796_v17 = vrot.slane %v1498_v59, 5  ;;  %v1329_v21 = vpop.permute.xlu1 %1328  ;;  %v11774_v37 = vld [vmem:[%s19052_s0 + $0x154] sm:$0xf] }
 0x1c2   :  { %v12329_v18 = vrot.slane %v12279_v7, 9  ;;  %v12200_v22 = vcombine.low %v5140_v62, %v5150_v15  ;;  %v1046_v23 = vrot.slane %v1045_v5, 4  ;;  %v5944_v6 = vsel %vm13677_vm2, %v5942_v10, %v5943_v43  ;;  %1407 = vst.msk [vmem:[#allocation2 + $0x90] sm:$0xff] %vm1388_vm6, %v1329_v21  ;;  %v11775_v49 = vld [vmem:[%s19052_s0 + $0x158] sm:$0x1]  ;;  %v13120_v2 = vld [vmem:[%s19052_s0 + $0x150] sm:$0xff]  }
 0x1c3   :  { %v1794_v24 = vsel %vm13677_vm2, %v11563_v42, %v1793_v11  ;;  %v1041_v25 = vsel %vm13722_vm5, %v1036_v16, %v1040_v28  ;;  %v12360_v26 = vcombine.low %v5941_v9, %v5944_v6  ;;  %v1795_v27 = vrot.slane %v1793_v11, 4  ;;  %v11901_v55 = vld [vmem:[%s19052_s0 + $0x150] sm:$0xe]  ;;  %v11902_v39 = vld [vmem:[%s19052_s0 + $0x154] sm:$0xf]  ;;  %v13140_v28 = vld [vmem:[%s19052_s0 + $0x138] sm:$0xff]  }
 0x1c4   :  { %v5947_v29 = vrot.slane %v12280_v4, 5  ;;  %5507 = vrot.lane.b32.xlu0 %v12200_v22, %s13582_s25  ;;  %v1051_v32 = vsel %vm13722_vm5, %v1046_v23, %v1050_v19  ;;  %v5950_v34 = vrot.slane %v12281_v57, 5  ;;  %v11562_v35 = vrot.slane %v1493_v12, 9  ;;  %v11903_v19 = vld [vmem:[%s19052_s0 + $0x158] sm:$0x1]  ;;  %321 = vst.msk [vmem:[#allocation2 + $0xc0] sm:$0xff] %vm296_vm8, %v13140_v28 }
 0x1c5   :  { %v1786_v36 = vrot.slane %v1494_v20, 5  ;;  %v11531_v40 = vcombine.low %v1041_v25, %v1051_v32  ;;  %v1797_v44 = vsel %vm13677_vm2, %v1795_v27, %v1796_v17  ;;  %v5496_v50 = vpop.permute.xlu0 %5495  ;;  %v1789_v54 = vrot.slane %v1495_v30, 5  ;;  %v11770_v0 = vld [vmem:[%s19052_s0 + $0x144] sm:$0xf]  ;;  %v11771_v4 = vld [vmem:[%s19052_s0 + $0x148] sm:$0xf] }
 0x1c6   :  { %v5948_v45 = vsel %vm13677_vm2, %v12329_v18, %v5947_v29  ;;  %v5949_v48 = vrot.slane %v5947_v29, 4  ;;  %v11595_v51 = vcombine.low %v1794_v24, %v1797_v44  ;;  %5576 = vst.msk [vmem:[#allocation2 + $0x80] sm:$0xff] %vm5559_vm13, %v5496_v50  ;;  %v3116_v59 = vshrl.u32 %v11773_v31, 16  ;;  %v11772_v15 = vld [vmem:[%s19052_s0 + $0x14c] sm:$0x1] }
 0x1c7   :  { %v16318_v52 = vsel %vm13677_vm2, %v11562_v35, %v1786_v36  ;;  %v1788_v53 = vrot.slane %v1786_v36, 4  ;;  %1342 = vrot.lane.b32.xlu1 %v11531_v40, %s13578_s27  ;;  %v3119_v7 = vshll.u32 %v11773_v31, 16  ;;  %v3125_v41 = vshll.u32 %v11774_v37, 16  ;;  %v11898_v29 = vld [vmem:[%s19052_s0 + $0x144] sm:$0xe] }
 0x1c8   :  { %v5951_v56 = vsel %vm13677_vm2, %v5949_v48, %v5950_v34  ;;  %6148 = vrot.lane.b32.xlu0 %v12360_v26, %s13583_s13  ;;  %v3129_v62 = vshrl.u32 %v11774_v37, 16  ;;  %v3135_v63 = vshll.u32 %v11775_v49, 16  ;;  %v3118_v33 = vrot.slane %v3116_v59, 4  ;;  %v13121_v34 = vld [vmem:[%s19052_s0 + $0x144] sm:$0xff]  }
 0x1c9   :  { %v12361_v60 = vcombine.low %v5948_v45, %v5951_v56  ;;  %v1790_v61 = vsel %vm13677_vm2, %v1788_v53, %v1789_v54  ;;  %v3121_v43 = vrot.slane %v3119_v7, 5  ;;  %v3127_v42 = vrot.slane %v3125_v41, 5  ;;  %v1331_v5 = vpop.permute.xlu1 %1330  ;;  %v6137_v9 = vpop.permute.xlu0 %6136  ;;  %v11899_v40 = vld [vmem:[%s19052_s0 + $0x148] sm:$0xf]  ;;  %v12158_v7 = vld [vmem:[%s19052_s0 + $0x160] sm:$0xf] }
 0x1ca   :  { %v11594_v3 = vcombine.low %v16318_v52, %v1790_v61  ;;  %v3131_v10 = vrot.slane %v3129_v62, 4  ;;  %v3137_v11 = vrot.slane %v3135_v63, 5  ;;  %v11947_v57 = vrot.slane %v11901_v55, 9  ;;  %1408 = vst.msk [vmem:[#allocation2 + $0x98] sm:$0xff] %vm1388_vm6, %v1331_v5  ;;  %v12157_v52 = vld [vmem:[%s19052_s0 + $0x15c] sm:$0xf] }
 0x1cb   :  { %v3877_v12 = vrot.slane %v11902_v39, 5  ;;  %6217 = vst.msk [vmem:[#allocation2 + $0x80] sm:$0xff] %vm6200_vm14, %v6137_v9  ;;  %1986 = vrot.lane.b32.xlu1 %v11595_v51, %s19070_s29  ;;  %v3122_v16 = vor.u32 %v3121_v43, %v3118_v33  ;;  %v3880_v17 = vrot.slane %v11903_v19, 5  ;;  %v3092_v18 = vshrl.u32 %v11770_v0, 16  ;;  %v11900_v51 = vld [vmem:[%s19052_s0 + $0x14c] sm:$0x1] }
 0x1cc   :  { %v3095_v20 = vshll.u32 %v11770_v0, 16  ;;  %6150 = vrot.lane.b32.xlu0 %v12361_v60, %s13583_s13  ;;  %v3132_v21 = vor.u32 %v3131_v10, %v3127_v42  ;;  %v3101_v6 = vshll.u32 %v11771_v4, 16  ;;  %v3105_v27 = vshrl.u32 %v11771_v4, 16  ;;  %v12159_v62 = vld [vmem:[%s19052_s0 + $0x164] sm:$0x1] }
 0x1cd   :  { %v16359_v22 = vsel %vm13677_vm2, %v11947_v57, %v3877_v12  ;;  %v3879_v23 = vrot.slane %v3877_v12, 4  ;;  %v3123_v24 = vrot.slane %v3122_v16, 4  ;;  %v3094_v25 = vrot.slane %v3092_v18, 4  ;;  %v1975_v30 = vpop.permute.xlu1 %1974  ;;  %v6139_v31 = vpop.permute.xlu0 %6138  ;;  %v407_v43 = vld [vmem:[%s19052_s0 + $0x150] sm:$0xf] }
 0x1ce   :  { %v3097_v26 = vrot.slane %v3095_v20, 5  ;;  %v3133_v32 = vrot.slane %v3132_v21, 4  ;;  %v3103_v36 = vrot.slane %v3101_v6, 5  ;;  %v3111_v37 = vshll.u32 %v11772_v15, 16  ;;  %2052 = vst.msk [vmem:[#allocation2 + $0x98] sm:$0xff] %vm2032_vm7, %v1975_v30  ;;  %v16376_v44 = vpop.f32.mrb[8].mxu0 }
 0x1cf   :  { %v16369_v35 = vsel %vm13677_vm2, %v3879_v23, %v3880_v17  ;;  %6218 = vst.msk [vmem:[#allocation2 + $0x88] sm:$0xff] %vm6200_vm14, %v6139_v31  ;;  %2340 = vrot.lane.b32.xlu1 %v13120_v2, %s13576_s21  ;;  %v3128_v45 = vsel %vm13722_vm5, %v3123_v24, %v3127_v42  ;;  %v3107_v50 = vrot.slane %v3105_v27, 4  ;;  %v16389_v53 = vpop.f32.mrb[9].mxu0  ;;  %v6714_v56 = vmax.f32 %v16222_v1, 0.0  ;;  %v13141_v1 = vld [vmem:[%s19052_s0 + $0x144] sm:$0xff]   ;;  %v13124_v27 = vld [vmem:[%s19052_s0 + $0x15c] sm:$0xff]  }
 0x1d0   :  { %v11979_v48 = vcombine.low %v16359_v22, %v16369_v35  ;;  %v3098_v49 = vor.u32 %v3097_v26, %v3094_v25  ;;  %1984 = vrot.lane.b32.xlu0 %v11594_v3, %s19070_s29  ;;  %v3138_v54 = vsel %vm13722_vm5, %v3133_v32, %v3137_v11  ;;  %v3113_v55 = vrot.slane %v3111_v37, 5  ;;  %v16399_v41 = vpop.f32.mrb[10].mxu0  ;;  %322 = vst.msk [vmem:[#allocation2 + $0xc8] sm:$0xff] %vm296_vm8, %v13141_v1  ;;  %v408_v18 = vld [vmem:[%s19052_s0 + $0x154] sm:$0xf] }
 0x1d1   :  { %v6712_v59 = vmax.f32 %v16225_v13, 0.0  ;;  %v11819_v39 = vcombine.low %v3128_v45, %v3138_v54  ;;  %v3108_v60 = vor.u32 %v3107_v50, %v3103_v36  ;;  %v11946_v61 = vrot.slane %v11898_v29, 9  ;;  %v2329_v63 = vpop.permute.xlu1 %2328  ;;  %v1973_v19 = vpop.permute.xlu0 %1972  ;;  %6779 = vst.msk [vmem:[#allocation3 + $0x30] sm:$0xff] %vm6772_vm1, %v6714_v56  ;;  %v409_v26 = vld [vmem:[%s19052_s0 + $0x158] sm:$0x1]  ;;  %v13125_v54 = vld [vmem:[%s19052_s0 + $0x150] sm:$0xff]  }
 0x1d2   :  { %v3099_v28 = vrot.slane %v3098_v49, 4  ;;  %v6249_v0 = vld [vmem:[#allocation2 + $0x80] sm:$0xff]  ;;  %v3870_v13 = vrot.slane %v11899_v40, 5  ;;  %v3873_v2 = vrot.slane %v11900_v51, 5  ;;  %v6715_v3 = vmax.f32 %v16228_v14, 0.0  ;;  %2406 = vst.msk [vmem:[#allocation2 + $0x98] sm:$0xff] %vm2386_vm9, %v2329_v63 }
 0x1d3   :  { %6777 = vst.msk [vmem:[#allocation3 + $0x20] sm:$0xff] %vm6772_vm1, %v6712_v59  ;;  %v6473_v33 = vadd.f32 %v16112_v38, %v16256_v47  ;;  %12930 = vmatprep.mubr.msk.bf16.mxu0 %vm6316_vm0, %v6249_v0  ;;  %v16418_v42 = vpop.f32.mrb[11].mxu0  ;;  %3429 = vrot.lane.b32.xlu1 %v11819_v39, %s13579_s18  ;;  %v3109_v4 = vrot.slane %v3108_v60, 4  ;;  %v5200_v5 = vshrl.u32 %v12157_v52, 16  ;;  %v5203_v47 = vshll.u32 %v12157_v52, 16 }
 0x1d4   :  { %2051 = vst.msk [vmem:[#allocation2 + $0x90] sm:$0xff] %vm2032_vm7, %v1973_v19  ;;  %v3104_v14 = vsel %vm13722_vm5, %v3099_v28, %v3103_v36  ;;  %2338 = vrot.lane.b32.xlu0 %v13121_v34, %s13576_s21  ;;  %v3871_v9 = vsel %vm13677_vm2, %v11946_v61, %v3870_v13  ;;  %v3872_v10 = vrot.slane %v3870_v13, 4  ;;  %v5209_v57 = vshll.u32 %v12158_v7, 16  ;;  %v12154_v34 = vld [vmem:[%s19052_s0 + $0x150] sm:$0xf] }
 0x1d5   :  { %6780 = vst.msk [vmem:[#allocation3 + $0x38] sm:$0xff] %vm6772_vm1, %v6715_v3  ;;  %v6713_v11 = vmax.f32 %v6473_v33, 0.0  ;;  %v3114_v12 = vsel %vm13722_vm5, %v3109_v4, %v3113_v55  ;;  %v5202_v15 = vrot.slane %v5200_v5, 4  ;;  %v5205_v16 = vrot.slane %v5203_v47, 5  ;;  %v3418_v20 = vpop.permute.xlu1 %3417  ;;  %v2327_v21 = vpop.permute.xlu0 %2326  ;;  %v12155_v45 = vld [vmem:[%s19052_s0 + $0x154] sm:$0xf] }
 0x1d6   :  { %v5213_v17 = vshrl.u32 %v12158_v7, 16  ;;  %v6250_v22 = vld [vmem:[#allocation2 + $0x88] sm:$0xff]  ;;  %v11818_v23 = vcombine.low %v3104_v14, %v3114_v12  ;;  %v3874_v6 = vsel %vm13677_vm2, %v3872_v10, %v3873_v2  ;;  %v5211_v24 = vrot.slane %v5209_v57, 5  ;;  %3495 = vst.msk [vmem:[#allocation2 + $0x98] sm:$0xff] %vm3475_vm10, %v3418_v20  ;;  %v12156_v7 = vld [vmem:[%s19052_s0 + $0x158] sm:$0x1] }
 0x1d7   :  { %6778 = vst.msk [vmem:[#allocation3 + $0x28] sm:$0xff] %vm6772_vm1, %v6713_v11  ;;  %v5219_v25 = vshll.u32 %v12159_v62, 16  ;;  %12931 = vmatmul.mubr.msk.bf16.gmra.mrb[32].mxu0 %vm6316_vm0, %v6250_v22  ;;  %4070 = vrot.lane.b32.xlu1 %v11979_v48, %s13580_s24  ;;  %v11978_v29 = vcombine.low %v3871_v9, %v3874_v6  ;;  %v5206_v30 = vor.u32 %v5205_v16, %v5202_v15  ;;  %v1053_v32 = vshrl.u32 %v407_v43, 16  ;;  %v410_v0 = vld [vmem:[%s19052_s0 + $0x15c] sm:$0xf] }
 0x1d8   :  { %2405 = vst.msk [vmem:[#allocation2 + $0x90] sm:$0xff] %vm2386_vm9, %v2327_v21  ;;  %v5215_v31 = vrot.slane %v5213_v17, 4  ;;  %3427 = vrot.lane.b32.xlu0 %v11818_v23, %s13579_s18  ;;  %v1056_v36 = vshll.u32 %v407_v43, 16  ;;  %v1062_v37 = vshll.u32 %v408_v18, 16  ;;  %v1066_v40 = vshrl.u32 %v408_v18, 16 }
 0x1d9   :  { %v5221_v35 = vrot.slane %v5219_v25, 5  ;;  %v5207_v48 = vrot.slane %v5206_v30, 4  ;;  %v1055_v50 = vrot.slane %v1053_v32, 4  ;;  %v1072_v51 = vshll.u32 %v409_v26, 16  ;;  %v4059_v52 = vpop.permute.xlu1 %4058  ;;  %v411_v15 = vld [vmem:[%s19052_s0 + $0x160] sm:$0xf] }
 0x1da   :  { %v5216_v49 = vor.u32 %v5215_v31, %v5211_v24  ;;  %v1058_v55 = vrot.slane %v1056_v36, 5  ;;  %v1064_v56 = vrot.slane %v1062_v37, 5  ;;  %v1068_v59 = vrot.slane %v1066_v40, 4  ;;  %4136 = vst.msk [vmem:[#allocation2 + $0x98] sm:$0xff] %vm4116_vm11, %v4059_v52  ;;  %v3416_v28 = vpop.permute.xlu0 %3415  ;;  %v12283_v25 = vld [vmem:[%s19052_s0 + $0x154] sm:$0xf] }
 0x1db   :  { %v5176_v39 = vshrl.u32 %v12154_v34, 16  ;;  %4424 = vrot.lane.b32.xlu1 %v13124_v27, %s13581_s16  ;;  %v5212_v62 = vsel %vm13722_vm5, %v5207_v48, %v5211_v24  ;;  %v1074_v19 = vrot.slane %v1072_v51, 5  ;;  %3494 = vst.msk [vmem:[#allocation2 + $0x90] sm:$0xff] %vm3475_vm10, %v3416_v28  ;;  %v16469_v1 = vadd.f32 %v16376_v44, %v16112_v38  ;;  %v12282_v24 = vld [vmem:[%s19052_s0 + $0x150] sm:$0xe] }
 0x1dc   :  { %v6903_v60 = vld [vmem:[#allocation3 + $0x30] ss:$2 sm:$0xff]  ;;  %v6935_v61 = vld [vmem:[#allocation3 + $0x31] ss:$2 sm:$0xff]  ;;  %v5217_v63 = vrot.slane %v5216_v49, 4  ;;  %4068 = vrot.lane.b32.xlu0 %v11978_v29, %s13580_s24  ;;  %v1059_v2 = vor.u32 %v1058_v55, %v1055_v50  ;;  %v1069_v3 = vor.u32 %v1068_v59, %v1064_v56  ;;  %v5179_v5 = vshll.u32 %v12154_v34, 16 }
 0x1dd   :  { %v6981_v13 = vmax.f32 %v6903_v60, %v6935_v61  ;;  %v5178_v33 = vrot.slane %v5176_v39, 4  ;;  %v5185_v47 = vshll.u32 %v12155_v45, 16  ;;  %v4413_v9 = vpop.permute.xlu1 %4412  ;;  %v16476_v10 = vadd.f32 %v16112_v38, %v16389_v53  ;;  %v412_v38 = vld [vmem:[%s19052_s0 + $0x164] sm:$0x1]  ;;  %v12284_v31 = vld [vmem:[%s19052_s0 + $0x158] sm:$0x1] }
 0x1de   :  { %v6839_v43 = vld [vmem:[#allocation3 + $0x20] ss:$2 sm:$0xff]  ;;  %v6871_v14 = vld [vmem:[#allocation3 + $0x21] ss:$2 sm:$0xff]  ;;  %v5222_v4 = vsel %vm13722_vm5, %v5217_v63, %v5221_v35  ;;  %v1060_v57 = vrot.slane %v1059_v2, 4  ;;  %v1070_v12 = vrot.slane %v1069_v3, 4  ;;  %v4057_v16 = vpop.permute.xlu0 %4056 }
 0x1df   :  { %v6965_v44 = vmax.f32 %v6839_v43, %v6871_v14  ;;  %v12203_v11 = vcombine.low %v5212_v62, %v5222_v4  ;;  %4490 = vst.msk [vmem:[#allocation2 + $0x98] sm:$0xff] %vm4470_vm12, %v4413_v9  ;;  %v5181_v17 = vrot.slane %v5179_v5, 5  ;;  %v5187_v18 = vrot.slane %v5185_v47, 5  ;;  %v1502_v40 = vld [vmem:[%s19052_s0 + $0x15c] sm:$0xe] }
 0x1e0   :  { %v5189_v20 = vshrl.u32 %v12155_v45, 16  ;;  %v5195_v21 = vshll.u32 %v12156_v7, 16  ;;  %4135 = vst.msk [vmem:[#allocation2 + $0x90] sm:$0xff] %vm4116_vm11, %v4057_v16  ;;  %4422 = vrot.lane.b32.xlu0 %v13125_v54, %s13581_s16  ;;  %v1065_v22 = vsel %vm13722_vm5, %v1060_v57, %v1064_v56  ;;  %v1075_v23 = vsel %vm13722_vm5, %v1070_v12, %v1074_v19  ;;  %v1503_v52 = vld [vmem:[%s19052_s0 + $0x160] sm:$0xf] }
 0x1e1   :  { %v6997_v53 = vmax.f32 %v6965_v44, %v6981_v13  ;;  %5513 = vrot.lane.b32.xlu1 %v12203_v11, %s13582_s25  ;;  %v1077_v6 = vshrl.u32 %v410_v0, 16  ;;  %v11532_v26 = vcombine.low %v1065_v22, %v1075_v23  ;;  %v5182_v27 = vor.u32 %v5181_v17, %v5178_v33  ;;  %v5502_v32 = vpop.permute.xlu1 %5501  ;;  %v1504_v7 = vld [vmem:[%s19052_s0 + $0x164] sm:$0x1]  ;;  %v12285_v2 = vld [vmem:[%s19052_s0 + $0x15c] sm:$0xe] }
 0x1e2   :  { %v5191_v29 = vrot.slane %v5189_v20, 4  ;;  %v5197_v30 = vrot.slane %v5195_v21, 5  ;;  %v1080_v35 = vshll.u32 %v410_v0, 16  ;;  %v1086_v36 = vshll.u32 %v411_v15, 16  ;;  %5579 = vst.msk [vmem:[#allocation2 + $0x98] sm:$0xff] %vm5559_vm13, %v5502_v32  ;;  %v4411_v45 = vpop.permute.xlu0 %4410 }
 0x1e3   :  { %7065 = vst.msk [vmem:[#allocation4 + $0x21] sm:$0xff] %vm6772_vm1, %v6997_v53  ;;  %v1079_v34 = vrot.slane %v1077_v6, 4  ;;  %v1090_v37 = vshrl.u32 %v411_v15, 16  ;;  %v5183_v48 = vrot.slane %v5182_v27, 4  ;;  %v1096_v50 = vshll.u32 %v412_v38, 16 }
 0x1e4   :  { %v5192_v49 = vor.u32 %v5191_v29, %v5187_v18  ;;  %v12330_v51 = vrot.slane %v12282_v24, 9  ;;  %4489 = vst.msk [vmem:[#allocation2 + $0x90] sm:$0xff] %vm4470_vm12, %v4411_v45  ;;  %v1082_v54 = vrot.slane %v1080_v35, 5  ;;  %v1088_v55 = vrot.slane %v1086_v36, 5  ;;  %v12286_v3 = vld [vmem:[%s19052_s0 + $0x160] sm:$0xf] }
 0x1e5   :  { %1344 = vrot.lane.b32.xlu1 %v11532_v26, %s13578_s27  ;;  %v1092_v56 = vrot.slane %v1090_v37, 4  ;;  %v5954_v59 = vrot.slane %v12283_v25, 5  ;;  %v5188_v39 = vsel %vm13722_vm5, %v5183_v48, %v5187_v18  ;;  %v1098_v60 = vrot.slane %v1096_v50, 5  ;;  %v1333_v62 = vpop.permute.xlu1 %1332  ;;  %v12287_v5 = vld [vmem:[%s19052_s0 + $0x164] sm:$0x1] }
 0x1e6   :  { %v5193_v28 = vrot.slane %v5192_v49, 4  ;;  %v5957_v61 = vrot.slane %v12284_v31, 5  ;;  %v1083_v63 = vor.u32 %v1082_v54, %v1079_v34  ;;  %1409 = vst.msk [vmem:[#allocation2 + $0xa0] sm:$0xff] %vm1388_vm6, %v1333_v62  ;;  %v11565_v43 = vrot.slane %v1502_v40, 9  ;;  %v1499_v57 = vld [vmem:[%s19052_s0 + $0x150] sm:$0xe] }
 0x1e7   :  { %v1093_v19 = vor.u32 %v1092_v56, %v1088_v55  ;;  %v5955_v0 = vsel %vm13677_vm2, %v12330_v51, %v5954_v59  ;;  %v5956_v13 = vrot.slane %v5954_v59, 4  ;;  %v1807_v14 = vrot.slane %v1503_v52, 5  ;;  %v1500_v12 = vld [vmem:[%s19052_s0 + $0x154] sm:$0xf]  ;;  %v1501_v20 = vld [vmem:[%s19052_s0 + $0x158] sm:$0x1] }
 0x1e8   :  { %v5198_v33 = vsel %vm13722_vm5, %v5193_v28, %v5197_v30  ;;  %v1810_v4 = vrot.slane %v1504_v7, 5  ;;  %v1084_v9 = vrot.slane %v1083_v63, 4  ;;  %v12331_v18 = vrot.slane %v12285_v2, 9  ;;  %v11779_v6 = vld [vmem:[%s19052_s0 + $0x168] sm:$0xf] }
 0x1e9   :  { %v12202_v47 = vcombine.low %v5188_v39, %v5198_v33  ;;  %v1094_v44 = vrot.slane %v1093_v19, 4  ;;  %v5958_v11 = vsel %vm13677_vm2, %v5956_v13, %v5957_v61  ;;  %v1808_v16 = vsel %vm13677_vm2, %v11565_v43, %v1807_v14  ;;  %v5500_v21 = vpop.permute.xlu0 %5499  ;;  %v11780_v29 = vld [vmem:[%s19052_s0 + $0x16c] sm:$0xf]  ;;  %v11781_v30 = vld [vmem:[%s19052_s0 + $0x170] sm:$0x1] }
 0x1ea   :  { %v12362_v15 = vcombine.low %v5955_v0, %v5958_v11  ;;  %v1809_v17 = vrot.slane %v1807_v14, 4  ;;  %v1089_v38 = vsel %vm13722_vm5, %v1084_v9, %v1088_v55  ;;  %v5961_v22 = vrot.slane %v12286_v3, 5  ;;  %5578 = vst.msk [vmem:[#allocation2 + $0x90] sm:$0xff] %vm5559_vm13, %v5500_v21  ;;  %v11907_v36 = vld [vmem:[%s19052_s0 + $0x168] sm:$0xe] }
 0x1eb   :  { %5511 = vrot.lane.b32.xlu0 %v12202_v47, %s13582_s25  ;;  %v1099_v53 = vsel %vm13722_vm5, %v1094_v44, %v1098_v60  ;;  %v5964_v23 = vrot.slane %v12287_v5, 5  ;;  %v11564_v26 = vrot.slane %v1499_v57, 9  ;;  %v1800_v27 = vrot.slane %v1500_v12, 5  ;;  %v11908_v37 = vld [vmem:[%s19052_s0 + $0x16c] sm:$0xf]  ;;  %v13144_v47 = vld [vmem:[%s19052_s0 + $0x150] sm:$0xff]  }
 0x1ec   :  { %v11533_v24 = vcombine.low %v1089_v38, %v1099_v53  ;;  %v1811_v25 = vsel %vm13677_vm2, %v1809_v17, %v1810_v4  ;;  %v5962_v32 = vsel %vm13677_vm2, %v12331_v18, %v5961_v22  ;;  %v5963_v34 = vrot.slane %v5961_v22, 4  ;;  %v11909_v40 = vld [vmem:[%s19052_s0 + $0x170] sm:$0x1]  ;;  %v11776_v51 = vld [vmem:[%s19052_s0 + $0x15c] sm:$0xf]  ;;  %v13126_v2 = vld [vmem:[%s19052_s0 + $0x168] sm:$0xff]  }
 0x1ed   :  { %v11597_v31 = vcombine.low %v1808_v16, %v1811_v25  ;;  %v1803_v35 = vrot.slane %v1501_v20, 5  ;;  %v16574_v45 = vsel %vm13677_vm2, %v11564_v26, %v1800_v27  ;;  %v1802_v48 = vrot.slane %v1800_v27, 4  ;;  %v1335_v52 = vpop.permute.xlu1 %1334  ;;  %v6141_v54 = vpop.permute.xlu0 %6140  ;;  %v11777_v39 = vld [vmem:[%s19052_s0 + $0x160] sm:$0xf]  ;;  %v11778_v44 = vld [vmem:[%s19052_s0 + $0x164] sm:$0x1] }
 0x1ee   :  { %1346 = vrot.lane.b32.xlu1 %v11533_v24, %s13578_s27  ;;  %v3164_v49 = vshrl.u32 %v11779_v6, 16  ;;  %v3167_v50 = vshll.u32 %v11779_v6, 16  ;;  %v5965_v55 = vsel %vm13677_vm2, %v5963_v34, %v5964_v23  ;;  %v3173_v56 = vshll.u32 %v11780_v29, 16  ;;  %1410 = vst.msk [vmem:[#allocation2 + $0xa8] sm:$0xff] %vm1388_vm6, %v1335_v52  ;;  %v11904_v21 = vld [vmem:[%s19052_s0 + $0x15c] sm:$0xe] }
 0x1ef   :  { %6152 = vrot.lane.b32.xlu0 %v12362_v15, %s13583_s13  ;;  %v3177_v59 = vshrl.u32 %v11780_v29, 16  ;;  %v3183_v7 = vshll.u32 %v11781_v30, 16  ;;  %6219 = vst.msk [vmem:[#allocation2 + $0x90] sm:$0xff] %vm6200_vm14, %v6141_v54  ;;  %v12363_v28 = vcombine.low %v5962_v32, %v5965_v55  ;;  %v1804_v60 = vsel %vm13677_vm2, %v1802_v48, %v1803_v35  ;;  %v11905_v38 = vld [vmem:[%s19052_s0 + $0x160] sm:$0xf] }
 0x1f0   :  { %v3166_v61 = vrot.slane %v3164_v49, 4  ;;  %v3169_v62 = vrot.slane %v3167_v50, 5  ;;  %v11596_v63 = vcombine.low %v16574_v45, %v1804_v60  ;;  %v3175_v19 = vrot.slane %v3173_v56, 5  ;;  %323 = vst.msk [vmem:[#allocation2 + $0xd0] sm:$0xff] %vm296_vm8, %v13144_v47  ;;  %v16621_v25 = vld [vmem:[%s19052_s0 + $0x164] sm:$0x1] }
 0x1f1   :  { %v3179_v0 = vrot.slane %v3177_v59, 4  ;;  %v3185_v13 = vrot.slane %v3183_v7, 5  ;;  %v11949_v33 = vrot.slane %v11907_v36, 9  ;;  %v3891_v43 = vrot.slane %v11908_v37, 5  ;;  %v1979_v4 = vpop.permute.xlu1 %1978  ;;  %v6143_v5 = vpop.permute.xlu0 %6142  ;;  %v13127_v27 = vld [vmem:[%s19052_s0 + $0x15c] sm:$0xff]  }
 0x1f2   :  { %1990 = vrot.lane.b32.xlu1 %v11597_v31, %s19070_s29  ;;  %v3170_v3 = vor.u32 %v3169_v62, %v3166_v61  ;;  %v3894_v14 = vrot.slane %v11909_v40, 5  ;;  %v3140_v11 = vshrl.u32 %v11776_v51, 16  ;;  %v3143_v57 = vshll.u32 %v11776_v51, 16  ;;  %2054 = vst.msk [vmem:[#allocation2 + $0xa8] sm:$0xff] %vm2032_vm7, %v1979_v4  ;;  %v16603_v15 = vpop.f32.mrb[12].mxu0  ;;  %v13130_v4 = vld [vmem:[%s19052_s0 + $0x174] sm:$0xff]  }
 0x1f3   :  { %6154 = vrot.lane.b32.xlu0 %v12363_v28, %s13583_s13  ;;  %v3180_v9 = vor.u32 %v3179_v0, %v3175_v19  ;;  %v3149_v12 = vshll.u32 %v11777_v39, 16  ;;  %6220 = vst.msk [vmem:[#allocation2 + $0x98] sm:$0xff] %vm6200_vm14, %v6143_v5  ;;  %v16607_v17 = vsel %vm13677_vm2, %v11949_v33, %v3891_v43  ;;  %v3893_v18 = vrot.slane %v3891_v43, 4  ;;  %v16615_v53 = vpop.f32.mrb[13].mxu0  ;;  %v12163_v32 = vld [vmem:[%s19052_s0 + $0x174] sm:$0xf] }
 0x1f4   :  { %v3171_v16 = vrot.slane %v3170_v3, 4  ;;  %v3153_v20 = vshrl.u32 %v11777_v39, 16  ;;  %v3142_v23 = vrot.slane %v3140_v11, 4  ;;  %v3145_v6 = vrot.slane %v3143_v57, 5  ;;  %v16642_v49 = vpop.f32.mrb[14].mxu0 }
 0x1f5   :  { %v3181_v22 = vrot.slane %v3180_v9, 4  ;;  %v3151_v24 = vrot.slane %v3149_v12, 5  ;;  %v3895_v29 = vsel %vm13677_vm2, %v3893_v18, %v3894_v14  ;;  %v3159_v31 = vshll.u32 %v11778_v44, 16  ;;  %v2333_v34 = vpop.permute.xlu1 %2332  ;;  %v1977_v35 = vpop.permute.xlu0 %1976  ;;  %v12164_v7 = vld [vmem:[%s19052_s0 + $0x178] sm:$0xf] }
 0x1f6   :  { %2344 = vrot.lane.b32.xlu1 %v13126_v2, %s13576_s21  ;;  %v3176_v26 = vsel %vm13722_vm5, %v3171_v16, %v3175_v19  ;;  %v3155_v30 = vrot.slane %v3153_v20, 4  ;;  %v6251_v36 = vld [vmem:[#allocation2 + $0x90] sm:$0xff]  ;;  %v11981_v40 = vcombine.low %v16607_v17, %v3895_v29  ;;  %v3146_v45 = vor.u32 %v3145_v6, %v3142_v23  ;;  %2408 = vst.msk [vmem:[#allocation2 + $0xa8] sm:$0xff] %vm2386_vm9, %v2333_v34  ;;  %v12165_v61 = vld [vmem:[%s19052_s0 + $0x17c] sm:$0x1]  ;;  %v6504_v11 = vpop.f32.mrb[15].mxu0 }
 0x1f7   :  { %1988 = vrot.lane.b32.xlu0 %v11596_v63, %s19070_s29  ;;  %v3186_v37 = vsel %vm13722_vm5, %v3181_v22, %v3185_v13  ;;  %v6718_v48 = vmax.f32 %v16469_v1, 0.0  ;;  %2053 = vst.msk [vmem:[#allocation2 + $0xa0] sm:$0xff] %vm2032_vm7, %v1977_v35  ;;  %12934 = vmatprep.mubr.msk.bf16.mxu0 %vm6316_vm0, %v6251_v36  ;;  %v3161_v52 = vrot.slane %v3159_v31, 5  ;;  %v6716_v54 = vmax.f32 %v16476_v10, 0.0  ;;  %v16655_v10 = vld [vmem:[%s19054_s2] ss:$0 sm:$0xff] }
 0x1f8   :  { %v11821_v50 = vcombine.low %v3176_v26, %v3186_v37  ;;  %v3156_v51 = vor.u32 %v3155_v30, %v3151_v24  ;;  %v3147_v55 = vrot.slane %v3146_v45, 4  ;;  %v11948_v56 = vrot.slane %v11904_v21, 9  ;;  %v13145_v13 = vld [vmem:[%s19052_s0 + $0x15c] sm:$0xff]   ;;  %v413_v33 = vld [vmem:[%s19052_s0 + $0x168] sm:$0xf] }
 0x1f9   :  { %6783 = vst.msk [vmem:[#allocation3 + $0x50] sm:$0xff] %vm6772_vm1, %v6718_v48  ;;  %v3884_v59 = vrot.slane %v11905_v38, 5  ;;  %v3887_v1 = vrot.slane %v16621_v25, 5  ;;  %6781 = vst.msk [vmem:[#allocation3 + $0x40] sm:$0xff] %vm6772_vm1, %v6716_v54  ;;  %v6497_v28 = vadd.f32 %v16655_v10, %v16399_v41  ;;  %v6489_v60 = vadd.f32 %v16655_v10, %v16418_v42  ;;  %v3422_v63 = vpop.permute.xlu1 %3421  ;;  %v2331_v19 = vpop.permute.xlu0 %2330  ;;  %v414_v43 = vld [vmem:[%s19052_s0 + $0x16c] sm:$0xf] }
 0x1fa   :  { %3433 = vrot.lane.b32.xlu1 %v11821_v50, %s13579_s18  ;;  %v3157_v39 = vrot.slane %v3156_v51, 4  ;;  %v5248_v62 = vshrl.u32 %v12163_v32, 16  ;;  %v6252_v0 = vld [vmem:[#allocation2 + $0x98] sm:$0xff]  ;;  %v3152_v41 = vsel %vm13722_vm5, %v3147_v55, %v3151_v24  ;;  %v5251_v3 = vshll.u32 %v12163_v32, 16  ;;  %3497 = vst.msk [vmem:[#allocation2 + $0xa8] sm:$0xff] %vm3475_vm10, %v3422_v63  ;;  %v13131_v55 = vld [vmem:[%s19052_s0 + $0x168] sm:$0xff]  }
 0x1fb   :  { %2342 = vrot.lane.b32.xlu0 %v13127_v27, %s13576_s21  ;;  %v3885_v42 = vsel %vm13677_vm2, %v11948_v56, %v3884_v59  ;;  %v3886_v2 = vrot.slane %v3884_v59, 4  ;;  %2407 = vst.msk [vmem:[#allocation2 + $0xa0] sm:$0xff] %vm2386_vm9, %v2331_v19  ;;  %12935 = vmatmul.mubr.msk.bf16.gmra.mrb[36].mxu0 %vm6316_vm0, %v6252_v0  ;;  %v6719_v5 = vmax.f32 %v6497_v28, 0.0  ;;  %v6717_v47 = vmax.f32 %v6489_v60, 0.0  ;;  %v415_v44 = vld [vmem:[%s19052_s0 + $0x170] sm:$0x1] }
 0x1fc   :  { %v3162_v14 = vsel %vm13722_vm5, %v3157_v39, %v3161_v52  ;;  %v5250_v9 = vrot.slane %v5248_v62, 4  ;;  %324 = vst.msk [vmem:[#allocation2 + $0xd8] sm:$0xff] %vm296_vm8, %v13145_v13  ;;  %v5253_v16 = vrot.slane %v5251_v3, 5  ;;  %v5257_v17 = vshll.u32 %v12164_v7, 16  ;;  %v12160_v18 = vld [vmem:[%s19052_s0 + $0x168] sm:$0xf] }
 0x1fd   :  { %v11820_v57 = vcombine.low %v3152_v41, %v3162_v14  ;;  %v3888_v12 = vsel %vm13677_vm2, %v3886_v2, %v3887_v1  ;;  %6784 = vst.msk [vmem:[#allocation3 + $0x58] sm:$0xff] %vm6772_vm1, %v6719_v5  ;;  %6782 = vst.msk [vmem:[#allocation3 + $0x48] sm:$0xff] %vm6772_vm1, %v6717_v47  ;;  %v5261_v21 = vshrl.u32 %v12164_v7, 16  ;;  %v5267_v38 = vshll.u32 %v12165_v61, 16  ;;  %v16701_v23 = vld [vmem:[%s19052_s0 + $0x16c] sm:$0xf]  ;;  %v4063_v6 = vpop.permute.xlu1 %4062 }
 0x1fe   :  { %4074 = vrot.lane.b32.xlu1 %v11981_v40, %s13580_s24  ;;  %v11980_v20 = vcombine.low %v3885_v42, %v3888_v12  ;;  %v1101_v22 = vshrl.u32 %v413_v33, 16  ;;  %v5254_v24 = vor.u32 %v5253_v16, %v5250_v9  ;;  %v5259_v25 = vrot.slane %v5257_v17, 5  ;;  %4138 = vst.msk [vmem:[#allocation2 + $0xa8] sm:$0xff] %vm4116_vm11, %v4063_v6  ;;  %v3420_v29 = vpop.permute.xlu0 %3419  ;;  %v12162_v1 = vld [vmem:[%s19052_s0 + $0x170] sm:$0x1] }
 0x1ff   :  { %3431 = vrot.lane.b32.xlu0 %v11820_v57, %s13579_s18  ;;  %v1104_v26 = vshll.u32 %v413_v33, 16  ;;  %v1110_v27 = vshll.u32 %v414_v43, 16  ;;  %v5263_v30 = vrot.slane %v5261_v21, 4  ;;  %v5269_v31 = vrot.slane %v5267_v38, 5  ;;  %3496 = vst.msk [vmem:[#allocation2 + $0xa0] sm:$0xff] %vm3475_vm10, %v3420_v29 }
 0x200   :  { %v1103_v32 = vrot.slane %v1101_v22, 4  ;;  %v1114_v34 = vshrl.u32 %v414_v43, 16  ;;  %v5255_v35 = vrot.slane %v5254_v24, 4  ;;  %v1120_v40 = vshll.u32 %v415_v44, 16  ;;  %v416_v63 = vld [vmem:[%s19052_s0 + $0x174] sm:$0xf] }
 0x201   :  { %v1106_v36 = vrot.slane %v1104_v26, 5  ;;  %v1112_v37 = vrot.slane %v1110_v27, 5  ;;  %v5264_v45 = vor.u32 %v5263_v30, %v5259_v25  ;;  %v5224_v50 = vshrl.u32 %v12160_v18, 16  ;;  %v4417_v52 = vpop.permute.xlu1 %4416  ;;  %v12290_v24 = vld [vmem:[%s19052_s0 + $0x170] sm:$0x1] }
 0x202   :  { %4428 = vrot.lane.b32.xlu1 %v13130_v4, %s13581_s16  ;;  %v1116_v48 = vrot.slane %v1114_v34, 4  ;;  %v5227_v51 = vshll.u32 %v12160_v18, 16  ;;  %v5260_v54 = vsel %vm13722_vm5, %v5255_v35, %v5259_v25  ;;  %v1122_v59 = vrot.slane %v1120_v40, 5  ;;  %4492 = vst.msk [vmem:[#allocation2 + $0xa8] sm:$0xff] %vm4470_vm12, %v4417_v52  ;;  %v4061_v39 = vpop.permute.xlu0 %4060  ;;  %v418_v18 = vld [vmem:[%s19052_s0 + $0x17c] sm:$0x1] }
 0x203   :  { %4072 = vrot.lane.b32.xlu0 %v11980_v20, %s13580_s24  ;;  %v1107_v56 = vor.u32 %v1106_v36, %v1103_v32  ;;  %v5233_v7 = vshll.u32 %v16701_v23, 16  ;;  %v5265_v28 = vrot.slane %v5264_v45, 4  ;;  %v5226_v61 = vrot.slane %v5224_v50, 4  ;;  %4137 = vst.msk [vmem:[#allocation2 + $0xa0] sm:$0xff] %vm4116_vm11, %v4061_v39  ;;  %v12288_v20 = vld [vmem:[%s19052_s0 + $0x168] sm:$0xe] }
 0x204   :  { %v1117_v60 = vor.u32 %v1116_v48, %v1112_v37  ;;  %v5229_v62 = vrot.slane %v5227_v51, 5  ;;  %v6905_v19 = vld [vmem:[#allocation3 + $0x50] ss:$2 sm:$0xff]  ;;  %v6937_v0 = vld [vmem:[#allocation3 + $0x51] ss:$2 sm:$0xff]  ;;  %v16724_v41 = vadd.f32 %v16655_v10, %v16603_v15  ;;  %v16728_v42 = vadd.f32 %v16655_v10, %v16615_v53  ;;  %v13146_v40 = vld [vmem:[%s19052_s0 + $0x168] sm:$0xff]  }
 0x205   :  { %v6841_v13 = vld [vmem:[#allocation3 + $0x40] ss:$2 sm:$0xff]  ;;  %v16732_v2 = vadd.f32 %v16655_v10, %v16642_v49  ;;  %v16735_v3 = vadd.f32 %v16655_v10, %v6504_v11  ;;  %v6982_v33 = vmax.f32 %v6905_v19, %v6937_v0  ;;  %v6873_v43 = vld [vmem:[#allocation3 + $0x41] ss:$2 sm:$0xff]  ;;  %v5270_v14 = vsel %vm13722_vm5, %v5265_v28, %v5269_v31  ;;  %v417_v15 = vld [vmem:[%s19052_s0 + $0x178] sm:$0xf]  ;;  %v5506_v53 = vpop.permute.xlu1 %5505 }
 0x206   :  { %v1108_v4 = vrot.slane %v1107_v56, 4  ;;  %v1118_v5 = vrot.slane %v1117_v60, 4  ;;  %v6966_v47 = vmax.f32 %v6841_v13, %v6873_v43  ;;  %v12205_v9 = vcombine.low %v5260_v54, %v5270_v14  ;;  %5581 = vst.msk [vmem:[#allocation2 + $0xa8] sm:$0xff] %vm5559_vm13, %v5506_v53  ;;  %v4415_v11 = vpop.permute.xlu0 %4414  ;;  %v1508_v30 = vld [vmem:[%s19052_s0 + $0x174] sm:$0xe] }
 0x207   :  { %4426 = vrot.lane.b32.xlu0 %v13131_v55, %s13581_s16  ;;  %v5230_v49 = vor.u32 %v5229_v62, %v5226_v61  ;;  %v16743_v44 = vrot.slane %v5233_v7, 5  ;;  %v5237_v16 = vshrl.u32 %v16701_v23, 16  ;;  %v5243_v17 = vshll.u32 %v12162_v1, 16  ;;  %4491 = vst.msk [vmem:[#allocation2 + $0xa0] sm:$0xff] %vm4470_vm12, %v4415_v11  ;;  %v12289_v23 = vld [vmem:[%s19052_s0 + $0x16c] sm:$0xf] }
 0x208   :  { %v1113_v57 = vsel %vm13722_vm5, %v1108_v4, %v1112_v37  ;;  %v1123_v12 = vsel %vm13722_vm5, %v1118_v5, %v1122_v59  ;;  %v6998_v21 = vmax.f32 %v6966_v47, %v6982_v33  ;;  %5517 = vrot.lane.b32.xlu1 %v12205_v9, %s13582_s25  ;;  %v1125_v6 = vshrl.u32 %v416_v63, 16  ;;  %v1509_v37 = vld [vmem:[%s19052_s0 + $0x178] sm:$0xf]  ;;  %v1510_v52 = vld [vmem:[%s19052_s0 + $0x17c] sm:$0x1]  ;;  %325 = vst.msk [vmem:[#allocation2 + $0xe0] sm:$0xff] %vm296_vm8, %v13146_v40 }
 0x209   :  { %v11534_v38 = vcombine.low %v1113_v57, %v1123_v12  ;;  %v5231_v22 = vrot.slane %v5230_v49, 4  ;;  %v5239_v25 = vrot.slane %v5237_v16, 4  ;;  %v5245_v26 = vrot.slane %v5243_v17, 5  ;;  %v1337_v31 = vpop.permute.xlu1 %1336  ;;  %v12291_v60 = vld [vmem:[%s19052_s0 + $0x174] sm:$0xe] }
 0x20a   :  { %v1128_v27 = vshll.u32 %v416_v63, 16  ;;  %v1134_v29 = vshll.u32 %v417_v15, 16  ;;  %7066 = vst.msk [vmem:[#allocation4 + $0x31] sm:$0xff] %vm6772_vm1, %v6998_v21  ;;  %v1127_v34 = vrot.slane %v1125_v6, 4  ;;  %v1138_v35 = vshrl.u32 %v417_v15, 16  ;;  %v13147_v62 = vld [vmem:[%s19052_s0 + $0x174] sm:$0xff]  }
 0x20b   :  { %v5236_v32 = vsel %vm13722_vm5, %v5231_v22, %v16743_v44  ;;  %v1144_v36 = vshll.u32 %v418_v18, 16  ;;  %1411 = vst.msk [vmem:[#allocation2 + $0xb0] sm:$0xff] %vm1388_vm6, %v1337_v31  ;;  %v5240_v45 = vor.u32 %v5239_v25, %v16743_v44  ;;  %v12332_v51 = vrot.slane %v12288_v20, 9  ;;  %v12292_v33 = vld [vmem:[%s19052_s0 + $0x178] sm:$0xf] }
 0x20c   :  { %v1130_v48 = vrot.slane %v1128_v27, 5  ;;  %v1136_v50 = vrot.slane %v1134_v29, 5  ;;  %1348 = vrot.lane.b32.xlu1 %v11534_v38, %s13578_s27  ;;  %v1140_v54 = vrot.slane %v1138_v35, 4  ;;  %v5968_v56 = vrot.slane %v12289_v23, 5  ;;  %v12293_v15 = vld [vmem:[%s19052_s0 + $0x17c] sm:$0x1] }
 0x20d   :  { %v1146_v55 = vrot.slane %v1144_v36, 5  ;;  %v5971_v59 = vrot.slane %v12290_v24, 5  ;;  %v5241_v1 = vrot.slane %v5240_v45, 4  ;;  %v11567_v39 = vrot.slane %v1508_v30, 9  ;;  %v5504_v61 = vpop.permute.xlu0 %5503  ;;  %v1505_v53 = vld [vmem:[%s19052_s0 + $0x168] sm:$0xe] }
 0x20e   :  { %v1131_v7 = vor.u32 %v1130_v48, %v1127_v34  ;;  %v1821_v28 = vrot.slane %v1509_v37, 5  ;;  %v1141_v63 = vor.u32 %v1140_v54, %v1136_v50  ;;  %v5969_v19 = vsel %vm13677_vm2, %v12332_v51, %v5968_v56  ;;  %5580 = vst.msk [vmem:[#allocation2 + $0xa0] sm:$0xff] %vm5559_vm13, %v5504_v61  ;;  %v1506_v11 = vld [vmem:[%s19052_s0 + $0x16c] sm:$0xf]  ;;  %v1507_v57 = vld [vmem:[%s19052_s0 + $0x170] sm:$0x1] }
 0x20f   :  { %v5970_v0 = vrot.slane %v5968_v56, 4  ;;  %v1824_v13 = vrot.slane %v1510_v52, 5  ;;  %v5246_v43 = vsel %vm13722_vm5, %v5241_v1, %v5245_v26  ;;  %326 = vst.msk [vmem:[#allocation2 + $0xe8] sm:$0xff] %vm296_vm8, %v13147_v62  ;;  %v12333_v44 = vrot.slane %v12291_v60, 9  ;;  %v11785_v20 = vld [vmem:[%s19052_s0 + $0x180] sm:$0xf] }
 0x210   :  { %v1132_v14 = vrot.slane %v1131_v7, 4  ;;  %v16801_v4 = vsel %vm13677_vm2, %v11567_v39, %v1821_v28  ;;  %v1823_v5 = vrot.slane %v1821_v28, 4  ;;  %v12204_v47 = vcombine.low %v5236_v32, %v5246_v43  ;;  %v11786_v21 = vld [vmem:[%s19052_s0 + $0x184] sm:$0xf]  ;;  %v11787_v26 = vld [vmem:[%s19052_s0 + $0x188] sm:$0x1] }
 0x211   :  { %v1142_v9 = vrot.slane %v1141_v63, 4  ;;  %v5972_v49 = vsel %vm13677_vm2, %v5970_v0, %v5971_v59  ;;  %v5975_v18 = vrot.slane %v12292_v33, 5  ;;  %v1339_v38 = vpop.permute.xlu1 %1338  ;;  %v6145_v22 = vpop.permute.xlu0 %6144  ;;  %v5978_v24 = vrot.slane %v12293_v15, 5  ;;  %v11913_v32 = vld [vmem:[%s19052_s0 + $0x180] sm:$0xe] }
 0x212   :  { %v1137_v12 = vsel %vm13722_vm5, %v1132_v14, %v1136_v50  ;;  %v12364_v16 = vcombine.low %v5969_v19, %v5972_v49  ;;  %v1825_v17 = vsel %vm13677_vm2, %v1823_v5, %v1824_v13  ;;  %5515 = vrot.lane.b32.xlu0 %v12204_v47, %s13582_s25  ;;  %v11566_v25 = vrot.slane %v1505_v53, 9  ;;  %1412 = vst.msk [vmem:[#allocation2 + $0xb8] sm:$0xff] %vm1388_vm6, %v1339_v38  ;;  %v11914_v40 = vld [vmem:[%s19052_s0 + $0x184] sm:$0xf]  ;;  %v11915_v52 = vld [vmem:[%s19052_s0 + $0x188] sm:$0x1] }
 0x213   :  { %v1147_v6 = vsel %vm13722_vm5, %v1142_v9, %v1146_v55  ;;  %v11599_v23 = vcombine.low %v16801_v4, %v1825_v17  ;;  %6221 = vst.msk [vmem:[#allocation2 + $0xa0] sm:$0xff] %vm6200_vm14, %v6145_v22  ;;  %v5976_v29 = vsel %vm13677_vm2, %v12333_v44, %v5975_v18  ;;  %v5977_v30 = vrot.slane %v5975_v18, 4  ;;  %v11782_v54 = vld [vmem:[%s19052_s0 + $0x174] sm:$0xf]  ;;  %v11783_v28 = vld [vmem:[%s19052_s0 + $0x178] sm:$0xf] }
 0x214   :  { %v11535_v27 = vcombine.low %v1137_v12, %v1147_v6  ;;  %v1814_v31 = vrot.slane %v1506_v11, 5  ;;  %v1817_v34 = vrot.slane %v1507_v57, 5  ;;  %v3212_v35 = vshrl.u32 %v11785_v20, 16  ;;  %v13132_v60 = vld [vmem:[%s19052_s0 + $0x180] sm:$0xff]   ;;  %v11784_v0 = vld [vmem:[%s19052_s0 + $0x17c] sm:$0x1] }
 0x215   :  { %v3215_v36 = vshll.u32 %v11785_v20, 16  ;;  %v3221_v37 = vshll.u32 %v11786_v21, 16  ;;  %v5979_v45 = vsel %vm13677_vm2, %v5977_v30, %v5978_v24  ;;  %v3225_v51 = vshrl.u32 %v11786_v21, 16  ;;  %v1983_v55 = vpop.permute.xlu1 %1982  ;;  %v6147_v56 = vpop.permute.xlu0 %6146  ;;  %v11910_v38 = vld [vmem:[%s19052_s0 + $0x174] sm:$0xe] }
 0x216   :  { %1350 = vrot.lane.b32.xlu1 %v11535_v27, %s13578_s27  ;;  %v16850_v48 = vsel %vm13677_vm2, %v11566_v25, %v1814_v31  ;;  %v1816_v50 = vrot.slane %v1814_v31, 4  ;;  %6156 = vrot.lane.b32.xlu0 %v12364_v16, %s13583_s13  ;;  %v12365_v59 = vcombine.low %v5976_v29, %v5979_v45  ;;  %v3214_v1 = vrot.slane %v3212_v35, 4  ;;  %2056 = vst.msk [vmem:[#allocation2 + $0xb8] sm:$0xff] %vm2032_vm7, %v1983_v55  ;;  %v13133_v6 = vld [vmem:[%s19052_s0 + $0x174] sm:$0xff]   ;;  %v11912_v27 = vld [vmem:[%s19052_s0 + $0x17c] sm:$0x1] }
 0x217   :  { %v3217_v7 = vrot.slane %v3215_v36, 5  ;;  %v3223_v39 = vrot.slane %v3221_v37, 5  ;;  %6222 = vst.msk [vmem:[#allocation2 + $0xa8] sm:$0xff] %vm6200_vm14, %v6147_v56  ;;  %v3227_v62 = vrot.slane %v3225_v51, 4  ;;  %v3231_v63 = vshll.u32 %v11787_v26, 16 }
 0x218   :  { %v1818_v61 = vsel %vm13677_vm2, %v1816_v50, %v1817_v34  ;;  %v11951_v19 = vrot.slane %v11913_v32, 9  ;;  %v3905_v43 = vrot.slane %v11914_v40, 5  ;;  %v3908_v14 = vrot.slane %v11915_v52, 5  ;;  %v11911_v26 = vld [vmem:[%s19052_s0 + $0x178] sm:$0xf] }
 0x219   :  { %v11598_v13 = vcombine.low %v16850_v48, %v1818_v61  ;;  %v3218_v33 = vor.u32 %v3217_v7, %v3214_v1  ;;  %v3228_v4 = vor.u32 %v3227_v62, %v3223_v39  ;;  %v3233_v5 = vrot.slane %v3231_v63, 5  ;;  %v2337_v47 = vpop.permute.xlu1 %2336  ;;  %v1981_v9 = vpop.permute.xlu0 %1980  ;;  %v12169_v34 = vld [vmem:[%s19052_s0 + $0x18c] sm:$0xf]  ;;  %v12170_v35 = vld [vmem:[%s19052_s0 + $0x190] sm:$0xf] }
 0x21a   :  { %1994 = vrot.lane.b32.xlu1 %v11599_v23, %s19070_s29  ;;  %v3188_v15 = vshrl.u32 %v11782_v54, 16  ;;  %v3191_v53 = vshll.u32 %v11782_v54, 16  ;;  %v6253_v49 = vld [vmem:[#allocation2 + $0xa0] sm:$0xff]  ;;  %6158 = vrot.lane.b32.xlu0 %v12365_v59, %s13583_s13  ;;  %v16877_v11 = vsel %vm13677_vm2, %v11951_v19, %v3905_v43  ;;  %v3907_v57 = vrot.slane %v3905_v43, 4  ;;  %2410 = vst.msk [vmem:[#allocation2 + $0xb8] sm:$0xff] %vm2386_vm9, %v2337_v47  ;;  %v16882_v16 = vpop.f32.mrb[16].mxu0 }
 0x21b   :  { %v3219_v44 = vrot.slane %v3218_v33, 4  ;;  %v3197_v12 = vshll.u32 %v11783_v28, 16  ;;  %2055 = vst.msk [vmem:[#allocation2 + $0xb0] sm:$0xff] %vm2032_vm7, %v1981_v9  ;;  %12938 = vmatprep.mubr.msk.bf16.mxu0 %vm6316_vm0, %v6253_v49  ;;  %v3229_v17 = vrot.slane %v3228_v4, 4  ;;  %v3201_v21 = vshrl.u32 %v11783_v28, 16  ;;  %v16925_v55 = vpop.f32.mrb[17].mxu0 }
 0x21c   :  { %v3190_v18 = vrot.slane %v3188_v15, 4  ;;  %v3193_v20 = vrot.slane %v3191_v53, 5  ;;  %v16894_v23 = vsel %vm13677_vm2, %v3907_v57, %v3908_v14  ;;  %v3207_v25 = vshll.u32 %v11784_v0, 16  ;;  %v12171_v52 = vld [vmem:[%s19052_s0 + $0x194] sm:$0x1]  ;;  %v16927_v1 = vpop.f32.mrb[18].mxu0 }
 0x21d   :  { %v3224_v22 = vsel %vm13722_vm5, %v3219_v44, %v3223_v39  ;;  %v3199_v24 = vrot.slane %v3197_v12, 5  ;;  %v3234_v29 = vsel %vm13722_vm5, %v3229_v17, %v3233_v5  ;;  %v11983_v30 = vcombine.low %v16877_v11, %v16894_v23  ;;  %v3426_v36 = vpop.permute.xlu1 %3425  ;;  %v2335_v37 = vpop.permute.xlu0 %2334  ;;  %v419_v54 = vld [vmem:[%s19052_s0 + $0x180] sm:$0xf]  ;;  %v420_v15 = vld [vmem:[%s19052_s0 + $0x184] sm:$0xf]  ;;  %v13136_v17 = vld [vmem:[%s19052_s0 + $0x18c] sm:$0xff]  }
 0x21e   :  { %2348 = vrot.lane.b32.xlu1 %v13132_v60, %s13576_s21  ;;  %v3194_v31 = vor.u32 %v3193_v20, %v3190_v18  ;;  %v3203_v32 = vrot.slane %v3201_v21, 4  ;;  %v6254_v40 = vld [vmem:[#allocation2 + $0xa8] sm:$0xff]  ;;  %1992 = vrot.lane.b32.xlu0 %v11598_v13, %s19070_s29  ;;  %v11823_v45 = vcombine.low %v3224_v22, %v3234_v29  ;;  %v3209_v48 = vrot.slane %v3207_v25, 5  ;;  %3499 = vst.msk [vmem:[#allocation2 + $0xb8] sm:$0xff] %vm3475_vm10, %v3426_v36  ;;  %v12166_v57 = vld [vmem:[%s19052_s0 + $0x180] sm:$0xf] }
 0x21f   :  { %v6722_v50 = vmax.f32 %v16724_v41, 0.0  ;;  %v6720_v51 = vmax.f32 %v16728_v42, 0.0  ;;  %2409 = vst.msk [vmem:[#allocation2 + $0xb0] sm:$0xff] %vm2386_vm9, %v2335_v37  ;;  %12939 = vmatmul.mubr.msk.bf16.gmra.mrb[40].mxu0 %vm6316_vm0, %v6254_v40  ;;  %v11950_v59 = vrot.slane %v11910_v38, 9  ;;  %v3898_v42 = vrot.slane %v11911_v26, 5  ;;  %v16956_v12 = vpop.f32.mrb[19].mxu0 }
 0x220   :  { %v3195_v56 = vrot.slane %v3194_v31, 4  ;;  %v3204_v41 = vor.u32 %v3203_v32, %v3199_v24  ;;  %v3901_v7 = vrot.slane %v11912_v27, 5  ;;  %v6723_v39 = vmax.f32 %v16732_v2, 0.0  ;;  %v421_v53 = vld [vmem:[%s19052_s0 + $0x188] sm:$0x1]  ;;  %v13148_v27 = vld [vmem:[%s19052_s0 + $0x180] sm:$0xff]  }
 0x221   :  { %6787 = vst.msk [vmem:[#allocation3 + $0x70] sm:$0xff] %vm6772_vm1, %v6722_v50  ;;  %6785 = vst.msk [vmem:[#allocation3 + $0x60] sm:$0xff] %vm6772_vm1, %v6720_v51  ;;  %v6721_v28 = vmax.f32 %v16735_v3, 0.0  ;;  %v5296_v60 = vshrl.u32 %v12169_v34, 16  ;;  %v3899_v63 = vsel %vm13677_vm2, %v11950_v59, %v3898_v42  ;;  %v3900_v19 = vrot.slane %v3898_v42, 4  ;;  %v4067_v0 = vpop.permute.xlu1 %4066 }
 0x222   :  { %3437 = vrot.lane.b32.xlu1 %v11823_v45, %s13579_s18  ;;  %v3200_v61 = vsel %vm13722_vm5, %v3195_v56, %v3199_v24  ;;  %v3205_v62 = vrot.slane %v3204_v41, 4  ;;  %2346 = vrot.lane.b32.xlu0 %v13133_v6, %s13576_s21  ;;  %6788 = vst.msk [vmem:[#allocation3 + $0x78] sm:$0xff] %vm6772_vm1, %v6723_v39  ;;  %v5299_v3 = vshll.u32 %v12169_v34, 16  ;;  %v5305_v13 = vshll.u32 %v12170_v35, 16  ;;  %v3424_v43 = vpop.permute.xlu0 %3423  ;;  %v12167_v31 = vld [vmem:[%s19052_s0 + $0x184] sm:$0xf] }
 0x223   :  { %6786 = vst.msk [vmem:[#allocation3 + $0x68] sm:$0xff] %vm6772_vm1, %v6721_v28  ;;  %v5298_v2 = vrot.slane %v5296_v60, 4  ;;  %v5309_v33 = vshrl.u32 %v12170_v35, 16  ;;  %v3902_v4 = vsel %vm13677_vm2, %v3900_v19, %v3901_v7  ;;  %v5315_v5 = vshll.u32 %v12171_v52, 16 }
 0x224   :  { %4140 = vst.msk [vmem:[#allocation2 + $0xb8] sm:$0xff] %vm4116_vm11, %v4067_v0  ;;  %v3210_v14 = vsel %vm13722_vm5, %v3205_v62, %v3209_v48  ;;  %v1149_v47 = vshrl.u32 %v419_v54, 16  ;;  %v11982_v49 = vcombine.low %v3899_v63, %v3902_v4  ;;  %v5301_v44 = vrot.slane %v5299_v3, 5  ;;  %v423_v4 = vld [vmem:[%s19052_s0 + $0x190] sm:$0xf] }
 0x225   :  { %3498 = vst.msk [vmem:[#allocation2 + $0xb0] sm:$0xff] %vm3475_vm10, %v3424_v43  ;;  %v11822_v9 = vcombine.low %v3200_v61, %v3210_v14  ;;  %v5307_v11 = vrot.slane %v5305_v13, 5  ;;  %v5311_v18 = vrot.slane %v5309_v33, 4  ;;  %v5317_v20 = vrot.slane %v5315_v5, 5  ;;  %v4421_v22 = vpop.permute.xlu1 %4420  ;;  %v424_v5 = vld [vmem:[%s19052_s0 + $0x194] sm:$0x1] }
 0x226   :  { %4078 = vrot.lane.b32.xlu1 %v11983_v30, %s13580_s24  ;;  %v1151_v21 = vrot.slane %v1149_v47, 4  ;;  %v1152_v38 = vshll.u32 %v419_v54, 16  ;;  %v5302_v6 = vor.u32 %v5301_v44, %v5298_v2  ;;  %v1158_v23 = vshll.u32 %v420_v15, 16  ;;  %4494 = vst.msk [vmem:[#allocation2 + $0xb8] sm:$0xff] %vm4470_vm12, %v4421_v22  ;;  %v4065_v26 = vpop.permute.xlu0 %4064  ;;  %v422_v2 = vld [vmem:[%s19052_s0 + $0x18c] sm:$0xf] }
 0x227   :  { %3435 = vrot.lane.b32.xlu0 %v11822_v9, %s13579_s18  ;;  %v1162_v24 = vshrl.u32 %v420_v15, 16  ;;  %v1168_v25 = vshll.u32 %v421_v53, 16  ;;  %v5312_v29 = vor.u32 %v5311_v18, %v5307_v11  ;;  %v5272_v32 = vshrl.u32 %v12166_v57, 16  ;;  %4139 = vst.msk [vmem:[#allocation2 + $0xb0] sm:$0xff] %vm4116_vm11, %v4065_v26  ;;  %v12294_v15 = vld [vmem:[%s19052_s0 + $0x180] sm:$0xe] }
 0x228   :  { %v1154_v30 = vrot.slane %v1152_v38, 5  ;;  %v5275_v34 = vshll.u32 %v12166_v57, 16  ;;  %v5303_v35 = vrot.slane %v5302_v6, 4  ;;  %v1160_v36 = vrot.slane %v1158_v23, 5  ;;  %327 = vst.msk [vmem:[#allocation2 + $0xf0] sm:$0xff] %vm296_vm8, %v13148_v27  ;;  %v13149_v57 = vld [vmem:[%s19052_s0 + $0x18c] sm:$0xff]  }
 0x229   :  { %v1164_v37 = vrot.slane %v1162_v24, 4  ;;  %v1170_v40 = vrot.slane %v1168_v25, 5  ;;  %v6907_v45 = vld [vmem:[#allocation3 + $0x70] ss:$2 sm:$0xff]  ;;  %v6939_v48 = vld [vmem:[#allocation3 + $0x71] ss:$2 sm:$0xff]  ;;  %v16975_v52 = vadd.f32 %v16655_v10, %v16882_v16  ;;  %v16979_v54 = vadd.f32 %v16655_v10, %v16925_v55 }
 0x22a   :  { %4432 = vrot.lane.b32.xlu1 %v13136_v17, %s13581_s16  ;;  %v6843_v50 = vld [vmem:[#allocation3 + $0x60] ss:$2 sm:$0xff]  ;;  %v1155_v51 = vor.u32 %v1154_v30, %v1151_v21  ;;  %v16983_v56 = vadd.f32 %v16655_v10, %v16927_v1  ;;  %v6983_v41 = vmax.f32 %v6907_v45, %v6939_v48  ;;  %v6875_v59 = vld [vmem:[#allocation3 + $0x61] ss:$2 sm:$0xff]  ;;  %v5308_v42 = vsel %vm13722_vm5, %v5303_v35, %v5307_v11  ;;  %v4419_v28 = vpop.permute.xlu0 %4418  ;;  %v1515_v26 = vld [vmem:[%s19052_s0 + $0x190] sm:$0xf] }
 0x22b   :  { %4076 = vrot.lane.b32.xlu0 %v11982_v49, %s13580_s24  ;;  %v5313_v7 = vrot.slane %v5312_v29, 4  ;;  %v13137_v16 = vld [vmem:[%s19052_s0 + $0x180] sm:$0xff]   ;;  %v1165_v39 = vor.u32 %v1164_v37, %v1160_v36  ;;  %v6967_v55 = vmax.f32 %v6843_v50, %v6875_v59  ;;  %v12168_v10 = vld [vmem:[%s19052_s0 + $0x188] sm:$0x1]  ;;  %v5274_v1 = vrot.slane %v5272_v32, 4  ;;  %4493 = vst.msk [vmem:[#allocation2 + $0xb0] sm:$0xff] %vm4470_vm12, %v4419_v28  ;;  %v5510_v3 = vpop.permute.xlu1 %5509 }
 0x22c   :  { %v1156_v60 = vrot.slane %v1155_v51, 4  ;;  %v5277_v61 = vrot.slane %v5275_v34, 5  ;;  %v5281_v19 = vshll.u32 %v12167_v31, 16  ;;  %v5285_v0 = vshrl.u32 %v12167_v31, 16  ;;  %5583 = vst.msk [vmem:[#allocation2 + $0xb8] sm:$0xff] %vm5559_vm13, %v5510_v3  ;;  %v13150_v22 = vld [vmem:[%s19055_s3] sm:$0xff]  }
 0x22d   :  { %v5318_v62 = vsel %vm13722_vm5, %v5313_v7, %v5317_v20  ;;  %v1166_v63 = vrot.slane %v1165_v39, 4  ;;  %v6999_v13 = vmax.f32 %v6967_v55, %v6983_v41  ;;  %v5291_v49 = vshll.u32 %v12168_v10, 16  ;;  %v12295_v44 = vld [vmem:[%s19052_s0 + $0x184] sm:$0xf]  ;;  %v12296_v11 = vld [vmem:[%s19052_s0 + $0x188] sm:$0x1]  ;;  %7803 = vmatpush1.bf16.msra.mxu1 %v13150_v22 }
 0x22e   :  { %v12207_v33 = vcombine.low %v5308_v42, %v5318_v62  ;;  %v1161_v43 = vsel %vm13722_vm5, %v1156_v60, %v1160_v36  ;;  %v5278_v14 = vor.u32 %v5277_v61, %v5274_v1  ;;  %v5283_v47 = vrot.slane %v5281_v19, 5  ;;  %v1514_v38 = vld [vmem:[%s19052_s0 + $0x18c] sm:$0xe]  ;;  %328 = vst.msk [vmem:[#allocation2 + $0xf8] sm:$0xff] %vm296_vm8, %v13149_v57  ;;  %v1516_v34 = vld [vmem:[%s19052_s0 + $0x194] sm:$0x1]  ;;  %7804 = vmatprep.subr.bf16.mxu1 %v13584_v58 }
 0x22f   :  { %4430 = vrot.lane.b32.xlu0 %v13137_v16, %s13581_s16  ;;  %v1171_v53 = vsel %vm13722_vm5, %v1166_v63, %v1170_v40  ;;  %v5287_v9 = vrot.slane %v5285_v0, 4  ;;  %7067 = vst.msk [vmem:[#allocation4 + $0x41] sm:$0xff] %vm6772_vm1, %v6999_v13  ;;  %v1173_v20 = vshrl.u32 %v422_v2, 16  ;;  %v1176_v21 = vshll.u32 %v422_v2, 16  ;;  %v1341_v27 = vpop.permute.xlu1 %1340  ;;  %v12297_v45 = vld [vmem:[%s19052_s0 + $0x18c] sm:$0xe] }
 0x230   :  { %5521 = vrot.lane.b32.xlu1 %v12207_v33, %s13582_s25  ;;  %v11536_v17 = vcombine.low %v1161_v43, %v1171_v53  ;;  %v5279_v18 = vrot.slane %v5278_v14, 4  ;;  %v5293_v23 = vrot.slane %v5291_v49, 5  ;;  %v1182_v24 = vshll.u32 %v423_v4, 16  ;;  %1413 = vst.msk [vmem:[#allocation2 + $0xc0] sm:$0xff] %vm1388_vm6, %v1341_v27  ;;  %v12298_v48 = vld [vmem:[%s19052_s0 + $0x190] sm:$0xf] }
 0x231   :  { %v5288_v6 = vor.u32 %v5287_v9, %v5283_v47  ;;  %v1186_v25 = vshrl.u32 %v423_v4, 16  ;;  %v1175_v30 = vrot.slane %v1173_v20, 4  ;;  %v1178_v31 = vrot.slane %v1176_v21, 5  ;;  %v12299_v42 = vld [vmem:[%s19052_s0 + $0x194] sm:$0x1]  ;;  %v13151_v7 = vld [vmem:[%s19055_s3 + $0x8] sm:$0xff]  }
 0x232   :  { %v5284_v29 = vsel %vm13722_vm5, %v5279_v18, %v5283_v47  ;;  %v1192_v32 = vshll.u32 %v424_v5, 16  ;;  %v1184_v36 = vrot.slane %v1182_v24, 5  ;;  %v12334_v40 = vrot.slane %v12294_v15, 9  ;;  %v1511_v62 = vld [vmem:[%s19052_s0 + $0x180] sm:$0xe]  ;;  %7805 = vmatpush1.bf16.msra.mxu1 %v13151_v7  ;;  %v13152_v57 = vld [vmem:[%s19055_s3 + $0x10] sm:$0xff]  }
 0x233   :  { %v5289_v35 = vrot.slane %v5288_v6, 4  ;;  %v1188_v37 = vrot.slane %v1186_v25, 4  ;;  %v1179_v50 = vor.u32 %v1178_v31, %v1175_v30  ;;  %v5982_v41 = vrot.slane %v12295_v44, 5  ;;  %v1512_v63 = vld [vmem:[%s19052_s0 + $0x184] sm:$0xf]  ;;  %7806 = vmatprep.subr.bf16.mxu1 %v13584_v58 }
 0x234   :  { %1352 = vrot.lane.b32.xlu1 %v11536_v17, %s13578_s27  ;;  %v1194_v51 = vrot.slane %v1192_v32, 5  ;;  %v5985_v59 = vrot.slane %v12296_v11, 5  ;;  %v11569_v28 = vrot.slane %v1514_v38, 9  ;;  %v1835_v55 = vrot.slane %v1515_v26, 5  ;;  %v1513_v19 = vld [vmem:[%s19052_s0 + $0x188] sm:$0x1] }
 0x235   :  { %v5294_v16 = vsel %vm13722_vm5, %v5289_v35, %v5293_v23  ;;  %v1189_v39 = vor.u32 %v1188_v37, %v1184_v36  ;;  %v1180_v10 = vrot.slane %v1179_v50, 4  ;;  %v5983_v1 = vsel %vm13677_vm2, %v12334_v40, %v5982_v41  ;;  %v11791_v0 = vld [vmem:[%s19052_s0 + $0x198] sm:$0xf]  ;;  %v11792_v43 = vld [vmem:[%s19052_s0 + $0x19c] sm:$0xf] }
 0x236   :  { %v12206_v60 = vcombine.low %v5284_v29, %v5294_v16  ;;  %v5984_v61 = vrot.slane %v5982_v41, 4  ;;  %v17074_v3 = vsel %vm13677_vm2, %v11569_v28, %v1835_v55  ;;  %v1837_v13 = vrot.slane %v1835_v55, 4  ;;  %v5508_v14 = vpop.permute.xlu0 %5507  ;;  %v11793_v11 = vld [vmem:[%s19052_s0 + $0x1a0] sm:$0x1]  ;;  %v11919_v38 = vld [vmem:[%s19052_s0 + $0x198] sm:$0xe]  ;;  %7807 = vmatpush1.bf16.msra.mxu1 %v13152_v57 }
 0x237   :  { %v1190_v2 = vrot.slane %v1189_v39, 4  ;;  %v1838_v33 = vrot.slane %v1516_v34, 5  ;;  %v1185_v4 = vsel %vm13722_vm5, %v1180_v10, %v1184_v36  ;;  %v12335_v15 = vrot.slane %v12297_v45, 9  ;;  %5582 = vst.msk [vmem:[#allocation2 + $0xb0] sm:$0xff] %vm5559_vm13, %v5508_v14  ;;  %v11920_v22 = vld [vmem:[%s19052_s0 + $0x19c] sm:$0xf]  ;;  %7808 = vmatprep.subr.bf16.mxu1 %v13584_v58 }
 0x238   :  { %5519 = vrot.lane.b32.xlu0 %v12206_v60, %s13582_s25  ;;  %v5986_v5 = vsel %vm13677_vm2, %v5984_v61, %v5985_v59  ;;  %v5989_v53 = vrot.slane %v12298_v48, 5  ;;  %v5992_v44 = vrot.slane %v12299_v42, 5  ;;  %v17108_v6 = vld [vmem:[%s19052_s0 + $0x1a0] sm:$0x1]  ;;  %v11568_v24 = vrot.slane %v1511_v62, 9  ;;  %v13153_v36 = vld [vmem:[%s19055_s3 + $0x18] sm:$0xff]  }
 0x239   :  { %v1195_v47 = vsel %vm13722_vm5, %v1190_v2, %v1194_v51  ;;  %v12366_v9 = vcombine.low %v5983_v1, %v5986_v5  ;;  %v1839_v49 = vsel %vm13677_vm2, %v1837_v13, %v1838_v33  ;;  %v1343_v23 = vpop.permute.xlu1 %1342  ;;  %v1828_v25 = vrot.slane %v1512_v63, 5  ;;  %v11788_v35 = vld [vmem:[%s19052_s0 + $0x18c] sm:$0xf]  ;;  %v11789_v50 = vld [vmem:[%s19052_s0 + $0x190] sm:$0xf]  ;;  %v13138_v51 = vld [vmem:[%s19052_s0 + $0x198] sm:$0xff]  }
 0x23a   :  { %v11537_v17 = vcombine.low %v1185_v4, %v1195_v47  ;;  %v11601_v18 = vcombine.low %v17074_v3, %v1839_v49  ;;  %v5990_v20 = vsel %vm13677_vm2, %v12335_v15, %v5989_v53  ;;  %v5991_v21 = vrot.slane %v5989_v53, 4  ;;  %1414 = vst.msk [vmem:[#allocation2 + $0xc8] sm:$0xff] %vm1388_vm6, %v1343_v23  ;;  %v6149_v29 = vpop.permute.xlu0 %6148  ;;  %v11790_v16 = vld [vmem:[%s19052_s0 + $0x194] sm:$0x1]  ;;  %7809 = vmatpush1.bf16.msra.mxu1 %v13153_v36  ;;  %v11916_v4 = vld [vmem:[%s19052_s0 + $0x18c] sm:$0xe] }
 0x23b   :  { %v1831_v26 = vrot.slane %v1513_v19, 5  ;;  %v3260_v27 = vshrl.u32 %v11791_v0, 16  ;;  %v3263_v31 = vshll.u32 %v11791_v0, 16  ;;  %v3269_v32 = vshll.u32 %v11792_v43, 16  ;;  %6223 = vst.msk [vmem:[#allocation2 + $0xb0] sm:$0xff] %vm6200_vm14, %v6149_v29  ;;  %7810 = vmatprep.subr.bf16.mxu1 %v13584_v58 }
 0x23c   :  { %1354 = vrot.lane.b32.xlu1 %v11537_v17, %s13578_s27  ;;  %6160 = vrot.lane.b32.xlu0 %v12366_v9, %s13583_s13  ;;  %v5993_v30 = vsel %vm13677_vm2, %v5991_v21, %v5992_v44  ;;  %v3273_v34 = vshrl.u32 %v11792_v43, 16  ;;  %v1829_v40 = vsel %vm13677_vm2, %v11568_v24, %v1828_v25  ;;  %v1830_v45 = vrot.slane %v1828_v25, 4  ;;  %v11917_v5 = vld [vmem:[%s19052_s0 + $0x190] sm:$0xf]  ;;  %v13154_v17 = vld [vmem:[%s19055_s3 + $0x20] sm:$0xff]   ;;  %s13588_s27 = smov 24  }
 0x23d   :  { %v12367_v37 = vcombine.low %v5990_v20, %v5993_v30  ;;  %v3262_v48 = vrot.slane %v3260_v27, 4  ;;  %v3265_v41 = vrot.slane %v3263_v31, 5  ;;  %v3271_v59 = vrot.slane %v3269_v32, 5  ;;  %v1987_v39 = vpop.permute.xlu1 %1986  ;;  %v13139_v9 = vld [vmem:[%s19052_s0 + $0x18c] sm:$0xff]   ;;  %v12176_v29 = vld [vmem:[%s19052_s0 + $0x1a8] sm:$0xf] }
 0x23e   :  { %v3275_v42 = vrot.slane %v3273_v34, 4  ;;  %v3279_v7 = vshll.u32 %v11793_v11, 16  ;;  %v17134_v28 = vpop.f32.mrb[20].mxu0  ;;  %v1832_v55 = vsel %vm13677_vm2, %v1830_v45, %v1831_v26  ;;  %v11953_v60 = vrot.slane %v11919_v38, 9  ;;  %2058 = vst.msk [vmem:[#allocation2 + $0xc8] sm:$0xff] %vm2032_vm7, %v1987_v39  ;;  %v6151_v61 = vpop.permute.xlu0 %6150  ;;  %7811 = vmatpush1.bf16.msra.mxu1 %v13154_v17 }
 0x23f   :  { %v3919_v10 = vrot.slane %v11920_v22, 5  ;;  %v3922_v1 = vrot.slane %v17108_v6, 5  ;;  %v17140_v62 = vpop.f32.mrb[21].mxu0  ;;  %v11600_v63 = vcombine.low %v1829_v40, %v1832_v55  ;;  %v3266_v19 = vor.u32 %v3265_v41, %v3262_v48  ;;  %6224 = vst.msk [vmem:[#allocation2 + $0xb8] sm:$0xff] %vm6200_vm14, %v6151_v61  ;;  %v17166_v11 = vld [vmem:[%s19052_s0 + $0x194] sm:$0x1]  ;;  %7812 = vmatprep.subr.bf16.mxu1 %v13584_v58 }
 0x240   :  { %1998 = vrot.lane.b32.xlu1 %v11601_v18, %s19070_s29  ;;  %6162 = vrot.lane.b32.xlu0 %v12367_v37, %s13583_s13  ;;  %v3276_v0 = vor.u32 %v3275_v42, %v3271_v59  ;;  %v3281_v2 = vrot.slane %v3279_v7, 5  ;;  %v17145_v3 = vpop.f32.mrb[22].mxu0  ;;  %v3236_v43 = vshrl.u32 %v11788_v35, 16  ;;  %v3239_v14 = vshll.u32 %v11788_v35, 16  ;;  %v17178_v22 = vld [vmem:[%s19052_s0 + $0x1a4] sm:$0xf] }
 0x241   :  { %v17149_v13 = vsel %vm13677_vm2, %v11953_v60, %v3919_v10  ;;  %v3921_v33 = vrot.slane %v3919_v10, 4  ;;  %v17157_v15 = vpop.f32.mrb[23].mxu0  ;;  %v3267_v53 = vrot.slane %v3266_v19, 4  ;;  %v3245_v49 = vshll.u32 %v11789_v50, 16  ;;  %v2341_v57 = vpop.permute.xlu1 %2340  ;;  %v13155_v35 = vld [vmem:[%s19055_s3 + $0x28] sm:$0xff]  }
 0x242   :  { %v3277_v47 = vrot.slane %v3276_v0, 4  ;;  %v3249_v44 = vshrl.u32 %v11789_v50, 16  ;;  %v3238_v20 = vrot.slane %v3236_v43, 4  ;;  %v3241_v21 = vrot.slane %v3239_v14, 5  ;;  %2412 = vst.msk [vmem:[#allocation2 + $0xc8] sm:$0xff] %vm2386_vm9, %v2341_v57  ;;  %v1985_v6 = vpop.permute.xlu0 %1984  ;;  %v6255_v23 = vld [vmem:[#allocation2 + $0xb0] sm:$0xff]  ;;  %7813 = vmatpush1.bf16.msra.mxu1 %v13155_v35 }
 0x243   :  { %v17173_v18 = vsel %vm13677_vm2, %v3921_v33, %v3922_v1  ;;  %v3255_v38 = vshll.u32 %v11790_v16, 16  ;;  %v3272_v24 = vsel %vm13722_vm5, %v3267_v53, %v3271_v59  ;;  %v3247_v27 = vrot.slane %v3245_v49, 5  ;;  %2057 = vst.msk [vmem:[#allocation2 + $0xc0] sm:$0xff] %vm2032_vm7, %v1985_v6  ;;  %12942 = vmatprep.mubr.msk.bf16.mxu0 %vm6316_vm0, %v6255_v23  ;;  %v12177_v42 = vld [vmem:[%s19052_s0 + $0x1ac] sm:$0x1]  ;;  %v13142_v33 = vld [vmem:[%s19052_s0 + $0x1a4] sm:$0xff]   ;;  %7814 = vmatprep.subr.bf16.mxu1 %v13584_v58 }
 0x244   :  { %2352 = vrot.lane.b32.xlu1 %v13138_v51, %s13576_s21  ;;  %1996 = vrot.lane.b32.xlu0 %v11600_v63, %s19070_s29  ;;  %v3282_v25 = vsel %vm13722_vm5, %v3277_v47, %v3281_v2  ;;  %v11985_v26 = vcombine.low %v17149_v13, %v17173_v18  ;;  %v3242_v31 = vor.u32 %v3241_v21, %v3238_v20  ;;  %v3251_v32 = vrot.slane %v3249_v44, 4  ;;  %v17222_v39 = vld [vmem:[%s19054_s2] ss:$0 sm:$0xff]  ;;  %v12304_v10 = vld [vmem:[%s19052_s0 + $0x1a8] sm:$0xf] }
 0x245   :  { %v11825_v30 = vcombine.low %v3272_v24, %v3282_v25  ;;  %v3257_v34 = vrot.slane %v3255_v38, 5  ;;  %v6726_v36 = vmax.f32 %v16975_v52, 0.0  ;;  %v6724_v37 = vmax.f32 %v16979_v54, 0.0  ;;  %v3430_v48 = vpop.permute.xlu1 %3429  ;;  %v17208_v52 = vld [vmem:[%s19052_s0 + $0x1a4] sm:$0xe]  ;;  %v13156_v13 = vld [vmem:[%s19055_s3 + $0x30] sm:$0xff]  }
 0x246   :  { %v11952_v40 = vrot.slane %v11916_v4, 9  ;;  %v3912_v45 = vrot.slane %v11917_v5, 5  ;;  %v3243_v50 = vrot.slane %v3242_v31, 4  ;;  %v3252_v51 = vor.u32 %v3251_v32, %v3247_v27  ;;  %3501 = vst.msk [vmem:[#allocation2 + $0xc8] sm:$0xff] %vm3475_vm10, %v3430_v48  ;;  %v2339_v54 = vpop.permute.xlu0 %2338  ;;  %v6256_v7 = vld [vmem:[#allocation2 + $0xb8] sm:$0xff]  ;;  %7815 = vmatpush1.bf16.msra.mxu1 %v13156_v13 }
 0x247   :  { %v3915_v41 = vrot.slane %v17166_v11, 5  ;;  %v6727_v59 = vmax.f32 %v16983_v56, 0.0  ;;  %6791 = vst.msk [vmem:[#allocation3 + $0x90] sm:$0xff] %vm6772_vm1, %v6726_v36  ;;  %6789 = vst.msk [vmem:[#allocation3 + $0x80] sm:$0xff] %vm6772_vm1, %v6724_v37  ;;  %v6521_v55 = vadd.f32 %v17222_v39, %v16956_v12  ;;  %v5344_v60 = vshrl.u32 %v17178_v22, 16  ;;  %12943 = vmatmul.mubr.msk.bf16.gmra.mrb[44].mxu0 %vm6316_vm0, %v6256_v7  ;;  %7816 = vmatprep.subr.bf16.mxu1 %v13584_v58  ;;  %v13157_v7 = vld [vmem:[%s19055_s3 + $0x38] sm:$0xff]  }
 0x248   :  { %3441 = vrot.lane.b32.xlu1 %v11825_v30, %s13579_s18  ;;  %2350 = vrot.lane.b32.xlu0 %v13139_v9, %s13576_s21  ;;  %v17217_v56 = vsel %vm13677_vm2, %v11952_v40, %v3912_v45  ;;  %v3914_v16 = vrot.slane %v3912_v45, 4  ;;  %v17233_v1 = vld [vmem:[%s19052_s0 + $0x1ac] sm:$0x1]  ;;  %v12172_v61 = vld [vmem:[%s19052_s0 + $0x198] sm:$0xf]  ;;  %2411 = vst.msk [vmem:[#allocation2 + $0xc0] sm:$0xff] %vm2386_vm9, %v2339_v54  ;;  %v3248_v12 = vsel %vm13722_vm5, %v3243_v50, %v3247_v27 }
 0x249   :  { %v3253_v63 = vrot.slane %v3252_v51, 4  ;;  %6792 = vst.msk [vmem:[#allocation3 + $0x98] sm:$0xff] %vm6772_vm1, %v6727_v59  ;;  %v5347_v19 = vshll.u32 %v17178_v22, 16  ;;  %v5353_v0 = vshll.u32 %v12176_v29, 16  ;;  %v17246_v2 = vld [vmem:[%s19052_s0 + $0x19c] sm:$0xf]  ;;  %v4071_v53 = vpop.permute.xlu1 %4070  ;;  %v17318_v13 = vadd.f32 %v17222_v39, %v17134_v28 }
 0x24a   :  { %v3916_v43 = vsel %vm13677_vm2, %v3914_v16, %v3915_v41  ;;  %v6725_v14 = vmax.f32 %v6521_v55, 0.0  ;;  %v5346_v4 = vrot.slane %v5344_v60, 4  ;;  %v5357_v5 = vshrl.u32 %v12176_v29, 16  ;;  %4142 = vst.msk [vmem:[#allocation2 + $0xc8] sm:$0xff] %vm4116_vm11, %v4071_v53  ;;  %v3428_v11 = vpop.permute.xlu0 %3427  ;;  %v12174_v25 = vld [vmem:[%s19052_s0 + $0x1a0] sm:$0x1]  ;;  %7817 = vmatpush1.bf16.msra.mxu1 %v13157_v7 }
 0x24b   :  { %v3258_v47 = vsel %vm13722_vm5, %v3253_v63, %v3257_v34  ;;  %v11984_v9 = vcombine.low %v17217_v56, %v3916_v43  ;;  %v5349_v49 = vrot.slane %v5347_v19, 5  ;;  %v5355_v44 = vrot.slane %v5353_v0, 5  ;;  %3500 = vst.msk [vmem:[#allocation2 + $0xc0] sm:$0xff] %vm3475_vm10, %v3428_v11  ;;  %v17275_v29 = vld [vmem:[%s19052_s0 + $0x198] sm:$0xe]  ;;  %7818 = vmatprep.subr.bf16.mxu1 %v13584_v58  ;;  %s13589_s21 = smov 40  }
 0x24c   :  { %4082 = vrot.lane.b32.xlu1 %v11985_v26, %s13580_s24  ;;  %v11824_v57 = vcombine.low %v3248_v12, %v3258_v47  ;;  %6790 = vst.msk [vmem:[#allocation3 + $0x88] sm:$0xff] %vm6772_vm1, %v6725_v14  ;;  %v5359_v17 = vrot.slane %v5357_v5, 4  ;;  %v5363_v18 = vshll.u32 %v12177_v42, 16  ;;  %v12337_v20 = vrot.slane %v17208_v52, 9  ;;  %v17285_v36 = vld [vmem:[%s19052_s0 + $0x19c] sm:$0xf] }
 0x24d   :  { %v5350_v21 = vor.u32 %v5349_v49, %v5346_v4  ;;  %v6003_v38 = vrot.slane %v12304_v10, 5  ;;  %v6006_v22 = vrot.slane %v17233_v1, 5  ;;  %v5320_v6 = vshrl.u32 %v12172_v61, 16  ;;  %v4425_v30 = vpop.permute.xlu1 %4424  ;;  %v13143_v50 = vld [vmem:[%s19052_s0 + $0x198] sm:$0xff]   ;;  %v17295_v41 = vld [vmem:[%s19052_s0 + $0x1a0] sm:$0x1] }
 0x24e   :  { %3439 = vrot.lane.b32.xlu0 %v11824_v57, %s13579_s18  ;;  %v5360_v23 = vor.u32 %v5359_v17, %v5355_v44  ;;  %v5365_v24 = vrot.slane %v5363_v18, 5  ;;  %v5323_v26 = vshll.u32 %v12172_v61, 16  ;;  %v5329_v27 = vshll.u32 %v17246_v2, 16  ;;  %4496 = vst.msk [vmem:[#allocation2 + $0xc8] sm:$0xff] %vm4470_vm12, %v4425_v30  ;;  %v4069_v37 = vpop.permute.xlu0 %4068  ;;  %v13158_v4 = vld [vmem:[%s19055_s3 + $0x40] sm:$0xff]  }
 0x24f   :  { %v5351_v31 = vrot.slane %v5350_v21, 4  ;;  %v17280_v32 = vsel %vm13677_vm2, %v12337_v20, %v6003_v38  ;;  %v6005_v34 = vrot.slane %v6003_v38, 4  ;;  %v5322_v35 = vrot.slane %v5320_v6, 4  ;;  %4141 = vst.msk [vmem:[#allocation2 + $0xc0] sm:$0xff] %vm4116_vm11, %v4069_v37  ;;  %7819 = vmatpush1.bf16.msra.mxu1 %v13158_v4  ;;  %v13159_v21 = vld [vmem:[%s19055_s3 + $0x48] sm:$0xff]  }
 0x250   :  { %4436 = vrot.lane.b32.xlu1 %v13142_v33, %s13581_s16  ;;  %v6909_v40 = vld [vmem:[#allocation3 + $0x90] ss:$2 sm:$0xff]  ;;  %v6941_v45 = vld [vmem:[#allocation3 + $0x91] ss:$2 sm:$0xff]  ;;  %v5361_v48 = vrot.slane %v5360_v23, 4  ;;  %v5325_v51 = vrot.slane %v5323_v26, 5  ;;  %v6534_v57 = vadd.f32 %v17222_v39, %v17140_v62  ;;  %v6545_v62 = vadd.f32 %v17222_v39, %v17145_v3  ;;  %7820 = vmatprep.subr.bf16.mxu1 %v13584_v58 }
 0x251   :  { %v6984_v59 = vmax.f32 %v6909_v40, %v6941_v45  ;;  %v5356_v42 = vsel %vm13722_vm5, %v5351_v31, %v5355_v44  ;;  %v17302_v52 = vsel %vm13677_vm2, %v6005_v34, %v6006_v22  ;;  %v17304_v54 = vrot.slane %v5329_v27, 5 }
 0x252   :  { %4080 = vrot.lane.b32.xlu0 %v11984_v9, %s13580_s24  ;;  %v5366_v56 = vsel %vm13722_vm5, %v5361_v48, %v5365_v24  ;;  %v12369_v16 = vcombine.low %v17280_v32, %v17302_v52  ;;  %v5326_v55 = vor.u32 %v5325_v51, %v5322_v35  ;;  %v5333_v60 = vshrl.u32 %v17246_v2, 16  ;;  %v4423_v0 = vpop.permute.xlu0 %4422  ;;  %v17485_v32 = vld [vmem:[#allocation4 + $0x11] sm:$0xff] }
 0x253   :  { %v6845_v10 = vld [vmem:[#allocation3 + $0x80] ss:$2 sm:$0xff]  ;;  %v6877_v1 = vld [vmem:[#allocation3 + $0x81] ss:$2 sm:$0xff]  ;;  %v12209_v61 = vcombine.low %v5356_v42, %v5366_v56  ;;  %v5339_v12 = vshll.u32 %v12174_v25, 16  ;;  %v12336_v63 = vrot.slane %v17275_v29, 9  ;;  %v5514_v19 = vpop.permute.xlu1 %5513  ;;  %v6537_v20 = vadd.f32 %v17222_v39, %v17157_v15  ;;  %7821 = vmatpush1.bf16.msra.mxu1 %v13159_v21 }
 0x254   :  { %v6968_v33 = vmax.f32 %v6845_v10, %v6877_v1  ;;  %v17320_v43 = vrot.slane %v5326_v55, 4  ;;  %v17322_v14 = vrot.slane %v5333_v60, 4  ;;  %v5996_v2 = vrot.slane %v17285_v36, 5  ;;  %5585 = vst.msk [vmem:[#allocation2 + $0xc8] sm:$0xff] %vm5559_vm13, %v5514_v19  ;;  %7822 = vmatprep.subr.bf16.mxu1 %v13584_v58  ;;  %v17501_v51 = vld [vmem:[#allocation4 + $0x31] sm:$0xff] }
 0x255   :  { %4495 = vst.msk [vmem:[#allocation2 + $0xc0] sm:$0xff] %vm4470_vm12, %v4423_v0  ;;  %5525 = vrot.lane.b32.xlu1 %v12209_v61, %s13582_s25  ;;  %v17332_v28 = vrot.slane %v5339_v12, 5  ;;  %v5999_v5 = vrot.slane %v17295_v41, 5  ;;  %vm7022_vm3 = vcmask 188416   ;;  %v13585_v9 = vmov 0.0   ;;  %v13160_v42 = vld [vmem:[%s19055_s3 + $0x50] sm:$0xff]  }
 0x256   :  { %v7000_v53 = vmax.f32 %v6968_v33, %v6984_v59  ;;  %4434 = vrot.lane.b32.xlu0 %v13143_v50, %s13581_s16  ;;  %v5336_v47 = vor.u32 %v17322_v14, %v17304_v54  ;;  %7044 = vst.msk [vmem:[#allocation4 + $0x19] sm:$0x1] %vm7022_vm3, %v13585_v9  ;;  %7045 = vst.msk [vmem:[#allocation4 + $0x29] sm:$0x1] %vm7022_vm3, %v13585_v9  ;;  %v5998_v49 = vrot.slane %v5996_v2, 4  ;;  %vm7013_vm4 = vcmask 189440  }
 0x257   :  { %7012 = vst.msk [vmem:[#allocation4] sm:$0xff] %vm6772_vm1, %v13585_v9  ;;  %7015 = vst.msk [vmem:[#allocation4 + $0xa0] sm:$0xff] %vm6772_vm1, %v13585_v9  ;;  %v1345_v44 = vpop.permute.xlu1 %1344  ;;  %v6730_v11 = vmax.f32 %v17318_v13, 0.0  ;;  %v5332_v17 = vsel %vm13722_vm5, %v17320_v43, %v17304_v54  ;;  %v5997_v3 = vsel %vm13677_vm2, %v12336_v63, %v5996_v2  ;;  %v6728_v15 = vmax.f32 %v6534_v57, 0.0  ;;  %v17509_v54 = vld [vmem:[#allocation4 + $0x21] sm:$0xff]  ;;  %7823 = vmatpush1.bf16.msra.mxu1 %v13160_v42  ;;  %v13161_v63 = vld [vmem:[%s19055_s3 + $0x58] sm:$0xff]  }
 0x258   :  { %7018 = vst.msk [vmem:[#allocation4 + $0x90] sm:$0xff] %vm6772_vm1, %v13585_v9  ;;  %7020 = vst.msk [vmem:[#allocation4 + $0x130] sm:$0xff] %vm6772_vm1, %v13585_v9  ;;  %v5337_v18 = vrot.slane %v5336_v47, 4  ;;  %v6000_v22 = vsel %vm13677_vm2, %v5998_v49, %v5999_v5  ;;  %v6731_v6 = vmax.f32 %v6545_v62, 0.0  ;;  %v6729_v23 = vmax.f32 %v6537_v20, 0.0  ;;  %7824 = vmatprep.subr.bf16.mxu1 %v13584_v58  ;;  %v13162_v57 = vld [vmem:[%s19055_s3 + $0x60] sm:$0xff]  }
 0x259   :  { %7024 = vst.msk [vmem:[#allocation4 + $0x10] sm:$0x1] %vm7022_vm3, %v13585_v9  ;;  %7025 = vst.msk [vmem:[#allocation4 + $0x20] sm:$0x1] %vm7022_vm3, %v13585_v9  ;;  %6166 = vrot.lane.b32.xlu1 %v12369_v16, %s13583_s13  ;;  %v12368_v46 = vcombine.low %v5997_v3, %v6000_v22  ;;  %v17525_v2 = vpack.c.bf16 %v17501_v51, %v17509_v54  ;;  %vm7798_vm2 = vcmask 1043456  }
 0x25a   :  { %7026 = vst.msk [vmem:[#allocation4 + $0x30] sm:$0x1] %vm7022_vm3, %v13585_v9  ;;  %7027 = vst.msk [vmem:[#allocation4 + $0x40] sm:$0x1] %vm7022_vm3, %v13585_v9  ;;  %v5342_v38 = vsel %vm13722_vm5, %v5337_v18, %v17332_v28 }
 0x25b   :  { %7028 = vst.msk [vmem:[#allocation4 + $0x50] sm:$0x1] %vm7022_vm3, %v13585_v9  ;;  %7029 = vst.msk [vmem:[#allocation4 + $0x60] sm:$0x1] %vm7022_vm3, %v13585_v9  ;;  %v12208_v24 = vcombine.low %v5332_v17, %v5342_v38  ;;  %7825 = vmatpush1.bf16.msra.mxu1 %v13161_v63  ;;  %v13163_v17 = vld [vmem:[%s19055_s3 + $0x68] ss:$0 sps:$4 sm:$0xff]  }
 0x25c   :  { %7030 = vst.msk [vmem:[#allocation4 + $0x70] sm:$0x1] %vm7022_vm3, %v13585_v9  ;;  %7031 = vst.msk [vmem:[#allocation4 + $0x80] sm:$0x1] %vm7022_vm3, %v13585_v9  ;;  %7826 = vmatprep.subr.bf16.mxu1 %v13584_v58  ;;  %s13591_s3 = smov 64  }
 0x25d   :  { %7034 = vst.msk [vmem:[#allocation4 + $0xb0] sm:$0x1] %vm7022_vm3, %v13585_v9  ;;  %7035 = vst.msk [vmem:[#allocation4 + $0xc0] sm:$0x1] %vm7022_vm3, %v13585_v9  ;;  %5523 = vrot.lane.b32.xlu0 %v12208_v24, %s13582_s25  ;;  %v17472_v25 = vld [vmem:[#allocation4 + $0x12] sm:$0xff]  ;;  %v17474_v26 = vld [vmem:[#allocation4 + $0x22] sm:$0xff]  ;;  %v5512_v8 = vpop.permute.xlu0 %5511 }
 0x25e   :  { %7036 = vst.msk [vmem:[#allocation4 + $0xd0] sm:$0x1] %vm7022_vm3, %v13585_v9  ;;  %7037 = vst.msk [vmem:[#allocation4 + $0xe0] sm:$0x1] %vm7022_vm3, %v13585_v9  ;;  %v7388_v27 = vpack.c.bf16 %v17474_v26, %v17472_v25  ;;  %s13586_s25 = smov 120  }
 0x25f   :  { %7038 = vst.msk [vmem:[#allocation4 + $0xf0] sm:$0x1] %vm7022_vm3, %v13585_v9  ;;  %7039 = vst.msk [vmem:[#allocation4 + $0x100] sm:$0x1] %vm7022_vm3, %v13585_v9  ;;  %7827 = vmatpush1.bf16.msra.mxu1 %v13162_v57 }
 0x260   :  { %7040 = vst.msk [vmem:[#allocation4 + $0x110] sm:$0x1] %vm7022_vm3, %v13585_v9  ;;  %7041 = vst.msk [vmem:[#allocation4 + $0x120] sm:$0x1] %vm7022_vm3, %v13585_v9  ;;  %v17478_v29 = vld [vmem:[#allocation4 + $0x20] sm:$0xff]  ;;  %v17487_v34 = vld [vmem:[#allocation4 + $0x10] sm:$0xff]  ;;  %7404 = vrot.lane.b32.xlu1 %v7388_v27, %s13586_s25  ;;  %v1347_v36 = vpop.permute.xlu1 %1346  ;;  %7828 = vmatprep.subr.bf16.mxu1 %v13584_v58 }
 0x261   :  { %7046 = vst.msk [vmem:[#allocation4 + $0x39] sm:$0x1] %vm7022_vm3, %v13585_v9  ;;  %7047 = vst.msk [vmem:[#allocation4 + $0x49] sm:$0x1] %vm7022_vm3, %v13585_v9  ;;  %v17480_v30 = vld [vmem:[#allocation4 + $0x30] sm:$0xff]  ;;  %v17490_v37 = vld [vmem:[#allocation4 + $0x40] sm:$0xff]  ;;  %6164 = vrot.lane.b32.xlu0 %v12368_v46, %s13583_s13  ;;  %v6153_v45 = vpop.permute.xlu0 %6152  ;;  %v7323_v46 = vpack.c.bf16 %v17509_v54, %v17485_v32 }
 0x262   :  { %7048 = vst.msk [vmem:[#allocation4 + $0x59] sm:$0x1] %vm7022_vm3, %v13585_v9  ;;  %7049 = vst.msk [vmem:[#allocation4 + $0x69] sm:$0x1] %vm7022_vm3, %v13585_v9  ;;  %v7463_v31 = vpack.c.bf16 %v17480_v30, %v17478_v29  ;;  %v12924_v41 = vpop.f32.mrb[24].mxu0 }
 0x263   :  { %7050 = vst.msk [vmem:[#allocation4 + $0x79] sm:$0x1] %vm7022_vm3, %v13585_v9  ;;  %7051 = vst.msk [vmem:[#allocation4 + $0x89] sm:$0x1] %vm7022_vm3, %v13585_v9  ;;  %v6558_v55 = vadd.f32 %v17222_v39, %v12924_v41  ;;  %v6549_v12 = vpop.f32.mrb[25].mxu0 }
 0x264   :  { %7054 = vst.msk [vmem:[#allocation4 + $0xb9] sm:$0x1] %vm7022_vm3, %v13585_v9  ;;  %7055 = vst.msk [vmem:[#allocation4 + $0xc9] sm:$0x1] %vm7022_vm3, %v13585_v9  ;;  %7479 = vrot.lane.b32.xlu1 %v7463_v31, %s13587_s23  ;;  %v1991_v61 = vpop.permute.xlu1 %1990  ;;  %v6550_v43 = vadd.f32 %v17222_v39, %v6549_v12  ;;  %v12925_v14 = vpop.f32.mrb[26].mxu0 }
 0x265   :  { %7056 = vst.msk [vmem:[#allocation4 + $0xd9] sm:$0x1] %vm7022_vm3, %v13585_v9  ;;  %7057 = vst.msk [vmem:[#allocation4 + $0xe9] sm:$0x1] %vm7022_vm3, %v13585_v9  ;;  %v6155_v13 = vpop.permute.xlu0 %6154  ;;  %v6734_v33 = vmax.f32 %v6558_v55, 0.0  ;;  %v6561_v4 = vadd.f32 %v17222_v39, %v12925_v14  ;;  %v6552_v28 = vpop.f32.mrb[27].mxu0 }
 0x266   :  { %7058 = vst.msk [vmem:[#allocation4 + $0xf9] sm:$0x1] %vm7022_vm3, %v13585_v9  ;;  %7059 = vst.msk [vmem:[#allocation4 + $0x109] sm:$0x1] %vm7022_vm3, %v13585_v9  ;;  %v6732_v47 = vmax.f32 %v6550_v43, 0.0  ;;  %v6553_v49 = vadd.f32 %v17222_v39, %v6552_v28 }
 0x267   :  { %7060 = vst.msk [vmem:[#allocation4 + $0x119] sm:$0x1] %vm7022_vm3, %v13585_v9  ;;  %7061 = vst.msk [vmem:[#allocation4 + $0x129] sm:$0x1] %vm7022_vm3, %v13585_v9 }
 0x268   :  { %7023 = vst.msk [vmem:[#allocation4] sm:$0x1] %vm7022_vm3, %v13585_v9  ;;  %7032 = vst.msk [vmem:[#allocation4 + $0x90] sm:$0x1] %vm7022_vm3, %v13585_v9  ;;  %v7578_v19 = vld [vmem:[#allocation4 + $0x32] sm:$0xff]  ;;  %7544 = vrot.lane.b32.xlu1 %v17525_v2, %s13589_s21  ;;  %v7375_v18 = vld [vmem:[#allocation4 + $0x42] sm:$0xff] }
 0x269   :  { %7033 = vst.msk [vmem:[#allocation4 + $0xa0] sm:$0x1] %vm7022_vm3, %v13585_v9  ;;  %7042 = vst.msk [vmem:[#allocation4 + $0x130] sm:$0x1] %vm7022_vm3, %v13585_v9  ;;  %v1989_v62 = vpop.permute.xlu0 %1988  ;;  %v6733_v21 = vmax.f32 %v6553_v49, 0.0  ;;  %v7593_v3 = vpack.c.bf16 %v7578_v19, %v17474_v26  ;;  %v7389_v24 = vpack.c.bf16 %v7375_v18, %v7578_v19 }
 0x26a   :  { %7068 = vst.msk [vmem:[#allocation4 + $0x51] sm:$0xff] %vm6772_vm1, %v7000_v53  ;;  %6795 = vst.msk [vmem:[#allocation3 + $0xb0] sm:$0xff] %vm6772_vm1, %v6730_v11  ;;  %v6735_v11 = vmax.f32 %v6561_v4, 0.0 }
 0x26b   :  { %7014 = vst.msk [vmem:[#allocation4 + $0x8] sm:$0x3] %vm7013_vm4, %v13585_v9  ;;  %7016 = vst.msk [vmem:[#allocation4 + $0xa8] sm:$0x3] %vm7013_vm4, %v13585_v9 }
 0x26c   :  { %7019 = vst.msk [vmem:[#allocation4 + $0x98] sm:$0x3] %vm7013_vm4, %v13585_v9  ;;  %7021 = vst.msk [vmem:[#allocation4 + $0x138] sm:$0x3] %vm7013_vm4, %v13585_v9  ;;  %7609 = vrot.lane.b32.xlu1 %v7593_v3, %s13591_s3 }
 0x26d   :  { %1415 = vst.msk [vmem:[#allocation2 + $0xd0] sm:$0xff] %vm1388_vm6, %v1345_v44  ;;  %1416 = vst.msk [vmem:[#allocation2 + $0xd8] sm:$0xff] %vm1388_vm6, %v1347_v36  ;;  %v2345_v44 = vpop.permute.xlu1 %2344  ;;  %v2343_v22 = vpop.permute.xlu0 %2342 }
 0x26e   :  { %7043 = vst.msk [vmem:[#allocation4 + $0x9] sm:$0x1] %vm7022_vm3, %v13585_v9  ;;  %7052 = vst.msk [vmem:[#allocation4 + $0x99] sm:$0x1] %vm7022_vm3, %v13585_v9 }
 0x26f   :  { %7053 = vst.msk [vmem:[#allocation4 + $0xa9] sm:$0x1] %vm7022_vm3, %v13585_v9  ;;  %7062 = vst.msk [vmem:[#allocation4 + $0x139] sm:$0x1] %vm7022_vm3, %v13585_v9  ;;  %v7080_v50 = vld [vmem:[#allocation4] sm:$0xff] }
 0x270   :  { %6793 = vst.msk [vmem:[#allocation3 + $0xa0] sm:$0xff] %vm6772_vm1, %v6728_v15  ;;  %6796 = vst.msk [vmem:[#allocation3 + $0xb8] sm:$0xff] %vm6772_vm1, %v6731_v6  ;;  %v7096_v59 = vpack.c.bf16 %v17487_v34, %v7080_v50  ;;  %v7258_v15 = vpack.c.bf16 %v17478_v29, %v17487_v34  ;;  %7406 = vrot.lane.b32.xlu1 %v7389_v24, %s13586_s25 }
 0x271   :  { %6794 = vst.msk [vmem:[#allocation3 + $0xa8] sm:$0xff] %vm6772_vm1, %v6729_v23  ;;  %v17492_v40 = vld [vmem:[#allocation4 + $0x50] sm:$0xff]  ;;  %7105 = vst.msk [vmem:[#allocation5 + $0x10] sm:$0xff] %vm6772_vm1, %v7463_v31  ;;  %v3434_v38 = vpop.permute.xlu1 %3433  ;;  %v7800_v23 = vsel %vm7798_vm2, %v13163_v17, 0 }
 0x272   :  { %5584 = vst.msk [vmem:[#allocation2 + $0xc0] sm:$0xff] %vm5559_vm13, %v5512_v8  ;;  %v7112_v35 = vld [vmem:[#allocation4 + $0x1] sm:$0xff]  ;;  %v17498_v48 = vpack.c.bf16 %v17492_v40, %v17490_v37  ;;  %7829 = vmatpush1.bf16.msra.mxu1 %v7800_v23  ;;  %v17562_v26 = vld [vmem:[#allocation4 + $0x51] sm:$0xff]  ;;  %v3432_v8 = vpop.permute.xlu0 %3431 }
 0x273   :  { %6225 = vst.msk [vmem:[#allocation2 + $0xc0] sm:$0xff] %vm6200_vm14, %v6153_v45  ;;  %v7128_v52 = vpack.c.bf16 %v17485_v32, %v7112_v35  ;;  %6226 = vst.msk [vmem:[#allocation2 + $0xc8] sm:$0xff] %vm6200_vm14, %v6155_v13  ;;  %v7514_v32 = vld [vmem:[#allocation4 + $0x41] sm:$0xff]  ;;  %v7580_v50 = vld [vmem:[#allocation4 + $0x52] sm:$0xff] }
 0x274   :  { %7106 = vst.msk [vmem:[#allocation5 + $0x20] sm:$0xff] %vm6772_vm1, %v17498_v48  ;;  %7104 = vst.msk [vmem:[#allocation5] sm:$0xff] %vm6772_vm1, %v7096_v59  ;;  %7481 = vrot.lane.b32.xlu1 %v17498_v48, %s13587_s23  ;;  %v7529_v42 = vpack.c.bf16 %v17562_v26, %v7514_v32  ;;  %v7594_v54 = vpack.c.bf16 %v7580_v50, %v7375_v18 }
 0x275   :  { %v7177_v60 = vld [vmem:[#allocation4 + $0x2] sm:$0xff]  ;;  %7144 = vrot.lane.b32.xlu0 %v7128_v52, %s13588_s27  ;;  %2060 = vst.msk [vmem:[#allocation2 + $0xd8] sm:$0xff] %vm2032_vm7, %v1991_v61  ;;  %2059 = vst.msk [vmem:[#allocation2 + $0xd0] sm:$0xff] %vm2032_vm7, %v1989_v62 }
 0x276   :  { %v7193_v5 = vpack.c.bf16 %v17472_v25, %v7177_v60  ;;  %6799 = vst.msk [vmem:[#allocation3 + $0xd0] sm:$0xff] %vm6772_vm1, %v6734_v33  ;;  %6797 = vst.msk [vmem:[#allocation3 + $0xc0] sm:$0xff] %vm6772_vm1, %v6732_v47  ;;  %v4075_v25 = vpop.permute.xlu1 %4074  ;;  %v4073_v41 = vpop.permute.xlu0 %4072 }
 0x277   :  { %v6911_v7 = vld [vmem:[#allocation3 + $0xb0] ss:$2 sm:$0xff]  ;;  %v6943_v56 = vld [vmem:[#allocation3 + $0xb1] ss:$2 sm:$0xff]  ;;  %2414 = vst.msk [vmem:[#allocation2 + $0xd8] sm:$0xff] %vm2386_vm9, %v2345_v44  ;;  %2413 = vst.msk [vmem:[#allocation2 + $0xd0] sm:$0xff] %vm2386_vm9, %v2343_v22 }
 0x278   :  { %v6847_v16 = vld [vmem:[#allocation3 + $0xa0] ss:$2 sm:$0xff]  ;;  %v6985_v10 = vmax.f32 %v6911_v7, %v6943_v56  ;;  %v6879_v1 = vld [vmem:[#allocation3 + $0xa1] ss:$2 sm:$0xff]  ;;  %6800 = vst.msk [vmem:[#allocation3 + $0xd8] sm:$0xff] %vm6772_vm1, %v6735_v11  ;;  %6798 = vst.msk [vmem:[#allocation3 + $0xc8] sm:$0xff] %vm6772_vm1, %v6733_v21  ;;  %7546 = vrot.lane.b32.xlu1 %v7529_v42, %s13589_s21  ;;  %v7259_v7 = vpack.c.bf16 %v17490_v37, %v17480_v30 }
 0x279   :  { %v6969_v0 = vmax.f32 %v6847_v16, %v6879_v1  ;;  %7209 = vrot.lane.b32.xlu0 %v7193_v5, %s13590_s17  ;;  %3503 = vst.msk [vmem:[#allocation2 + $0xd8] sm:$0xff] %vm3475_vm10, %v3434_v38  ;;  %3502 = vst.msk [vmem:[#allocation2 + $0xd0] sm:$0xff] %vm3475_vm10, %v3432_v8 }
 0x27a   :  { %v6257_v20 = vld [vmem:[#allocation2 + $0xc0] sm:$0xff]  ;;  %v6258_v6 = vld [vmem:[#allocation2 + $0xc8] sm:$0xff]  ;;  %4144 = vst.msk [vmem:[#allocation2 + $0xd8] sm:$0xff] %vm4116_vm11, %v4075_v25  ;;  %v4429_v45 = vpop.permute.xlu1 %4428  ;;  %4143 = vst.msk [vmem:[#allocation2 + $0xd0] sm:$0xff] %vm4116_vm11, %v4073_v41  ;;  %v4427_v48 = vpop.permute.xlu0 %4426 }
 0x27b   :  { %v7001_v53 = vmax.f32 %v6969_v0, %v6985_v10  ;;  %12946 = vmatprep.mubr.msk.bf16.mxu0 %vm6316_vm0, %v6257_v20  ;;  %4498 = vst.msk [vmem:[#allocation2 + $0xd8] sm:$0xff] %vm4470_vm12, %v4429_v45  ;;  %4497 = vst.msk [vmem:[#allocation2 + $0xd0] sm:$0xff] %vm4470_vm12, %v4427_v48  ;;  %v7324_v10 = vpack.c.bf16 %v7514_v32, %v17501_v51  ;;  %v7454_v32 = vld [vmem:[#allocation4 + $0x90] sm:$0xff] }
 0x27c   :  { %12947 = vmatmul.mubr.msk.bf16.gmra.mrb[48].mxu0 %vm6316_vm0, %v6258_v6  ;;  %7611 = vrot.lane.b32.xlu1 %v7594_v54, %s13591_s3 }
 0x27d   :  { %7069 = vst.msk [vmem:[#allocation4 + $0x61] sm:$0xff] %vm6772_vm1, %v7001_v53  ;;  %7274 = vrot.lane.b32.xlu0 %v7258_v15, %s13583_s13 }
 0x27e   :  { %v5518_v56 = vpop.permute.xlu1 %5517 }
 0x27f   :  { %v6913_v27 = vld [vmem:[#allocation3 + $0xd0] ss:$2 sm:$0xff]  ;;  %v6945_v29 = vld [vmem:[#allocation3 + $0xd1] ss:$2 sm:$0xff]  ;;  %v6849_v34 = vld [vmem:[#allocation3 + $0xc0] ss:$2 sm:$0xff] }
 0x280   :  { %v6986_v31 = vmax.f32 %v6913_v27, %v6945_v29  ;;  %v6881_v35 = vld [vmem:[#allocation3 + $0xc1] ss:$2 sm:$0xff]  ;;  %5587 = vst.msk [vmem:[#allocation2 + $0xd8] sm:$0xff] %vm5559_vm13, %v5518_v56 }
 0x281   :  { %7339 = vrot.lane.b32.xlu0 %v7323_v46, %s13592_s19  ;;  %v6970_v36 = vmax.f32 %v6849_v34, %v6881_v35 }
 0x282   :  { %v1349_v1 = vpop.permute.xlu1 %1348 }
 0x283   :  { %v7002_v59 = vmax.f32 %v6970_v36, %v6986_v31  ;;  %1417 = vst.msk [vmem:[#allocation2 + $0xe0] sm:$0xff] %vm1388_vm6, %v1349_v1 }
 0x284   :  { %v7377_v52 = vld [vmem:[#allocation4 + $0x62] sm:$0xff]  ;;  %v5516_v12 = vpop.permute.xlu0 %5515 }
 0x285   :  { %7146 = vrot.lane.b32.xlu0 %v17525_v2, %s13588_s27  ;;  %7070 = vst.msk [vmem:[#allocation4 + $0x71] sm:$0xff] %vm6772_vm1, %v7002_v59  ;;  %v7390_v16 = vpack.c.bf16 %v7377_v52, %v7580_v50  ;;  %v7247_v55 = vld [vmem:[#allocation4 + $0x60] sm:$0xff]  ;;  %v7519_v59 = vld [vmem:[#allocation4 + $0x91] sm:$0xff] }
 0x286   :  { %v7312_v37 = vld [vmem:[#allocation4 + $0x61] sm:$0xff]  ;;  %5586 = vst.msk [vmem:[#allocation2 + $0xd0] sm:$0xff] %vm5559_vm13, %v5516_v12  ;;  %v12928_v19 = vpop.f32.mrb[28].mxu0  ;;  %v7260_v2 = vpack.c.bf16 %v7247_v55, %v17492_v40 }
 0x287   :  { %7408 = vrot.lane.b32.xlu1 %v7390_v16, %s13586_s25  ;;  %v6574_v0 = vadd.f32 %v17222_v39, %v12928_v19  ;;  %v6565_v13 = vpop.f32.mrb[29].mxu0 }
 0x288   :  { %v1351_v33 = vpop.permute.xlu1 %1350  ;;  %v6566_v43 = vadd.f32 %v17222_v39, %v6565_v13  ;;  %v12929_v14 = vpop.f32.mrb[30].mxu0 }
 0x289   :  { %7211 = vrot.lane.b32.xlu0 %v7593_v3, %s13590_s17  ;;  %1418 = vst.msk [vmem:[#allocation2 + $0xe8] sm:$0xff] %vm1388_vm6, %v1351_v33  ;;  %v6157_v4 = vpop.permute.xlu0 %6156  ;;  %v6738_v28 = vmax.f32 %v6574_v0, 0.0  ;;  %v6577_v5 = vadd.f32 %v17222_v39, %v12929_v14  ;;  %v6568_v53 = vpop.f32.mrb[31].mxu0 }
 0x28a   :  { %6227 = vst.msk [vmem:[#allocation2 + $0xd0] sm:$0xff] %vm6200_vm14, %v6157_v4  ;;  %v6736_v47 = vmax.f32 %v6566_v43, 0.0  ;;  %v6569_v44 = vadd.f32 %v17222_v39, %v6568_v53  ;;  %v7325_v39 = vpack.c.bf16 %v7312_v37, %v17562_v26 }
 0x28b   :  { %6803 = vst.msk [vmem:[#allocation3 + $0xf0] sm:$0xff] %vm6772_vm1, %v6738_v28  ;;  %v6739_v11 = vmax.f32 %v6577_v5, 0.0 }
 0x28c   :  { %v17582_v60 = vld [vmem:[#allocation4 + $0x70] sm:$0xff]  ;;  %v1995_v57 = vpop.permute.xlu1 %1994  ;;  %6801 = vst.msk [vmem:[#allocation3 + $0xe0] sm:$0xff] %vm6772_vm1, %v6736_v47  ;;  %v6737_v40 = vmax.f32 %v6569_v44, 0.0 }
 0x28d   :  { %7276 = vrot.lane.b32.xlu0 %v7259_v7, %s13583_s13  ;;  %v7465_v61 = vpack.c.bf16 %v17582_v60, %v7247_v55  ;;  %v17589_v30 = vld [vmem:[#allocation4 + $0x71] sm:$0xff]  ;;  %2062 = vst.msk [vmem:[#allocation2 + $0xe8] sm:$0xff] %vm2032_vm7, %v1995_v57  ;;  %v6159_v17 = vpop.permute.xlu0 %6158  ;;  %v17645_v55 = vld [vmem:[%s19054_s2] ss:$0 sm:$0xff] }
 0x28e   :  { %v17594_v51 = vld [vmem:[#allocation4 + $0x72] sm:$0xff]  ;;  %v7131_v63 = vpack.c.bf16 %v17589_v30, %v7312_v37  ;;  %6804 = vst.msk [vmem:[#allocation3 + $0xf8] sm:$0xff] %vm6772_vm1, %v6739_v11  ;;  %6802 = vst.msk [vmem:[#allocation3 + $0xe8] sm:$0xff] %vm6772_vm1, %v6737_v40 }
 0x28f   :  { %7107 = vst.msk [vmem:[#allocation5 + $0x30] sm:$0xff] %vm6772_vm1, %v7465_v61  ;;  %7483 = vrot.lane.b32.xlu1 %v7465_v61, %s13587_s23  ;;  %v7196_v49 = vpack.c.bf16 %v17594_v51, %v7377_v52 }
 0x290   :  { %6228 = vst.msk [vmem:[#allocation2 + $0xd8] sm:$0xff] %vm6200_vm14, %v6159_v17  ;;  %v2349_v18 = vpop.permute.xlu1 %2348 }
 0x291   :  { %7341 = vrot.lane.b32.xlu0 %v7324_v10, %s13592_s19  ;;  %2416 = vst.msk [vmem:[#allocation2 + $0xe8] sm:$0xff] %vm2386_vm9, %v2349_v18  ;;  %v1993_v62 = vpop.permute.xlu0 %1992  ;;  %v6259_v20 = vld [vmem:[#allocation2 + $0xd0] sm:$0xff] }
 0x292   :  { %2061 = vst.msk [vmem:[#allocation2 + $0xe0] sm:$0xff] %vm2032_vm7, %v1993_v62  ;;  %12950 = vmatprep.mubr.msk.bf16.mxu0 %vm6316_vm0, %v6259_v20 }
 0x293   :  { %7548 = vrot.lane.b32.xlu1 %v7131_v63, %s13589_s21 }
 0x294   :  { %v3438_v21 = vpop.permute.xlu1 %3437 }
 0x295   :  { %7148 = vrot.lane.b32.xlu0 %v7529_v42, %s13588_s27  ;;  %v6915_v3 = vld [vmem:[#allocation3 + $0xf0] ss:$2 sm:$0xff]  ;;  %v6947_v15 = vld [vmem:[#allocation3 + $0xf1] ss:$2 sm:$0xff]  ;;  %3505 = vst.msk [vmem:[#allocation2 + $0xe8] sm:$0xff] %vm3475_vm10, %v3438_v21  ;;  %v2347_v38 = vpop.permute.xlu0 %2346 }
 0x296   :  { %v6987_v6 = vmax.f32 %v6915_v3, %v6947_v15  ;;  %v6851_v23 = vld [vmem:[#allocation3 + $0xe0] ss:$2 sm:$0xff]  ;;  %v6883_v24 = vld [vmem:[#allocation3 + $0xe1] ss:$2 sm:$0xff]  ;;  %2415 = vst.msk [vmem:[#allocation2 + $0xe0] sm:$0xff] %vm2386_vm9, %v2347_v38 }
 0x297   :  { %7613 = vrot.lane.b32.xlu1 %v7196_v49, %s13591_s3  ;;  %v6260_v22 = vld [vmem:[#allocation2 + $0xd8] sm:$0xff]  ;;  %v6971_v46 = vmax.f32 %v6851_v23, %v6883_v24 }
 0x298   :  { %12951 = vmatmul.mubr.msk.bf16.gmra.mrb[52].mxu0 %vm6316_vm0, %v6260_v22  ;;  %v4079_v25 = vpop.permute.xlu1 %4078 }
 0x299   :  { %7213 = vrot.lane.b32.xlu0 %v7594_v54, %s13590_s17  ;;  %v7003_v26 = vmax.f32 %v6971_v46, %v6987_v6  ;;  %4146 = vst.msk [vmem:[#allocation2 + $0xe8] sm:$0xff] %vm4116_vm11, %v4079_v25  ;;  %v3436_v8 = vpop.permute.xlu0 %3435  ;;  %v7584_v54 = vld [vmem:[#allocation4 + $0x92] sm:$0xff] }
 0x29a   :  { %3504 = vst.msk [vmem:[#allocation2 + $0xe0] sm:$0xff] %vm3475_vm10, %v3436_v8 }
 0x29b   :  { %7071 = vst.msk [vmem:[#allocation4 + $0x81] sm:$0xff] %vm6772_vm1, %v7003_v26 }
 0x29c   :  { %v4433_v27 = vpop.permute.xlu1 %4432 }
 0x29d   :  { %7278 = vrot.lane.b32.xlu0 %v7260_v2, %s13583_s13  ;;  %4500 = vst.msk [vmem:[#allocation2 + $0xe8] sm:$0xff] %vm4470_vm12, %v4433_v27  ;;  %v4077_v29 = vpop.permute.xlu0 %4076 }
 0x29e   :  { %4145 = vst.msk [vmem:[#allocation2 + $0xe0] sm:$0xff] %vm4116_vm11, %v4077_v29 }
 0x2a1   :  { %7343 = vrot.lane.b32.xlu0 %v7325_v39, %s13592_s19  ;;  %v4431_v31 = vpop.permute.xlu0 %4430 }
 0x2a2   :  { %v7379_v34 = vld [vmem:[#allocation4 + $0x82] sm:$0xff]  ;;  %v5522_v45 = vpop.permute.xlu1 %5521  ;;  %4499 = vst.msk [vmem:[#allocation2 + $0xe0] sm:$0xff] %vm4470_vm12, %v4431_v31 }
 0x2a3   :  { %v7249_v35 = vld [vmem:[#allocation4 + $0x80] sm:$0xff]  ;;  %v7391_v50 = vpack.c.bf16 %v7379_v34, %v17594_v51  ;;  %5589 = vst.msk [vmem:[#allocation2 + $0xe8] sm:$0xff] %vm5559_vm13, %v5522_v45  ;;  %v7596_v13 = vpack.c.bf16 %v7584_v54, %v7379_v34 }
 0x2a4   :  { %v7314_v36 = vld [vmem:[#allocation4 + $0x81] sm:$0xff]  ;;  %v7261_v41 = vpack.c.bf16 %v7249_v35, %v17582_v60  ;;  %v7466_v52 = vpack.c.bf16 %v7454_v32, %v7249_v35 }
 0x2a5   :  { %7150 = vrot.lane.b32.xlu0 %v7131_v63, %s13588_s27  ;;  %7410 = vrot.lane.b32.xlu1 %v7391_v50, %s13586_s25  ;;  %v7326_v48 = vpack.c.bf16 %v7314_v36, %v17589_v30  ;;  %v7531_v16 = vpack.c.bf16 %v7519_v59, %v7314_v36 }
 0x2a6   :  { %v1353_v42 = vpop.permute.xlu1 %1352 }
 0x2a7   :  { %1419 = vst.msk [vmem:[#allocation2 + $0xf0] sm:$0xff] %vm1388_vm6, %v1353_v42 }
 0x2a9   :  { %7215 = vrot.lane.b32.xlu0 %v7196_v49, %s13590_s17  ;;  %7485 = vrot.lane.b32.xlu1 %v7466_v52, %s13587_s23 }
 0x2aa   :  { %v5520_v7 = vpop.permute.xlu0 %5519  ;;  %v12932_v56 = vpop.f32.mrb[32].mxu0 }
 0x2ab   :  { %5588 = vst.msk [vmem:[#allocation2 + $0xe0] sm:$0xff] %vm5559_vm13, %v5520_v7  ;;  %v6590_v60 = vadd.f32 %v17645_v55, %v12932_v56  ;;  %v6581_v10 = vpop.f32.mrb[33].mxu0 }
 0x2ac   :  { %v6582_v1 = vadd.f32 %v17645_v55, %v6581_v10  ;;  %v12933_v61 = vpop.f32.mrb[34].mxu0 }
 0x2ad   :  { %7280 = vrot.lane.b32.xlu0 %v7261_v41, %s13583_s13  ;;  %7550 = vrot.lane.b32.xlu1 %v7531_v16, %s13589_s21  ;;  %v6742_v30 = vmax.f32 %v6590_v60, 0.0  ;;  %v6593_v37 = vadd.f32 %v17645_v55, %v12933_v61  ;;  %v6584_v12 = vpop.f32.mrb[35].mxu0 }
 0x2ae   :  { %v1355_v51 = vpop.permute.xlu1 %1354  ;;  %v6161_v63 = vpop.permute.xlu0 %6160  ;;  %v6740_v19 = vmax.f32 %v6582_v1, 0.0  ;;  %v6585_v0 = vadd.f32 %v17645_v55, %v6584_v12 }
 0x2af   :  { %1420 = vst.msk [vmem:[#allocation2 + $0xf8] sm:$0xff] %vm1388_vm6, %v1355_v51  ;;  %v6743_v33 = vmax.f32 %v6593_v37, 0.0 }
 0x2b0   :  { %6229 = vst.msk [vmem:[#allocation2 + $0xe0] sm:$0xff] %vm6200_vm14, %v6161_v63  ;;  %v6741_v43 = vmax.f32 %v6585_v0, 0.0 }
 0x2b1   :  { %7345 = vrot.lane.b32.xlu0 %v7326_v48, %s13592_s19  ;;  %6807 = vst.msk [vmem:[#allocation3 + $0x110] sm:$0xff] %vm6772_vm1, %v6742_v30  ;;  %6805 = vst.msk [vmem:[#allocation3 + $0x100] sm:$0xff] %vm6772_vm1, %v6740_v19  ;;  %7615 = vrot.lane.b32.xlu1 %v7596_v13, %s13591_s3 }
 0x2b2   :  { %6808 = vst.msk [vmem:[#allocation3 + $0x118] sm:$0xff] %vm6772_vm1, %v6743_v33  ;;  %v1999_v14 = vpop.permute.xlu1 %1998  ;;  %v6163_v2 = vpop.permute.xlu0 %6162  ;;  %6806 = vst.msk [vmem:[#allocation3 + $0x108] sm:$0xff] %vm6772_vm1, %v6741_v43 }
 0x2b3   :  { %2064 = vst.msk [vmem:[#allocation2 + $0xf8] sm:$0xff] %vm2032_vm7, %v1999_v14 }
 0x2b4   :  { %6230 = vst.msk [vmem:[#allocation2 + $0xe8] sm:$0xff] %vm6200_vm14, %v6163_v2 }
 0x2b5   :  { %16 = vsyncpa [#allocation9], 0  ;;  %v7120_v3 = vld [vmem:[#allocation4 + $0xa1] sm:$0xff]  ;;  %vm7430_vm5 = vcmask 130048   ;;  %vm7503_vm6 = vcmask 326784   ;;  %vm7568_vm8 = vcmask 523584  }
 0x2b6   :  { %v2353_v4 = vpop.permute.xlu1 %2352  ;;  %v1997_v28 = vpop.permute.xlu0 %1996  ;;  %v7185_v23 = vld [vmem:[#allocation4 + $0xa2] sm:$0xff]  ;;  %vm7915_vm15 = vcmask 392192   ;;  %s13595_s24 = smov 112   ;;  %s13596_s30 = smov 32   ;;  %vm8122_vm3 = vcmask 778624   ;;  %vm8193_vm4 = vcmask 1041152  }
 0x2b7   :  { %v6261_v5 = vld [vmem:[#allocation2 + $0xe0] sm:$0xff]  ;;  %2418 = vst.msk [vmem:[#allocation2 + $0xf8] sm:$0xff] %vm2386_vm9, %v2353_v4  ;;  %vm8194_vm2 = vcmask 123905  }
 0x2b8   :  { %2063 = vst.msk [vmem:[#allocation2 + $0xf0] sm:$0xff] %vm2032_vm7, %v1997_v28  ;;  %12954 = vmatprep.mubr.msk.bf16.mxu0 %vm6316_vm0, %v6261_v5  ;;  %vm7168_vm7 = vcmask 392384   ;;  %v7088_v7 = vld [vmem:[#allocation4 + $0xa0] sm:$0xff] }
 0x2b9   :  { %v6917_v53 = vld [vmem:[#allocation3 + $0x110] ss:$2 sm:$0xff]  ;;  %v6949_v47 = vld [vmem:[#allocation3 + $0x111] ss:$2 sm:$0xff]  ;;  %v6853_v44 = vld [vmem:[#allocation3 + $0x100] ss:$2 sm:$0xff] }
 0x2ba   :  { %v6988_v49 = vmax.f32 %v6917_v53, %v6949_v47  ;;  %v6885_v11 = vld [vmem:[#allocation3 + $0x101] ss:$2 sm:$0xff]  ;;  %v3442_v57 = vpop.permute.xlu1 %3441  ;;  %v2351_v40 = vpop.permute.xlu0 %2350 }
 0x2bb   :  { %v6262_v17 = vld [vmem:[#allocation2 + $0xe8] sm:$0xff]  ;;  %v6972_v39 = vmax.f32 %v6853_v44, %v6885_v11  ;;  %3507 = vst.msk [vmem:[#allocation2 + $0xf8] sm:$0xff] %vm3475_vm10, %v3442_v57 }
 0x2bc   :  { %2417 = vst.msk [vmem:[#allocation2 + $0xf0] sm:$0xff] %vm2386_vm9, %v2351_v40  ;;  %12955 = vmatmul.mubr.msk.bf16.gmra.mrb[56].mxu0 %vm6316_vm0, %v6262_v17  ;;  %vm7233_vm9 = vcmask 589184  }
 0x2bd   :  { %v7004_v18 = vmax.f32 %v6972_v39, %v6988_v49 }
 0x2be   :  { %v4083_v62 = vpop.permute.xlu1 %4082 }
 0x2bf   :  { %7072 = vst.msk [vmem:[#allocation4 + $0xb1] sm:$0xff] %vm6772_vm1, %v7004_v18 }
 0x2c0   :  { %4148 = vst.msk [vmem:[#allocation2 + $0xf8] sm:$0xff] %vm4116_vm11, %v4083_v62  ;;  %v3440_v20 = vpop.permute.xlu0 %3439 }
 0x2c1   :  { %3506 = vst.msk [vmem:[#allocation2 + $0xf0] sm:$0xff] %vm3475_vm10, %v3440_v20  ;;  %vm7633_vm10 = vcmask 720384  }
 0x2c2   :  { %v4437_v21 = vpop.permute.xlu1 %4436 }
 0x2c3   :  { %4502 = vst.msk [vmem:[#allocation2 + $0xf8] sm:$0xff] %vm4470_vm12, %v4437_v21 }
 0x2c4   :  { %v4081_v15 = vpop.permute.xlu0 %4080 }
 0x2c5   :  { %4147 = vst.msk [vmem:[#allocation2 + $0xf0] sm:$0xff] %vm4116_vm11, %v4081_v15  ;;  %vm7298_vm11 = vcmask 785984  }
 0x2c6   :  { %v17672_v38 = vld [vmem:[#allocation4 + $0xb1] sm:$0xff] }
 0x2c7   :  { %v7132_v22 = vpack.c.bf16 %v17672_v38, %v7120_v3  ;;  %v5526_v6 = vpop.permute.xlu1 %5525  ;;  %v17675_v24 = vld [vmem:[#allocation4 + $0xb2] sm:$0xff] }
 0x2c8   :  { %5591 = vst.msk [vmem:[#allocation2 + $0xf8] sm:$0xff] %vm5559_vm13, %v5526_v6  ;;  %v4435_v46 = vpop.permute.xlu0 %4434  ;;  %v7197_v25 = vpack.c.bf16 %v17675_v24, %v7185_v23  ;;  %v17690_v48 = vld [vmem:[#allocation4 + $0xb0] sm:$0xff] }
 0x2c9   :  { %7152 = vrot.lane.b32.xlu0 %v7132_v22, %s13588_s27  ;;  %4501 = vst.msk [vmem:[#allocation2 + $0xf0] sm:$0xff] %vm4470_vm12, %v4435_v46  ;;  %v7100_v16 = vpack.c.bf16 %v17690_v48, %v7088_v7  ;;  %vm7363_vm12 = vcmask 982784  }
 0x2cb   :  { %v6167_v26 = vpop.permute.xlu1 %6166  ;;  %7108 = vst.msk [vmem:[#allocation5 + $0x40] sm:$0xff] %vm6772_vm1, %v7100_v16 }
 0x2cc   :  { %6232 = vst.msk [vmem:[#allocation2 + $0xf8] sm:$0xff] %vm6200_vm14, %v6167_v26 }
 0x2cd   :  { %7217 = vrot.lane.b32.xlu0 %v7197_v25, %s13590_s17 }
 0x2ce   :  { %v12936_v8 = vpop.f32.mrb[36].mxu0 }
 0x2cf   :  { %v5524_v27 = vpop.permute.xlu0 %5523  ;;  %v6606_v29 = vadd.f32 %v17645_v55, %v12936_v8  ;;  %v6597_v31 = vpop.f32.mrb[37].mxu0 }
 0x2d0   :  { %5590 = vst.msk [vmem:[#allocation2 + $0xf0] sm:$0xff] %vm5559_vm13, %v5524_v27  ;;  %v6598_v34 = vadd.f32 %v17645_v55, %v6597_v31  ;;  %v12937_v35 = vpop.f32.mrb[38].mxu0  ;;  %vm7428_vm13 = vcmask 1048512  }
 0x2d1   :  { %v6746_v32 = vmax.f32 %v6606_v29, 0.0  ;;  %v6609_v36 = vadd.f32 %v17645_v55, %v12937_v35  ;;  %v6600_v45 = vpop.f32.mrb[39].mxu0 }
 0x2d2   :  { %v7405_v50 = vpop.permute.xlu1 %7404  ;;  %v6744_v41 = vmax.f32 %v6598_v34, 0.0  ;;  %v6601_v59 = vadd.f32 %v17645_v55, %v6600_v45 }
 0x2d3   :  { %v6165_v42 = vpop.permute.xlu0 %6164  ;;  %7431 = vst.msk [vmem:[#allocation5 + $0x8] sm:$0xff] %vm7430_vm5, %v7405_v50  ;;  %v6747_v52 = vmax.f32 %v6609_v36, 0.0  ;;  %v6264_v1 = vld [vmem:[#allocation2 + $0xf8] sm:$0xff] }
 0x2d4   :  { %6811 = vst.msk [vmem:[#allocation3 + $0x130] sm:$0xff] %vm6772_vm1, %v6746_v32  ;;  %6809 = vst.msk [vmem:[#allocation3 + $0x120] sm:$0xff] %vm6772_vm1, %v6744_v41  ;;  %v6745_v54 = vmax.f32 %v6601_v59, 0.0 }
 0x2d5   :  { %6231 = vst.msk [vmem:[#allocation2 + $0xf0] sm:$0xff] %vm6200_vm14, %v6165_v42  ;;  %vm7773_vm14 = vcmask 719872  }
 0x2d6   :  { %6812 = vst.msk [vmem:[#allocation3 + $0x138] sm:$0xff] %vm6772_vm1, %v6747_v52  ;;  %v7480_v56 = vpop.permute.xlu1 %7479  ;;  %6810 = vst.msk [vmem:[#allocation3 + $0x128] sm:$0xff] %vm6772_vm1, %v6745_v54 }
 0x2d7   :  { %7504 = vst.msk [vmem:[#allocation5 + $0x8] sm:$0xff] %vm7503_vm6, %v7480_v56 }
 0x2da   :  { %v7545_v10 = vpop.permute.xlu1 %7544 }
 0x2db   :  { %7569 = vst.msk [vmem:[#allocation5 + $0x8] sm:$0xff] %vm7568_vm8, %v7545_v10 }
 0x2dc   :  { %v6263_v30 = vld [vmem:[#allocation2 + $0xf0] sm:$0xff] }
 0x2dd   :  { %12958 = vmatprep.mubr.msk.bf16.mxu0 %vm6316_vm0, %v6263_v30  ;;  %v6919_v37 = vld [vmem:[#allocation3 + $0x130] ss:$2 sm:$0xff]  ;;  %v6951_v12 = vld [vmem:[#allocation3 + $0x131] ss:$2 sm:$0xff]  ;;  %v6855_v63 = vld [vmem:[#allocation3 + $0x120] ss:$2 sm:$0xff] }
 0x2de   :  { %12959 = vmatmul.mubr.msk.bf16.gmra.mrb[60].mxu0 %vm6316_vm0, %v6264_v1  ;;  %v6989_v51 = vmax.f32 %v6919_v37, %v6951_v12  ;;  %v6887_v19 = vld [vmem:[#allocation3 + $0x121] ss:$2 sm:$0xff]  ;;  %v7610_v0 = vpop.permute.xlu1 %7609  ;;  %vm8082_vm0 = vcmask 1041409  }
 0x2df   :  { %v6973_v13 = vmax.f32 %v6855_v63, %v6887_v19  ;;  %7634 = vst.msk [vmem:[#allocation5 + $0x8] sm:$0xff] %vm7633_vm10, %v7610_v0 }
 0x2e1   :  { %v7005_v43 = vmax.f32 %v6973_v13, %v6989_v51 }
 0x2e2   :  { %v7407_v14 = vpop.permute.xlu1 %7406 }
 0x2e3   :  { %7073 = vst.msk [vmem:[#allocation4 + $0xc1] sm:$0xff] %vm6772_vm1, %v7005_v43 }
 0x2e4   :  { %7433 = vst.msk [vmem:[#allocation5 + $0x18] sm:$0xff] %vm7430_vm5, %v7407_v14 }
 0x2e6   :  { %v7482_v4 = vpop.permute.xlu1 %7481  ;;  %v7643_v28 = vld [vmem:[#allocation5 + $0x8] sm:$0xff] }
 0x2e7   :  { %v7145_v60 = vpop.permute.xlu0 %7144  ;;  %7505 = vst.msk [vmem:[#allocation5 + $0x18] sm:$0xff] %vm7503_vm6, %v7482_v4  ;;  %12424 = vmatprep.mubr.msk.bf16.mxu1 %vm7773_vm14, %v7643_v28 }
 0x2e8   :  { %7169 = vst.msk [vmem:[#allocation5] sm:$0xff] %vm7168_vm7, %v7145_v60 }
 0x2ea   :  { %v17713_v53 = vld [vmem:[#allocation4 + $0xc2] sm:$0xff]  ;;  %v7547_v49 = vpop.permute.xlu1 %7546 }
 0x2eb   :  { %v7210_v61 = vpop.permute.xlu0 %7209  ;;  %v17715_v47 = vld [vmem:[#allocation4 + $0xc0] sm:$0xff]  ;;  %v7392_v44 = vpack.c.bf16 %v17713_v53, %v17675_v24  ;;  %7570 = vst.msk [vmem:[#allocation5 + $0x18] sm:$0xff] %vm7568_vm8, %v7547_v49 }
 0x2ec   :  { %7234 = vst.msk [vmem:[#allocation5] sm:$0xff] %vm7233_vm9, %v7210_v61  ;;  %v7262_v11 = vpack.c.bf16 %v17715_v47, %v17690_v48  ;;  %v17722_v40 = vld [vmem:[#allocation4 + $0xc1] sm:$0xff] }
 0x2ed   :  { %7412 = vrot.lane.b32.xlu1 %v7392_v44, %s13586_s25  ;;  %v7327_v18 = vpack.c.bf16 %v17722_v40, %v17672_v38 }
 0x2ee   :  { %7282 = vrot.lane.b32.xlu0 %v7262_v11, %s13583_s13  ;;  %v7612_v39 = vpop.permute.xlu1 %7611 }
 0x2ef   :  { %v7275_v33 = vpop.permute.xlu0 %7274  ;;  %7635 = vst.msk [vmem:[#allocation5 + $0x18] sm:$0xff] %vm7633_vm10, %v7612_v39 }
 0x2f0   :  { %7299 = vst.msk [vmem:[#allocation5] sm:$0xff] %vm7298_vm11, %v7275_v33 }
 0x2f2   :  { %7347 = vrot.lane.b32.xlu0 %v7327_v18, %s13592_s19  ;;  %v12940_v21 = vpop.f32.mrb[40].mxu0 }
 0x2f3   :  { %v7340_v2 = vpop.permute.xlu0 %7339  ;;  %v6622_v15 = vadd.f32 %v17645_v55, %v12940_v21  ;;  %v6613_v22 = vpop.f32.mrb[41].mxu0 }
 0x2f4   :  { %7364 = vst.msk [vmem:[#allocation5] sm:$0xff] %vm7363_vm12, %v7340_v2  ;;  %v6614_v6 = vadd.f32 %v17645_v55, %v6613_v22  ;;  %v12941_v38 = vpop.f32.mrb[42].mxu0 }
 0x2f5   :  { %7429 = vst.msk [vmem:[#allocation5] sm:$0xff] %vm7428_vm13, %v7405_v50  ;;  %v6750_v23 = vmax.f32 %v6622_v15, 0.0  ;;  %v6625_v24 = vadd.f32 %v17645_v55, %v12941_v38  ;;  %v6616_v46 = vpop.f32.mrb[43].mxu0 }
 0x2f6   :  { %v7645_v25 = vld [vmem:[#allocation5 + $0x18] sm:$0xff]  ;;  %v6748_v26 = vmax.f32 %v6614_v6, 0.0  ;;  %v6617_v8 = vadd.f32 %v17645_v55, %v6616_v46 }
 0x2f7   :  { %v7147_v5 = vpop.permute.xlu0 %7146  ;;  %6815 = vst.msk [vmem:[#allocation3 + $0x150] sm:$0xff] %vm6772_vm1, %v6750_v23  ;;  %v6751_v31 = vmax.f32 %v6625_v24, 0.0 }
 0x2f8   :  { %7170 = vst.msk [vmem:[#allocation5 + $0x10] sm:$0xff] %vm7168_vm7, %v7147_v5  ;;  %v6749_v34 = vmax.f32 %v6617_v8, 0.0 }
 0x2f9   :  { %v7409_v20 = vpop.permute.xlu1 %7408  ;;  %6813 = vst.msk [vmem:[#allocation3 + $0x140] sm:$0xff] %vm6772_vm1, %v6748_v26  ;;  %6816 = vst.msk [vmem:[#allocation3 + $0x158] sm:$0xff] %vm6772_vm1, %v6751_v31 }
 0x2fa   :  { %7435 = vst.msk [vmem:[#allocation5 + $0x28] sm:$0xff] %vm7430_vm5, %v7409_v20 }
 0x2fb   :  { %v7212_v57 = vpop.permute.xlu0 %7211  ;;  %6814 = vst.msk [vmem:[#allocation3 + $0x148] sm:$0xff] %vm6772_vm1, %v6749_v34 }
 0x2fc   :  { %7235 = vst.msk [vmem:[#allocation5 + $0x10] sm:$0xff] %vm7233_vm9, %v7212_v57  ;;  %v7642_v17 = vld [vmem:[#allocation5] sm:$0xff] }
 0x2fd   :  { %7835 = vmatmul.mubr.bf16.vlgmr.msra.gmra.mrb[0].mxu1 %v7642_v17 }
 0x2fe   :  { %12425 = vmatprep.mubr.msk.bf16.mxu1 %vm7773_vm14, %v7645_v25 }
 0x2ff   :  { %v7277_v62 = vpop.permute.xlu0 %7276 }
 0x300   :  { %7300 = vst.msk [vmem:[#allocation5 + $0x10] sm:$0xff] %vm7298_vm11, %v7277_v62  ;;  %v6921_v41 = vld [vmem:[#allocation3 + $0x150] ss:$2 sm:$0xff]  ;;  %v6953_v59 = vld [vmem:[#allocation3 + $0x151] ss:$2 sm:$0xff] }
 0x301   :  { %v7484_v27 = vpop.permute.xlu1 %7483  ;;  %v6990_v42 = vmax.f32 %v6921_v41, %v6953_v59 }
 0x302   :  { %7506 = vst.msk [vmem:[#allocation5 + $0x28] sm:$0xff] %vm7503_vm6, %v7484_v27  ;;  %v6857_v52 = vld [vmem:[#allocation3 + $0x140] ss:$2 sm:$0xff]  ;;  %v6889_v48 = vld [vmem:[#allocation3 + $0x141] ss:$2 sm:$0xff] }
 0x303   :  { %v7342_v3 = vpop.permute.xlu0 %7341  ;;  %v6974_v54 = vmax.f32 %v6857_v52, %v6889_v48 }
 0x304   :  { %7365 = vst.msk [vmem:[#allocation5 + $0x10] sm:$0xff] %vm7363_vm12, %v7342_v3 }
 0x305   :  { %7432 = vst.msk [vmem:[#allocation5 + $0x10] sm:$0xff] %vm7428_vm13, %v7407_v14  ;;  %v7549_v35 = vpop.permute.xlu1 %7548  ;;  %v7006_v56 = vmax.f32 %v6974_v54, %v6990_v42 }
 0x306   :  { %7571 = vst.msk [vmem:[#allocation5 + $0x28] sm:$0xff] %vm7568_vm8, %v7549_v35 }
 0x307   :  { %v7149_v29 = vpop.permute.xlu0 %7148  ;;  %7074 = vst.msk [vmem:[#allocation4 + $0xd1] sm:$0xff] %vm6772_vm1, %v7006_v56 }
 0x308   :  { %7171 = vst.msk [vmem:[#allocation5 + $0x20] sm:$0xff] %vm7168_vm7, %v7149_v29 }
 0x309   :  { %v7614_v45 = vpop.permute.xlu1 %7613 }
 0x30a   :  { %7636 = vst.msk [vmem:[#allocation5 + $0x28] sm:$0xff] %vm7633_vm10, %v7614_v45 }
 0x30b   :  { %v7214_v32 = vpop.permute.xlu0 %7213 }
 0x30c   :  { %7236 = vst.msk [vmem:[#allocation5 + $0x20] sm:$0xff] %vm7233_vm9, %v7214_v32  ;;  %v7644_v36 = vld [vmem:[#allocation5 + $0x10] sm:$0xff] }
 0x30d   :  { %7843 = vmatmul.mubr.bf16.gmra.mrb[4].mxu1 %v7644_v36 }
 0x30e   :  { %v7456_v61 = vld [vmem:[#allocation4 + $0xd0] sm:$0xff] }
 0x30f   :  { %v7279_v50 = vpop.permute.xlu0 %7278  ;;  %v17756_v30 = vld [vmem:[#allocation4 + $0xd1] sm:$0xff]  ;;  %v7467_v37 = vpack.c.bf16 %v7456_v61, %v17715_v47 }
 0x310   :  { %7301 = vst.msk [vmem:[#allocation5 + $0x20] sm:$0xff] %vm7298_vm11, %v7279_v50  ;;  %v7133_v12 = vpack.c.bf16 %v17756_v30, %v17722_v40  ;;  %v7188_v51 = vld [vmem:[#allocation4 + $0xd2] sm:$0xff] }
 0x311   :  { %v7647_v16 = vld [vmem:[#allocation5 + $0x28] sm:$0xff]  ;;  %7487 = vrot.lane.b32.xlu1 %v7467_v37, %s13587_s23  ;;  %7109 = vst.msk [vmem:[#allocation5 + $0x50] sm:$0xff] %vm6772_vm1, %v7467_v37  ;;  %v7198_v63 = vpack.c.bf16 %v7188_v51, %v17713_v53 }
 0x312   :  { %12426 = vmatprep.mubr.msk.bf16.mxu1 %vm7773_vm14, %v7647_v16  ;;  %7154 = vrot.lane.b32.xlu0 %v7133_v12, %s13588_s27 }
 0x313   :  { %v7344_v7 = vpop.permute.xlu0 %7343 }
 0x314   :  { %7366 = vst.msk [vmem:[#allocation5 + $0x20] sm:$0xff] %vm7363_vm12, %v7344_v7 }
 0x315   :  { %7434 = vst.msk [vmem:[#allocation5 + $0x20] sm:$0xff] %vm7428_vm13, %v7409_v20  ;;  %7552 = vrot.lane.b32.xlu1 %v7133_v12, %s13589_s21 }
 0x316   :  { %7219 = vrot.lane.b32.xlu0 %v7198_v63, %s13590_s17 }
 0x317   :  { %v7151_v60 = vpop.permute.xlu0 %7150  ;;  %v7411_v19 = vpop.permute.xlu1 %7410 }
 0x318   :  { %7172 = vst.msk [vmem:[#allocation5 + $0x30] sm:$0xff] %vm7168_vm7, %v7151_v60 }
 0x319   :  { %7437 = vst.msk [vmem:[#allocation5 + $0x38] sm:$0xff] %vm7430_vm5, %v7411_v19  ;;  %7617 = vrot.lane.b32.xlu1 %v7198_v63, %s13591_s3 }
 0x31a   :  { %v12944_v43 = vpop.f32.mrb[44].mxu0 }
 0x31b   :  { %v7216_v10 = vpop.permute.xlu0 %7215  ;;  %v7486_v13 = vpop.permute.xlu1 %7485  ;;  %v6638_v14 = vadd.f32 %v17645_v55, %v12944_v43 }
 0x31c   :  { %7237 = vst.msk [vmem:[#allocation5 + $0x30] sm:$0xff] %vm7233_vm9, %v7216_v10  ;;  %v7646_v1 = vld [vmem:[#allocation5 + $0x20] sm:$0xff]  ;;  %v6629_v2 = vpop.f32.mrb[45].mxu0 }
 0x31d   :  { %7851 = vmatmul.mubr.bf16.gmra.mrb[8].mxu1 %v7646_v1  ;;  %7507 = vst.msk [vmem:[#allocation5 + $0x38] sm:$0xff] %vm7503_vm6, %v7486_v13  ;;  %v6630_v4 = vadd.f32 %v17645_v55, %v6629_v2  ;;  %v12945_v28 = vpop.f32.mrb[46].mxu0  ;;  %v6754_v53 = vmax.f32 %v6638_v14, 0.0 }
 0x31e   :  { %v6641_v47 = vadd.f32 %v17645_v55, %v12945_v28  ;;  %v6632_v49 = vpop.f32.mrb[47].mxu0 }
 0x31f   :  { %v7281_v0 = vpop.permute.xlu0 %7280  ;;  %v7551_v5 = vpop.permute.xlu1 %7550  ;;  %v6752_v44 = vmax.f32 %v6630_v4, 0.0  ;;  %v6633_v11 = vadd.f32 %v17645_v55, %v6632_v49  ;;  %6819 = vst.msk [vmem:[#allocation3 + $0x170] sm:$0xff] %vm6772_vm1, %v6754_v53 }
 0x320   :  { %7302 = vst.msk [vmem:[#allocation5 + $0x30] sm:$0xff] %vm7298_vm11, %v7281_v0  ;;  %v6755_v57 = vmax.f32 %v6641_v47, 0.0 }
 0x321   :  { %7572 = vst.msk [vmem:[#allocation5 + $0x38] sm:$0xff] %vm7568_vm8, %v7551_v5  ;;  %v6753_v40 = vmax.f32 %v6633_v11, 0.0 }
 0x322   :  { %6817 = vst.msk [vmem:[#allocation3 + $0x160] sm:$0xff] %vm6772_vm1, %v6752_v44  ;;  %6820 = vst.msk [vmem:[#allocation3 + $0x178] sm:$0xff] %vm6772_vm1, %v6755_v57 }
 0x323   :  { %v7346_v33 = vpop.permute.xlu0 %7345  ;;  %v7616_v17 = vpop.permute.xlu1 %7615  ;;  %6818 = vst.msk [vmem:[#allocation3 + $0x168] sm:$0xff] %vm6772_vm1, %v6753_v40 }
 0x324   :  { %7367 = vst.msk [vmem:[#allocation5 + $0x30] sm:$0xff] %vm7363_vm12, %v7346_v33 }
 0x325   :  { %7436 = vst.msk [vmem:[#allocation5 + $0x30] sm:$0xff] %vm7428_vm13, %v7411_v19 }
 0x326   :  { %7637 = vst.msk [vmem:[#allocation5 + $0x38] sm:$0xff] %vm7633_vm10, %v7616_v17 }
 0x329   :  { %v6923_v39 = vld [vmem:[#allocation3 + $0x170] ss:$2 sm:$0xff]  ;;  %v6955_v18 = vld [vmem:[#allocation3 + $0x171] ss:$2 sm:$0xff] }
 0x32a   :  { %v6991_v20 = vmax.f32 %v6923_v39, %v6955_v18  ;;  %v6859_v21 = vld [vmem:[#allocation3 + $0x160] ss:$2 sm:$0xff]  ;;  %v6891_v3 = vld [vmem:[#allocation3 + $0x161] ss:$2 sm:$0xff] }
 0x32b   :  { %v6975_v22 = vmax.f32 %v6859_v21, %v6891_v3 }
 0x32c   :  { %v7648_v15 = vld [vmem:[#allocation5 + $0x30] sm:$0xff] }
 0x32d   :  { %v7649_v62 = vld [vmem:[#allocation5 + $0x38] sm:$0xff]  ;;  %v7007_v6 = vmax.f32 %v6975_v22, %v6991_v20 }
 0x32e   :  { %12427 = vmatprep.mubr.msk.bf16.mxu1 %vm7773_vm14, %v7649_v62 }
 0x32f   :  { %7859 = vmatmul.mubr.bf16.gmra.mrb[12].mxu1 %v7648_v15  ;;  %7075 = vst.msk [vmem:[#allocation4 + $0xe1] sm:$0xff] %vm6772_vm1, %v7007_v6 }
 0x336   :  { %v7383_v38 = vld [vmem:[#allocation4 + $0xe2] sm:$0xff] }
 0x337   :  { %v7253_v23 = vld [vmem:[#allocation4 + $0xe0] sm:$0xff]  ;;  %v7393_v24 = vpack.c.bf16 %v7383_v38, %v7188_v51 }
 0x338   :  { %v7263_v46 = vpack.c.bf16 %v7253_v23, %v7456_v61  ;;  %v7318_v25 = vld [vmem:[#allocation4 + $0xe1] sm:$0xff] }
 0x339   :  { %7414 = vrot.lane.b32.xlu1 %v7393_v24, %s13586_s25  ;;  %v7328_v8 = vpack.c.bf16 %v7318_v25, %v17756_v30 }
 0x33a   :  { %7284 = vrot.lane.b32.xlu0 %v7263_v46, %s13583_s13 }
 0x33b   :  { %v7153_v26 = vpop.permute.xlu0 %7152 }
 0x33c   :  { %7173 = vst.msk [vmem:[#allocation5 + $0x40] sm:$0xff] %vm7168_vm7, %v7153_v26 }
 0x33e   :  { %7349 = vrot.lane.b32.xlu0 %v7328_v8, %s13592_s19 }
 0x33f   :  { %v7218_v27 = vpop.permute.xlu0 %7217 }
 0x340   :  { %7238 = vst.msk [vmem:[#allocation5 + $0x40] sm:$0xff] %vm7233_vm9, %v7218_v27 }
 0x34f   :  { %v12948_v29 = vpop.f32.mrb[48].mxu0 }
 0x350   :  { %v6654_v31 = vadd.f32 %v17645_v55, %v12948_v29  ;;  %v6645_v34 = vpop.f32.mrb[49].mxu0 }
 0x351   :  { %v6646_v35 = vadd.f32 %v17645_v55, %v6645_v34  ;;  %v12949_v32 = vpop.f32.mrb[50].mxu0 }
 0x352   :  { %v6758_v36 = vmax.f32 %v6654_v31, 0.0  ;;  %v6657_v45 = vadd.f32 %v17645_v55, %v12949_v32  ;;  %v6648_v50 = vpop.f32.mrb[51].mxu0 }
 0x353   :  { %v6756_v41 = vmax.f32 %v6646_v35, 0.0  ;;  %v6649_v59 = vadd.f32 %v17645_v55, %v6648_v50 }
 0x354   :  { %6823 = vst.msk [vmem:[#allocation3 + $0x190] sm:$0xff] %vm6772_vm1, %v6758_v36  ;;  %v6759_v42 = vmax.f32 %v6657_v45, 0.0 }
 0x355   :  { %6821 = vst.msk [vmem:[#allocation3 + $0x180] sm:$0xff] %vm6772_vm1, %v6756_v41  ;;  %v6757_v52 = vmax.f32 %v6649_v59, 0.0 }
 0x356   :  { %6824 = vst.msk [vmem:[#allocation3 + $0x198] sm:$0xff] %vm6772_vm1, %v6759_v42 }
 0x357   :  { %6822 = vst.msk [vmem:[#allocation3 + $0x188] sm:$0xff] %vm6772_vm1, %v6757_v52 }
 0x35d   :  { %v6925_v48 = vld [vmem:[#allocation3 + $0x190] ss:$2 sm:$0xff]  ;;  %v6957_v54 = vld [vmem:[#allocation3 + $0x191] ss:$2 sm:$0xff] }
 0x35e   :  { %v6992_v7 = vmax.f32 %v6925_v48, %v6957_v54  ;;  %v6861_v56 = vld [vmem:[#allocation3 + $0x180] ss:$2 sm:$0xff]  ;;  %v6893_v16 = vld [vmem:[#allocation3 + $0x181] ss:$2 sm:$0xff] }
 0x35f   :  { %v6976_v60 = vmax.f32 %v6861_v56, %v6893_v16  ;;  %v7413_v51 = vpop.permute.xlu1 %7412 }
 0x360   :  { %v7283_v63 = vpop.permute.xlu0 %7282  ;;  %7439 = vst.msk [vmem:[#allocation5 + $0x48] sm:$0xff] %vm7430_vm5, %v7413_v51 }
 0x361   :  { %v7008_v10 = vmax.f32 %v6976_v60, %v6992_v7  ;;  %7303 = vst.msk [vmem:[#allocation5 + $0x40] sm:$0xff] %vm7298_vm11, %v7283_v63 }
 0x363   :  { %7076 = vst.msk [vmem:[#allocation4 + $0xf1] sm:$0xff] %vm6772_vm1, %v7008_v10 }
 0x364   :  { %v7348_v0 = vpop.permute.xlu0 %7347 }
 0x365   :  { %7368 = vst.msk [vmem:[#allocation5 + $0x40] sm:$0xff] %vm7363_vm12, %v7348_v0 }
 0x366   :  { %7438 = vst.msk [vmem:[#allocation5 + $0x40] sm:$0xff] %vm7428_vm13, %v7413_v51 }
 0x36a   :  { %v7458_v1 = vld [vmem:[#allocation4 + $0xf0] sm:$0xff] }
 0x36b   :  { %v7125_v61 = vld [vmem:[#allocation4 + $0xf1] sm:$0xff]  ;;  %v7468_v30 = vpack.c.bf16 %v7458_v1, %v7253_v23  ;;  %v12952_v13 = vpop.f32.mrb[52].mxu0 }
 0x36c   :  { %v7134_v37 = vpack.c.bf16 %v7125_v61, %v7318_v25  ;;  %v7190_v12 = vld [vmem:[#allocation4 + $0xf2] sm:$0xff]  ;;  %v6670_v33 = vadd.f32 %v17645_v55, %v12952_v13  ;;  %v6661_v43 = vpop.f32.mrb[53].mxu0 }
 0x36d   :  { %7489 = vrot.lane.b32.xlu1 %v7468_v30, %s13587_s23  ;;  %7110 = vst.msk [vmem:[#allocation5 + $0x60] sm:$0xff] %vm6772_vm1, %v7468_v30  ;;  %v7199_v19 = vpack.c.bf16 %v7190_v12, %v7383_v38  ;;  %v6662_v14 = vadd.f32 %v17645_v55, %v6661_v43  ;;  %v12953_v2 = vpop.f32.mrb[54].mxu0  ;;  %v7650_v59 = vld [vmem:[#allocation5 + $0x40] sm:$0xff] }
 0x36e   :  { %7156 = vrot.lane.b32.xlu0 %v7134_v37, %s13588_s27  ;;  %v6762_v4 = vmax.f32 %v6670_v33, 0.0  ;;  %v6673_v28 = vadd.f32 %v17645_v55, %v12953_v2  ;;  %v6664_v5 = vpop.f32.mrb[55].mxu0 }
 0x36f   :  { %v6760_v53 = vmax.f32 %v6662_v14, 0.0  ;;  %v6665_v47 = vadd.f32 %v17645_v55, %v6664_v5 }
 0x370   :  { %6827 = vst.msk [vmem:[#allocation3 + $0x1b0] sm:$0xff] %vm6772_vm1, %v6762_v4  ;;  %v6763_v49 = vmax.f32 %v6673_v28, 0.0 }
 0x371   :  { %7554 = vrot.lane.b32.xlu1 %v7134_v37, %s13589_s21  ;;  %6825 = vst.msk [vmem:[#allocation3 + $0x1a0] sm:$0xff] %vm6772_vm1, %v6760_v53  ;;  %v6761_v44 = vmax.f32 %v6665_v47, 0.0 }
 0x372   :  { %7221 = vrot.lane.b32.xlu0 %v7199_v19, %s13590_s17  ;;  %6828 = vst.msk [vmem:[#allocation3 + $0x1b8] sm:$0xff] %vm6772_vm1, %v6763_v49 }
 0x373   :  { %6826 = vst.msk [vmem:[#allocation3 + $0x1a8] sm:$0xff] %vm6772_vm1, %v6761_v44 }
 0x375   :  { %7619 = vrot.lane.b32.xlu1 %v7199_v19, %s13591_s3 }
 0x379   :  { %v6927_v11 = vld [vmem:[#allocation3 + $0x1b0] ss:$2 sm:$0xff]  ;;  %v6959_v57 = vld [vmem:[#allocation3 + $0x1b1] ss:$2 sm:$0xff] }
 0x37a   :  { %v6993_v40 = vmax.f32 %v6927_v11, %v6959_v57  ;;  %v6863_v17 = vld [vmem:[#allocation3 + $0x1a0] ss:$2 sm:$0xff]  ;;  %v6895_v39 = vld [vmem:[#allocation3 + $0x1a1] ss:$2 sm:$0xff] }
 0x37b   :  { %v6977_v18 = vmax.f32 %v6863_v17, %v6895_v39  ;;  %v17861_v57 = vld [vmem:[%s19056_s4] ss:$0 sm:$0xff] }
 0x37d   :  { %v7009_v62 = vmax.f32 %v6977_v18, %v6993_v40 }
 0x37f   :  { %7077 = vst.msk [vmem:[#allocation4 + $0x101] sm:$0xff] %vm6772_vm1, %v7009_v62 }
 0x383   :  { %v7488_v20 = vpop.permute.xlu1 %7487 }
 0x384   :  { %v7155_v21 = vpop.permute.xlu0 %7154  ;;  %7508 = vst.msk [vmem:[#allocation5 + $0x48] sm:$0xff] %vm7503_vm6, %v7488_v20 }
 0x385   :  { %7174 = vst.msk [vmem:[#allocation5 + $0x50] sm:$0xff] %vm7168_vm7, %v7155_v21 }
 0x386   :  { %v7385_v3 = vld [vmem:[#allocation4 + $0x102] sm:$0xff] }
 0x387   :  { %v7255_v15 = vld [vmem:[#allocation4 + $0x100] sm:$0xff]  ;;  %v7394_v22 = vpack.c.bf16 %v7385_v3, %v7190_v12  ;;  %v7553_v23 = vpop.permute.xlu1 %7552 }
 0x388   :  { %v7264_v6 = vpack.c.bf16 %v7255_v15, %v7458_v1  ;;  %v7320_v38 = vld [vmem:[#allocation4 + $0x101] sm:$0xff]  ;;  %v7220_v24 = vpop.permute.xlu0 %7219  ;;  %7573 = vst.msk [vmem:[#allocation5 + $0x48] sm:$0xff] %vm7568_vm8, %v7553_v23 }
 0x389   :  { %7416 = vrot.lane.b32.xlu1 %v7394_v22, %s13586_s25  ;;  %7239 = vst.msk [vmem:[#allocation5 + $0x50] sm:$0xff] %vm7233_vm9, %v7220_v24  ;;  %v7329_v46 = vpack.c.bf16 %v7320_v38, %v7125_v61 }
 0x38a   :  { %7286 = vrot.lane.b32.xlu0 %v7264_v6, %s13583_s13 }
 0x38b   :  { %v7618_v25 = vpop.permute.xlu1 %7617 }
 0x38c   :  { %7638 = vst.msk [vmem:[#allocation5 + $0x48] sm:$0xff] %vm7633_vm10, %v7618_v25 }
 0x38e   :  { %7351 = vrot.lane.b32.xlu0 %v7329_v46, %s13592_s19 }
 0x38f   :  { %v12956_v26 = vpop.f32.mrb[56].mxu0 }
 0x390   :  { %v6686_v8 = vadd.f32 %v17645_v55, %v12956_v26  ;;  %v6677_v27 = vpop.f32.mrb[57].mxu0  ;;  %v7462_v26 = vld [vmem:[#allocation4 + $0x130] sm:$0xff] }
 0x391   :  { %v6678_v29 = vadd.f32 %v17645_v55, %v6677_v27  ;;  %v12957_v31 = vpop.f32.mrb[58].mxu0 }
 0x392   :  { %v6766_v34 = vmax.f32 %v6686_v8, 0.0  ;;  %v6689_v35 = vadd.f32 %v17645_v55, %v12957_v31  ;;  %v6680_v32 = vpop.f32.mrb[59].mxu0 }
 0x393   :  { %v6764_v36 = vmax.f32 %v6678_v29, 0.0  ;;  %v6681_v45 = vadd.f32 %v17645_v55, %v6680_v32  ;;  %v7651_v50 = vld [vmem:[#allocation5 + $0x48] sm:$0xff]  ;;  %v7527_v32 = vld [vmem:[#allocation4 + $0x131] sm:$0xff] }
 0x394   :  { %6831 = vst.msk [vmem:[#allocation3 + $0x1d0] sm:$0xff] %vm6772_vm1, %v6766_v34  ;;  %v6767_v41 = vmax.f32 %v6689_v35, 0.0  ;;  %12428 = vmatprep.mubr.msk.bf16.mxu1 %vm7773_vm14, %v7651_v50 }
 0x395   :  { %6829 = vst.msk [vmem:[#allocation3 + $0x1c0] sm:$0xff] %vm6772_vm1, %v6764_v36  ;;  %v6765_v42 = vmax.f32 %v6681_v45, 0.0  ;;  %7867 = vmatmul.mubr.bf16.gmra.mrb[16].mxu1 %v7650_v59 }
 0x396   :  { %6832 = vst.msk [vmem:[#allocation3 + $0x1d8] sm:$0xff] %vm6772_vm1, %v6767_v41 }
 0x397   :  { %6830 = vst.msk [vmem:[#allocation3 + $0x1c8] sm:$0xff] %vm6772_vm1, %v6765_v42 }
 0x39d   :  { %v6929_v52 = vld [vmem:[#allocation3 + $0x1d0] ss:$2 sm:$0xff]  ;;  %v6961_v48 = vld [vmem:[#allocation3 + $0x1d1] ss:$2 sm:$0xff] }
 0x39e   :  { %v6994_v54 = vmax.f32 %v6929_v52, %v6961_v48  ;;  %v6865_v7 = vld [vmem:[#allocation3 + $0x1c0] ss:$2 sm:$0xff]  ;;  %v6897_v56 = vld [vmem:[#allocation3 + $0x1c1] ss:$2 sm:$0xff] }
 0x39f   :  { %v6978_v16 = vmax.f32 %v6865_v7, %v6897_v56 }
 0x3a1   :  { %v7010_v60 = vmax.f32 %v6978_v16, %v6994_v54  ;;  %v7592_v54 = vld [vmem:[#allocation4 + $0x132] sm:$0xff] }
 0x3a3   :  { %7078 = vst.msk [vmem:[#allocation4 + $0x111] sm:$0xff] %vm6772_vm1, %v7010_v60 }
 0x3aa   :  { %v7460_v10 = vld [vmem:[#allocation4 + $0x110] sm:$0xff] }
 0x3ab   :  { %v17837_v1 = vld [vmem:[#allocation4 + $0x111] sm:$0xff]  ;;  %v7469_v61 = vpack.c.bf16 %v7460_v10, %v7255_v15  ;;  %v7415_v12 = vpop.permute.xlu1 %7414 }
 0x3ac   :  { %v7135_v30 = vpack.c.bf16 %v17837_v1, %v7320_v38  ;;  %v7192_v37 = vld [vmem:[#allocation4 + $0x112] sm:$0xff]  ;;  %v7285_v51 = vpop.permute.xlu0 %7284  ;;  %7441 = vst.msk [vmem:[#allocation5 + $0x58] sm:$0xff] %vm7430_vm5, %v7415_v12 }
 0x3ad   :  { %7491 = vrot.lane.b32.xlu1 %v7469_v61, %s13587_s23  ;;  %7111 = vst.msk [vmem:[#allocation5 + $0x70] sm:$0xff] %vm6772_vm1, %v7469_v61  ;;  %v7200_v63 = vpack.c.bf16 %v7192_v37, %v7385_v3 }
 0x3ae   :  { %7158 = vrot.lane.b32.xlu0 %v7135_v30, %s13588_s27  ;;  %7304 = vst.msk [vmem:[#allocation5 + $0x50] sm:$0xff] %vm7298_vm11, %v7285_v51  ;;  %s13597_s27 = smov 80  }
 0x3b0   :  { %v7350_v0 = vpop.permute.xlu0 %7349 }
 0x3b1   :  { %v12960_v19 = vpop.f32.mrb[60].mxu0  ;;  %7556 = vrot.lane.b32.xlu1 %v7135_v30, %s13589_s21  ;;  %7369 = vst.msk [vmem:[#allocation5 + $0x50] sm:$0xff] %vm7363_vm12, %v7350_v0 }
 0x3b2   :  { %7223 = vrot.lane.b32.xlu0 %v7200_v63, %s13590_s17  ;;  %v6702_v13 = vadd.f32 %v17645_v55, %v12960_v19  ;;  %v6693_v33 = vpop.f32.mrb[61].mxu0  ;;  %7440 = vst.msk [vmem:[#allocation5 + $0x50] sm:$0xff] %vm7428_vm13, %v7415_v12 }
 0x3b3   :  { %v6694_v43 = vadd.f32 %v17645_v55, %v6693_v33  ;;  %v12961_v14 = vpop.f32.mrb[62].mxu0 }
 0x3b4   :  { %v6770_v2 = vmax.f32 %v6702_v13, 0.0  ;;  %v6705_v4 = vadd.f32 %v17645_v55, %v12961_v14  ;;  %v6696_v28 = vpop.f32.mrb[63].mxu0 }
 0x3b5   :  { %v6768_v5 = vmax.f32 %v6694_v43, 0.0  ;;  %v6697_v53 = vadd.f32 %v17645_v55, %v6696_v28  ;;  %7621 = vrot.lane.b32.xlu1 %v7200_v63, %s13591_s3 }
 0x3b6   :  { %6835 = vst.msk [vmem:[#allocation3 + $0x1f0] sm:$0xff] %vm6772_vm1, %v6770_v2  ;;  %v6771_v47 = vmax.f32 %v6705_v4, 0.0 }
 0x3b7   :  { %6833 = vst.msk [vmem:[#allocation3 + $0x1e0] sm:$0xff] %vm6772_vm1, %v6768_v5  ;;  %v6769_v49 = vmax.f32 %v6697_v53, 0.0 }
 0x3b8   :  { %6836 = vst.msk [vmem:[#allocation3 + $0x1f8] sm:$0xff] %vm6772_vm1, %v6771_v47 }
 0x3b9   :  { %6834 = vst.msk [vmem:[#allocation3 + $0x1e8] sm:$0xff] %vm6772_vm1, %v6769_v49 }
 0x3bf   :  { %v6931_v44 = vld [vmem:[#allocation3 + $0x1f0] ss:$2 sm:$0xff]  ;;  %v6963_v11 = vld [vmem:[#allocation3 + $0x1f1] ss:$2 sm:$0xff] }
 0x3c0   :  { %v6995_v55 = vmax.f32 %v6931_v44, %v6963_v11  ;;  %v6867_v40 = vld [vmem:[#allocation3 + $0x1e0] ss:$2 sm:$0xff]  ;;  %v6899_v17 = vld [vmem:[#allocation3 + $0x1e1] ss:$2 sm:$0xff] }
 0x3c1   :  { %v6979_v39 = vmax.f32 %v6867_v40, %v6899_v17 }
 0x3c3   :  { %v7011_v21 = vmax.f32 %v6979_v39, %v6995_v55 }
 0x3c5   :  { %7079 = vst.msk [vmem:[#allocation4 + $0x121] sm:$0xff] %vm6772_vm1, %v7011_v21  ;;  %vm8100_vm1 = vcmask 385024  }
 0x3cc   :  { %v7387_v23 = vld [vmem:[#allocation4 + $0x122] sm:$0xff] }
 0x3cd   :  { %v7257_v24 = vld [vmem:[#allocation4 + $0x120] sm:$0xff]  ;;  %v7395_v46 = vpack.c.bf16 %v7387_v23, %v7192_v37  ;;  %v7600_v16 = vpack.c.bf16 %v7592_v54, %v7387_v23  ;;  %v7652_v37 = vld [vmem:[#allocation5 + $0x50] sm:$0xff] }
 0x3ce   :  { %v7265_v25 = vpack.c.bf16 %v7257_v24, %v7460_v10  ;;  %v7322_v8 = vld [vmem:[#allocation4 + $0x121] sm:$0xff]  ;;  %v7470_v29 = vpack.c.bf16 %v7462_v26, %v7257_v24 }
 0x3cf   :  { %7418 = vrot.lane.b32.xlu1 %v7395_v46, %s13586_s25  ;;  %v7330_v31 = vpack.c.bf16 %v7322_v8, %v17837_v1  ;;  %v7535_v52 = vpack.c.bf16 %v7527_v32, %v7322_v8  ;;  %v13593_v8 = vmov 1966171168  }
 0x3d0   :  { %v7836_v18 = vpop.f32.mrb[0].mxu1  ;;  %7288 = vrot.lane.b32.xlu0 %v7265_v25, %s13583_s13 }
 0x3d1   :  { %v7837_v62 = vadd.f32 %v17861_v57, %v7836_v18  ;;  %v7838_v20 = vpop.f32.mrb[1].mxu1 }
 0x3d2   :  { %v7839_v3 = vpop.f32.mrb[2].mxu1 }
 0x3d3   :  { %v7899_v15 = vmax.f32 %v7837_v62, 0.0  ;;  %v7840_v22 = vadd.f32 %v17861_v57, %v7839_v3  ;;  %v7841_v6 = vpop.f32.mrb[3].mxu1  ;;  %7493 = vrot.lane.b32.xlu1 %v7470_v29, %s13587_s23  ;;  %v8026_v29 = vlaneseq }
 0x3d4   :  { %7353 = vrot.lane.b32.xlu0 %v7330_v31, %s13592_s19 }
 0x3d5   :  { %7916 = vst.msk [vmem:[#allocation6] sm:$0xff] %vm7915_vm15, %v7899_v15  ;;  %v7900_v38 = vmax.f32 %v7840_v22, 0.0  ;;  %v17911_v32 = vshrl.u32 %v8026_v29, 7 }
 0x3d7   :  { %7917 = vst.msk [vmem:[#allocation6 + $0x8] sm:$0xff] %vm7915_vm15, %v7900_v38  ;;  %7558 = vrot.lane.b32.xlu1 %v7535_v52, %s13589_s21 }
 0x3db   :  { %7623 = vrot.lane.b32.xlu1 %v7600_v16, %s13591_s3 }
 0x3dc   :  { %v7932_v46 = vld [vmem:[#allocation6] ss:$2 sm:$0xf]  ;;  %v7948_v25 = vld [vmem:[#allocation6 + $0x1] ss:$2 sm:$0xf] }
 0x3dd   :  { %v7995_v31 = vmax.f32 %v7932_v46, %v7948_v25 }
 0x3de   :  { %v7964_v23 = vld [vmem:[#allocation6 + $0x8] ss:$2 sm:$0xf]  ;;  %v7980_v24 = vld [vmem:[#allocation6 + $0x9] ss:$2 sm:$0xf] }
 0x3df   :  { %v7490_v36 = vpop.permute.xlu1 %7489  ;;  %v8003_v26 = vmax.f32 %v7964_v23, %v7980_v24 }
 0x3e0   :  { %v7844_v27 = vpop.f32.mrb[4].mxu1  ;;  %7509 = vst.msk [vmem:[#allocation5 + $0x58] sm:$0xff] %vm7503_vm6, %v7490_v36  ;;  %v7157_v50 = vpop.permute.xlu0 %7156 }
 0x3e1   :  { %v7845_v34 = vadd.f32 %v17861_v57, %v7844_v27  ;;  %v7846_v35 = vpop.f32.mrb[5].mxu1  ;;  %7175 = vst.msk [vmem:[#allocation5 + $0x60] sm:$0xff] %vm7168_vm7, %v7157_v50  ;;  %v8024_v27 = vunpack.c.l.s4 %v13593_v8 }
 0x3e2   :  { %v7847_v45 = vpop.f32.mrb[6].mxu1 }
 0x3e3   :  { %v7901_v41 = vmax.f32 %v7845_v34, 0.0  ;;  %v7848_v59 = vadd.f32 %v17861_v57, %v7847_v45  ;;  %v7849_v42 = vpop.f32.mrb[7].mxu1  ;;  %v7555_v7 = vpop.permute.xlu1 %7554  ;;  %v8011_v34 = vmax.f32 %v7995_v31, %v8003_v26  ;;  %v8025_v35 = vunpack.c.0.s8 %v8024_v27 }
 0x3e4   :  { %7574 = vst.msk [vmem:[#allocation5 + $0x58] sm:$0xff] %vm7568_vm8, %v7555_v7  ;;  %v7222_v56 = vpop.permute.xlu0 %7221 }
 0x3e5   :  { %7918 = vst.msk [vmem:[#allocation6 + $0x10] sm:$0xff] %vm7915_vm15, %v7901_v41  ;;  %v7902_v48 = vmax.f32 %v7848_v59, 0.0  ;;  %v17916_v54 = vsub.s32 %v8025_v35, %v17911_v32 }
 0x3e6   :  { %7240 = vst.msk [vmem:[#allocation5 + $0x60] sm:$0xff] %vm7233_vm9, %v7222_v56  ;;  %v13594_v56 = vmov 1935823168  }
 0x3e7   :  { %7919 = vst.msk [vmem:[#allocation6 + $0x18] sm:$0xff] %vm7915_vm15, %v7902_v48  ;;  %v7620_v60 = vpop.permute.xlu1 %7619  ;;  %v8019_v48 = vpack.c.bf16 %v8011_v34, %v8011_v34  ;;  %v8052_v16 = vunpack.c.l.s4 %v13594_v56 }
 0x3e8   :  { %7639 = vst.msk [vmem:[#allocation5 + $0x58] sm:$0xff] %vm7633_vm10, %v7620_v60 }
 0x3e9   :  { %v8029_v60 = vrot.slane %v8019_v48, %v17916_v54 }
 0x3ef   :  { %v7653_v1 = vld [vmem:[#allocation5 + $0x58] sm:$0xff] }
 0x3f0   :  { %v7852_v10 = vpop.f32.mrb[8].mxu1  ;;  %12429 = vmatprep.mubr.msk.bf16.mxu1 %vm7773_vm14, %v7653_v1  ;;  %v8124_v1 = vcombine.high %v8029_v60, %v8029_v60 }
 0x3f1   :  { %v7853_v61 = vadd.f32 %v17861_v57, %v7852_v10  ;;  %v7854_v30 = vpop.f32.mrb[9].mxu1  ;;  %7875 = vmatmul.mubr.bf16.gmra.mrb[20].mxu1 %v7652_v37  ;;  %v8053_v10 = vunpack.c.0.s8 %v8052_v16  ;;  %v8036_v37 = vrot.slane %v8029_v60, %v17916_v54 }
 0x3f2   :  { %v7855_v12 = vpop.f32.mrb[10].mxu1 }
 0x3f3   :  { %v7903_v51 = vmax.f32 %v7853_v61, 0.0  ;;  %v7856_v63 = vadd.f32 %v17861_v57, %v7855_v12  ;;  %v7857_v19 = vpop.f32.mrb[11].mxu1  ;;  %v17923_v12 = vsub.s32 %v8053_v10, %v17911_v32 }
 0x3f5   :  { %7920 = vst.msk [vmem:[#allocation6 + $0x20] sm:$0xff] %vm7915_vm15, %v7903_v51  ;;  %v7904_v0 = vmax.f32 %v7856_v63, 0.0 }
 0x3f7   :  { %7921 = vst.msk [vmem:[#allocation6 + $0x28] sm:$0xff] %vm7915_vm15, %v7904_v0 }
 0x3fb   :  { %v7417_v13 = vpop.permute.xlu1 %7416 }
 0x3fc   :  { %v7287_v33 = vpop.permute.xlu0 %7286  ;;  %7443 = vst.msk [vmem:[#allocation5 + $0x68] sm:$0xff] %vm7430_vm5, %v7417_v13 }
 0x3fd   :  { %7305 = vst.msk [vmem:[#allocation5 + $0x60] sm:$0xff] %vm7298_vm11, %v7287_v33 }
 0x400   :  { %v7352_v43 = vpop.permute.xlu0 %7351 }
 0x401   :  { %7370 = vst.msk [vmem:[#allocation5 + $0x60] sm:$0xff] %vm7363_vm12, %v7352_v43  ;;  %v8057_v43 = vrot.slane %v8036_v37, %v17923_v12 }
 0x402   :  { %7442 = vst.msk [vmem:[#allocation5 + $0x60] sm:$0xff] %vm7428_vm13, %v7417_v13  ;;  %v7860_v14 = vpop.f32.mrb[12].mxu1  ;;  %v8131_v13 = vrot.slane %v8124_v1, %v17916_v54 }
 0x403   :  { %v7861_v2 = vadd.f32 %v17861_v57, %v7860_v14  ;;  %v7862_v4 = vpop.f32.mrb[13].mxu1 }
 0x404   :  { %v7863_v28 = vpop.f32.mrb[14].mxu1 }
 0x405   :  { %v7905_v5 = vmax.f32 %v7861_v2, 0.0  ;;  %v7864_v53 = vadd.f32 %v17861_v57, %v7863_v28  ;;  %v7865_v47 = vpop.f32.mrb[15].mxu1  ;;  %v8146_v2 = vrot.slane %v8131_v13, %v17923_v12  ;;  %v8064_v28 = vrot.slane %v8057_v43, %v17923_v12 }
 0x407   :  { %7922 = vst.msk [vmem:[#allocation6 + $0x30] sm:$0xff] %vm7915_vm15, %v7905_v5  ;;  %v7906_v49 = vmax.f32 %v7864_v53, 0.0  ;;  %v8153_v47 = vrot.slane %v8146_v2, %v17923_v12 }
 0x409   :  { %7923 = vst.msk [vmem:[#allocation6 + $0x38] sm:$0xff] %vm7915_vm15, %v7906_v49  ;;  %v7654_v18 = vld [vmem:[#allocation5 + $0x60] sm:$0xff] }
 0x41f   :  { %v7492_v44 = vpop.permute.xlu1 %7491 }
 0x420   :  { %v7159_v11 = vpop.permute.xlu0 %7158  ;;  %7510 = vst.msk [vmem:[#allocation5 + $0x68] sm:$0xff] %vm7503_vm6, %v7492_v44  ;;  %v8079_v44 = vunpack.c.l.b16 %v8064_v28 }
 0x421   :  { %7176 = vst.msk [vmem:[#allocation5 + $0x70] sm:$0xff] %vm7168_vm7, %v7159_v11  ;;  %vm8217_vm7 = vcmask 516224  }
 0x423   :  { %v7557_v55 = vpop.permute.xlu1 %7556 }
 0x424   :  { %v7224_v40 = vpop.permute.xlu0 %7223  ;;  %7575 = vst.msk [vmem:[#allocation5 + $0x68] sm:$0xff] %vm7568_vm8, %v7557_v55 }
 0x425   :  { %7241 = vst.msk [vmem:[#allocation5 + $0x70] sm:$0xff] %vm7233_vm9, %v7224_v40  ;;  %vm8327_vm9 = vcmask 254977  }
 0x427   :  { %v7622_v17 = vpop.permute.xlu1 %7621 }
 0x428   :  { %7640 = vst.msk [vmem:[#allocation5 + $0x68] sm:$0xff] %vm7633_vm10, %v7622_v17  ;;  %v8168_v17 = vunpack.c.l.b16 %v8153_v47 }
 0x42f   :  { %v7655_v39 = vld [vmem:[#allocation5 + $0x68] sm:$0xff] }
 0x430   :  { %12430 = vmatprep.mubr.msk.bf16.mxu1 %vm7773_vm14, %v7655_v39 }
 0x431   :  { %7883 = vmatmul.mubr.bf16.gmra.mrb[24].mxu1 %v7654_v18  ;;  %v8102_v18 = vrot.slane %v8079_v44, 1 }
 0x441   :  { %v7419_v62 = vpop.permute.xlu1 %7418 }
 0x442   :  { %v7289_v20 = vpop.permute.xlu0 %7288  ;;  %7445 = vst.msk [vmem:[#allocation5 + $0x78] sm:$0xff] %vm7430_vm5, %v7419_v62  ;;  %vm8190_vm5 = vcmask 785408  }
 0x443   :  { %7306 = vst.msk [vmem:[#allocation5 + $0x70] sm:$0xff] %vm7298_vm11, %v7289_v20  ;;  %vm8301_vm11 = vcmask 909824  }
 0x445   :  { %v7494_v21 = vpop.permute.xlu1 %7493 }
 0x446   :  { %v7354_v3 = vpop.permute.xlu0 %7353  ;;  %7511 = vst.msk [vmem:[#allocation5 + $0x78] sm:$0xff] %vm7503_vm6, %v7494_v21  ;;  %vm18003_vm6 = vmor %vm8194_vm2, %vm8193_vm4 }
 0x447   :  { %7371 = vst.msk [vmem:[#allocation5 + $0x70] sm:$0xff] %vm7363_vm12, %v7354_v3  ;;  %v8197_v3 = vrot.slane %v8168_v17, 1 }
 0x448   :  { %7444 = vst.msk [vmem:[#allocation5 + $0x70] sm:$0xff] %vm7428_vm13, %v7419_v62  ;;  %vm8396_vm13 = vcmask 647424  }
 0x449   :  { %v7559_v15 = vpop.permute.xlu1 %7558 }
 0x44a   :  { %7576 = vst.msk [vmem:[#allocation5 + $0x78] sm:$0xff] %vm7568_vm8, %v7559_v15  ;;  %vm8326_vm8 = vcmask 1041280  }
 0x44b   :  { %vm18183_vm12 = vmor %vm8327_vm9, %vm8326_vm8 }
 0x44d   :  { %v7624_v22 = vpop.permute.xlu1 %7623 }
 0x44e   :  { %7641 = vst.msk [vmem:[#allocation5 + $0x78] sm:$0xff] %vm7633_vm10, %v7624_v22  ;;  %vm8323_vm10 = vcmask 916480  }
 0x44f   :  { %v7656_v38 = vld [vmem:[#allocation5 + $0x70] sm:$0xff] }
 0x455   :  { %v7657_v6 = vld [vmem:[#allocation5 + $0x78] sm:$0xff] }
 0x456   :  { %12431 = vmatprep.mubr.msk.bf16.mxu1 %vm7773_vm14, %v7657_v6  ;;  %vm8418_vm14 = vcmask 1041024  }
 0x457   :  { %7891 = vmatmul.mubr.bf16.gmra.mrb[28].mxu1 %v7656_v38 }
 0x468   :  { %v7868_v36 = vpop.f32.mrb[16].mxu1 }
 0x469   :  { %v7869_v45 = vadd.f32 %v17861_v57, %v7868_v36  ;;  %v7870_v50 = vpop.f32.mrb[17].mxu1 }
 0x46a   :  { %v7871_v41 = vpop.f32.mrb[18].mxu1  ;;  %v7966_v50 = vld [vmem:[#allocation6 + $0x18] ss:$2 sm:$0xf] }
 0x46b   :  { %v7907_v59 = vmax.f32 %v7869_v45, 0.0  ;;  %v7872_v42 = vadd.f32 %v17861_v57, %v7871_v41  ;;  %v7873_v52 = vpop.f32.mrb[19].mxu1  ;;  %v7982_v41 = vld [vmem:[#allocation6 + $0x19] ss:$2 sm:$0xf] }
 0x46c   :  { %v8004_v52 = vmax.f32 %v7966_v50, %v7982_v41  ;;  %v13164_v50 = vld [vmem:[%s19057_s5] ss:$12 sps:$4 sm:$0xff]   ;;  %v13166_v41 = vld [vmem:[%s19057_s5 + $0x4] ss:$12 sps:$4 sm:$0xff]  }
 0x46d   :  { %7924 = vst.msk [vmem:[#allocation6 + $0x40] sm:$0xff] %vm7915_vm15, %v7907_v59  ;;  %v7908_v7 = vmax.f32 %v7872_v42, 0.0  ;;  %v7934_v59 = vld [vmem:[#allocation6 + $0x10] ss:$2 sm:$0xf]  ;;  %9838 = vmatprep.subr.bf16.mxu1 %v13166_v41 }
 0x46e   :  { %v7950_v42 = vld [vmem:[#allocation6 + $0x11] ss:$2 sm:$0xf]  ;;  %9839 = vmatpush1.bf16.msra.mxu1 %v13164_v50 }
 0x46f   :  { %7925 = vst.msk [vmem:[#allocation6 + $0x48] sm:$0xff] %vm7915_vm15, %v7908_v7  ;;  %v7996_v48 = vmax.f32 %v7934_v59, %v7950_v42  ;;  %v13169_v59 = vld [vmem:[%s19057_s5 + $0x1c] ss:$12 sps:$4 sm:$0xff]  }
 0x470   :  { %9840 = vmatprep.subr.bf16.mxu1 %v13169_v59  ;;  %v13173_v41 = vld [vmem:[%s19057_s5 + $0x48] ss:$12 sps:$4 sm:$0xff]   ;;  %v13175_v59 = vld [vmem:[%s19057_s5 + $0x4c] ss:$12 sps:$4 sm:$0xff]  }
 0x471   :  { %v8012_v60 = vmax.f32 %v7996_v48, %v8004_v52 }
 0x474   :  { %v7940_v61 = vld [vmem:[#allocation6 + $0x40] ss:$2 sm:$0xf]  ;;  %v7956_v30 = vld [vmem:[#allocation6 + $0x41] ss:$2 sm:$0xf] }
 0x475   :  { %v7999_v19 = vmax.f32 %v7940_v61, %v7956_v30 }
 0x476   :  { %v7972_v51 = vld [vmem:[#allocation6 + $0x48] ss:$2 sm:$0xf]  ;;  %v7988_v63 = vld [vmem:[#allocation6 + $0x49] ss:$2 sm:$0xf] }
 0x477   :  { %v8007_v0 = vmax.f32 %v7972_v51, %v7988_v63  ;;  %v8219_v51 = vpack.c.bf16 %v8012_v60, %v8012_v60 }
 0x479   :  { %v8015_v33 = vmax.f32 %v7999_v19, %v8007_v0  ;;  %v8229_v63 = vrot.slane %v8219_v51, %v17916_v54 }
 0x47b   :  { %v8020_v14 = vpack.c.bf16 %v8015_v33, %v8015_v33  ;;  %v8236_v13 = vrot.slane %v8229_v63, %v17916_v54 }
 0x47d   :  { %v8043_v4 = vrot.slane %v8020_v14, %v17916_v54 }
 0x47f   :  { %v8050_v5 = vrot.slane %v8043_v4, %v17916_v54  ;;  %v8132_v53 = vcombine.high %v8043_v4, %v8043_v4  ;;  %v8330_v4 = vcombine.high %v8229_v63, %v8229_v63 }
 0x481   :  { %v8071_v49 = vrot.slane %v8050_v5, %v17923_v12  ;;  %v8139_v11 = vrot.slane %v8132_v53, %v17916_v54  ;;  %v8257_v5 = vrot.slane %v8236_v13, %v17923_v12  ;;  %v8337_v47 = vrot.slane %v8330_v4, %v17916_v54 }
 0x483   :  { %v8078_v55 = vrot.slane %v8071_v49, %v17923_v12  ;;  %v8160_v40 = vrot.slane %v8139_v11, %v17923_v12 }
 0x485   :  { %v8080_v39 = vunpack.c.l.b16 %v8078_v55  ;;  %v8167_v62 = vrot.slane %v8160_v40, %v17923_v12  ;;  %v8352_v40 = vrot.slane %v8337_v47, %v17923_v12 }
 0x487   :  { %v8103_v20 = vsel %vm8082_vm0, %v8080_v39, %v8102_v18  ;;  %v8169_v21 = vunpack.c.l.b16 %v8167_v62  ;;  %v8081_v46 = vrot.slane %v8080_v39, 7 }
 0x488   :  { %v8104_v15 = vpack.c.b16 %v8103_v20, %v8103_v20  ;;  %v8359_v20 = vrot.slane %v8352_v40, %v17923_v12 }
 0x489   :  { %v8198_v22 = vsel %vm8082_vm0, %v8169_v21, %v8197_v3  ;;  %v8170_v6 = vrot.slane %v8169_v21, 7  ;;  %v8083_v27 = vsel %vm8082_vm0, %v8081_v46, %v8079_v44  ;;  %v8264_v44 = vrot.slane %v8257_v5, %v17923_v12 }
 0x48a   :  { %v8111_v38 = vrot.slane %v8104_v15, %v17916_v54  ;;  %v8199_v23 = vpack.c.b16 %v8198_v22, %v8198_v22  ;;  %v8084_v29 = vpack.c.b16 %v8083_v27, %v8083_v27 }
 0x48b   :  { %v8171_v24 = vsel %vm8082_vm0, %v8170_v6, %v8168_v17  ;;  %v8279_v39 = vunpack.c.l.b16 %v8264_v44 }
 0x48c   :  { %v8118_v25 = vrot.slane %v8111_v38, %v17916_v54  ;;  %v8206_v26 = vrot.slane %v8199_v23, %v17916_v54  ;;  %v8172_v8 = vpack.c.b16 %v8171_v24, %v8171_v24  ;;  %v8091_v35 = vrot.slane %v8084_v29, %v17916_v54 }
 0x48d   :  { %v8303_v15 = vrot.slane %v8279_v39, 1  ;;  %v8374_v23 = vunpack.c.l.b16 %v8359_v20 }
 0x48e   :  { %8119 = vrot.lane.b32.xlu0 %v8118_v25, %s13590_s17  ;;  %v8213_v31 = vrot.slane %v8206_v26, %v17916_v54  ;;  %v8179_v34 = vrot.slane %v8172_v8, %v17916_v54  ;;  %v8098_v36 = vrot.slane %v8091_v35, %v17916_v54 }
 0x490   :  { %v8186_v45 = vrot.slane %v8179_v34, %v17916_v54  ;;  %8101 = vst.msk [vmem:[#allocation7] sm:$0x1] %vm8100_vm1, %v8098_v36 }
 0x492   :  { %8214 = vrot.lane.b32.xlu0 %v8213_v31, %s13587_s23  ;;  %v8398_v31 = vrot.slane %v8374_v23, 1 }
 0x496   :  { %8187 = vrot.lane.b32.xlu0 %v8186_v45, %s13592_s19 }
 0x4c4   :  { %v7876_v7 = vpop.f32.mrb[20].mxu1 }
 0x4c5   :  { %v7877_v56 = vadd.f32 %v17861_v57, %v7876_v7  ;;  %v7878_v16 = vpop.f32.mrb[21].mxu1  ;;  %v13167_v7 = vld [vmem:[%s19057_s5 + $0x18] ss:$12 sps:$4 sm:$0xff]  }
 0x4c6   :  { %v7879_v10 = vpop.f32.mrb[22].mxu1  ;;  %9841 = vmatpush1.bf16.msra.mxu1 %v13167_v7 }
 0x4c7   :  { %v7909_v1 = vmax.f32 %v7877_v56, 0.0  ;;  %v7880_v61 = vadd.f32 %v17861_v57, %v7879_v10  ;;  %v7881_v30 = vpop.f32.mrb[23].mxu1  ;;  %v7968_v10 = vld [vmem:[#allocation6 + $0x28] ss:$2 sm:$0xf] }
 0x4c8   :  { %v7952_v30 = vld [vmem:[#allocation6 + $0x21] ss:$2 sm:$0xf] }
 0x4c9   :  { %7926 = vst.msk [vmem:[#allocation6 + $0x50] sm:$0xff] %vm7915_vm15, %v7909_v1  ;;  %v7910_v37 = vmax.f32 %v7880_v61, 0.0  ;;  %v7984_v1 = vld [vmem:[#allocation6 + $0x29] ss:$2 sm:$0xf] }
 0x4ca   :  { %v7936_v61 = vld [vmem:[#allocation6 + $0x20] ss:$2 sm:$0xf] }
 0x4cb   :  { %7927 = vst.msk [vmem:[#allocation6 + $0x58] sm:$0xff] %vm7915_vm15, %v7910_v37  ;;  %v8005_v37 = vmax.f32 %v7968_v10, %v7984_v1  ;;  %v7997_v63 = vmax.f32 %v7936_v61, %v7952_v30  ;;  %v7970_v1 = vld [vmem:[#allocation6 + $0x38] ss:$2 sm:$0xf] }
 0x4cc   :  { %v7986_v61 = vld [vmem:[#allocation6 + $0x39] ss:$2 sm:$0xf] }
 0x4d0   :  { %v7942_v19 = vld [vmem:[#allocation6 + $0x50] ss:$2 sm:$0xf]  ;;  %v7958_v0 = vld [vmem:[#allocation6 + $0x51] ss:$2 sm:$0xf] }
 0x4d1   :  { %v8000_v14 = vmax.f32 %v7942_v19, %v7958_v0  ;;  %v8013_v19 = vmax.f32 %v7997_v63, %v8005_v37 }
 0x4d2   :  { %v7974_v33 = vld [vmem:[#allocation6 + $0x58] ss:$2 sm:$0xf]  ;;  %v7990_v43 = vld [vmem:[#allocation6 + $0x59] ss:$2 sm:$0xf] }
 0x4d3   :  { %v8008_v2 = vmax.f32 %v7974_v33, %v7990_v43  ;;  %v8420_v5 = vpack.c.bf16 %v8013_v19, %v8013_v19 }
 0x4d5   :  { %v8016_v28 = vmax.f32 %v8000_v14, %v8008_v2 }
 0x4d7   :  { %v8220_v53 = vpack.c.bf16 %v8016_v28, %v8016_v28 }
 0x4d9   :  { %v8243_v49 = vrot.slane %v8220_v53, %v17916_v54 }
 0x4db   :  { %v8250_v11 = vrot.slane %v8243_v49, %v17916_v54  ;;  %v8338_v55 = vcombine.high %v8243_v49, %v8243_v49 }
 0x4dd   :  { %v8271_v17 = vrot.slane %v8250_v11, %v17923_v12  ;;  %v8345_v18 = vrot.slane %v8338_v55, %v17916_v54  ;;  %v8430_v55 = vrot.slane %v8420_v5, %v17916_v54 }
 0x4df   :  { %v8278_v62 = vrot.slane %v8271_v17, %v17923_v12  ;;  %v8366_v21 = vrot.slane %v8345_v18, %v17923_v12  ;;  %v8522_v40 = vcombine.high %v8430_v55, %v8430_v55  ;;  %v8437_v18 = vrot.slane %v8430_v55, %v17916_v54 }
 0x4e1   :  { %v8280_v3 = vunpack.c.l.b16 %v8278_v62  ;;  %v8373_v22 = vrot.slane %v8366_v21, %v17923_v12 }
 0x4e3   :  { %v8304_v6 = vsel %vm8082_vm0, %v8280_v3, %v8303_v15  ;;  %v8281_v38 = vrot.slane %v8280_v3, 7  ;;  %v8375_v24 = vunpack.c.l.b16 %v8373_v22  ;;  %v8529_v15 = vrot.slane %v8522_v40, %v17916_v54  ;;  %v13181_v40 = vld [vmem:[%s19057_s5 + $0x7c] ss:$12 sps:$4 sm:$0xff]  }
 0x4e4   :  { %v8305_v46 = vpack.c.b16 %v8304_v6, %v8304_v6  ;;  %v8458_v6 = vrot.slane %v8437_v18, %v17923_v12 }
 0x4e5   :  { %v8282_v25 = vsel %vm8082_vm0, %v8281_v38, %v8279_v39  ;;  %v8376_v26 = vrot.slane %v8375_v24, 7  ;;  %v8399_v45 = vsel %vm8082_vm0, %v8375_v24, %v8398_v31 }
 0x4e6   :  { %v8312_v8 = vrot.slane %v8305_v46, %v17916_v54  ;;  %v8283_v27 = vpack.c.b16 %v8282_v25, %v8282_v25  ;;  %v8400_v48 = vpack.c.b16 %v8399_v45, %v8399_v45  ;;  %v8465_v46 = vrot.slane %v8458_v6, %v17923_v12 }
 0x4e7   :  { %v8377_v29 = vsel %vm8082_vm0, %v8376_v26, %v8374_v23  ;;  %v8544_v23 = vrot.slane %v8529_v15, %v17923_v12  ;;  %v13188_v15 = vld [vmem:[%s19057_s5 + $0xc8] ss:$12 sps:$4 sm:$0xff]  }
 0x4e8   :  { %v8319_v34 = vrot.slane %v8312_v8, %v17916_v54  ;;  %v8290_v35 = vrot.slane %v8283_v27, %v17916_v54  ;;  %v8378_v36 = vpack.c.b16 %v8377_v29, %v8377_v29  ;;  %v8407_v16 = vrot.slane %v8400_v48, %v17916_v54  ;;  %12758 = vmatprep.subr.bf16.mxu0 %v13188_v15 }
 0x4e9   :  { %v8551_v8 = vrot.slane %v8544_v23, %v17923_v12  ;;  %v8480_v29 = vunpack.c.l.b16 %v8465_v46  ;;  %v13184_v23 = vld [vmem:[%s19057_s5 + $0x94] ss:$12 sps:$4 sm:$0xff]  }
 0x4ea   :  { %8320 = vrot.lane.b32.xlu0 %v8319_v34, %s13595_s24  ;;  %v8297_v42 = vrot.slane %v8290_v35, %v17916_v54  ;;  %v8385_v52 = vrot.slane %v8378_v36, %v17916_v54  ;;  %v8414_v60 = vrot.slane %v8407_v16, %v17916_v54  ;;  %v13170_v34 = vld [vmem:[%s19057_s5 + $0x30] ss:$12 sps:$4 sm:$0xff]   ;;  %v13172_v35 = vld [vmem:[%s19057_s5 + $0x34] ss:$12 sps:$4 sm:$0xff]  }
 0x4eb   :  { %v8566_v50 = vunpack.c.l.b16 %v8551_v8  ;;  %9842 = vmatprep.subr.bf16.mxu1 %v13172_v35  ;;  %v13192_v35 = vld [vmem:[%s19057_s5 + $0xc4] ss:$12 sps:$4 sm:$0xff]  }
 0x4ec   :  { %v8392_v56 = vrot.slane %v8385_v52, %v17916_v54  ;;  %9843 = vmatpush1.bf16.msra.mxu1 %v13170_v34  ;;  %v8501_v52 = vrot.slane %v8480_v29, 1  ;;  %v13185_v34 = vld [vmem:[%s19057_s5 + $0xa8] ss:$12 sps:$4 sm:$0xff]  }
 0x4ed   :  { %9844 = vmatprep.subr.bf16.mxu1 %v13175_v59  ;;  %v8591_v16 = vrot.slane %v8566_v50, 1 }
 0x4ee   :  { %8298 = vrot.lane.b32.xlu0 %v8297_v42, %s13591_s3 }
 0x4f0   :  { %9845 = vmatpush1.bf16.msra.mxu1 %v13173_v41  ;;  %v13190_v41 = vld [vmem:[%s19057_s5 + $0xc0] ss:$12 sps:$4 sm:$0xff]  }
 0x4f2   :  { %8393 = vrot.lane.b32.xlu0 %v8392_v56, %s13596_s30 }
 0x4f6   :  { %8415 = vrot.lane.b32.xlu0 %v8414_v60, %s13597_s27 }
 0x500   :  { %v8120_v51 = vpop.permute.xlu0 %8119 }
 0x501   :  { %8123 = vst.msk [vmem:[#allocation7] sm:$0x1] %vm8122_vm3, %v8120_v51 }
 0x504   :  { %v7884_v0 = vpop.f32.mrb[24].mxu1  ;;  %v8215_v13 = vpop.permute.xlu0 %8214 }
 0x505   :  { %v7885_v33 = vadd.f32 %v17861_v57, %v7884_v0  ;;  %v7886_v43 = vpop.f32.mrb[25].mxu1  ;;  %v7938_v0 = vld [vmem:[#allocation6 + $0x30] ss:$2 sm:$0xf] }
 0x506   :  { %v7887_v14 = vpop.f32.mrb[26].mxu1 }
 0x507   :  { %v7911_v2 = vmax.f32 %v7885_v33, 0.0  ;;  %v7888_v4 = vadd.f32 %v17861_v57, %v7887_v14  ;;  %v7889_v28 = vpop.f32.mrb[27].mxu1  ;;  %v8006_v14 = vmax.f32 %v7970_v1, %v7986_v61 }
 0x508   :  { %v8188_v53 = vpop.permute.xlu0 %8187 }
 0x509   :  { %7928 = vst.msk [vmem:[#allocation6 + $0x60] sm:$0xff] %vm7915_vm15, %v7911_v2  ;;  %v7912_v47 = vmax.f32 %v7888_v4, 0.0  ;;  %v8189_v44 = vrot.slane %v8188_v53, 7 }
 0x50b   :  { %7929 = vst.msk [vmem:[#allocation6 + $0x68] sm:$0xff] %vm7915_vm15, %v7912_v47  ;;  %v8191_v11 = vsel %vm8190_vm5, %v8189_v44, %v8188_v53  ;;  %v13176_v47 = vld [vmem:[%s19057_s5 + $0x60] ss:$12 sps:$4 sm:$0xff]   ;;  %v13178_v44 = vld [vmem:[%s19057_s5 + $0x64] ss:$12 sps:$4 sm:$0xff]  }
 0x50c   :  { %8196 = vst.msk [vmem:[#allocation7] sm:$0x3] %vm18003_vm6, %v8191_v11  ;;  %9846 = vmatprep.subr.bf16.mxu1 %v13178_v44 }
 0x50d   :  { %8218 = vst.msk [vmem:[#allocation7 + $0x1] sm:$0x1] %vm8217_vm7, %v8215_v13  ;;  %v7954_v13 = vld [vmem:[#allocation6 + $0x31] ss:$2 sm:$0xf]  ;;  %9847 = vmatpush1.bf16.msra.mxu1 %v13176_v47 }
 0x50e   :  { %v7998_v53 = vmax.f32 %v7938_v0, %v7954_v13  ;;  %9848 = vmatprep.subr.bf16.mxu1 %v13181_v40  ;;  %v13205_v40 = vld [vmem:[%s19057_s5 + $0x10c] ss:$12 sps:$4 sm:$0xff]  }
 0x510   :  { %v7944_v17 = vld [vmem:[#allocation6 + $0x60] ss:$2 sm:$0xf]  ;;  %v7960_v39 = vld [vmem:[#allocation6 + $0x61] ss:$2 sm:$0xf]  ;;  %v8014_v18 = vmax.f32 %v7998_v53, %v8006_v14 }
 0x511   :  { %v8001_v21 = vmax.f32 %v7944_v17, %v7960_v39  ;;  %v13202_v53 = vld [vmem:[%s19057_s5 + $0x38] ss:$12 sps:$4 sm:$0xff]  }
 0x512   :  { %v7976_v62 = vld [vmem:[#allocation6 + $0x68] ss:$2 sm:$0xf]  ;;  %v7992_v20 = vld [vmem:[#allocation6 + $0x69] ss:$2 sm:$0xf] }
 0x513   :  { %v8009_v3 = vmax.f32 %v7976_v62, %v7992_v20 }
 0x515   :  { %v8017_v22 = vmax.f32 %v8001_v21, %v8009_v3  ;;  %v13179_v3 = vld [vmem:[%s19057_s5 + $0x78] ss:$12 sps:$4 sm:$0xff]  }
 0x516   :  { %9849 = vmatpush1.bf16.msra.mxu1 %v13179_v3 }
 0x517   :  { %v8421_v38 = vpack.c.bf16 %v8017_v22, %v8017_v22  ;;  %9850 = vmatprep.subr.bf16.mxu1 %v13184_v23  ;;  %v13208_v23 = vld [vmem:[%s19057_s5 + $0x120] ss:$12 sps:$4 sm:$0xff]  }
 0x519   :  { %v8444_v24 = vrot.slane %v8421_v38, %v17916_v54 }
 0x51b   :  { %v8451_v25 = vrot.slane %v8444_v24, %v17916_v54  ;;  %v8530_v26 = vcombine.high %v8444_v24, %v8444_v24  ;;  %v13189_v24 = vld [vmem:[%s19057_s5 + $0x8] ss:$12 sps:$4 sm:$0xff]  }
 0x51c   :  { %12759 = vmatpush3.bf16.msra.mxu0 %v13189_v24  ;;  %v13211_v24 = vld [vmem:[%s19057_s5 + $0x128] ss:$12 sps:$4 sm:$0xff]  }
 0x51d   :  { %v8472_v27 = vrot.slane %v8451_v25, %v17923_v12  ;;  %v8537_v31 = vrot.slane %v8530_v26, %v17916_v54  ;;  %v8612_v25 = vpack.c.bf16 %v8014_v18, %v8014_v18  ;;  %v13197_v26 = vld [vmem:[%s19057_s5 + $0x20] ss:$12 sps:$4 sm:$0xff]  }
 0x51f   :  { %v8479_v36 = vrot.slane %v8472_v27, %v17923_v12  ;;  %v8558_v45 = vrot.slane %v8537_v31, %v17923_v12  ;;  %v13182_v27 = vld [vmem:[%s19057_s5 + $0x90] ss:$12 sps:$4 sm:$0xff]   ;;  %v8622_v31 = vrot.slane %v8612_v25, %v17916_v54 }
 0x520   :  { %9851 = vmatpush1.bf16.msra.mxu1 %v13182_v27 }
 0x521   :  { %v8481_v42 = vunpack.c.l.b16 %v8479_v36  ;;  %v8565_v48 = vrot.slane %v8558_v45, %v17923_v12 }
 0x523   :  { %v8502_v7 = vsel %vm8082_vm0, %v8481_v42, %v8501_v52  ;;  %v8567_v56 = vunpack.c.l.b16 %v8565_v48  ;;  %v8482_v60 = vrot.slane %v8481_v42, 7 }
 0x524   :  { %v8503_v10 = vpack.c.b16 %v8502_v7, %v8502_v7  ;;  %v8718_v7 = vcombine.high %v8622_v31, %v8622_v31 }
 0x525   :  { %v8592_v30 = vsel %vm8082_vm0, %v8567_v56, %v8591_v16  ;;  %v8568_v37 = vrot.slane %v8567_v56, 7  ;;  %v8483_v51 = vsel %vm8082_vm0, %v8482_v60, %v8480_v29  ;;  %v13187_v29 = vld [vmem:[%s19057_s5 + $0xac] ss:$12 sps:$4 sm:$0xff]   ;;  %v13195_v56 = vld [vmem:[%s19057_s5 + $0xdc] ss:$12 sps:$4 sm:$0xff]  }
 0x526   :  { %v8510_v63 = vrot.slane %v8503_v10, %v17916_v54  ;;  %v8593_v19 = vpack.c.b16 %v8592_v30, %v8592_v30  ;;  %v8484_v33 = vpack.c.b16 %v8483_v51, %v8483_v51  ;;  %9852 = vmatprep.subr.bf16.mxu1 %v13187_v29  ;;  %v13193_v10 = vld [vmem:[%s19057_s5 + $0xd8] ss:$12 sps:$4 sm:$0xff]   ;;  %v8725_v61 = vrot.slane %v8718_v7, %v17916_v54 }
 0x527   :  { %v8569_v43 = vsel %vm8082_vm0, %v8568_v37, %v8566_v50  ;;  %v8629_v50 = vrot.slane %v8622_v31, %v17916_v54  ;;  %9853 = vmatpush1.bf16.msra.mxu1 %v13185_v34  ;;  %v13215_v34 = vld [vmem:[%s19057_s5 + $0x13c] ss:$12 sps:$4 sm:$0xff]   ;;  %v13221_v7 = vld [vmem:[%s19057_s5 + $0x158] ss:$12 sps:$4 sm:$0xff]  }
 0x528   :  { %v8517_v2 = vrot.slane %v8510_v63, %v17916_v54  ;;  %v8600_v4 = vrot.slane %v8593_v19, %v17916_v54  ;;  %v8570_v28 = vpack.c.b16 %v8569_v43, %v8569_v43  ;;  %v8491_v5 = vrot.slane %v8484_v33, %v17916_v54  ;;  %9854 = vmatprep.subr.bf16.mxu1 %v13192_v35  ;;  %v13216_v35 = vld [vmem:[%s19057_s5 + $0x140] ss:$12 sps:$4 sm:$0xff]  }
 0x529   :  { %v8650_v60 = vrot.slane %v8629_v50, %v17923_v12  ;;  %v8740_v19 = vrot.slane %v8725_v61, %v17923_v12  ;;  %v13217_v50 = vld [vmem:[%s19057_s5 + $0x80] ss:$12 sps:$4 sm:$0xff]  }
 0x52a   :  { %v7892_v11 = vpop.f32.mrb[28].mxu1  ;;  %8518 = vrot.lane.b32.xlu1 %v8517_v2, %s13590_s17  ;;  %v8498_v55 = vrot.slane %v8491_v5, %v17916_v54  ;;  %v8607_v20 = vrot.slane %v8600_v4, %v17916_v54  ;;  %v8577_v21 = vrot.slane %v8570_v28, %v17916_v54  ;;  %v13198_v4 = vld [vmem:[%s19057_s5 + $0xf0] ss:$12 sps:$4 sm:$0xff]   ;;  %v13200_v28 = vld [vmem:[%s19057_s5 + $0xf4] ss:$12 sps:$4 sm:$0xff]  }
 0x52b   :  { %v7893_v17 = vadd.f32 %v17861_v57, %v7892_v11  ;;  %v7894_v39 = vpop.f32.mrb[29].mxu1  ;;  %9855 = vmatpush1.bf16.msra.mxu1 %v13190_v41  ;;  %v8657_v37 = vrot.slane %v8650_v60, %v17923_v12  ;;  %v8747_v14 = vrot.slane %v8740_v19, %v17923_v12  ;;  %v13201_v5 = vld [vmem:[%s19057_s5 + $0xf8] ss:$12 sps:$4 sm:$0xff]   ;;  %v13220_v41 = vld [vmem:[%s19057_s5 + $0x154] ss:$12 sps:$4 sm:$0xff]  }
 0x52c   :  { %v7895_v62 = vpop.f32.mrb[30].mxu1  ;;  %8500 = vst.msk [vmem:[#allocation7 + $0x3] sm:$0x1] %vm8100_vm1, %v8498_v55  ;;  %v8584_v8 = vrot.slane %v8577_v21, %v17916_v54  ;;  %9856 = vmatprep.subr.bf16.mxu1 %v13195_v56  ;;  %v13203_v55 = vld [vmem:[%s19057_s5 + $0x108] ss:$12 sps:$4 sm:$0xff]  }
 0x52d   :  { %v7913_v22 = vmax.f32 %v7893_v17, 0.0  ;;  %v7896_v6 = vadd.f32 %v17861_v57, %v7895_v62  ;;  %v7897_v38 = vpop.f32.mrb[31].mxu1  ;;  %v13196_v57 = vld [vmem:[%s19057_s5 + $0xe0] ss:$12 sps:$4 sm:$0xff]   ;;  %v8672_v13 = vunpack.c.l.b16 %v8657_v37  ;;  %v13206_v17 = vld [vmem:[%s19057_s5 + $0x110] ss:$12 sps:$4 sm:$0xff]  }
 0x52e   :  { %8608 = vrot.lane.b32.xlu1 %v8607_v20, %s13587_s23  ;;  %12760 = vmatprep.subr.bf16.mxu0 %v13196_v57  ;;  %v13207_v20 = vld [vmem:[%s19057_s5 + $0x50] ss:$12 sps:$4 sm:$0xff]   ;;  %v13212_v57 = vld [vmem:[%s19057_s5 + $0x68] ss:$12 sps:$4 sm:$0xff]  }
 0x52f   :  { %7930 = vst.msk [vmem:[#allocation6 + $0x70] sm:$0xff] %vm7915_vm15, %v7913_v22  ;;  %v7914_v46 = vmax.f32 %v7896_v6, 0.0  ;;  %12761 = vmatpush3.bf16.msra.mxu0 %v13197_v26  ;;  %9857 = vmatpush1.bf16.msra.mxu1 %v13193_v10  ;;  %v8695_v44 = vrot.slane %v8672_v13, 1  ;;  %v13210_v22 = vld [vmem:[%s19057_s5 + $0x124] ss:$12 sps:$4 sm:$0xff]  }
 0x530   :  { %9858 = vmatprep.subr.bf16.mxu1 %v13200_v28  ;;  %12762 = vmatprep.subr.bf16.mxu0 %v13201_v5  ;;  %v13218_v60 = vld [vmem:[%s19057_s5 + $0x150] ss:$12 sps:$4 sm:$0xff]   ;;  %v13222_v10 = vld [vmem:[%s19057_s5 + $0x98] ss:$12 sps:$4 sm:$0xff]  }
 0x531   :  { %7931 = vst.msk [vmem:[#allocation6 + $0x78] sm:$0xff] %vm7915_vm15, %v7914_v46  ;;  %v13226_v37 = vld [vmem:[%s19057_s5 + $0x170] ss:$12 sps:$4 sm:$0xff]   ;;  %vm13598_vm15 = vmmov 0  }
 0x532   :  { %8585 = vrot.lane.b32.xlu1 %v8584_v8, %s13592_s19  ;;  %v13227_v19 = vld [vmem:[%s19057_s5 + $0xb0] ss:$12 sps:$4 sm:$0xff]  }
 0x533   :  { %9859 = vmatpush1.bf16.msra.mxu1 %v13198_v4  ;;  %12763 = vmatpush3.bf16.msra.mxu0 %v13202_v53 }
 0x534   :  { %9860 = vmatprep.subr.bf16.mxu1 %v13205_v40  ;;  %12764 = vmatprep.subr.bf16.mxu0 %v13206_v17 }
 0x536   :  { %v7946_v36 = vld [vmem:[#allocation6 + $0x70] ss:$2 sm:$0xf]  ;;  %v7962_v45 = vld [vmem:[#allocation6 + $0x71] ss:$2 sm:$0xf] }
 0x537   :  { %v8002_v52 = vmax.f32 %v7946_v36, %v7962_v45  ;;  %9861 = vmatpush1.bf16.msra.mxu1 %v13203_v55  ;;  %12765 = vmatpush3.bf16.msra.mxu0 %v13207_v20  ;;  %v13213_v45 = vld [vmem:[%s19057_s5 + $0x138] ss:$12 sps:$4 sm:$0xff]  }
 0x538   :  { %v7978_v59 = vld [vmem:[#allocation6 + $0x78] ss:$2 sm:$0xf]  ;;  %v7994_v42 = vld [vmem:[#allocation6 + $0x79] ss:$2 sm:$0xf]  ;;  %9862 = vmatprep.subr.bf16.mxu1 %v13210_v22  ;;  %12766 = vmatprep.subr.bf16.mxu0 %v13211_v24 }
 0x539   :  { %v8010_v48 = vmax.f32 %v7978_v59, %v7994_v42  ;;  %v13233_v22 = vld [vmem:[%s19057_s5 + $0x198] ss:$12 sps:$4 sm:$0xff]   ;;  %v13238_v24 = vld [vmem:[%s19057_s5 + $0x1b0] ss:$12 sps:$4 sm:$0xff]  }
 0x53b   :  { %v8018_v16 = vmax.f32 %v8002_v52, %v8010_v48  ;;  %9863 = vmatpush1.bf16.msra.mxu1 %v13208_v23  ;;  %12767 = vmatpush3.bf16.msra.mxu0 %v13212_v57  ;;  %v13241_v23 = vld [vmem:[%s19057_s5 + $0x278] ss:$12 sps:$4 sm:$0xff]   ;;  %v13246_v57 = vld [vmem:[%s19057_s5 + $0x290] ss:$12 sps:$4 sm:$0xff]  }
 0x53c   :  { %9864 = vmatprep.subr.bf16.mxu1 %v13215_v34  ;;  %12768 = vmatprep.subr.bf16.mxu0 %v13216_v35  ;;  %v13252_v34 = vld [vmem:[%s19057_s5 + $0x1e8] ss:$12 sps:$4 sm:$0xff]   ;;  %v13262_v48 = vld [vmem:[%s19057_s5 + $0x218] ss:$12 sps:$4 sm:$0xff]  }
 0x53d   :  { %v8613_v1 = vpack.c.bf16 %v8018_v16, %v8018_v16  ;;  %v13255_v35 = vld [vmem:[%s19057_s5 + $0x1fc] ss:$12 sps:$4 sm:$0xff]  }
 0x53f   :  { %v8636_v30 = vrot.slane %v8613_v1, %v17916_v54  ;;  %9865 = vmatpush1.bf16.msra.mxu1 %v13213_v45  ;;  %12769 = vmatpush3.bf16.msra.mxu0 %v13217_v50  ;;  %v13225_v1 = vld [vmem:[%s19057_s5 + $0x16c] ss:$12 sps:$4 sm:$0xff]  }
 0x540   :  { %9866 = vmatprep.subr.bf16.mxu1 %v13220_v41  ;;  %12770 = vmatprep.subr.bf16.mxu0 %v13221_v7  ;;  %v13253_v45 = vld [vmem:[%s19057_s5 + $0x1f8] ss:$12 sps:$4 sm:$0xff]   ;;  %v13257_v50 = vld [vmem:[%s19057_s5 + $0x200] ss:$12 sps:$4 sm:$0xff]  }
 0x541   :  { %v8643_v51 = vrot.slane %v8636_v30, %v17916_v54  ;;  %v8726_v63 = vcombine.high %v8636_v30, %v8636_v30  ;;  %v13260_v41 = vld [vmem:[%s19057_s5 + $0x214] ss:$12 sps:$4 sm:$0xff]   ;;  %v13265_v7 = vld [vmem:[%s19057_s5 + $0x22c] ss:$12 sps:$4 sm:$0xff]  }
 0x543   :  { %v8664_v0 = vrot.slane %v8643_v51, %v17923_v12  ;;  %v8733_v33 = vrot.slane %v8726_v63, %v17916_v54  ;;  %9867 = vmatpush1.bf16.msra.mxu1 %v13218_v60  ;;  %v13223_v63 = vld [vmem:[%s19057_s5 + $0x168] ss:$12 sps:$4 sm:$0xff]   ;;  %12771 = vmatpush3.bf16.msra.mxu0 %v13222_v10  ;;  %v13267_v10 = vld [vmem:[%s19057_s5 + $0x230] ss:$12 sps:$4 sm:$0xff]  }
 0x544   :  { %9868 = vmatprep.subr.bf16.mxu1 %v13225_v1  ;;  %12772 = vmatprep.subr.bf16.mxu0 %v13226_v37  ;;  %v13263_v60 = vld [vmem:[%s19057_s5 + $0x228] ss:$12 sps:$4 sm:$0xff]   ;;  %v13270_v1 = vld [vmem:[%s19057_s5 + $0x244] ss:$12 sps:$4 sm:$0xff]   ;;  %v13268_v37 = vld [vmem:[%s19057_s5 + $0x240] ss:$12 sps:$4 sm:$0xff]  }
 0x545   :  { %v8671_v43 = vrot.slane %v8664_v0, %v17923_v12  ;;  %v8754_v2 = vrot.slane %v8733_v33, %v17923_v12  ;;  %v13230_v33 = vld [vmem:[%s19057_s5 + $0x184] ss:$12 sps:$4 sm:$0xff]  }
 0x547   :  { %v8673_v47 = vunpack.c.l.b16 %v8671_v43  ;;  %v8761_v11 = vrot.slane %v8754_v2, %v17923_v12  ;;  %v8762_v12 = vunpack.c.l.b16 %v8747_v14  ;;  %9869 = vmatpush1.bf16.msra.mxu1 %v13223_v63  ;;  %12773 = vmatpush3.bf16.msra.mxu0 %v13227_v19  ;;  %v13231_v43 = vld [vmem:[%s19057_s5 + $0x248] ss:$12 sps:$4 sm:$0xff]  }
 0x548   :  { %9879 = vmatprep.subr.bf16.mxu1 %v13230_v33  ;;  %12780 = vmatprep.subr.bf16.mxu0 %v13231_v43  ;;  %v13276_v19 = vld [vmem:[%s19057_s5 + $0x25c] ss:$12 sps:$4 sm:$0xff]   ;;  %v13274_v33 = vld [vmem:[%s19057_s5 + $0x258] ss:$12 sps:$4 sm:$0xff]   ;;  %v13278_v43 = vld [vmem:[%s19057_s5 + $0x320] ss:$12 sps:$4 sm:$0xff]  }
 0x549   :  { %v8696_v39 = vsel %vm8082_vm0, %v8673_v47, %v8695_v44  ;;  %v8674_v18 = vrot.slane %v8673_v47, 7  ;;  %v8763_v62 = vunpack.c.l.b16 %v8761_v11  ;;  %v8785_v25 = vrot.slane %v8762_v12, 1 }
 0x54a   :  { %v8697_v21 = vpack.c.b16 %v8696_v39, %v8696_v39 }
 0x54b   :  { %v8675_v3 = vsel %vm8082_vm0, %v8674_v18, %v8672_v13  ;;  %v8764_v15 = vrot.slane %v8763_v62, 7  ;;  %v8786_v29 = vsel %vm8082_vm0, %v8763_v62, %v8785_v25  ;;  %v13232_v62 = vld [vmem:[%s19057_s5 + $0x188] ss:$12 sps:$4 sm:$0xff]   ;;  %v13245_v25 = vld [vmem:[%s19057_s5 + $0x1cc] ss:$12 sps:$4 sm:$0xff]  }
 0x54c   :  { %v8704_v6 = vrot.slane %v8697_v21, %v17916_v54  ;;  %v8676_v38 = vpack.c.b16 %v8675_v3, %v8675_v3  ;;  %v8787_v52 = vpack.c.b16 %v8786_v29, %v8786_v29  ;;  %v13235_v3 = vld [vmem:[%s19057_s5 + $0x19c] ss:$12 sps:$4 sm:$0xff]  }
 0x54d   :  { %v8765_v46 = vsel %vm8082_vm0, %v8764_v15, %v8762_v12  ;;  %v13228_v12 = vld [vmem:[%s19057_s5 + $0x180] ss:$12 sps:$4 sm:$0xff]   ;;  %v13251_v29 = vld [vmem:[%s19057_s5 + $0x2a8] ss:$12 sps:$4 sm:$0xff]  }
 0x54e   :  { %v8711_v26 = vrot.slane %v8704_v6, %v17916_v54  ;;  %v8683_v8 = vrot.slane %v8676_v38, %v17916_v54  ;;  %v8766_v27 = vpack.c.b16 %v8765_v46, %v8765_v46  ;;  %v8794_v30 = vrot.slane %v8787_v52, %v17916_v54  ;;  %v13236_v15 = vld [vmem:[%s19057_s5 + $0x260] ss:$12 sps:$4 sm:$0xff]   ;;  %v13242_v46 = vld [vmem:[%s19057_s5 + $0x1b8] ss:$12 sps:$4 sm:$0xff]   ;;  %v13258_v52 = vld [vmem:[%s19057_s5 + $0x210] ss:$12 sps:$4 sm:$0xff]  }
 0x54f   :  { %v13237_v6 = vld [vmem:[%s19057_s5 + $0x1a0] ss:$12 sps:$4 sm:$0xff]  }
 0x550   :  { %8712 = vrot.lane.b32.xlu1 %v8711_v26, %s13595_s24  ;;  %v8690_v59 = vrot.slane %v8683_v8, %v17916_v54  ;;  %v8773_v42 = vrot.slane %v8766_v27, %v17916_v54  ;;  %v8801_v0 = vrot.slane %v8794_v30, %v17916_v54  ;;  %v13240_v38 = vld [vmem:[%s19057_s5 + $0x1b4] ss:$12 sps:$4 sm:$0xff]   ;;  %v13247_v8 = vld [vmem:[%s19057_s5 + $0x1d0] ss:$12 sps:$4 sm:$0xff]  }
 0x551   :  { %v13243_v26 = vld [vmem:[%s19057_s5 + $0x1c8] ss:$12 sps:$4 sm:$0xff]   ;;  %v13250_v27 = vld [vmem:[%s19057_s5 + $0x1e4] ss:$12 sps:$4 sm:$0xff]  }
 0x552   :  { %v8780_v61 = vrot.slane %v8773_v42, %v17916_v54 }
 0x554   :  { %8691 = vrot.lane.b32.xlu1 %v8690_v59, %s13591_s3  ;;  %v13261_v59 = vld [vmem:[%s19057_s5 + $0x2d8] ss:$12 sps:$4 sm:$0xff]  }
 0x558   :  { %8781 = vrot.lane.b32.xlu1 %v8780_v61, %s13596_s30  ;;  %v13271_v61 = vld [vmem:[%s19057_s5 + $0x3c8] ss:$12 sps:$4 sm:$0xff]  }
 0x55c   :  { %v8321_v31 = vpop.permute.xlu0 %8320  ;;  %8802 = vrot.lane.b32.xlu1 %v8801_v0, %s13597_s27  ;;  %v13277_v0 = vld [vmem:[%s19057_s5 + $0x3e0] ss:$12 sps:$4 sm:$0xff]  }
 0x55d   :  { %v8322_v36 = vrot.slane %v8321_v31, 7 }
 0x55f   :  { %v8324_v16 = vsel %vm8323_vm10, %v8322_v36, %v8321_v31  ;;  %v13248_v31 = vld [vmem:[%s19057_s5 + $0x1e0] ss:$12 sps:$4 sm:$0xff]  }
 0x560   :  { %v8299_v56 = vpop.permute.xlu0 %8298  ;;  %v13256_v36 = vld [vmem:[%s19057_s5 + $0x2c0] ss:$12 sps:$4 sm:$0xff]  }
 0x561   :  { %8302 = vst.msk [vmem:[#allocation7 + $0x1] sm:$0x1] %vm8301_vm11, %v8299_v56  ;;  %v13266_v56 = vld [vmem:[%s19057_s5 + $0x2f0] ss:$12 sps:$4 sm:$0xff]  }
 0x562   :  { %8329 = vst.msk [vmem:[#allocation7 + $0x1] sm:$0x3] %vm18183_vm12, %v8324_v16 }
 0x564   :  { %v8394_v51 = vpop.permute.xlu0 %8393 }
 0x565   :  { %8397 = vst.msk [vmem:[#allocation7 + $0x2] sm:$0x1] %vm8396_vm13, %v8394_v51  ;;  %v13272_v51 = vld [vmem:[%s19057_s5 + $0x308] ss:$12 sps:$4 sm:$0xff]  }
 0x568   :  { %v8416_v13 = vpop.permute.xlu0 %8415 }
 0x569   :  { %8419 = vst.msk [vmem:[#allocation7 + $0x2] sm:$0x1] %vm8418_vm14, %v8416_v13 }
 0x59c   :  { %v8519_v14 = vpop.permute.xlu1 %8518 }
 0x59d   :  { %8521 = vst.msk [vmem:[#allocation7 + $0x3] sm:$0x1] %vm8122_vm3, %v8519_v14  ;;  %v13281_v14 = vld [vmem:[%s19057_s5 + $0x274] ss:$12 sps:$4 sm:$0xff]  }
 0x5a0   :  { %v8609_v2 = vpop.permute.xlu1 %8608 }
 0x5a4   :  { %v8586_v4 = vpop.permute.xlu1 %8585 }
 0x5a5   :  { %v8587_v28 = vrot.slane %v8586_v4, 7 }
 0x5a7   :  { %v8588_v5 = vsel %vm8190_vm5, %v8587_v28, %v8586_v4  ;;  %v13279_v4 = vld [vmem:[%s19057_s5 + $0x270] ss:$12 sps:$4 sm:$0xff]   ;;  %v13283_v28 = vld [vmem:[%s19057_s5 + $0x338] ss:$12 sps:$4 sm:$0xff]  }
 0x5a8   :  { %8590 = vst.msk [vmem:[#allocation7 + $0x3] sm:$0x3] %vm18003_vm6, %v8588_v5  ;;  %v13286_v5 = vld [vmem:[%s19057_s5 + $0x28c] ss:$12 sps:$4 sm:$0xff]  }
 0x5a9   :  { %8611 = vst.msk [vmem:[#allocation7 + $0x4] sm:$0x1] %vm8217_vm7, %v8609_v2  ;;  %v13282_v2 = vld [vmem:[%s19057_s5 + $0x3f8] ss:$12 sps:$4 sm:$0xff]  }
 0x5c2   :  { %v8713_v53 = vpop.permute.xlu1 %8712 }
 0x5c3   :  { %v8714_v47 = vrot.slane %v8713_v53, 7 }
 0x5c5   :  { %v8715_v11 = vsel %vm8323_vm10, %v8714_v47, %v8713_v53  ;;  %v13287_v53 = vld [vmem:[%s19057_s5 + $0x410] ss:$12 sps:$4 sm:$0xff]   ;;  %v13284_v47 = vld [vmem:[%s19057_s5 + $0x288] ss:$12 sps:$4 sm:$0xff]  }
 0x5c6   :  { %v8692_v44 = vpop.permute.xlu1 %8691 }
 0x5c7   :  { %8694 = vst.msk [vmem:[#allocation7 + $0x4] sm:$0x1] %vm8301_vm11, %v8692_v44  ;;  %v13288_v44 = vld [vmem:[%s19057_s5 + $0x350] ss:$12 sps:$4 sm:$0xff]  }
 0x5c8   :  { %8717 = vst.msk [vmem:[#allocation7 + $0x4] sm:$0x3] %vm18183_vm12, %v8715_v11  ;;  %v13291_v11 = vld [vmem:[%s19057_s5 + $0x2a4] ss:$12 sps:$4 sm:$0xff]  }
 0x5ca   :  { %v8782_v55 = vpop.permute.xlu1 %8781 }
 0x5cb   :  { %8784 = vst.msk [vmem:[#allocation7 + $0x5] sm:$0x1] %vm8396_vm13, %v8782_v55  ;;  %v13292_v55 = vld [vmem:[%s19057_s5 + $0x428] ss:$12 sps:$4 sm:$0xff]  }
 0x5ce   :  { %v8803_v40 = vpop.permute.xlu1 %8802 }
 0x5cf   :  { %8805 = vst.msk [vmem:[#allocation7 + $0x5] sm:$0x1] %vm8418_vm14, %v8803_v40  ;;  %v13289_v40 = vld [vmem:[%s19057_s5 + $0x2a0] ss:$12 sps:$4 sm:$0xff]  }
 0x5d6   :  { %v18237_v49 = vld [vmem:[#allocation7] sm:$0x3f] }
 0x5d7   :  { %v9024_v17 = vrot.slane %v18237_v49, %v17916_v54  ;;  %v9017_v42 = vcombine.high %v18237_v49, %v18237_v49  ;;  %v13293_v49 = vld [vmem:[%s19057_s5 + $0x368] ss:$12 sps:$4 sm:$0xff]  }
 0x5d9   :  { %v9032_v39 = vcombine.high %v9024_v17, %v9024_v17  ;;  %v18249_v20 = vrot.slane %v9024_v17, %v17916_v54  ;;  %v18334_v16 = vrot.slane %v9017_v42, %v17916_v54  ;;  %v13296_v17 = vld [vmem:[%s19057_s5 + $0x2bc] ss:$12 sps:$4 sm:$0xff]   ;;  %v13333_v42 = vld [vmem:[%s19057_s5 + $0x3c0] ss:$12 sps:$4 sm:$0xff]  }
 0x5db   :  { %v9054_v18 = vrot.slane %v9032_v39, %v17916_v54  ;;  %v9033_v30 = vcombine.high %v18334_v16, %v18334_v16  ;;  %v18358_v63 = vcombine.high %v18249_v20, %v18249_v20  ;;  %v13297_v39 = vld [vmem:[%s19057_s5 + $0x440] ss:$12 sps:$4 sm:$0xff]  }
 0x5dd   :  { %9870 = vmatprep.mubr.bf16.mxu1 %v9054_v18  ;;  %9993 = vmatprep.mubr.bf16.mxu0 %v9054_v18  ;;  %v9063_v21 = vcombine.high %v9054_v18, %v9054_v18  ;;  %v18368_v13 = vrot.slane %v9033_v30, %v17916_v54  ;;  %v13294_v18 = vld [vmem:[%s19057_s5 + $0x2b8] ss:$12 sps:$4 sm:$0xff]  }
 0x5de   :  { %9871 = vmatmul.mubr.bf16.vlgmr.msra.gmra.mrb[32].mxu1 %v18249_v20  ;;  %9994 = vmatmul.mubr.bf16.vlgmr.msra.gmra.mrb[64].mxu0 %v18249_v20  ;;  %v13302_v20 = vld [vmem:[%s19057_s5 + $0x458] ss:$12 sps:$4 sm:$0xff]  }
 0x5df   :  { %9880 = vmatpush1.bf16.msra.mxu1 %v13228_v12  ;;  %12781 = vmatpush3.bf16.msra.mxu0 %v13232_v62  ;;  %v13298_v12 = vld [vmem:[%s19057_s5 + $0x380] ss:$12 sps:$4 sm:$0xff]   ;;  %v13348_v30 = vld [vmem:[%s19057_s5 + $0x438] ss:$12 sps:$4 sm:$0xff]  }
 0x5e0   :  { %9911 = vmatprep.mubr.bf16.mxu1 %v9063_v21  ;;  %10033 = vmatprep.mubr.bf16.mxu0 %v9063_v21  ;;  %v13301_v62 = vld [vmem:[%s19057_s5 + $0x2d4] ss:$12 sps:$4 sm:$0xff]   ;;  %v13299_v21 = vld [vmem:[%s19057_s5 + $0x2d0] ss:$12 sps:$4 sm:$0xff]  }
 0x5e1   :  { %9881 = vmatprep.subr.bf16.mxu1 %v13235_v3  ;;  %12782 = vmatprep.subr.bf16.mxu0 %v13236_v15  ;;  %v13303_v3 = vld [vmem:[%s19057_s5 + $0x398] ss:$12 sps:$4 sm:$0xff]  }
 0x5e2   :  { %v13306_v15 = vld [vmem:[%s19057_s5 + $0x2ec] ss:$12 sps:$4 sm:$0xff]  }
 0x5e3   :  { %9882 = vmatpush1.bf16.msra.mxu1 %v13233_v22  ;;  %12783 = vmatpush3.bf16.msra.mxu0 %v13237_v6  ;;  %v13307_v22 = vld [vmem:[%s19057_s5 + $0x470] ss:$12 sps:$4 sm:$0xff]   ;;  %v13304_v6 = vld [vmem:[%s19057_s5 + $0x2e8] ss:$12 sps:$4 sm:$0xff]  }
 0x5e4   :  { %9883 = vmatprep.subr.bf16.mxu1 %v13240_v38  ;;  %12784 = vmatprep.subr.bf16.mxu0 %v13241_v23  ;;  %v13308_v38 = vld [vmem:[%s19057_s5 + $0x3b0] ss:$12 sps:$4 sm:$0xff]  }
 0x5e5   :  { %v13311_v23 = vld [vmem:[%s19057_s5 + $0x304] ss:$12 sps:$4 sm:$0xff]  }
 0x5e7   :  { %9884 = vmatpush1.bf16.msra.mxu1 %v13238_v24  ;;  %12785 = vmatpush3.bf16.msra.mxu0 %v13242_v46  ;;  %v13309_v24 = vld [vmem:[%s19057_s5 + $0x300] ss:$12 sps:$4 sm:$0xff]   ;;  %v18457_v46 = vrot.slane %v18334_v16, %v17916_v54 }
 0x5e8   :  { %9885 = vmatprep.subr.bf16.mxu1 %v13245_v25  ;;  %12786 = vmatprep.subr.bf16.mxu0 %v13246_v57  ;;  %v13314_v25 = vld [vmem:[%s19057_s5 + $0x31c] ss:$12 sps:$4 sm:$0xff]   ;;  %v13312_v57 = vld [vmem:[%s19057_s5 + $0x318] ss:$12 sps:$4 sm:$0xff]   ;;  %v13317_v54 = vld [vmem:[%s19057_s5 + $0x334] ss:$12 sps:$4 sm:$0xff]  }
 0x5e9   :  { %v13344_v16 = vld [vmem:[%s19057_s5 + $0x40c] ss:$12 sps:$4 sm:$0xff]  }
 0x5eb   :  { %9886 = vmatpush1.bf16.msra.mxu1 %v13243_v26  ;;  %12787 = vmatpush3.bf16.msra.mxu0 %v13247_v8  ;;  %v13315_v26 = vld [vmem:[%s19057_s5 + $0x330] ss:$12 sps:$4 sm:$0xff]   ;;  %v13320_v8 = vld [vmem:[%s19057_s5 + $0x34c] ss:$12 sps:$4 sm:$0xff]  }
 0x5ec   :  { %9887 = vmatprep.subr.bf16.mxu1 %v13250_v27  ;;  %12788 = vmatprep.subr.bf16.mxu0 %v13251_v29  ;;  %v13318_v27 = vld [vmem:[%s19057_s5 + $0x348] ss:$12 sps:$4 sm:$0xff]   ;;  %v13323_v29 = vld [vmem:[%s19057_s5 + $0x364] ss:$12 sps:$4 sm:$0xff]  }
 0x5ef   :  { %9888 = vmatpush1.bf16.msra.mxu1 %v13248_v31  ;;  %12789 = vmatpush3.bf16.msra.mxu0 %v13252_v34  ;;  %v13321_v31 = vld [vmem:[%s19057_s5 + $0x360] ss:$12 sps:$4 sm:$0xff]   ;;  %v13326_v34 = vld [vmem:[%s19057_s5 + $0x37c] ss:$12 sps:$4 sm:$0xff]  }
 0x5f0   :  { %9889 = vmatprep.subr.bf16.mxu1 %v13255_v35  ;;  %12790 = vmatprep.subr.bf16.mxu0 %v13256_v36  ;;  %v13324_v35 = vld [vmem:[%s19057_s5 + $0x378] ss:$12 sps:$4 sm:$0xff]   ;;  %v13329_v36 = vld [vmem:[%s19057_s5 + $0x394] ss:$12 sps:$4 sm:$0xff]  }
 0x5f3   :  { %9890 = vmatpush1.bf16.msra.mxu1 %v13253_v45  ;;  %12791 = vmatpush3.bf16.msra.mxu0 %v13257_v50  ;;  %v13327_v45 = vld [vmem:[%s19057_s5 + $0x390] ss:$12 sps:$4 sm:$0xff]   ;;  %v13332_v50 = vld [vmem:[%s19057_s5 + $0x3ac] ss:$12 sps:$4 sm:$0xff]  }
 0x5f4   :  { %9891 = vmatprep.subr.bf16.mxu1 %v13260_v41  ;;  %12792 = vmatprep.subr.bf16.mxu0 %v13261_v59  ;;  %v13330_v41 = vld [vmem:[%s19057_s5 + $0x3a8] ss:$12 sps:$4 sm:$0xff]   ;;  %v13335_v59 = vld [vmem:[%s19057_s5 + $0x3c4] ss:$12 sps:$4 sm:$0xff]  }
 0x5f7   :  { %9892 = vmatpush1.bf16.msra.mxu1 %v13258_v52  ;;  %12793 = vmatpush3.bf16.msra.mxu0 %v13262_v48  ;;  %v13338_v52 = vld [vmem:[%s19057_s5 + $0x3dc] ss:$12 sps:$4 sm:$0xff]   ;;  %v13336_v48 = vld [vmem:[%s19057_s5 + $0x3d8] ss:$12 sps:$4 sm:$0xff]  }
 0x5f8   :  { %9893 = vmatprep.subr.bf16.mxu1 %v13265_v7  ;;  %12794 = vmatprep.subr.bf16.mxu0 %v13266_v56  ;;  %v13341_v7 = vld [vmem:[%s19057_s5 + $0x3f4] ss:$12 sps:$4 sm:$0xff]   ;;  %v13339_v56 = vld [vmem:[%s19057_s5 + $0x3f0] ss:$12 sps:$4 sm:$0xff]  }
 0x5fb   :  { %9894 = vmatpush1.bf16.msra.mxu1 %v13263_v60  ;;  %12795 = vmatpush3.bf16.msra.mxu0 %v13267_v10  ;;  %v13342_v60 = vld [vmem:[%s19057_s5 + $0x408] ss:$12 sps:$4 sm:$0xff]   ;;  %v13347_v10 = vld [vmem:[%s19057_s5 + $0x424] ss:$12 sps:$4 sm:$0xff]  }
 0x5fc   :  { %9895 = vmatprep.subr.bf16.mxu1 %v13270_v1  ;;  %12802 = vmatprep.subr.bf16.mxu0 %v13271_v61  ;;  %v13345_v1 = vld [vmem:[%s19057_s5 + $0x420] ss:$12 sps:$4 sm:$0xff]   ;;  %v13350_v61 = vld [vmem:[%s19057_s5 + $0x43c] ss:$12 sps:$4 sm:$0xff]  }
 0x5fe   :  { %10034 = vmatmul.mubr.bf16.vlgmr.msra.gmra.mrb[68].mxu0 %v18358_v63 }
 0x5ff   :  { %9896 = vmatpush1.bf16.msra.mxu1 %v13268_v37  ;;  %12803 = vmatpush3.bf16.msra.mxu0 %v13272_v51  ;;  %v13353_v37 = vld [vmem:[%s19057_s5 + $0x454] ss:$12 sps:$4 sm:$0xff]   ;;  %v13351_v51 = vld [vmem:[%s19057_s5 + $0x450] ss:$12 sps:$4 sm:$0xff]  }
 0x600   :  { %10073 = vmatprep.mubr.bf16.mxu0 %v18368_v13  ;;  %9897 = vmatprep.subr.bf16.mxu1 %v13276_v19  ;;  %v13354_v19 = vld [vmem:[%s19057_s5 + $0x468] ss:$12 sps:$4 sm:$0xff]  }
 0x601   :  { %12804 = vmatprep.subr.bf16.mxu0 %v13277_v0  ;;  %v13357_v0 = vld [vmem:[%s19059_s7] ss:$12 sps:$4 sm:$0xff]  }
 0x603   :  { %9898 = vmatpush1.bf16.msra.mxu1 %v13274_v33  ;;  %12805 = vmatpush3.bf16.msra.mxu0 %v13278_v43  ;;  %v13362_v33 = vld [vmem:[%s19059_s7 + $0x1c] ss:$12 sps:$4 sm:$0xff]   ;;  %v13360_v43 = vld [vmem:[%s19059_s7 + $0x18] ss:$12 sps:$4 sm:$0xff]  }
 0x604   :  { %9899 = vmatprep.subr.bf16.mxu1 %v13281_v14  ;;  %12806 = vmatprep.subr.bf16.mxu0 %v13282_v2  ;;  %v13365_v14 = vld [vmem:[%s19059_s7 + $0x34] ss:$12 sps:$4 sm:$0xff]  }
 0x605   :  { %v13384_v2 = vld [vmem:[%s19059_s7 + $0xc8] ss:$12 sps:$4 sm:$0xff]  }
 0x607   :  { %9900 = vmatpush1.bf16.msra.mxu1 %v13279_v4  ;;  %12807 = vmatpush3.bf16.msra.mxu0 %v13283_v28  ;;  %v13385_v4 = vld [vmem:[%s19059_s7 + $0x8] ss:$12 sps:$4 sm:$0xff]   ;;  %v13363_v28 = vld [vmem:[%s19059_s7 + $0x30] ss:$12 sps:$4 sm:$0xff]  }
 0x608   :  { %9901 = vmatprep.subr.bf16.mxu1 %v13286_v5  ;;  %12808 = vmatprep.subr.bf16.mxu0 %v13287_v53  ;;  %v13389_v5 = vld [vmem:[%s19059_s7 + $0xe0] ss:$12 sps:$4 sm:$0xff]  }
 0x609   :  { %v13368_v53 = vld [vmem:[%s19059_s7 + $0x4c] ss:$12 sps:$4 sm:$0xff]  }
 0x60b   :  { %9902 = vmatpush1.bf16.msra.mxu1 %v13284_v47  ;;  %12809 = vmatpush3.bf16.msra.mxu0 %v13288_v44  ;;  %v13390_v47 = vld [vmem:[%s19059_s7 + $0x20] ss:$12 sps:$4 sm:$0xff]   ;;  %v13394_v44 = vld [vmem:[%s19059_s7 + $0xf8] ss:$12 sps:$4 sm:$0xff]  }
 0x60c   :  { %9903 = vmatprep.subr.bf16.mxu1 %v13291_v11  ;;  %12810 = vmatprep.subr.bf16.mxu0 %v13292_v55  ;;  %v13366_v11 = vld [vmem:[%s19059_s7 + $0x48] ss:$12 sps:$4 sm:$0xff]   ;;  %v13371_v55 = vld [vmem:[%s19059_s7 + $0x64] ss:$12 sps:$4 sm:$0xff]  }
 0x60f   :  { %9904 = vmatpush1.bf16.msra.mxu1 %v13289_v40  ;;  %12811 = vmatpush3.bf16.msra.mxu0 %v13293_v49  ;;  %v13395_v40 = vld [vmem:[%s19059_s7 + $0x38] ss:$12 sps:$4 sm:$0xff]   ;;  %v13399_v49 = vld [vmem:[%s19059_s7 + $0x110] ss:$12 sps:$4 sm:$0xff]  }
 0x610   :  { %9905 = vmatprep.subr.bf16.mxu1 %v13296_v17  ;;  %12812 = vmatprep.subr.bf16.mxu0 %v13297_v39  ;;  %v13369_v17 = vld [vmem:[%s19059_s7 + $0x60] ss:$12 sps:$4 sm:$0xff]   ;;  %v13374_v39 = vld [vmem:[%s19059_s7 + $0x7c] ss:$12 sps:$4 sm:$0xff]  }
 0x613   :  { %9906 = vmatpush1.bf16.msra.mxu1 %v13294_v18  ;;  %12813 = vmatpush3.bf16.msra.mxu0 %v13298_v12  ;;  %v13400_v18 = vld [vmem:[%s19059_s7 + $0x50] ss:$12 sps:$4 sm:$0xff]   ;;  %v13404_v12 = vld [vmem:[%s19059_s7 + $0x128] ss:$12 sps:$4 sm:$0xff]  }
 0x614   :  { %9907 = vmatprep.subr.bf16.mxu1 %v13301_v62  ;;  %12814 = vmatprep.subr.bf16.mxu0 %v13302_v20  ;;  %v13372_v62 = vld [vmem:[%s19059_s7 + $0x78] ss:$12 sps:$4 sm:$0xff]   ;;  %v13377_v20 = vld [vmem:[%s19059_s7 + $0x94] ss:$12 sps:$4 sm:$0xff]  }
 0x617   :  { %9908 = vmatpush1.bf16.msra.mxu1 %v13299_v21  ;;  %12815 = vmatpush3.bf16.msra.mxu0 %v13303_v3  ;;  %v13405_v21 = vld [vmem:[%s19059_s7 + $0x68] ss:$12 sps:$4 sm:$0xff]   ;;  %v13409_v3 = vld [vmem:[%s19059_s7 + $0x140] ss:$12 sps:$4 sm:$0xff]  }
 0x618   :  { %9909 = vmatprep.subr.bf16.mxu1 %v13306_v15  ;;  %12816 = vmatprep.subr.bf16.mxu0 %v13307_v22  ;;  %v13375_v15 = vld [vmem:[%s19059_s7 + $0x90] ss:$12 sps:$4 sm:$0xff]   ;;  %v13380_v22 = vld [vmem:[%s19059_s7 + $0xac] ss:$12 sps:$4 sm:$0xff]  }
 0x61b   :  { %9910 = vmatpush1.bf16.msra.mxu1 %v13304_v6  ;;  %12817 = vmatpush3.bf16.msra.mxu0 %v13308_v38  ;;  %v13410_v6 = vld [vmem:[%s19059_s7 + $0x80] ss:$12 sps:$4 sm:$0xff]   ;;  %v13378_v38 = vld [vmem:[%s19059_s7 + $0xa8] ss:$12 sps:$4 sm:$0xff]  }
 0x61c   :  { %9920 = vmatprep.subr.bf16.mxu1 %v13311_v23  ;;  %v13383_v23 = vld [vmem:[%s19059_s7 + $0xc4] ss:$12 sps:$4 sm:$0xff]  }
 0x61e   :  { %9912 = vmatmul.mubr.bf16.vlgmr.msra.gmra.mrb[32].mxu1 %v18358_v63  ;;  %10074 = vmatmul.mubr.bf16.vlgmr.msra.gmra.mrb[72].mxu0 %v18457_v46  ;;  %v13356_v63 = vld [vmem:[%s19057_s5 + $0x46c] ss:$12 sps:$4 sm:$0xff]  }
 0x61f   :  { %9921 = vmatpush1.bf16.msra.mxu1 %v13309_v24  ;;  %9952 = vmatprep.mubr.bf16.mxu1 %v18368_v13  ;;  %v13359_v13 = vld [vmem:[%s19059_s7 + $0x4] ss:$12 sps:$4 sm:$0xff]   ;;  %v13381_v24 = vld [vmem:[%s19059_s7 + $0xc0] ss:$12 sps:$4 sm:$0xff]  }
 0x620   :  { %9922 = vmatprep.subr.bf16.mxu1 %v13314_v25  ;;  %10584 = vmatprep.subr.bf16.mxu0 %v13359_v13  ;;  %v13386_v25 = vld [vmem:[%s19059_s7 + $0xd8] ss:$12 sps:$4 sm:$0xff]  }
 0x621   :  { %10585 = vmatpush1.bf16.msra.mxu0 %v13357_v0 }
 0x622   :  { %10586 = vmatprep.subr.bf16.mxu0 %v13362_v33 }
 0x623   :  { %9923 = vmatpush1.bf16.msra.mxu1 %v13312_v57  ;;  %v13393_v57 = vld [vmem:[%s19059_s7 + $0xf4] ss:$12 sps:$4 sm:$0xff]  }
 0x624   :  { %9924 = vmatprep.subr.bf16.mxu1 %v13317_v54  ;;  %v13391_v54 = vld [vmem:[%s19059_s7 + $0xf0] ss:$12 sps:$4 sm:$0xff]  }
 0x625   :  { %10587 = vmatpush1.bf16.msra.mxu0 %v13360_v43 }
 0x626   :  { %10588 = vmatprep.subr.bf16.mxu0 %v13365_v14 }
 0x627   :  { %9925 = vmatpush1.bf16.msra.mxu1 %v13315_v26  ;;  %v13398_v26 = vld [vmem:[%s19059_s7 + $0x10c] ss:$12 sps:$4 sm:$0xff]  }
 0x628   :  { %9926 = vmatprep.subr.bf16.mxu1 %v13320_v8  ;;  %v13396_v8 = vld [vmem:[%s19059_s7 + $0x108] ss:$12 sps:$4 sm:$0xff]  }
 0x629   :  { %10589 = vmatpush1.bf16.msra.mxu0 %v13363_v28 }
 0x62a   :  { %10590 = vmatprep.subr.bf16.mxu0 %v13368_v53  ;;  %v18711_v53 = vsub.s32 0, %v17911_v32 }
 0x62b   :  { %9927 = vmatpush1.bf16.msra.mxu1 %v13318_v27  ;;  %v13403_v27 = vld [vmem:[%s19059_s7 + $0x124] ss:$12 sps:$4 sm:$0xff]  }
 0x62c   :  { %9928 = vmatprep.subr.bf16.mxu1 %v13323_v29  ;;  %v13401_v29 = vld [vmem:[%s19059_s7 + $0x120] ss:$12 sps:$4 sm:$0xff]  }
 0x62d   :  { %10591 = vmatpush1.bf16.msra.mxu0 %v13366_v11 }
 0x62e   :  { %10592 = vmatprep.subr.bf16.mxu0 %v13371_v55 }
 0x62f   :  { %9929 = vmatpush1.bf16.msra.mxu1 %v13321_v31  ;;  %v13408_v31 = vld [vmem:[%s19059_s7 + $0x13c] ss:$12 sps:$4 sm:$0xff]  }
 0x630   :  { %9930 = vmatprep.subr.bf16.mxu1 %v13326_v34  ;;  %v13406_v34 = vld [vmem:[%s19059_s7 + $0x138] ss:$12 sps:$4 sm:$0xff]  }
 0x631   :  { %10593 = vmatpush1.bf16.msra.mxu0 %v13369_v17 }
 0x632   :  { %10594 = vmatprep.subr.bf16.mxu0 %v13374_v39 }
 0x633   :  { %9931 = vmatpush1.bf16.msra.mxu1 %v13324_v35 }
 0x634   :  { %9932 = vmatprep.subr.bf16.mxu1 %v13329_v36 }
 0x635   :  { %10595 = vmatpush1.bf16.msra.mxu0 %v13372_v62 }
 0x636   :  { %10596 = vmatprep.subr.bf16.mxu0 %v13377_v20 }
 0x637   :  { %9933 = vmatpush1.bf16.msra.mxu1 %v13327_v45 }
 0x638   :  { %9934 = vmatprep.subr.bf16.mxu1 %v13332_v50 }
 0x639   :  { %10597 = vmatpush1.bf16.msra.mxu0 %v13375_v15  ;;  %v13427_v15 = vld [vmem:[%s19059_s7 + $0x19c] ss:$12 sps:$4 sm:$0xff]  }
 0x63a   :  { %10598 = vmatprep.subr.bf16.mxu0 %v13380_v22  ;;  %v13425_v22 = vld [vmem:[%s19059_s7 + $0x198] ss:$12 sps:$4 sm:$0xff]  }
 0x63b   :  { %9935 = vmatpush1.bf16.msra.mxu1 %v13330_v41 }
 0x63c   :  { %9936 = vmatprep.subr.bf16.mxu1 %v13335_v59  ;;  %v13411_v59 = vld [vmem:[%s19059_s7 + $0x150] ss:$12 sps:$4 sm:$0xff]  }
 0x63d   :  { %10599 = vmatpush1.bf16.msra.mxu0 %v13378_v38  ;;  %v13431_v38 = vld [vmem:[%s19059_s7 + $0x1b4] ss:$12 sps:$4 sm:$0xff]  }
 0x63e   :  { %10600 = vmatprep.subr.bf16.mxu0 %v13383_v23  ;;  %v13429_v23 = vld [vmem:[%s19059_s7 + $0x1b0] ss:$12 sps:$4 sm:$0xff]  }
 0x63f   :  { %9937 = vmatpush1.bf16.msra.mxu1 %v13333_v42  ;;  %v13413_v42 = vld [vmem:[%s19059_s7 + $0x154] ss:$12 sps:$4 sm:$0xff]  }
 0x640   :  { %9938 = vmatprep.subr.bf16.mxu1 %v13338_v52  ;;  %v13414_v52 = vld [vmem:[%s19059_s7 + $0x158] ss:$12 sps:$4 sm:$0xff]  }
 0x641   :  { %10601 = vmatpush1.bf16.msra.mxu0 %v13381_v24  ;;  %v13432_v24 = vld [vmem:[%s19059_s7 + $0x1b8] ss:$12 sps:$4 sm:$0xff]  }
 0x643   :  { %9939 = vmatpush1.bf16.msra.mxu1 %v13336_v48  ;;  %v13415_v48 = vld [vmem:[%s19059_s7 + $0x98] ss:$12 sps:$4 sm:$0xff]  }
 0x644   :  { %9940 = vmatprep.subr.bf16.mxu1 %v13341_v7  ;;  %v13418_v7 = vld [vmem:[%s19059_s7 + $0x16c] ss:$12 sps:$4 sm:$0xff]  }
 0x647   :  { %9941 = vmatpush1.bf16.msra.mxu1 %v13339_v56  ;;  %v13419_v56 = vld [vmem:[%s19059_s7 + $0x170] ss:$12 sps:$4 sm:$0xff]  }
 0x648   :  { %9942 = vmatprep.subr.bf16.mxu1 %v13344_v16  ;;  %v13416_v16 = vld [vmem:[%s19059_s7 + $0x168] ss:$12 sps:$4 sm:$0xff]  }
 0x64b   :  { %9943 = vmatpush1.bf16.msra.mxu1 %v13342_v60  ;;  %v13420_v60 = vld [vmem:[%s19059_s7 + $0xb0] ss:$12 sps:$4 sm:$0xff]  }
 0x64c   :  { %9944 = vmatprep.subr.bf16.mxu1 %v13347_v10  ;;  %v13423_v10 = vld [vmem:[%s19059_s7 + $0x184] ss:$12 sps:$4 sm:$0xff]  }
 0x64f   :  { %9945 = vmatpush1.bf16.msra.mxu1 %v13345_v1  ;;  %v18702_v1 = vsub.s32 2, %v17911_v32 }
 0x650   :  { %9946 = vmatprep.subr.bf16.mxu1 %v13350_v61  ;;  %v8999_v61 = vld [vmem:[%s19058_s6] sm:$0x7] }
 0x653   :  { %9947 = vmatpush1.bf16.msra.mxu1 %v13348_v30  ;;  %v9012_v30 = vrot.slane %v8999_v61, %v18702_v1 }
 0x654   :  { %9948 = vmatprep.subr.bf16.mxu1 %v13353_v37 }
 0x657   :  { %9949 = vmatpush1.bf16.msra.mxu1 %v13351_v51 }
 0x658   :  { %9950 = vmatprep.subr.bf16.mxu1 %v13356_v63 }
 0x65b   :  { %9951 = vmatpush1.bf16.msra.mxu1 %v13354_v19 }
 0x65c   :  { %12824 = vmatprep.subr.bf16.mxu1 %v13384_v2 }
 0x65e   :  { %9953 = vmatmul.mubr.bf16.vlgmr.msra.gmra.mrb[32].mxu1 %v18457_v46  ;;  %v13388_v46 = vld [vmem:[%s19059_s7 + $0xdc] ss:$12 sps:$4 sm:$0xff]  }
 0x65f   :  { %12825 = vmatpush3.bf16.msra.mxu1 %v13385_v4  ;;  %10602 = vmatprep.subr.bf16.mxu0 %v13388_v46  ;;  %v13435_v46 = vld [vmem:[%s19059_s7 + $0x1cc] ss:$12 sps:$4 sm:$0xff]  }
 0x660   :  { %12826 = vmatprep.subr.bf16.mxu1 %v13389_v5  ;;  %10603 = vmatpush1.bf16.msra.mxu0 %v13386_v25  ;;  %v13433_v25 = vld [vmem:[%s19059_s7 + $0x1c8] ss:$12 sps:$4 sm:$0xff]  }
 0x661   :  { %10604 = vmatprep.subr.bf16.mxu0 %v13393_v57  ;;  %v13436_v57 = vld [vmem:[%s19059_s7 + $0x1d0] ss:$12 sps:$4 sm:$0xff]  }
 0x663   :  { %12827 = vmatpush3.bf16.msra.mxu1 %v13390_v47  ;;  %v18714_v47 = vsub.s32 1, %v17911_v32  ;;  %v13424_v32 = vld [vmem:[%s19059_s7 + $0x188] ss:$12 sps:$4 sm:$0xff]  }
 0x664   :  { %12828 = vmatprep.subr.bf16.mxu1 %v13394_v44  ;;  %10605 = vmatpush1.bf16.msra.mxu0 %v13391_v54  ;;  %v9004_v44 = vrot.slane %v8999_v61, %v18711_v53  ;;  %v13439_v54 = vld [vmem:[%s19059_s7 + $0x1e4] ss:$12 sps:$4 sm:$0xff]  }
 0x665   :  { %10606 = vmatprep.subr.bf16.mxu0 %v13398_v26  ;;  %v9008_v11 = vrot.slane %v8999_v61, %v18714_v47  ;;  %v13437_v26 = vld [vmem:[%s19059_s7 + $0x1e0] ss:$12 sps:$4 sm:$0xff]   ;;  %v13462_v61 = vld [vmem:[%s19061_s9 + $0x48] ss:$12 sps:$4 sm:$0xff]  }
 0x667   :  { %12829 = vmatpush3.bf16.msra.mxu1 %v13395_v40 }
 0x668   :  { %12830 = vmatprep.subr.bf16.mxu1 %v13399_v49  ;;  %10607 = vmatpush1.bf16.msra.mxu0 %v13396_v8  ;;  %v13440_v8 = vld [vmem:[%s19059_s7 + $0x1e8] ss:$12 sps:$4 sm:$0xff]  }
 0x669   :  { %10608 = vmatprep.subr.bf16.mxu0 %v13403_v27  ;;  %v13443_v27 = vld [vmem:[%s19059_s7 + $0x1fc] ss:$12 sps:$4 sm:$0xff]  }
 0x66b   :  { %12831 = vmatpush3.bf16.msra.mxu1 %v13400_v18 }
 0x66c   :  { %12832 = vmatprep.subr.bf16.mxu1 %v13404_v12  ;;  %10609 = vmatpush1.bf16.msra.mxu0 %v13401_v29  ;;  %v13441_v29 = vld [vmem:[%s19059_s7 + $0x1f8] ss:$12 sps:$4 sm:$0xff]  }
 0x66d   :  { %10610 = vmatprep.subr.bf16.mxu0 %v13408_v31  ;;  %v13444_v31 = vld [vmem:[%s19059_s7 + $0x200] ss:$12 sps:$4 sm:$0xff]  }
 0x66f   :  { %12833 = vmatpush3.bf16.msra.mxu1 %v13405_v21  ;;  %v13421_v21 = vld [vmem:[%s19059_s7 + $0x180] ss:$12 sps:$4 sm:$0xff]  }
 0x670   :  { %12834 = vmatprep.subr.bf16.mxu1 %v13409_v3  ;;  %10611 = vmatpush1.bf16.msra.mxu0 %v13406_v34  ;;  %v13447_v34 = vld [vmem:[%s19059_s7 + $0x214] ss:$12 sps:$4 sm:$0xff]  }
 0x671   :  { %10612 = vmatprep.subr.bf16.mxu0 %v13413_v42  ;;  %v13455_v42 = vld [vmem:[%s19061_s9 + $0x4] ss:$12 sps:$4 sm:$0xff]  }
 0x673   :  { %12835 = vmatpush3.bf16.msra.mxu1 %v13410_v6  ;;  %v13428_v6 = vld [vmem:[%s19059_s7 + $0x1a0] ss:$12 sps:$4 sm:$0xff]  }
 0x674   :  { %12836 = vmatprep.subr.bf16.mxu1 %v13414_v52  ;;  %10613 = vmatpush1.bf16.msra.mxu0 %v13411_v59  ;;  %v13453_v52 = vld [vmem:[%s19061_s9] ss:$12 sps:$4 sm:$0xff]  }
 0x675   :  { %10614 = vmatprep.subr.bf16.mxu0 %v13418_v7  ;;  %v13458_v7 = vld [vmem:[%s19061_s9 + $0x1c] ss:$12 sps:$4 sm:$0xff]  }
 0x677   :  { %12837 = vmatpush3.bf16.msra.mxu1 %v13415_v48 }
 0x678   :  { %12838 = vmatprep.subr.bf16.mxu1 %v13419_v56  ;;  %10615 = vmatpush1.bf16.msra.mxu0 %v13416_v16  ;;  %v13456_v56 = vld [vmem:[%s19061_s9 + $0x18] ss:$12 sps:$4 sm:$0xff]   ;;  %v13461_v16 = vld [vmem:[%s19061_s9 + $0x34] ss:$12 sps:$4 sm:$0xff]  }
 0x679   :  { %10625 = vmatprep.subr.bf16.mxu0 %v13423_v10  ;;  %v13464_v10 = vld [vmem:[%s19061_s9 + $0x4c] ss:$12 sps:$4 sm:$0xff]  }
 0x67b   :  { %12839 = vmatpush3.bf16.msra.mxu1 %v13420_v60  ;;  %v13459_v60 = vld [vmem:[%s19061_s9 + $0x30] ss:$12 sps:$4 sm:$0xff]  }
 0x67c   :  { %12962 = vmatprep.subr.bf16.mxu1 %v13585_v9 }
 0x6b1   :  { %v12774_v35 = vpop.f32.mrb[64].mxu0 }
 0x6b2   :  { %v12775_v36 = vpop.f32.mrb[65].mxu0 }
 0x6b3   :  { %v12776_v45 = vadd.f32 %v12775_v36, %v12774_v35  ;;  %v12777_v50 = vpop.f32.mrb[66].mxu0  ;;  %v13445_v35 = vld [vmem:[%s19059_s7 + $0x210] ss:$12 sps:$4 sm:$0xff]   ;;  %v13448_v36 = vld [vmem:[%s19059_s7 + $0x218] ss:$12 sps:$4 sm:$0xff]  }
 0x6b4   :  { %v12778_v41 = vpop.f32.mrb[67].mxu0  ;;  %v13449_v50 = vld [vmem:[%s19059_s7 + $0x228] ss:$12 sps:$4 sm:$0xff]  }
 0x6b5   :  { %v9996_v63 = vadd.f32 %v12776_v45, %v9012_v30  ;;  %v13451_v45 = vld [vmem:[%s19059_s7 + $0x22c] ss:$12 sps:$4 sm:$0xff]   ;;  %v13452_v41 = vld [vmem:[%s19059_s7 + $0x230] ss:$12 sps:$4 sm:$0xff]  }
 0x6b6   :  { %v13467_v30 = vld [vmem:[%s19061_s9 + $0x64] ss:$12 sps:$4 sm:$0xff]  }
 0x6d1   :  { %v12796_v37 = vpop.f32.mrb[68].mxu0 }
 0x6d2   :  { %v12797_v51 = vpop.f32.mrb[69].mxu0 }
 0x6d3   :  { %v12798_v19 = vadd.f32 %v12797_v51, %v12796_v37  ;;  %v12799_v0 = vpop.f32.mrb[70].mxu0  ;;  %v13465_v37 = vld [vmem:[%s19061_s9 + $0x60] ss:$12 sps:$4 sm:$0xff]   ;;  %v13470_v51 = vld [vmem:[%s19061_s9 + $0x7c] ss:$12 sps:$4 sm:$0xff]  }
 0x6d4   :  { %v12800_v13 = vpop.f32.mrb[71].mxu0  ;;  %v13471_v0 = vld [vmem:[%s19061_s9 + $0x90] ss:$12 sps:$4 sm:$0xff]  }
 0x6d5   :  { %v10036_v33 = vadd.f32 %v12798_v19, %v9996_v63  ;;  %v13468_v63 = vld [vmem:[%s19061_s9 + $0x78] ss:$12 sps:$4 sm:$0xff]   ;;  %v13473_v19 = vld [vmem:[%s19061_s9 + $0x94] ss:$12 sps:$4 sm:$0xff]  }
 0x6d6   :  { %v13474_v13 = vld [vmem:[%s19061_s9 + $0xa8] ss:$12 sps:$4 sm:$0xff]  }
 0x6f1   :  { %v12818_v43 = vpop.f32.mrb[72].mxu0 }
 0x6f2   :  { %v12819_v14 = vpop.f32.mrb[73].mxu0 }
 0x6f3   :  { %v12820_v2 = vadd.f32 %v12819_v14, %v12818_v43  ;;  %v12821_v4 = vpop.f32.mrb[74].mxu0  ;;  %v13479_v43 = vld [vmem:[%s19061_s9 + $0xc4] ss:$12 sps:$4 sm:$0xff]   ;;  %v13480_v14 = vld [vmem:[%s19061_s9 + $0xc8] ss:$12 sps:$4 sm:$0xff]  }
 0x6f4   :  { %v12822_v28 = vpop.f32.mrb[75].mxu0  ;;  %v13485_v4 = vld [vmem:[%s19061_s9 + $0xe0] ss:$12 sps:$4 sm:$0xff]  }
 0x6f5   :  { %v18708_v5 = vadd.f32 %v12820_v2, %v10036_v33  ;;  %v13476_v33 = vld [vmem:[%s19061_s9 + $0xac] ss:$12 sps:$4 sm:$0xff]   ;;  %v13481_v2 = vld [vmem:[%s19061_s9 + $0x8] ss:$12 sps:$4 sm:$0xff]  }
 0x6f6   :  { %v13477_v28 = vld [vmem:[%s19061_s9 + $0xc0] ss:$12 sps:$4 sm:$0xff]  }
 0x6f7   :  { %v10083_v59 = vmax.f32 %v18708_v5, 0.0  ;;  %v13484_v5 = vld [vmem:[%s19061_s9 + $0xdc] ss:$12 sps:$4 sm:$0xff]  }
 0x6f9   :  { %v10086_v48 = vpack.c.bf16 %v10083_v59, %v10083_v59 }
 0x731   :  { %v9954_v55 = vpop.f32.mrb[32].mxu1 }
 0x732   :  { %v13002_v40 = vadd.f32 %v9954_v55, %v9004_v44  ;;  %v9956_v49 = vpop.f32.mrb[33].mxu1  ;;  %v13486_v44 = vld [vmem:[%s19061_s9 + $0x20] ss:$12 sps:$4 sm:$0xff]   ;;  %v13482_v55 = vld [vmem:[%s19061_s9 + $0xd8] ss:$12 sps:$4 sm:$0xff]  }
 0x733   :  { %v13003_v17 = vadd.f32 %v9956_v49, %v9008_v11  ;;  %v9958_v39 = vpop.f32.mrb[34].mxu1  ;;  %v13490_v11 = vld [vmem:[%s19061_s9 + $0xf8] ss:$12 sps:$4 sm:$0xff]  }
 0x734   :  { %v10081_v18 = vmax.f32 %v13002_v40, 0.0  ;;  %v9959_v12 = vpop.f32.mrb[35].mxu1  ;;  %v13489_v40 = vld [vmem:[%s19061_s9 + $0xf4] ss:$12 sps:$4 sm:$0xff]   ;;  %v13491_v49 = vld [vmem:[%s19061_s9 + $0x38] ss:$12 sps:$4 sm:$0xff]  }
 0x735   :  { %v10082_v62 = vmax.f32 %v13003_v17, 0.0  ;;  %v13495_v17 = vld [vmem:[%s19061_s9 + $0x110] ss:$12 sps:$4 sm:$0xff]  }
 0x736   :  { %v10084_v3 = vpack.c.bf16 %v10081_v18, %v10081_v18  ;;  %v13487_v39 = vld [vmem:[%s19061_s9 + $0xf0] ss:$12 sps:$4 sm:$0xff]   ;;  %v13494_v18 = vld [vmem:[%s19061_s9 + $0x10c] ss:$12 sps:$4 sm:$0xff]  }
 0x737   :  { %v10085_v20 = vpack.c.bf16 %v10082_v62, %v10082_v62  ;;  %v13496_v12 = vld [vmem:[%s19061_s9 + $0x50] ss:$12 sps:$4 sm:$0xff]   ;;  %v13500_v62 = vld [vmem:[%s19061_s9 + $0x128] ss:$12 sps:$4 sm:$0xff]  }
 0x739   :  { %10616 = vmatprep.mubr.bf16.mxu0 %v10085_v20  ;;  %10698 = vmatprep.mubr.bf16.mxu1 %v10085_v20  ;;  %v13492_v20 = vld [vmem:[%s19061_s9 + $0x108] ss:$12 sps:$4 sm:$0xff]  }
 0x73a   :  { %10617 = vmatmul.mubr.bf16.vlgmr.msra.gmra.mrb[76].mxu0 %v10084_v3  ;;  %10699 = vmatmul.mubr.bf16.vlgmr.msra.gmra.mrb[36].mxu1 %v10084_v3  ;;  %v13505_v3 = vld [vmem:[%s19061_s9 + $0x140] ss:$12 sps:$4 sm:$0xff]  }
 0x73b   :  { %10626 = vmatpush1.bf16.msra.mxu0 %v13421_v21  ;;  %12963 = vmatpush3.bf16.msra.mxu1 %v13424_v32  ;;  %v13499_v21 = vld [vmem:[%s19061_s9 + $0x124] ss:$12 sps:$4 sm:$0xff]   ;;  %v13501_v32 = vld [vmem:[%s19061_s9 + $0x68] ss:$12 sps:$4 sm:$0xff]  }
 0x73c   :  { %10627 = vmatprep.subr.bf16.mxu0 %v13427_v15  ;;  %12964 = vmatprep.subr.bf16.mxu1 %v13585_v9  ;;  %v13497_v15 = vld [vmem:[%s19061_s9 + $0x120] ss:$12 sps:$4 sm:$0xff]  }
 0x73d   :  { %10657 = vmatprep.mubr.bf16.mxu0 %v13584_v58  ;;  %12978 = vmatprep.mubr.msk.bf16.mxu1 %vm13598_vm15, %v13585_v9 }
 0x73f   :  { %10628 = vmatpush1.bf16.msra.mxu0 %v13425_v22  ;;  %12965 = vmatpush3.bf16.msra.mxu1 %v13428_v6  ;;  %v13504_v22 = vld [vmem:[%s19061_s9 + $0x13c] ss:$12 sps:$4 sm:$0xff]   ;;  %v13506_v6 = vld [vmem:[%s19061_s9 + $0x80] ss:$12 sps:$4 sm:$0xff]  }
 0x740   :  { %10629 = vmatprep.subr.bf16.mxu0 %v13431_v38  ;;  %12966 = vmatprep.subr.bf16.mxu1 %v13585_v9  ;;  %v13502_v38 = vld [vmem:[%s19061_s9 + $0x138] ss:$12 sps:$4 sm:$0xff]  }
 0x743   :  { %10630 = vmatpush1.bf16.msra.mxu0 %v13429_v23  ;;  %12967 = vmatpush3.bf16.msra.mxu1 %v13432_v24  ;;  %v13507_v23 = vld [vmem:[%s19061_s9 + $0x150] ss:$12 sps:$4 sm:$0xff]   ;;  %v13509_v24 = vld [vmem:[%s19061_s9 + $0x154] ss:$12 sps:$4 sm:$0xff]  }
 0x744   :  { %10631 = vmatprep.subr.bf16.mxu0 %v13435_v46  ;;  %12968 = vmatprep.subr.bf16.mxu1 %v13585_v9  ;;  %v13510_v46 = vld [vmem:[%s19061_s9 + $0x158] ss:$12 sps:$4 sm:$0xff]  }
 0x747   :  { %10632 = vmatpush1.bf16.msra.mxu0 %v13433_v25  ;;  %12969 = vmatpush3.bf16.msra.mxu1 %v13436_v57  ;;  %v13511_v25 = vld [vmem:[%s19061_s9 + $0x98] ss:$12 sps:$4 sm:$0xff]  }
 0x748   :  { %10633 = vmatprep.subr.bf16.mxu0 %v13439_v54  ;;  %12970 = vmatprep.subr.bf16.mxu1 %v13585_v9  ;;  %v13514_v57 = vld [vmem:[%s19061_s9 + $0x16c] ss:$12 sps:$4 sm:$0xff]   ;;  %v13515_v54 = vld [vmem:[%s19061_s9 + $0x170] ss:$12 sps:$4 sm:$0xff]  }
 0x74b   :  { %10634 = vmatpush1.bf16.msra.mxu0 %v13437_v26  ;;  %12971 = vmatpush3.bf16.msra.mxu1 %v13440_v8  ;;  %v13512_v26 = vld [vmem:[%s19061_s9 + $0x168] ss:$12 sps:$4 sm:$0xff]   ;;  %v13516_v8 = vld [vmem:[%s19061_s9 + $0xb0] ss:$12 sps:$4 sm:$0xff]  }
 0x74c   :  { %10635 = vmatprep.subr.bf16.mxu0 %v13443_v27  ;;  %12972 = vmatprep.subr.bf16.mxu1 %v13585_v9  ;;  %v13519_v27 = vld [vmem:[%s19061_s9 + $0x184] ss:$12 sps:$4 sm:$0xff]  }
 0x74f   :  { %10636 = vmatpush1.bf16.msra.mxu0 %v13441_v29  ;;  %12973 = vmatpush3.bf16.msra.mxu1 %v13444_v31 }
 0x750   :  { %10637 = vmatprep.subr.bf16.mxu0 %v13447_v34  ;;  %12974 = vmatprep.subr.bf16.mxu1 %v13585_v9 }
 0x753   :  { %10638 = vmatpush1.bf16.msra.mxu0 %v13445_v35  ;;  %12975 = vmatpush3.bf16.msra.mxu1 %v13448_v36 }
 0x754   :  { %10639 = vmatprep.subr.bf16.mxu0 %v13451_v45  ;;  %12976 = vmatprep.subr.bf16.mxu1 %v13585_v9  ;;  %v10183_v45 = vld [vmem:[%s19060_s8] sm:$0x7] }
 0x755   :  { %v10192_v59 = vrot.slane %v10183_v45, %v18714_v47 }
 0x757   :  { %10640 = vmatpush1.bf16.msra.mxu0 %v13449_v50  ;;  %12977 = vmatpush3.bf16.msra.mxu1 %v13452_v41  ;;  %v10196_v50 = vrot.slane %v10183_v45, %v18702_v1  ;;  %v10188_v41 = vrot.slane %v10183_v45, %v18711_v53 }
 0x758   :  { %11249 = vmatprep.subr.bf16.mxu0 %v13455_v42  ;;  %12855 = vmatprep.subr.bf16.mxu1 %v13480_v14  ;;  %v13523_v14 = vld [vmem:[%s19061_s9 + $0x19c] ss:$12 sps:$4 sm:$0xff]  }
 0x75a   :  { %10658 = vmatmul.mubr.bf16.vlgmr.msra.gmra.mrb[76].mxu0 %v10086_v48  ;;  %12979 = vmatmul.mubr.bf16.vlgmr.msra.gmra.mrb[40].mxu1 %v10086_v48 }
 0x75b   :  { %11250 = vmatpush1.bf16.msra.mxu0 %v13453_v52  ;;  %12856 = vmatpush3.bf16.msra.mxu1 %v13481_v2  ;;  %v13521_v2 = vld [vmem:[%s19061_s9 + $0x198] ss:$12 sps:$4 sm:$0xff]  }
 0x75c   :  { %11251 = vmatprep.subr.bf16.mxu0 %v13458_v7  ;;  %12857 = vmatprep.subr.bf16.mxu1 %v13485_v4  ;;  %v13524_v4 = vld [vmem:[%s19061_s9 + $0x1a0] ss:$12 sps:$4 sm:$0xff]  }
 0x75f   :  { %11252 = vmatpush1.bf16.msra.mxu0 %v13456_v56  ;;  %12858 = vmatpush3.bf16.msra.mxu1 %v13486_v44  ;;  %v13528_v44 = vld [vmem:[%s19061_s9 + $0x1b8] ss:$12 sps:$4 sm:$0xff]  }
 0x760   :  { %11253 = vmatprep.subr.bf16.mxu0 %v13461_v16  ;;  %12859 = vmatprep.subr.bf16.mxu1 %v13490_v11  ;;  %v13529_v11 = vld [vmem:[%s19061_s9 + $0x1c8] ss:$12 sps:$4 sm:$0xff]  }
 0x763   :  { %11254 = vmatpush1.bf16.msra.mxu0 %v13459_v60  ;;  %12860 = vmatpush3.bf16.msra.mxu1 %v13491_v49  ;;  %v13533_v49 = vld [vmem:[%s19061_s9 + $0x1e0] ss:$12 sps:$4 sm:$0xff]  }
 0x764   :  { %11255 = vmatprep.subr.bf16.mxu0 %v13464_v10  ;;  %12861 = vmatprep.subr.bf16.mxu1 %v13495_v17  ;;  %v13536_v17 = vld [vmem:[%s19061_s9 + $0x1e8] ss:$12 sps:$4 sm:$0xff]  }
 0x767   :  { %11256 = vmatpush1.bf16.msra.mxu0 %v13462_v61  ;;  %12862 = vmatpush3.bf16.msra.mxu1 %v13496_v12  ;;  %v13540_v12 = vld [vmem:[%s19061_s9 + $0x200] ss:$12 sps:$4 sm:$0xff]  }
 0x768   :  { %11257 = vmatprep.subr.bf16.mxu0 %v13467_v30  ;;  %12863 = vmatprep.subr.bf16.mxu1 %v13500_v62  ;;  %v13543_v62 = vld [vmem:[%s19061_s9 + $0x214] ss:$12 sps:$4 sm:$0xff]  }
 0x76b   :  { %11258 = vmatpush1.bf16.msra.mxu0 %v13465_v37  ;;  %12864 = vmatpush3.bf16.msra.mxu1 %v13501_v32  ;;  %v13547_v32 = vld [vmem:[%s19061_s9 + $0x22c] ss:$12 sps:$4 sm:$0xff]  }
 0x76c   :  { %11259 = vmatprep.subr.bf16.mxu0 %v13470_v51  ;;  %12865 = vmatprep.subr.bf16.mxu1 %v13505_v3  ;;  %v13545_v3 = vld [vmem:[%s19061_s9 + $0x228] ss:$12 sps:$4 sm:$0xff]  }
 0x76f   :  { %11260 = vmatpush1.bf16.msra.mxu0 %v13468_v63  ;;  %12866 = vmatpush3.bf16.msra.mxu1 %v13506_v6 }
 0x770   :  { %11261 = vmatprep.subr.bf16.mxu0 %v13473_v19  ;;  %12867 = vmatprep.subr.bf16.mxu1 %v13510_v46 }
 0x773   :  { %11262 = vmatpush1.bf16.msra.mxu0 %v13471_v0  ;;  %12868 = vmatpush3.bf16.msra.mxu1 %v13511_v25 }
 0x774   :  { %11263 = vmatprep.subr.bf16.mxu0 %v13476_v33  ;;  %12869 = vmatprep.subr.bf16.mxu1 %v13515_v54  ;;  %v13520_v33 = vld [vmem:[%s19061_s9 + $0x188] ss:$12 sps:$4 sm:$0xff]  }
 0x777   :  { %11264 = vmatpush1.bf16.msra.mxu0 %v13474_v13  ;;  %12870 = vmatpush3.bf16.msra.mxu1 %v13516_v8  ;;  %v13517_v13 = vld [vmem:[%s19061_s9 + $0x180] ss:$12 sps:$4 sm:$0xff]  }
 0x778   :  { %11265 = vmatprep.subr.bf16.mxu0 %v13479_v43  ;;  %12982 = vmatprep.subr.bf16.mxu1 %v13585_v9 }
 0x77b   :  { %11266 = vmatpush1.bf16.msra.mxu0 %v13477_v28  ;;  %v13527_v28 = vld [vmem:[%s19061_s9 + $0x1b4] ss:$12 sps:$4 sm:$0xff]  }
 0x77c   :  { %11267 = vmatprep.subr.bf16.mxu0 %v13484_v5  ;;  %v13525_v5 = vld [vmem:[%s19061_s9 + $0x1b0] ss:$12 sps:$4 sm:$0xff]  }
 0x77f   :  { %11268 = vmatpush1.bf16.msra.mxu0 %v13482_v55  ;;  %v13532_v55 = vld [vmem:[%s19061_s9 + $0x1d0] ss:$12 sps:$4 sm:$0xff]  }
 0x780   :  { %11269 = vmatprep.subr.bf16.mxu0 %v13489_v40  ;;  %v13535_v40 = vld [vmem:[%s19061_s9 + $0x1e4] ss:$12 sps:$4 sm:$0xff]  }
 0x783   :  { %11270 = vmatpush1.bf16.msra.mxu0 %v13487_v39  ;;  %v13539_v39 = vld [vmem:[%s19061_s9 + $0x1fc] ss:$12 sps:$4 sm:$0xff]  }
 0x784   :  { %11271 = vmatprep.subr.bf16.mxu0 %v13494_v18  ;;  %v13537_v18 = vld [vmem:[%s19061_s9 + $0x1f8] ss:$12 sps:$4 sm:$0xff]  }
 0x787   :  { %11272 = vmatpush1.bf16.msra.mxu0 %v13492_v20  ;;  %v13541_v20 = vld [vmem:[%s19061_s9 + $0x210] ss:$12 sps:$4 sm:$0xff]  }
 0x788   :  { %11273 = vmatprep.subr.bf16.mxu0 %v13499_v21  ;;  %v13544_v21 = vld [vmem:[%s19061_s9 + $0x218] ss:$12 sps:$4 sm:$0xff]  }
 0x78b   :  { %11274 = vmatpush1.bf16.msra.mxu0 %v13497_v15  ;;  %v13548_v15 = vld [vmem:[%s19061_s9 + $0x230] ss:$12 sps:$4 sm:$0xff]  }
 0x78c   :  { %11275 = vmatprep.subr.bf16.mxu0 %v13504_v22 }
 0x78f   :  { %11276 = vmatpush1.bf16.msra.mxu0 %v13502_v38 }
 0x790   :  { %11277 = vmatprep.subr.bf16.mxu0 %v13509_v24 }
 0x793   :  { %11278 = vmatpush1.bf16.msra.mxu0 %v13507_v23 }
 0x794   :  { %11279 = vmatprep.subr.bf16.mxu0 %v13514_v57  ;;  %v10848_v57 = vld [vmem:[%s19062_s10] sm:$0x7] }
 0x795   :  { %v10861_v54 = vrot.slane %v10848_v57, %v18702_v1 }
 0x797   :  { %11280 = vmatpush1.bf16.msra.mxu0 %v13512_v26  ;;  %v10853_v26 = vrot.slane %v10848_v57, %v18711_v53 }
 0x798   :  { %11290 = vmatprep.subr.bf16.mxu0 %v13519_v27 }
 0x80d   :  { %v12840_v29 = vpop.f32.mrb[36].mxu1 }
 0x80e   :  { %v12841_v31 = vpop.f32.mrb[37].mxu1 }
 0x80f   :  { %v12842_v34 = vadd.f32 %v12841_v31, %v12840_v29  ;;  %v12843_v35 = vpop.f32.mrb[38].mxu1 }
 0x810   :  { %v12844_v36 = vpop.f32.mrb[39].mxu1 }
 0x811   :  { %v10701_v42 = vadd.f32 %v12842_v34, %v10196_v50 }
 0x82d   :  { %v10659_v52 = vpop.f32.mrb[76].mxu0  ;;  %v10740_v48 = vpop.f32.mrb[40].mxu1 }
 0x82e   :  { %v13004_v7 = vadd.f32 %v10659_v52, %v10188_v41  ;;  %v18952_v56 = vadd.f32 %v10740_v48, %v10701_v42  ;;  %v10661_v16 = vpop.f32.mrb[77].mxu0  ;;  %v12980_v60 = vpop.f32.mrb[41].mxu1 }
 0x82f   :  { %v13005_v10 = vadd.f32 %v10661_v16, %v10192_v59  ;;  %v10663_v61 = vpop.f32.mrb[78].mxu0  ;;  %v10743_v30 = vpop.f32.mrb[42].mxu1 }
 0x830   :  { %v10746_v37 = vmax.f32 %v13004_v7, 0.0  ;;  %v10664_v51 = vpop.f32.mrb[79].mxu0  ;;  %v12981_v63 = vpop.f32.mrb[43].mxu1  ;;  %v10748_v22 = vmax.f32 %v18952_v56, 0.0 }
 0x831   :  { %v10747_v19 = vmax.f32 %v13005_v10, 0.0 }
 0x832   :  { %v10749_v43 = vpack.c.bf16 %v10746_v37, %v10746_v37  ;;  %v10751_v6 = vpack.c.bf16 %v10748_v22, %v10748_v22 }
 0x833   :  { %v10750_v0 = vpack.c.bf16 %v10747_v19, %v10747_v19 }
 0x835   :  { %11281 = vmatprep.mubr.bf16.mxu0 %v10750_v0  ;;  %11363 = vmatprep.mubr.bf16.mxu1 %v10750_v0 }
 0x836   :  { %11282 = vmatmul.mubr.bf16.vlgmr.msra.gmra.mrb[80].mxu0 %v10749_v43  ;;  %11364 = vmatmul.mubr.bf16.vlgmr.msra.gmra.mrb[44].mxu1 %v10749_v43 }
 0x837   :  { %11291 = vmatpush1.bf16.msra.mxu0 %v13517_v13  ;;  %12983 = vmatpush3.bf16.msra.mxu1 %v13520_v33 }
 0x838   :  { %11292 = vmatprep.subr.bf16.mxu0 %v13523_v14  ;;  %12984 = vmatprep.subr.bf16.mxu1 %v13585_v9 }
 0x839   :  { %11322 = vmatprep.mubr.bf16.mxu0 %v13584_v58  ;;  %12998 = vmatprep.mubr.msk.bf16.mxu1 %vm13598_vm15, %v13585_v9  ;;  %v13531_v58 = vld [vmem:[%s19061_s9 + $0x1cc] ss:$12 sps:$4 sm:$0xff]   ;;  %s13599_s9 = smov [#allocation8]  }
 0x83a   :  { %s11420_s10 = sshll.u32 %s13599_s9, 4  ;;  %s11421_s10 = int_to_ptr.vmem [resolvable:$true] %s11420_s10 }
 0x83b   :  { %11293 = vmatpush1.bf16.msra.mxu0 %v13521_v2  ;;  %12985 = vmatpush3.bf16.msra.mxu1 %v13524_v4  ;;  %s13552_s23 = scalar_lea.vmem %s11421_s10, 32  ;;  %p13557_p1 = scmp.lt.s32.totalorder %s11421_s10, %s11421_s10 }
 0x83c   :  { %11294 = vmatprep.subr.bf16.mxu0 %v13527_v28  ;;  %12986 = vmatprep.subr.bf16.mxu1 %v13585_v9  ;;  %p13553_p0 = scmp.ne.s32.totalorder %s11421_s10, %s13552_s23  ;;  %p13558_p2 = scmp.lt.s32.totalorder %s13552_s23, %s13552_s23 }
 0x83e   :  { %p13559_p3 = por %p13558_p2, %p13557_p1 }
 0x83f   :  { %11295 = vmatpush1.bf16.msra.mxu0 %v13525_v5  ;;  %12987 = vmatpush3.bf16.msra.mxu1 %v13528_v44 }
 0x840   :  { %11296 = vmatprep.subr.bf16.mxu0 %v13531_v58  ;;  %12988 = vmatprep.subr.bf16.mxu1 %v13585_v9  ;;  %p13560_p4 = pnand %p13559_p3, %p13553_p0 }
 0x843   :  { %11297 = vmatpush1.bf16.msra.mxu0 %v13529_v11  ;;  %12989 = vmatpush3.bf16.msra.mxu1 %v13532_v55 }
 0x844   :  { %11298 = vmatprep.subr.bf16.mxu0 %v13535_v40  ;;  %12990 = vmatprep.subr.bf16.mxu1 %v13585_v9 }
 0x847   :  { %11299 = vmatpush1.bf16.msra.mxu0 %v13533_v49  ;;  %12991 = vmatpush3.bf16.msra.mxu1 %v13536_v17 }
 0x848   :  { %11300 = vmatprep.subr.bf16.mxu0 %v13539_v39  ;;  %12992 = vmatprep.subr.bf16.mxu1 %v13585_v9 }
 0x84b   :  { %11301 = vmatpush1.bf16.msra.mxu0 %v13537_v18  ;;  %12993 = vmatpush3.bf16.msra.mxu1 %v13540_v12 }
 0x84c   :  { %11302 = vmatprep.subr.bf16.mxu0 %v13543_v62  ;;  %12994 = vmatprep.subr.bf16.mxu1 %v13585_v9 }
 0x84f   :  { %11303 = vmatpush1.bf16.msra.mxu0 %v13541_v20  ;;  %12995 = vmatpush3.bf16.msra.mxu1 %v13544_v21 }
 0x850   :  { %11304 = vmatprep.subr.bf16.mxu0 %v13547_v32  ;;  %12996 = vmatprep.subr.bf16.mxu1 %v13585_v9  ;;  %v10857_v9 = vrot.slane %v10848_v57, %v18714_v47 }
 0x853   :  { %11305 = vmatpush1.bf16.msra.mxu0 %v13545_v3  ;;  %12997 = vmatpush3.bf16.msra.mxu1 %v13548_v15 }
 0x856   :  { %11323 = vmatmul.mubr.bf16.vlgmr.msra.gmra.mrb[80].mxu0 %v10751_v6  ;;  %12999 = vmatmul.mubr.bf16.vlgmr.msra.gmra.mrb[48].mxu1 %v10751_v6 }
 0x909   :  { %v12871_v38 = vpop.f32.mrb[44].mxu1 }
 0x90a   :  { %v12872_v23 = vpop.f32.mrb[45].mxu1 }
 0x90b   :  { %v12873_v24 = vadd.f32 %v12872_v23, %v12871_v38  ;;  %v12874_v46 = vpop.f32.mrb[46].mxu1 }
 0x90c   :  { %v12875_v25 = vpop.f32.mrb[47].mxu1 }
 0x90d   :  { %v11366_v8 = vadd.f32 %v12873_v24, %v10861_v54 }
 0x929   :  { %v11324_v27 = vpop.f32.mrb[80].mxu0  ;;  %v11405_v29 = vpop.f32.mrb[48].mxu1 }
 0x92a   :  { %v13006_v31 = vadd.f32 %v11324_v27, %v10853_v26  ;;  %v11406_v34 = vadd.f32 %v11405_v29, %v11366_v8  ;;  %v11326_v35 = vpop.f32.mrb[81].mxu0  ;;  %v13000_v36 = vpop.f32.mrb[49].mxu1 }
 0x92b   :  { %v13007_v45 = vadd.f32 %v11326_v35, %v10857_v9  ;;  %v11328_v50 = vpop.f32.mrb[82].mxu0  ;;  %v11408_v41 = vpop.f32.mrb[50].mxu1 }
 0x92c   :  { %v11329_v59 = vpop.f32.mrb[83].mxu0  ;;  %v13001_v42 = vpop.f32.mrb[51].mxu1 }
 0x92d   :  { %v11411_v52 = vmax.f32 %v13006_v31, %v13007_v45 }
 0x92f   :  { %v11412_v1 = vmax.f32 %v11411_v52, %v11406_v34 }
 0x931   :  { %11413 = vst [vmem:[#allocation8] sm:$0x3] %v11412_v1 }
 0x932   :  { %13563 = shalt.err (!%p13560_p4)
}
 0x933   :  { %s13564_s16 = scalar_lea.hbm %s19063_s11, 32 }
 0x934   :  { %p13565_p5 = scmp.ne.s32.totalorder %s19063_s11, %s13564_s16  ;;  %p13568_p6 = scmp.lt.u32.totalorder %s13564_s16, %s19063_s11 }
 0x936   :  { %p13570_p7 = pnand %p13568_p6, %p13565_p5 }
 0x938   :  { %13573 = shalt.err (!%p13570_p7)
}
 0x939   :  { %11423 = dma.vmem_to_hbm [thread:$0]  %s11421_s10, 32, %s19063_s11, [#allocation9]  }
 0x93a   :  { %13574 = dma.done.wait [#allocation9], 32  }
 0x93b   :  { %13575 = vsyncadd [#allocation9], 4294967264 }
 0x93c   :  { %11427 = vsyncpa [#allocation9], 1 }

</bundles_post_ra>
